<compile_context>
chip_gen: v5e
topology: v5e:2x2
jax: 0.10.0
libtpu: 0.0.40
codegen_flags: <defaults>
</compile_context>

<pallas_src>
import math

import jax
import jax.numpy as jnp
from jax.experimental import pallas as pl
from jax.experimental.pallas import tpu as pltpu


def _round_up(x, m):
    return (x + m - 1) // m * m


# ----------------------------------------------------------------------------
# Kernel 1: fused bidirectional GRU recurrence (features folded into the batch)
#           + in-loop Linear(2H -> 1) projection accumulation
# ----------------------------------------------------------------------------
def make_rnn_kernel(T, H):
    H2 = 2 * H

    def kernel(inp_ref, wx_ref, wh_ref, wp_ref, bp_ref, est_ref, estf_scr, estb_scr):
        RB = inp_ref.shape[2]                      # lane block (B*F rows)
        Wx = wx_ref[...]                           # [8H, 8]  input + (folded) biases
        Wh = wh_ref[...]                           # [8H, 2H] block-diag recurrent
        Wp = wp_ref[...]                           # [2, 2H]  fwd/bwd projection halves

        def body(t, h):
            # Input-side pre-activations (off the recurrence critical path); the
            # constant-one input row carries every bias term.
            gi = jnp.dot(Wx, inp_ref[t], preferred_element_type=jnp.float32)   # [8H, RB]
            # Recurrent pre-activations (critical path): one fused fwd+bwd matmul.
            gh = jnp.dot(Wh, h, preferred_element_type=jnp.float32)            # [8H, RB]
            pre = gi + gh
            # Row layout: [0:2H] r | [2H:4H] z | [4H:6H] n (input part) | [6H:8H] n (hidden part),
            # each block ordered [forward rows ; backward rows] to match the stacked h.
            r = jax.nn.sigmoid(pre[0:H2])
            z = jax.nn.sigmoid(pre[H2:2 * H2])
            n = jnp.tanh(pre[2 * H2:3 * H2] + r * pre[3 * H2:4 * H2])
            h_new = (1.0 - z) * n + z * h                                       # [2H, RB]
            # Fused per-step Linear(2H -> 1): row 0 = fwd half, row 1 = bwd half.
            est2 = jnp.dot(Wp, h_new, preferred_element_type=jnp.float32)       # [2, RB]
            estf_scr[pl.ds(t, 1), :] = est2[0:1]
            estb_scr[pl.ds(T - 1 - t, 1), :] = est2[1:2]   # re-align backward time
            return h_new

        h0 = jnp.zeros((H2, RB), jnp.float32)
        jax.lax.fori_loop(0, T, body, h0, unroll=min(T, 8))

        est_ref[...] = estf_scr[...] + estb_scr[...] + bp_ref[0]

    return kernel


# ----------------------------------------------------------------------------
# Kernel 2: MrnnFcnRegression (fused K = 3F matmul) + final imputation
# ----------------------------------------------------------------------------
def fcn_kernel(z_ref, x_ref, m_ref, w3_ref, beta_ref, wfin_ref, bfin_ref, out_ref):
    # z = [X | RNN_imputed | M]  ->  one matmul instead of three K=F matmuls.
    h = jax.nn.sigmoid(
        jnp.dot(z_ref[...], w3_ref[...], preferred_element_type=jnp.float32)
        + beta_ref[...])
    fcn = jnp.dot(h, wfin_ref[...], preferred_element_type=jnp.float32) + bfin_ref[...]
    x = x_ref[...]
    m = m_ref[...]
    out_ref[...] = m * x + (1.0 - m) * fcn


# ----------------------------------------------------------------------------
# Weight packing for kernel 1
# ----------------------------------------------------------------------------
def _build_gru_weights(params):
    """Build Wx [8H, 8] (input cols: 0:3 fwd x/m/delta, 3:6 bwd, 6 = bias, 7 = pad)
    and Wh [8H, 2H] (cols 0:H act on h_fwd, H:2H on h_bwd).  Row blocks of size H:
    [fwd r, bwd r, fwd z, bwd z, fwd gi_n, bwd gi_n, fwd gh_n, bwd gh_n]."""
    H = params["H"]
    f32 = jnp.float32
    Wx = jnp.zeros((8 * H, 8), f32)
    Wh = jnp.zeros((8 * H, 2 * H), f32)

    wih_f, whh_f = params["wih_f"], params["whh_f"]
    bih_f, bhh_f = params["bih_f"], params["bhh_f"]
    wih_b, whh_b = params["wih_b"], params["whh_b"]
    bih_b, bhh_b = params["bih_b"], params["bhh_b"]

    specs = [
        # (row0, wih rows, whh rows, bias-for-ones-column, input col base, h col base)
        # r gate: input + hidden combined, biases (bih_r + bhh_r) combined
        (0 * H, wih_f[0:H],           whh_f[0:H],           bih_f[0:H] + bhh_f[0:H],           0, 0),
        (1 * H, wih_b[0:H],           whh_b[0:H],           bih_b[0:H] + bhh_b[0:H],           3, H),
        # z gate
        (2 * H, wih_f[H:2 * H],       whh_f[H:2 * H],       bih_f[H:2 * H] + bhh_f[H:2 * H],   0, 0),
        (3 * H, wih_b[H:2 * H],       whh_b[H:2 * H],       bih_b[H:2 * H] + bhh_b[H:2 * H],   3, H),
        # n gate, input part (must stay separate from the hidden part)
        (4 * H, wih_f[2 * H:3 * H],   None,                 bih_f[2 * H:3 * H],                0, 0),
        (5 * H, wih_b[2 * H:3 * H],   None,                 bih_b[2 * H:3 * H],                3, H),
        # n gate, hidden part (bhh_n stays inside the r * (.) term)
        (6 * H, None,                 whh_f[2 * H:3 * H],   bhh_f[2 * H:3 * H],                0, 0),
        (7 * H, None,                 whh_b[2 * H:3 * H],   bhh_b[2 * H:3 * H],                3, H),
    ]
    for row0, wih_g, whh_g, bias, in_col, h_col in specs:
        if wih_g is not None:
            Wx = Wx.at[row0:row0 + H, in_col:in_col + 3].set(wih_g.astype(f32))
        Wx = Wx.at[row0:row0 + H, 6].set(bias.astype(f32))
        if whh_g is not None:
            Wh = Wh.at[row0:row0 + H, h_col:h_col + H].set(whh_g.astype(f32))
    return Wx, Wh


# ----------------------------------------------------------------------------
# Wrapper
# ----------------------------------------------------------------------------
def mrnn_pallas_forward(X_f, M_f, D_f, X_b, M_b, D_b, params):
    B, T, F = X_f.shape
    H = params["H"]
    f32 = jnp.float32
    R = B * F                                       # features folded into the batch

    # Lane block: 256 on large R when vreg pressure allows (H <= 32), else 128;
    # R is zero-padded up to a multiple of rb (pad rows are independent & discarded).
    rb = 256 if (R >= 256 and H <= 32) else 128
    Rp = _round_up(R, rb)

    def pack_dir(X, M, D):
        z = jnp.stack([X, M, D], axis=0)            # [3, B, T, F]
        z = jnp.transpose(z, (2, 0, 1, 3))          # [T, 3, B, F]
        return z.reshape(T, 3, R).astype(f32)       # row r = b*F + f

    inp = jnp.concatenate(
        [pack_dir(X_f, M_f, D_f),                   # -> Wx cols 0:3
         pack_dir(X_b, M_b, D_b),                   # -> Wx cols 3:6
         jnp.ones((T, 1, R), f32),                  # constant-one row (carries biases)
         jnp.zeros((T, 1, R), f32)],                # pad to 8 sublanes
        axis=1)                                     # [T, 8, R]
    inp = jnp.pad(inp, ((0, 0), (0, 0), (0, Rp - R)))

    Wx, Wh = _build_gru_weights(params)
    wp = params["w_proj"]                           # [1, 2H]
    Wp = jnp.zeros((2, 2 * H), f32)
    Wp = Wp.at[0, :H].set(wp[0, :H].astype(f32))
    Wp = Wp.at[1, H:].set(wp[0, H:].astype(f32))

    vmem = pl.BlockSpec(memory_space=pltpu.MemorySpace.VMEM)
    smem = pl.BlockSpec(memory_space=pltpu.MemorySpace.SMEM)

    # --- kernel 1: fused bi-GRU recurrence over the folded batch -------------
    est_tr = pl.pallas_call(
        make_rnn_kernel(T, H),
        out_shape=jax.ShapeDtypeStruct((T, Rp), f32),
        grid=(Rp // rb,),
        in_specs=[
            pl.BlockSpec((T, 8, rb), lambda i: (0, 0, i)),   # raw packed inputs
            vmem, vmem, vmem,                                # Wx, Wh, Wp (resident)
            smem,                                            # b_proj scalar
        ],
        out_specs=pl.BlockSpec((T, rb), lambda i: (0, i)),
        scratch_shapes=[
            pltpu.VMEM((T, rb), f32),   # forward per-step projections
            pltpu.VMEM((T, rb), f32),   # backward per-step projections (time-realigned)
        ],
        compiler_params=pltpu.CompilerParams(dimension_semantics=("parallel",)),
    )(inp, Wx, Wh, Wp, params["b_proj"])

    rnn_est = jnp.transpose(est_tr[:, :R].reshape(T, B, F), (1, 0, 2))   # [B, T, F]

    # --- kernel 2: FCN regression + final imputation, row-tiled over B*T -----
    rows = B * T
    rb2 = 256 if rows >= 256 else _round_up(rows, 8)
    rows_p = _round_up(rows, rb2)

    x2 = X_f.reshape(rows, F).astype(f32)
    m2 = M_f.reshape(rows, F).astype(f32)
    e2 = rnn_est.reshape(rows, F)
    imp2 = m2 * x2 + (1.0 - m2) * e2                 # RNN_imputed_data
    zcat = jnp.concatenate([x2, imp2, m2], axis=1)   # [rows, 3F]

    pad = ((0, rows_p - rows), (0, 0))
    zcat_p = jnp.pad(zcat, pad)
    x2_p = jnp.pad(x2, pad)
    m2_p = jnp.pad(m2, pad)

    mmask = jnp.ones((F, F), f32) - jnp.eye(F, dtype=f32)
    w3 = jnp.concatenate([(params["U"] * mmask).T,
                          (params["V1"] * mmask).T,
                          params["V2"].T], axis=0)   # [3F, F]

    imputed2 = pl.pallas_call(
        fcn_kernel,
        out_shape=jax.ShapeDtypeStruct((rows_p, F), f32),
        grid=(rows_p // rb2,),
        in_specs=[pl.BlockSpec((rb2, 3 * F), lambda i: (i, 0)),
                  pl.BlockSpec((rb2, F), lambda i: (i, 0)),
                  pl.BlockSpec((rb2, F), lambda i: (i, 0)),
                  vmem, vmem, vmem, vmem],
        out_specs=pl.BlockSpec((rb2, F), lambda i: (i, 0)),
        compiler_params=pltpu.CompilerParams(dimension_semantics=("parallel",)),
    )(zcat_p, x2_p, m2_p, w3,
      params["beta"][None, :], params["W_fin"].T, params["b_fin"][None, :])

    return imputed2[:rows].reshape(B, T, F)


# ----------------------------------------------------------------------------
# Pure-JAX reference (mirrors the PyTorch code structure)
# ----------------------------------------------------------------------------
def mrnn_reference(X_f, M_f, D_f, X_b, M_b, D_b, params):
    B, T, F = X_f.shape
    H = params["H"]
    hp = jax.lax.Precision.HIGHEST

    def gru_cell(x, h, wih, whh, bih, bhh):
        gi = jnp.dot(x, wih.T, precision=hp) + bih
        gh = jnp.dot(h, whh.T, precision=hp) + bhh
        r = jax.nn.sigmoid(gi[:, :H] + gh[:, :H])
        z = jax.nn.sigmoid(gi[:, H:2 * H] + gh[:, H:2 * H])
        n = jnp.tanh(gi[:, 2 * H:] + r * gh[:, 2 * H:])
        return (1.0 - z) * n + z * h

    feats = []
    for f in range(F):
        xf = jnp.stack([X_f[:, :, f], M_f[:, :, f], D_f[:, :, f]], axis=-1)
        xb = jnp.stack([X_b[:, :, f], M_b[:, :, f], D_b[:, :, f]], axis=-1)
        hf = jnp.zeros((B, H), jnp.float32)
        hb = jnp.zeros((B, H), jnp.float32)
        hfs, hbs = [], []
        for t in range(T):
            hf = gru_cell(xf[:, t], hf, params["wih_f"], params["whh_f"],
                          params["bih_f"], params["bhh_f"])
            hb = gru_cell(xb[:, t], hb, params["wih_b"], params["whh_b"],
                          params["bih_b"], params["bhh_b"])
            hfs.append(hf)
            hbs.append(hb)
        hf_states = jnp.stack(hfs, axis=1)            # [B, T, H]
        hb_states = jnp.stack(hbs[::-1], axis=1)      # [B, T, H]
        hcat = jnp.concatenate([hf_states, hb_states], axis=-1)
        est = jnp.dot(hcat, params["w_proj"].T, precision=hp) + params["b_proj"]
        feats.append(est)                             # [B, T, 1]
    rnn_est = jnp.concatenate(feats, axis=2)          # [B, T, F]

    rnn_imp = M_f * X_f + (1.0 - M_f) * rnn_est
    mmask = jnp.ones((F, F), jnp.float32) - jnp.eye(F, dtype=jnp.float32)
    h = jax.nn.sigmoid(
        jnp.dot(X_f, (params["U"] * mmask).T, precision=hp)
        + jnp.dot(rnn_imp, (params["V1"] * mmask).T, precision=hp)
        + jnp.dot(M_f, params["V2"].T, precision=hp)
        + params["beta"])
    fcn = jnp.dot(h, params["W_fin"].T, precision=hp) + params["b_fin"]
    return M_f * X_f + (1.0 - M_f) * fcn


# ----------------------------------------------------------------------------
# Deterministic parameter initialization (matches the module's shapes)
# ----------------------------------------------------------------------------
def init_params(key, n_steps, n_features, hidden):
    H, F = hidden, n_features
    ks = jax.random.split(key, 16)

    def u(k, shape, s):
        return jax.random.uniform(k, shape, jnp.float32, -s, s)

    s_rnn = 1.0 / math.sqrt(H)
    s_proj = 1.0 / math.sqrt(2 * H)
    s_f = 1.0 / math.sqrt(F)
    return dict(
        H=H,
        wih_f=u(ks[0], (3 * H, 3), s_rnn), whh_f=u(ks[1], (3 * H, H), s_rnn),
        bih_f=u(ks[2], (3 * H,), s_rnn), bhh_f=u(ks[3], (3 * H,), s_rnn),
        wih_b=u(ks[4], (3 * H, 3), s_rnn), whh_b=u(ks[5], (3 * H, H), s_rnn),
        bih_b=u(ks[6], (3 * H,), s_rnn), bhh_b=u(ks[7], (3 * H,), s_rnn),
        w_proj=u(ks[8], (1, 2 * H), s_proj), b_proj=u(ks[9], (1,), s_proj),
        U=u(ks[10], (F, F), s_f), V1=u(ks[11], (F, F), s_f), V2=u(ks[12], (F, F), s_f),
        beta=u(ks[13], (F,), s_f),
        W_fin=u(ks[14], (F, F), s_f), b_fin=u(ks[15], (F,), s_f),
    )


if __name__ == "__main__":
    B, T, F, H = 2, 8, 4, 32
    key = jax.random.PRNGKey(0)
    kx, km, kp = jax.random.split(key, 3)

    X_true = jax.random.normal(kx, (B, T, F), jnp.float32)
    M_f = (jax.random.uniform(km, (B, T, F)) < 0.7).astype(jnp.float32)
    X_f = X_true * M_f                                 # missing values zeroed

    def make_deltas(M):
        d = [jnp.zeros((B, F), jnp.float32)]
        for t in range(1, T):
            d.append(1.0 + (1.0 - M[:, t - 1]) * d[-1])
        return jnp.stack(d, axis=1)

    D_f = make_deltas(M_f)
    X_b = X_f[:, ::-1, :]
    M_b = M_f[:, ::-1, :]
    D_b = make_deltas(M_b)

    params = init_params(kp, T, F, H)

    imputed = mrnn_pallas_forward(X_f, M_f, D_f, X_b, M_b, D_b, params)
    imputed = jax.block_until_ready(imputed)
    assert imputed.shape == (B, T, F)

    ref = mrnn_reference(X_f, M_f, D_f, X_b, M_b, D_b, params)
    # In-kernel MXU matmuls run at default (bf16-pass) precision while the pure-JAX
    # reference uses Precision.HIGHEST; 3e-3 covers that precision gap at these scales.
    if not bool(jnp.allclose(imputed, ref, atol=3e-3, rtol=3e-3)):
        raise SystemExit(
            f"mismatch: max abs err = {float(jnp.max(jnp.abs(imputed - ref)))}")

    print("KERNEL_OK")
</pallas_src>

<mosaic_0001>
module attributes {stable_mosaic.version = 11 : i64} {
  func.func @kernel(%arg0: i32, %arg1: memref<8x8x128xf32, #tpu.memory_space<vmem>>, %arg2: memref<256x8xf32, #tpu.memory_space<vmem>>, %arg3: memref<256x64xf32, #tpu.memory_space<vmem>>, %arg4: memref<2x64xf32, #tpu.memory_space<vmem>>, %arg5: memref<1xf32, #tpu.memory_space<smem>>, %arg6: memref<8x128xf32, #tpu.memory_space<vmem>>, %arg7: memref<8x128xf32, #tpu.memory_space<vmem>>, %arg8: memref<8x128xf32, #tpu.memory_space<vmem>>) attributes {dimension_semantics = [#tpu.dimension_semantics<parallel>], iteration_bounds = array<i64: 1>, scalar_prefetch = 0 : i64, scratch_operands = 2 : i64, tpu.core_type = #tpu.core_type<tc>, window_params = [{transform_indices = @transform_0, window_bounds = array<i64: 8, 8, 128>}, {pipeline_mode = #tpu.pipeline_mode<synchronous>, transform_indices = @transform_1, window_bounds = array<i64: 256, 8>}, {pipeline_mode = #tpu.pipeline_mode<synchronous>, transform_indices = @transform_2, window_bounds = array<i64: 256, 64>}, {pipeline_mode = #tpu.pipeline_mode<synchronous>, transform_indices = @transform_3, window_bounds = array<i64: 2, 64>}, {transform_indices = @transform_4, window_bounds = array<i64: 1>}, {transform_indices = @transform_5, window_bounds = array<i64: 8, 128>}]} {
    %c0 = arith.constant 0 : index
    %c0_0 = arith.constant 0 : index
    %0 = vector.load %arg2[%c0, %c0_0] : memref<256x8xf32, #tpu.memory_space<vmem>>, vector<256x8xf32>
    %c0_1 = arith.constant 0 : index
    %c0_2 = arith.constant 0 : index
    %1 = vector.load %arg3[%c0_1, %c0_2] : memref<256x64xf32, #tpu.memory_space<vmem>>, vector<256x64xf32>
    %c0_3 = arith.constant 0 : index
    %c0_4 = arith.constant 0 : index
    %2 = vector.load %arg4[%c0_3, %c0_4] : memref<2x64xf32, #tpu.memory_space<vmem>>, vector<2x64xf32>
    %cst = arith.constant 0.000000e+00 : f32
    %3 = vector.broadcast %cst : f32 to vector<64x128xf32>
    %c0_i32 = arith.constant 0 : i32
    %4 = arith.index_cast %c0_i32 : i32 to index
    %c0_5 = arith.constant 0 : index
    %c0_6 = arith.constant 0 : index
    %5 = vector.load %arg1[%4, %c0_5, %c0_6] : memref<8x8x128xf32, #tpu.memory_space<vmem>>, vector<1x8x128xf32>
    %6 = vector.shape_cast %5 : vector<1x8x128xf32> to vector<8x128xf32>
    %cst_7 = arith.constant dense<0.000000e+00> : vector<256x128xf32>
    %7 = tpu.matmul %0, %6, %cst_7 {dimension_numbers = #tpu.dot_dimension_numbers<[1], [0], [0], [1], [0, 0, 1, 1], [], []>} : vector<256x8xf32>, vector<8x128xf32>, vector<256x128xf32> -> vector<256x128xf32>
    %cst_8 = arith.constant dense<0.000000e+00> : vector<256x128xf32>
    %8 = tpu.matmul %1, %3, %cst_8 {dimension_numbers = #tpu.dot_dimension_numbers<[1], [0], [0], [1], [0, 0, 1, 1], [], []>} : vector<256x64xf32>, vector<64x128xf32>, vector<256x128xf32> -> vector<256x128xf32>
    %9 = arith.addf %7, %8 : vector<256x128xf32>
    %10 = vector.extract_strided_slice %9 {offsets = [0, 0], sizes = [64, 128], strides = [1, 1]} : vector<256x128xf32> to vector<64x128xf32>
    %11 = arith.negf %10 : vector<64x128xf32>
    %12 = math.exp %11 : vector<64x128xf32>
    %cst_9 = arith.constant 1.000000e+00 : f32
    %13 = vector.broadcast %cst_9 : f32 to vector<64x128xf32>
    %14 = arith.addf %13, %12 : vector<64x128xf32>
    %15 = arith.divf %13, %14 : vector<64x128xf32>
    %16 = vector.extract_strided_slice %9 {offsets = [64, 0], sizes = [64, 128], strides = [1, 1]} : vector<256x128xf32> to vector<64x128xf32>
    %17 = arith.negf %16 : vector<64x128xf32>
    %18 = math.exp %17 : vector<64x128xf32>
    %cst_10 = arith.constant 1.000000e+00 : f32
    %19 = vector.broadcast %cst_10 : f32 to vector<64x128xf32>
    %20 = arith.addf %19, %18 : vector<64x128xf32>
    %21 = arith.divf %19, %20 : vector<64x128xf32>
    %22 = vector.extract_strided_slice %9 {offsets = [128, 0], sizes = [64, 128], strides = [1, 1]} : vector<256x128xf32> to vector<64x128xf32>
    %23 = vector.extract_strided_slice %9 {offsets = [192, 0], sizes = [64, 128], strides = [1, 1]} : vector<256x128xf32> to vector<64x128xf32>
    %24 = arith.mulf %15, %23 : vector<64x128xf32>
    %25 = arith.addf %22, %24 : vector<64x128xf32>
    %26 = math.tanh %25 : vector<64x128xf32>
    %cst_11 = arith.constant 1.000000e+00 : f32
    %27 = vector.broadcast %cst_11 : f32 to vector<64x128xf32>
    %28 = arith.subf %27, %21 : vector<64x128xf32>
    %29 = arith.mulf %28, %26 : vector<64x128xf32>
    %30 = arith.mulf %21, %3 : vector<64x128xf32>
    %31 = arith.addf %29, %30 : vector<64x128xf32>
    %cst_12 = arith.constant dense<0.000000e+00> : vector<2x128xf32>
    %32 = tpu.matmul %2, %31, %cst_12 {dimension_numbers = #tpu.dot_dimension_numbers<[1], [0], [0], [1], [0, 0, 1, 1], [], []>} : vector<2x64xf32>, vector<64x128xf32>, vector<2x128xf32> -> vector<2x128xf32>
    %33 = vector.extract_strided_slice %32 {offsets = [0, 0], sizes = [1, 128], strides = [1, 1]} : vector<2x128xf32> to vector<1x128xf32>
    %34 = arith.index_cast %c0_i32 : i32 to index
    %c0_13 = arith.constant 0 : index
    %35 = vector.load %arg7[%34, %c0_13] : memref<8x128xf32, #tpu.memory_space<vmem>>, vector<1x128xf32>
    tpu.vector_store %arg7[%34, %c0_13], %33 {strides = array<i32>} : memref<8x128xf32, #tpu.memory_space<vmem>>, vector<1x128xf32>,
    %36 = vector.extract_strided_slice %32 {offsets = [1, 0], sizes = [1, 128], strides = [1, 1]} : vector<2x128xf32> to vector<1x128xf32>
    %c7_i32 = arith.constant 7 : i32
    %37 = arith.subi %c7_i32, %c0_i32 : i32
    %38 = arith.index_cast %37 : i32 to index
    %c0_14 = arith.constant 0 : index
    %39 = vector.load %arg8[%38, %c0_14] : memref<8x128xf32, #tpu.memory_space<vmem>>, vector<1x128xf32>
    tpu.vector_store %arg8[%38, %c0_14], %36 {strides = array<i32>} : memref<8x128xf32, #tpu.memory_space<vmem>>, vector<1x128xf32>,
    %c1_i32 = arith.constant 1 : i32
    %40 = arith.index_cast %c1_i32 : i32 to index
    %c0_15 = arith.constant 0 : index
    %c0_16 = arith.constant 0 : index
    %41 = vector.load %arg1[%40, %c0_15, %c0_16] : memref<8x8x128xf32, #tpu.memory_space<vmem>>, vector<1x8x128xf32>
    %42 = vector.shape_cast %41 : vector<1x8x128xf32> to vector<8x128xf32>
    %cst_17 = arith.constant dense<0.000000e+00> : vector<256x128xf32>
    %43 = tpu.matmul %0, %42, %cst_17 {dimension_numbers = #tpu.dot_dimension_numbers<[1], [0], [0], [1], [0, 0, 1, 1], [], []>} : vector<256x8xf32>, vector<8x128xf32>, vector<256x128xf32> -> vector<256x128xf32>
    %cst_18 = arith.constant dense<0.000000e+00> : vector<256x128xf32>
    %44 = tpu.matmul %1, %31, %cst_18 {dimension_numbers = #tpu.dot_dimension_numbers<[1], [0], [0], [1], [0, 0, 1, 1], [], []>} : vector<256x64xf32>, vector<64x128xf32>, vector<256x128xf32> -> vector<256x128xf32>
    %45 = arith.addf %43, %44 : vector<256x128xf32>
    %46 = vector.extract_strided_slice %45 {offsets = [0, 0], sizes = [64, 128], strides = [1, 1]} : vector<256x128xf32> to vector<64x128xf32>
    %47 = arith.negf %46 : vector<64x128xf32>
    %48 = math.exp %47 : vector<64x128xf32>
    %cst_19 = arith.constant 1.000000e+00 : f32
    %49 = vector.broadcast %cst_19 : f32 to vector<64x128xf32>
    %50 = arith.addf %49, %48 : vector<64x128xf32>
    %51 = arith.divf %49, %50 : vector<64x128xf32>
    %52 = vector.extract_strided_slice %45 {offsets = [64, 0], sizes = [64, 128], strides = [1, 1]} : vector<256x128xf32> to vector<64x128xf32>
    %53 = arith.negf %52 : vector<64x128xf32>
    %54 = math.exp %53 : vector<64x128xf32>
    %cst_20 = arith.constant 1.000000e+00 : f32
    %55 = vector.broadcast %cst_20 : f32 to vector<64x128xf32>
    %56 = arith.addf %55, %54 : vector<64x128xf32>
    %57 = arith.divf %55, %56 : vector<64x128xf32>
    %58 = vector.extract_strided_slice %45 {offsets = [128, 0], sizes = [64, 128], strides = [1, 1]} : vector<256x128xf32> to vector<64x128xf32>
    %59 = vector.extract_strided_slice %45 {offsets = [192, 0], sizes = [64, 128], strides = [1, 1]} : vector<256x128xf32> to vector<64x128xf32>
    %60 = arith.mulf %51, %59 : vector<64x128xf32>
    %61 = arith.addf %58, %60 : vector<64x128xf32>
    %62 = math.tanh %61 : vector<64x128xf32>
    %cst_21 = arith.constant 1.000000e+00 : f32
    %63 = vector.broadcast %cst_21 : f32 to vector<64x128xf32>
    %64 = arith.subf %63, %57 : vector<64x128xf32>
    %65 = arith.mulf %64, %62 : vector<64x128xf32>
    %66 = arith.mulf %57, %31 : vector<64x128xf32>
    %67 = arith.addf %65, %66 : vector<64x128xf32>
    %cst_22 = arith.constant dense<0.000000e+00> : vector<2x128xf32>
    %68 = tpu.matmul %2, %67, %cst_22 {dimension_numbers = #tpu.dot_dimension_numbers<[1], [0], [0], [1], [0, 0, 1, 1], [], []>} : vector<2x64xf32>, vector<64x128xf32>, vector<2x128xf32> -> vector<2x128xf32>
    %69 = vector.extract_strided_slice %68 {offsets = [0, 0], sizes = [1, 128], strides = [1, 1]} : vector<2x128xf32> to vector<1x128xf32>
    %70 = arith.index_cast %c1_i32 : i32 to index
    %c0_23 = arith.constant 0 : index
    %71 = vector.load %arg7[%70, %c0_23] : memref<8x128xf32, #tpu.memory_space<vmem>>, vector<1x128xf32>
    tpu.vector_store %arg7[%70, %c0_23], %69 {strides = array<i32>} : memref<8x128xf32, #tpu.memory_space<vmem>>, vector<1x128xf32>,
    %72 = vector.extract_strided_slice %68 {offsets = [1, 0], sizes = [1, 128], strides = [1, 1]} : vector<2x128xf32> to vector<1x128xf32>
    %c7_i32_24 = arith.constant 7 : i32
    %73 = arith.subi %c7_i32_24, %c1_i32 : i32
    %74 = arith.index_cast %73 : i32 to index
    %c0_25 = arith.constant 0 : index
    %75 = vector.load %arg8[%74, %c0_25] : memref<8x128xf32, #tpu.memory_space<vmem>>, vector<1x128xf32>
    tpu.vector_store %arg8[%74, %c0_25], %72 {strides = array<i32>} : memref<8x128xf32, #tpu.memory_space<vmem>>, vector<1x128xf32>,
    %c2_i32 = arith.constant 2 : i32
    %76 = arith.index_cast %c2_i32 : i32 to index
    %c0_26 = arith.constant 0 : index
    %c0_27 = arith.constant 0 : index
    %77 = vector.load %arg1[%76, %c0_26, %c0_27] : memref<8x8x128xf32, #tpu.memory_space<vmem>>, vector<1x8x128xf32>
    %78 = vector.shape_cast %77 : vector<1x8x128xf32> to vector<8x128xf32>
    %cst_28 = arith.constant dense<0.000000e+00> : vector<256x128xf32>
    %79 = tpu.matmul %0, %78, %cst_28 {dimension_numbers = #tpu.dot_dimension_numbers<[1], [0], [0], [1], [0, 0, 1, 1], [], []>} : vector<256x8xf32>, vector<8x128xf32>, vector<256x128xf32> -> vector<256x128xf32>
    %cst_29 = arith.constant dense<0.000000e+00> : vector<256x128xf32>
    %80 = tpu.matmul %1, %67, %cst_29 {dimension_numbers = #tpu.dot_dimension_numbers<[1], [0], [0], [1], [0, 0, 1, 1], [], []>} : vector<256x64xf32>, vector<64x128xf32>, vector<256x128xf32> -> vector<256x128xf32>
    %81 = arith.addf %79, %80 : vector<256x128xf32>
    %82 = vector.extract_strided_slice %81 {offsets = [0, 0], sizes = [64, 128], strides = [1, 1]} : vector<256x128xf32> to vector<64x128xf32>
    %83 = arith.negf %82 : vector<64x128xf32>
    %84 = math.exp %83 : vector<64x128xf32>
    %cst_30 = arith.constant 1.000000e+00 : f32
    %85 = vector.broadcast %cst_30 : f32 to vector<64x128xf32>
    %86 = arith.addf %85, %84 : vector<64x128xf32>
    %87 = arith.divf %85, %86 : vector<64x128xf32>
    %88 = vector.extract_strided_slice %81 {offsets = [64, 0], sizes = [64, 128], strides = [1, 1]} : vector<256x128xf32> to vector<64x128xf32>
    %89 = arith.negf %88 : vector<64x128xf32>
    %90 = math.exp %89 : vector<64x128xf32>
    %cst_31 = arith.constant 1.000000e+00 : f32
    %91 = vector.broadcast %cst_31 : f32 to vector<64x128xf32>
    %92 = arith.addf %91, %90 : vector<64x128xf32>
    %93 = arith.divf %91, %92 : vector<64x128xf32>
    %94 = vector.extract_strided_slice %81 {offsets = [128, 0], sizes = [64, 128], strides = [1, 1]} : vector<256x128xf32> to vector<64x128xf32>
    %95 = vector.extract_strided_slice %81 {offsets = [192, 0], sizes = [64, 128], strides = [1, 1]} : vector<256x128xf32> to vector<64x128xf32>
    %96 = arith.mulf %87, %95 : vector<64x128xf32>
    %97 = arith.addf %94, %96 : vector<64x128xf32>
    %98 = math.tanh %97 : vector<64x128xf32>
    %cst_32 = arith.constant 1.000000e+00 : f32
    %99 = vector.broadcast %cst_32 : f32 to vector<64x128xf32>
    %100 = arith.subf %99, %93 : vector<64x128xf32>
    %101 = arith.mulf %100, %98 : vector<64x128xf32>
    %102 = arith.mulf %93, %67 : vector<64x128xf32>
    %103 = arith.addf %101, %102 : vector<64x128xf32>
    %cst_33 = arith.constant dense<0.000000e+00> : vector<2x128xf32>
    %104 = tpu.matmul %2, %103, %cst_33 {dimension_numbers = #tpu.dot_dimension_numbers<[1], [0], [0], [1], [0, 0, 1, 1], [], []>} : vector<2x64xf32>, vector<64x128xf32>, vector<2x128xf32> -> vector<2x128xf32>
    %105 = vector.extract_strided_slice %104 {offsets = [0, 0], sizes = [1, 128], strides = [1, 1]} : vector<2x128xf32> to vector<1x128xf32>
    %106 = arith.index_cast %c2_i32 : i32 to index
    %c0_34 = arith.constant 0 : index
    %107 = vector.load %arg7[%106, %c0_34] : memref<8x128xf32, #tpu.memory_space<vmem>>, vector<1x128xf32>
    tpu.vector_store %arg7[%106, %c0_34], %105 {strides = array<i32>} : memref<8x128xf32, #tpu.memory_space<vmem>>, vector<1x128xf32>,
    %108 = vector.extract_strided_slice %104 {offsets = [1, 0], sizes = [1, 128], strides = [1, 1]} : vector<2x128xf32> to vector<1x128xf32>
    %c7_i32_35 = arith.constant 7 : i32
    %109 = arith.subi %c7_i32_35, %c2_i32 : i32
    %110 = arith.index_cast %109 : i32 to index
    %c0_36 = arith.constant 0 : index
    %111 = vector.load %arg8[%110, %c0_36] : memref<8x128xf32, #tpu.memory_space<vmem>>, vector<1x128xf32>
    tpu.vector_store %arg8[%110, %c0_36], %108 {strides = array<i32>} : memref<8x128xf32, #tpu.memory_space<vmem>>, vector<1x128xf32>,
    %c3_i32 = arith.constant 3 : i32
    %112 = arith.index_cast %c3_i32 : i32 to index
    %c0_37 = arith.constant 0 : index
    %c0_38 = arith.constant 0 : index
    %113 = vector.load %arg1[%112, %c0_37, %c0_38] : memref<8x8x128xf32, #tpu.memory_space<vmem>>, vector<1x8x128xf32>
    %114 = vector.shape_cast %113 : vector<1x8x128xf32> to vector<8x128xf32>
    %cst_39 = arith.constant dense<0.000000e+00> : vector<256x128xf32>
    %115 = tpu.matmul %0, %114, %cst_39 {dimension_numbers = #tpu.dot_dimension_numbers<[1], [0], [0], [1], [0, 0, 1, 1], [], []>} : vector<256x8xf32>, vector<8x128xf32>, vector<256x128xf32> -> vector<256x128xf32>
    %cst_40 = arith.constant dense<0.000000e+00> : vector<256x128xf32>
    %116 = tpu.matmul %1, %103, %cst_40 {dimension_numbers = #tpu.dot_dimension_numbers<[1], [0], [0], [1], [0, 0, 1, 1], [], []>} : vector<256x64xf32>, vector<64x128xf32>, vector<256x128xf32> -> vector<256x128xf32>
    %117 = arith.addf %115, %116 : vector<256x128xf32>
    %118 = vector.extract_strided_slice %117 {offsets = [0, 0], sizes = [64, 128], strides = [1, 1]} : vector<256x128xf32> to vector<64x128xf32>
    %119 = arith.negf %118 : vector<64x128xf32>
    %120 = math.exp %119 : vector<64x128xf32>
    %cst_41 = arith.constant 1.000000e+00 : f32
    %121 = vector.broadcast %cst_41 : f32 to vector<64x128xf32>
    %122 = arith.addf %121, %120 : vector<64x128xf32>
    %123 = arith.divf %121, %122 : vector<64x128xf32>
    %124 = vector.extract_strided_slice %117 {offsets = [64, 0], sizes = [64, 128], strides = [1, 1]} : vector<256x128xf32> to vector<64x128xf32>
    %125 = arith.negf %124 : vector<64x128xf32>
    %126 = math.exp %125 : vector<64x128xf32>
    %cst_42 = arith.constant 1.000000e+00 : f32
    %127 = vector.broadcast %cst_42 : f32 to vector<64x128xf32>
    %128 = arith.addf %127, %126 : vector<64x128xf32>
    %129 = arith.divf %127, %128 : vector<64x128xf32>
    %130 = vector.extract_strided_slice %117 {offsets = [128, 0], sizes = [64, 128], strides = [1, 1]} : vector<256x128xf32> to vector<64x128xf32>
    %131 = vector.extract_strided_slice %117 {offsets = [192, 0], sizes = [64, 128], strides = [1, 1]} : vector<256x128xf32> to vector<64x128xf32>
    %132 = arith.mulf %123, %131 : vector<64x128xf32>
    %133 = arith.addf %130, %132 : vector<64x128xf32>
    %134 = math.tanh %133 : vector<64x128xf32>
    %cst_43 = arith.constant 1.000000e+00 : f32
    %135 = vector.broadcast %cst_43 : f32 to vector<64x128xf32>
    %136 = arith.subf %135, %129 : vector<64x128xf32>
    %137 = arith.mulf %136, %134 : vector<64x128xf32>
    %138 = arith.mulf %129, %103 : vector<64x128xf32>
    %139 = arith.addf %137, %138 : vector<64x128xf32>
    %cst_44 = arith.constant dense<0.000000e+00> : vector<2x128xf32>
    %140 = tpu.matmul %2, %139, %cst_44 {dimension_numbers = #tpu.dot_dimension_numbers<[1], [0], [0], [1], [0, 0, 1, 1], [], []>} : vector<2x64xf32>, vector<64x128xf32>, vector<2x128xf32> -> vector<2x128xf32>
    %141 = vector.extract_strided_slice %140 {offsets = [0, 0], sizes = [1, 128], strides = [1, 1]} : vector<2x128xf32> to vector<1x128xf32>
    %142 = arith.index_cast %c3_i32 : i32 to index
    %c0_45 = arith.constant 0 : index
    %143 = vector.load %arg7[%142, %c0_45] : memref<8x128xf32, #tpu.memory_space<vmem>>, vector<1x128xf32>
    tpu.vector_store %arg7[%142, %c0_45], %141 {strides = array<i32>} : memref<8x128xf32, #tpu.memory_space<vmem>>, vector<1x128xf32>,
    %144 = vector.extract_strided_slice %140 {offsets = [1, 0], sizes = [1, 128], strides = [1, 1]} : vector<2x128xf32> to vector<1x128xf32>
    %c7_i32_46 = arith.constant 7 : i32
    %145 = arith.subi %c7_i32_46, %c3_i32 : i32
    %146 = arith.index_cast %145 : i32 to index
    %c0_47 = arith.constant 0 : index
    %147 = vector.load %arg8[%146, %c0_47] : memref<8x128xf32, #tpu.memory_space<vmem>>, vector<1x128xf32>
    tpu.vector_store %arg8[%146, %c0_47], %144 {strides = array<i32>} : memref<8x128xf32, #tpu.memory_space<vmem>>, vector<1x128xf32>,
    %c4_i32 = arith.constant 4 : i32
    %148 = arith.index_cast %c4_i32 : i32 to index
    %c0_48 = arith.constant 0 : index
    %c0_49 = arith.constant 0 : index
    %149 = vector.load %arg1[%148, %c0_48, %c0_49] : memref<8x8x128xf32, #tpu.memory_space<vmem>>, vector<1x8x128xf32>
    %150 = vector.shape_cast %149 : vector<1x8x128xf32> to vector<8x128xf32>
    %cst_50 = arith.constant dense<0.000000e+00> : vector<256x128xf32>
    %151 = tpu.matmul %0, %150, %cst_50 {dimension_numbers = #tpu.dot_dimension_numbers<[1], [0], [0], [1], [0, 0, 1, 1], [], []>} : vector<256x8xf32>, vector<8x128xf32>, vector<256x128xf32> -> vector<256x128xf32>
    %cst_51 = arith.constant dense<0.000000e+00> : vector<256x128xf32>
    %152 = tpu.matmul %1, %139, %cst_51 {dimension_numbers = #tpu.dot_dimension_numbers<[1], [0], [0], [1], [0, 0, 1, 1], [], []>} : vector<256x64xf32>, vector<64x128xf32>, vector<256x128xf32> -> vector<256x128xf32>
    %153 = arith.addf %151, %152 : vector<256x128xf32>
    %154 = vector.extract_strided_slice %153 {offsets = [0, 0], sizes = [64, 128], strides = [1, 1]} : vector<256x128xf32> to vector<64x128xf32>
    %155 = arith.negf %154 : vector<64x128xf32>
    %156 = math.exp %155 : vector<64x128xf32>
    %cst_52 = arith.constant 1.000000e+00 : f32
    %157 = vector.broadcast %cst_52 : f32 to vector<64x128xf32>
    %158 = arith.addf %157, %156 : vector<64x128xf32>
    %159 = arith.divf %157, %158 : vector<64x128xf32>
    %160 = vector.extract_strided_slice %153 {offsets = [64, 0], sizes = [64, 128], strides = [1, 1]} : vector<256x128xf32> to vector<64x128xf32>
    %161 = arith.negf %160 : vector<64x128xf32>
    %162 = math.exp %161 : vector<64x128xf32>
    %cst_53 = arith.constant 1.000000e+00 : f32
    %163 = vector.broadcast %cst_53 : f32 to vector<64x128xf32>
    %164 = arith.addf %163, %162 : vector<64x128xf32>
    %165 = arith.divf %163, %164 : vector<64x128xf32>
    %166 = vector.extract_strided_slice %153 {offsets = [128, 0], sizes = [64, 128], strides = [1, 1]} : vector<256x128xf32> to vector<64x128xf32>
    %167 = vector.extract_strided_slice %153 {offsets = [192, 0], sizes = [64, 128], strides = [1, 1]} : vector<256x128xf32> to vector<64x128xf32>
    %168 = arith.mulf %159, %167 : vector<64x128xf32>
    %169 = arith.addf %166, %168 : vector<64x128xf32>
    %170 = math.tanh %169 : vector<64x128xf32>
    %cst_54 = arith.constant 1.000000e+00 : f32
    %171 = vector.broadcast %cst_54 : f32 to vector<64x128xf32>
    %172 = arith.subf %171, %165 : vector<64x128xf32>
    %173 = arith.mulf %172, %170 : vector<64x128xf32>
    %174 = arith.mulf %165, %139 : vector<64x128xf32>
    %175 = arith.addf %173, %174 : vector<64x128xf32>
    %cst_55 = arith.constant dense<0.000000e+00> : vector<2x128xf32>
    %176 = tpu.matmul %2, %175, %cst_55 {dimension_numbers = #tpu.dot_dimension_numbers<[1], [0], [0], [1], [0, 0, 1, 1], [], []>} : vector<2x64xf32>, vector<64x128xf32>, vector<2x128xf32> -> vector<2x128xf32>
    %177 = vector.extract_strided_slice %176 {offsets = [0, 0], sizes = [1, 128], strides = [1, 1]} : vector<2x128xf32> to vector<1x128xf32>
    %178 = arith.index_cast %c4_i32 : i32 to index
    %c0_56 = arith.constant 0 : index
    %179 = vector.load %arg7[%178, %c0_56] : memref<8x128xf32, #tpu.memory_space<vmem>>, vector<1x128xf32>
    tpu.vector_store %arg7[%178, %c0_56], %177 {strides = array<i32>} : memref<8x128xf32, #tpu.memory_space<vmem>>, vector<1x128xf32>,
    %180 = vector.extract_strided_slice %176 {offsets = [1, 0], sizes = [1, 128], strides = [1, 1]} : vector<2x128xf32> to vector<1x128xf32>
    %c7_i32_57 = arith.constant 7 : i32
    %181 = arith.subi %c7_i32_57, %c4_i32 : i32
    %182 = arith.index_cast %181 : i32 to index
    %c0_58 = arith.constant 0 : index
    %183 = vector.load %arg8[%182, %c0_58] : memref<8x128xf32, #tpu.memory_space<vmem>>, vector<1x128xf32>
    tpu.vector_store %arg8[%182, %c0_58], %180 {strides = array<i32>} : memref<8x128xf32, #tpu.memory_space<vmem>>, vector<1x128xf32>,
    %c5_i32 = arith.constant 5 : i32
    %184 = arith.index_cast %c5_i32 : i32 to index
    %c0_59 = arith.constant 0 : index
    %c0_60 = arith.constant 0 : index
    %185 = vector.load %arg1[%184, %c0_59, %c0_60] : memref<8x8x128xf32, #tpu.memory_space<vmem>>, vector<1x8x128xf32>
    %186 = vector.shape_cast %185 : vector<1x8x128xf32> to vector<8x128xf32>
    %cst_61 = arith.constant dense<0.000000e+00> : vector<256x128xf32>
    %187 = tpu.matmul %0, %186, %cst_61 {dimension_numbers = #tpu.dot_dimension_numbers<[1], [0], [0], [1], [0, 0, 1, 1], [], []>} : vector<256x8xf32>, vector<8x128xf32>, vector<256x128xf32> -> vector<256x128xf32>
    %cst_62 = arith.constant dense<0.000000e+00> : vector<256x128xf32>
    %188 = tpu.matmul %1, %175, %cst_62 {dimension_numbers = #tpu.dot_dimension_numbers<[1], [0], [0], [1], [0, 0, 1, 1], [], []>} : vector<256x64xf32>, vector<64x128xf32>, vector<256x128xf32> -> vector<256x128xf32>
    %189 = arith.addf %187, %188 : vector<256x128xf32>
    %190 = vector.extract_strided_slice %189 {offsets = [0, 0], sizes = [64, 128], strides = [1, 1]} : vector<256x128xf32> to vector<64x128xf32>
    %191 = arith.negf %190 : vector<64x128xf32>
    %192 = math.exp %191 : vector<64x128xf32>
    %cst_63 = arith.constant 1.000000e+00 : f32
    %193 = vector.broadcast %cst_63 : f32 to vector<64x128xf32>
    %194 = arith.addf %193, %192 : vector<64x128xf32>
    %195 = arith.divf %193, %194 : vector<64x128xf32>
    %196 = vector.extract_strided_slice %189 {offsets = [64, 0], sizes = [64, 128], strides = [1, 1]} : vector<256x128xf32> to vector<64x128xf32>
    %197 = arith.negf %196 : vector<64x128xf32>
    %198 = math.exp %197 : vector<64x128xf32>
    %cst_64 = arith.constant 1.000000e+00 : f32
    %199 = vector.broadcast %cst_64 : f32 to vector<64x128xf32>
    %200 = arith.addf %199, %198 : vector<64x128xf32>
    %201 = arith.divf %199, %200 : vector<64x128xf32>
    %202 = vector.extract_strided_slice %189 {offsets = [128, 0], sizes = [64, 128], strides = [1, 1]} : vector<256x128xf32> to vector<64x128xf32>
    %203 = vector.extract_strided_slice %189 {offsets = [192, 0], sizes = [64, 128], strides = [1, 1]} : vector<256x128xf32> to vector<64x128xf32>
    %204 = arith.mulf %195, %203 : vector<64x128xf32>
    %205 = arith.addf %202, %204 : vector<64x128xf32>
    %206 = math.tanh %205 : vector<64x128xf32>
    %cst_65 = arith.constant 1.000000e+00 : f32
    %207 = vector.broadcast %cst_65 : f32 to vector<64x128xf32>
    %208 = arith.subf %207, %201 : vector<64x128xf32>
    %209 = arith.mulf %208, %206 : vector<64x128xf32>
    %210 = arith.mulf %201, %175 : vector<64x128xf32>
    %211 = arith.addf %209, %210 : vector<64x128xf32>
    %cst_66 = arith.constant dense<0.000000e+00> : vector<2x128xf32>
    %212 = tpu.matmul %2, %211, %cst_66 {dimension_numbers = #tpu.dot_dimension_numbers<[1], [0], [0], [1], [0, 0, 1, 1], [], []>} : vector<2x64xf32>, vector<64x128xf32>, vector<2x128xf32> -> vector<2x128xf32>
    %213 = vector.extract_strided_slice %212 {offsets = [0, 0], sizes = [1, 128], strides = [1, 1]} : vector<2x128xf32> to vector<1x128xf32>
    %214 = arith.index_cast %c5_i32 : i32 to index
    %c0_67 = arith.constant 0 : index
    %215 = vector.load %arg7[%214, %c0_67] : memref<8x128xf32, #tpu.memory_space<vmem>>, vector<1x128xf32>
    tpu.vector_store %arg7[%214, %c0_67], %213 {strides = array<i32>} : memref<8x128xf32, #tpu.memory_space<vmem>>, vector<1x128xf32>,
    %216 = vector.extract_strided_slice %212 {offsets = [1, 0], sizes = [1, 128], strides = [1, 1]} : vector<2x128xf32> to vector<1x128xf32>
    %c7_i32_68 = arith.constant 7 : i32
    %217 = arith.subi %c7_i32_68, %c5_i32 : i32
    %218 = arith.index_cast %217 : i32 to index
    %c0_69 = arith.constant 0 : index
    %219 = vector.load %arg8[%218, %c0_69] : memref<8x128xf32, #tpu.memory_space<vmem>>, vector<1x128xf32>
    tpu.vector_store %arg8[%218, %c0_69], %216 {strides = array<i32>} : memref<8x128xf32, #tpu.memory_space<vmem>>, vector<1x128xf32>,
    %c6_i32 = arith.constant 6 : i32
    %220 = arith.index_cast %c6_i32 : i32 to index
    %c0_70 = arith.constant 0 : index
    %c0_71 = arith.constant 0 : index
    %221 = vector.load %arg1[%220, %c0_70, %c0_71] : memref<8x8x128xf32, #tpu.memory_space<vmem>>, vector<1x8x128xf32>
    %222 = vector.shape_cast %221 : vector<1x8x128xf32> to vector<8x128xf32>
    %cst_72 = arith.constant dense<0.000000e+00> : vector<256x128xf32>
    %223 = tpu.matmul %0, %222, %cst_72 {dimension_numbers = #tpu.dot_dimension_numbers<[1], [0], [0], [1], [0, 0, 1, 1], [], []>} : vector<256x8xf32>, vector<8x128xf32>, vector<256x128xf32> -> vector<256x128xf32>
    %cst_73 = arith.constant dense<0.000000e+00> : vector<256x128xf32>
    %224 = tpu.matmul %1, %211, %cst_73 {dimension_numbers = #tpu.dot_dimension_numbers<[1], [0], [0], [1], [0, 0, 1, 1], [], []>} : vector<256x64xf32>, vector<64x128xf32>, vector<256x128xf32> -> vector<256x128xf32>
    %225 = arith.addf %223, %224 : vector<256x128xf32>
    %226 = vector.extract_strided_slice %225 {offsets = [0, 0], sizes = [64, 128], strides = [1, 1]} : vector<256x128xf32> to vector<64x128xf32>
    %227 = arith.negf %226 : vector<64x128xf32>
    %228 = math.exp %227 : vector<64x128xf32>
    %cst_74 = arith.constant 1.000000e+00 : f32
    %229 = vector.broadcast %cst_74 : f32 to vector<64x128xf32>
    %230 = arith.addf %229, %228 : vector<64x128xf32>
    %231 = arith.divf %229, %230 : vector<64x128xf32>
    %232 = vector.extract_strided_slice %225 {offsets = [64, 0], sizes = [64, 128], strides = [1, 1]} : vector<256x128xf32> to vector<64x128xf32>
    %233 = arith.negf %232 : vector<64x128xf32>
    %234 = math.exp %233 : vector<64x128xf32>
    %cst_75 = arith.constant 1.000000e+00 : f32
    %235 = vector.broadcast %cst_75 : f32 to vector<64x128xf32>
    %236 = arith.addf %235, %234 : vector<64x128xf32>
    %237 = arith.divf %235, %236 : vector<64x128xf32>
    %238 = vector.extract_strided_slice %225 {offsets = [128, 0], sizes = [64, 128], strides = [1, 1]} : vector<256x128xf32> to vector<64x128xf32>
    %239 = vector.extract_strided_slice %225 {offsets = [192, 0], sizes = [64, 128], strides = [1, 1]} : vector<256x128xf32> to vector<64x128xf32>
    %240 = arith.mulf %231, %239 : vector<64x128xf32>
    %241 = arith.addf %238, %240 : vector<64x128xf32>
    %242 = math.tanh %241 : vector<64x128xf32>
    %cst_76 = arith.constant 1.000000e+00 : f32
    %243 = vector.broadcast %cst_76 : f32 to vector<64x128xf32>
    %244 = arith.subf %243, %237 : vector<64x128xf32>
    %245 = arith.mulf %244, %242 : vector<64x128xf32>
    %246 = arith.mulf %237, %211 : vector<64x128xf32>
    %247 = arith.addf %245, %246 : vector<64x128xf32>
    %cst_77 = arith.constant dense<0.000000e+00> : vector<2x128xf32>
    %248 = tpu.matmul %2, %247, %cst_77 {dimension_numbers = #tpu.dot_dimension_numbers<[1], [0], [0], [1], [0, 0, 1, 1], [], []>} : vector<2x64xf32>, vector<64x128xf32>, vector<2x128xf32> -> vector<2x128xf32>
    %249 = vector.extract_strided_slice %248 {offsets = [0, 0], sizes = [1, 128], strides = [1, 1]} : vector<2x128xf32> to vector<1x128xf32>
    %250 = arith.index_cast %c6_i32 : i32 to index
    %c0_78 = arith.constant 0 : index
    %251 = vector.load %arg7[%250, %c0_78] : memref<8x128xf32, #tpu.memory_space<vmem>>, vector<1x128xf32>
    tpu.vector_store %arg7[%250, %c0_78], %249 {strides = array<i32>} : memref<8x128xf32, #tpu.memory_space<vmem>>, vector<1x128xf32>,
    %252 = vector.extract_strided_slice %248 {offsets = [1, 0], sizes = [1, 128], strides = [1, 1]} : vector<2x128xf32> to vector<1x128xf32>
    %c7_i32_79 = arith.constant 7 : i32
    %253 = arith.subi %c7_i32_79, %c6_i32 : i32
    %254 = arith.index_cast %253 : i32 to index
    %c0_80 = arith.constant 0 : index
    %255 = vector.load %arg8[%254, %c0_80] : memref<8x128xf32, #tpu.memory_space<vmem>>, vector<1x128xf32>
    tpu.vector_store %arg8[%254, %c0_80], %252 {strides = array<i32>} : memref<8x128xf32, #tpu.memory_space<vmem>>, vector<1x128xf32>,
    %c7_i32_81 = arith.constant 7 : i32
    %256 = arith.index_cast %c7_i32_81 : i32 to index
    %c0_82 = arith.constant 0 : index
    %c0_83 = arith.constant 0 : index
    %257 = vector.load %arg1[%256, %c0_82, %c0_83] : memref<8x8x128xf32, #tpu.memory_space<vmem>>, vector<1x8x128xf32>
    %258 = vector.shape_cast %257 : vector<1x8x128xf32> to vector<8x128xf32>
    %cst_84 = arith.constant dense<0.000000e+00> : vector<256x128xf32>
    %259 = tpu.matmul %0, %258, %cst_84 {dimension_numbers = #tpu.dot_dimension_numbers<[1], [0], [0], [1], [0, 0, 1, 1], [], []>} : vector<256x8xf32>, vector<8x128xf32>, vector<256x128xf32> -> vector<256x128xf32>
    %cst_85 = arith.constant dense<0.000000e+00> : vector<256x128xf32>
    %260 = tpu.matmul %1, %247, %cst_85 {dimension_numbers = #tpu.dot_dimension_numbers<[1], [0], [0], [1], [0, 0, 1, 1], [], []>} : vector<256x64xf32>, vector<64x128xf32>, vector<256x128xf32> -> vector<256x128xf32>
    %261 = arith.addf %259, %260 : vector<256x128xf32>
    %262 = vector.extract_strided_slice %261 {offsets = [0, 0], sizes = [64, 128], strides = [1, 1]} : vector<256x128xf32> to vector<64x128xf32>
    %263 = arith.negf %262 : vector<64x128xf32>
    %264 = math.exp %263 : vector<64x128xf32>
    %cst_86 = arith.constant 1.000000e+00 : f32
    %265 = vector.broadcast %cst_86 : f32 to vector<64x128xf32>
    %266 = arith.addf %265, %264 : vector<64x128xf32>
    %267 = arith.divf %265, %266 : vector<64x128xf32>
    %268 = vector.extract_strided_slice %261 {offsets = [64, 0], sizes = [64, 128], strides = [1, 1]} : vector<256x128xf32> to vector<64x128xf32>
    %269 = arith.negf %268 : vector<64x128xf32>
    %270 = math.exp %269 : vector<64x128xf32>
    %cst_87 = arith.constant 1.000000e+00 : f32
    %271 = vector.broadcast %cst_87 : f32 to vector<64x128xf32>
    %272 = arith.addf %271, %270 : vector<64x128xf32>
    %273 = arith.divf %271, %272 : vector<64x128xf32>
    %274 = vector.extract_strided_slice %261 {offsets = [128, 0], sizes = [64, 128], strides = [1, 1]} : vector<256x128xf32> to vector<64x128xf32>
    %275 = vector.extract_strided_slice %261 {offsets = [192, 0], sizes = [64, 128], strides = [1, 1]} : vector<256x128xf32> to vector<64x128xf32>
    %276 = arith.mulf %267, %275 : vector<64x128xf32>
    %277 = arith.addf %274, %276 : vector<64x128xf32>
    %278 = math.tanh %277 : vector<64x128xf32>
    %cst_88 = arith.constant 1.000000e+00 : f32
    %279 = vector.broadcast %cst_88 : f32 to vector<64x128xf32>
    %280 = arith.subf %279, %273 : vector<64x128xf32>
    %281 = arith.mulf %280, %278 : vector<64x128xf32>
    %282 = arith.mulf %273, %247 : vector<64x128xf32>
    %283 = arith.addf %281, %282 : vector<64x128xf32>
    %cst_89 = arith.constant dense<0.000000e+00> : vector<2x128xf32>
    %284 = tpu.matmul %2, %283, %cst_89 {dimension_numbers = #tpu.dot_dimension_numbers<[1], [0], [0], [1], [0, 0, 1, 1], [], []>} : vector<2x64xf32>, vector<64x128xf32>, vector<2x128xf32> -> vector<2x128xf32>
    %285 = vector.extract_strided_slice %284 {offsets = [0, 0], sizes = [1, 128], strides = [1, 1]} : vector<2x128xf32> to vector<1x128xf32>
    %286 = arith.index_cast %c7_i32_81 : i32 to index
    %c0_90 = arith.constant 0 : index
    %287 = vector.load %arg7[%286, %c0_90] : memref<8x128xf32, #tpu.memory_space<vmem>>, vector<1x128xf32>
    tpu.vector_store %arg7[%286, %c0_90], %285 {strides = array<i32>} : memref<8x128xf32, #tpu.memory_space<vmem>>, vector<1x128xf32>,
    %288 = vector.extract_strided_slice %284 {offsets = [1, 0], sizes = [1, 128], strides = [1, 1]} : vector<2x128xf32> to vector<1x128xf32>
    %c7_i32_91 = arith.constant 7 : i32
    %289 = arith.subi %c7_i32_91, %c7_i32_81 : i32
    %290 = arith.index_cast %289 : i32 to index
    %c0_92 = arith.constant 0 : index
    %291 = vector.load %arg8[%290, %c0_92] : memref<8x128xf32, #tpu.memory_space<vmem>>, vector<1x128xf32>
    tpu.vector_store %arg8[%290, %c0_92], %288 {strides = array<i32>} : memref<8x128xf32, #tpu.memory_space<vmem>>, vector<1x128xf32>,
    %c8_i32 = arith.constant 8 : i32
    %c0_93 = arith.constant 0 : index
    %c0_94 = arith.constant 0 : index
    %292 = vector.load %arg7[%c0_93, %c0_94] : memref<8x128xf32, #tpu.memory_space<vmem>>, vector<8x128xf32>
    %c0_95 = arith.constant 0 : index
    %c0_96 = arith.constant 0 : index
    %293 = vector.load %arg8[%c0_95, %c0_96] : memref<8x128xf32, #tpu.memory_space<vmem>>, vector<8x128xf32>
    %294 = arith.addf %292, %293 : vector<8x128xf32>
    %c0_97 = arith.constant 0 : index
    %295 = memref.load %arg5[%c0_97] : memref<1xf32, #tpu.memory_space<smem>>
    %296 = vector.broadcast %295 : f32 to vector<8x128xf32>
    %297 = arith.addf %294, %296 : vector<8x128xf32>
    %c0_98 = arith.constant 0 : index
    %c0_99 = arith.constant 0 : index
    %298 = vector.load %arg6[%c0_98, %c0_99] : memref<8x128xf32, #tpu.memory_space<vmem>>, vector<8x128xf32>
    tpu.vector_store %arg6[%c0_98, %c0_99], %297 {strides = array<i32>} : memref<8x128xf32, #tpu.memory_space<vmem>>, vector<8x128xf32>,
    return
  }
  func.func @transform_0(%arg0: i32) -> (i32, i32, i32) {
    %c0_i32 = arith.constant 0 : i32
    %c0_i32_0 = arith.constant 0 : i32
    %c0_i32_1 = arith.constant 0 : i32
    return %c0_i32, %c0_i32_0, %arg0 : i32, i32, i32
  }
  func.func @transform_1(%arg0: i32) -> (i32, i32) {
    %c0_i32 = arith.constant 0 : i32
    %c0_i32_0 = arith.constant 0 : i32
    %c0_i32_1 = arith.constant 0 : i32
    return %c0_i32, %c0_i32_0 : i32, i32
  }
  func.func @transform_2(%arg0: i32) -> (i32, i32) {
    %c0_i32 = arith.constant 0 : i32
    %c0_i32_0 = arith.constant 0 : i32
    %c0_i32_1 = arith.constant 0 : i32
    return %c0_i32, %c0_i32_0 : i32, i32
  }
  func.func @transform_3(%arg0: i32) -> (i32, i32) {
    %c0_i32 = arith.constant 0 : i32
    %c0_i32_0 = arith.constant 0 : i32
    %c0_i32_1 = arith.constant 0 : i32
    return %c0_i32, %c0_i32_0 : i32, i32
  }
  func.func @transform_4(%arg0: i32) -> i32 {
    %c0_i32 = arith.constant 0 : i32
    %c0_i32_0 = arith.constant 0 : i32
    return %c0_i32 : i32
  }
  func.func @transform_5(%arg0: i32) -> (i32, i32) {
    %c0_i32 = arith.constant 0 : i32
    %c0_i32_0 = arith.constant 0 : i32
    return %c0_i32, %arg0 : i32, i32
  }
}

</mosaic_0001>

<bundles_post_ra>
// kernel: tpu_custom_call.1
= control target key start
LH: loop header
LB: loop body
LE: loop exit
PB: predicated region body
PF: predicated region fallthrough
CT: control target
= control target key end

     0   :  { %vm14250_vm0 = vcmask 523264   ;;  %vm14249_vm1 = vcmask 64512   ;;  %v6964_v3 = vmov 0.0   ;;  %s14243_s0 = inlined_call_operand.vmem [shape: f32[8,8,128], index: 0, kind: input, shape index: {}]   ;;  %s14244_s1 = inlined_call_operand.vmem [shape: f32[256,8], index: 1, kind: input, shape index: {}]   ;;  %s14245_s2 = inlined_call_operand.vmem [shape: f32[256,64], index: 2, kind: input, shape index: {}]   ;;  %s14246_s3 = inlined_call_operand.vmem [shape: f32[2,64], index: 3, kind: input, shape index: {}]   ;;  %s14247_s4 = inlined_call_operand.<no memory space> [shape: f32[1], index: 4, kind: input, shape index: {}]   ;;  %s14248_s5 = inlined_call_operand.hbm [shape: f32[8,128], index: 5, kind: output, shape index: {}]  }
   0x1   :  { %v87_v0 = vld [vmem:[%s14243_s0] sm:$0xff]  ;;  %200 = vmatpush.msra.mxu0 %v6964_v3 }
   0x2   :  { %v54_v1 = vld [vmem:[%s14245_s2] sm:$0xff]  ;;  %410 = vmatpush.msra.mxu1 %v87_v0 }
   0x3   :  { %v22_v2 = vld [vmem:[%s14244_s1] sm:$0xff]  ;;  %5186 = vmatmul.msk.f32.vlgmr.msra.gmra.mxu0 %vm14250_vm0, %v54_v1 }
   0x4   :  { %5218 = vmatmul.msk.f32.vlgmr.msra.gmra.mxu1 %vm14249_vm1, %v22_v2 }
   0x5   :  { %11 = vsyncpa [#allocation6], 0  ;;  %v55_v4 = vld [vmem:[%s14245_s2 + $0x8] sm:$0xff]  ;;  %v56_v6 = vld [vmem:[%s14245_s2 + $0x10] sm:$0xff]  ;;  %s6965_s19 = smov [#allocation5]  }
   0x6   :  { %v23_v5 = vld [vmem:[%s14244_s1 + $0x8] sm:$0xff]  ;;  %v24_v7 = vld [vmem:[%s14244_s1 + $0x10] sm:$0xff]  ;;  %v57_v8 = vld [vmem:[%s14245_s2 + $0x18] sm:$0xff]  ;;  %s5175_s20 = sshll.u32 %s6965_s19, 4  ;;  %s5176_s20 = int_to_ptr.vmem [resolvable:$true] %s5175_s20 }
   0x7   :  { %v25_v9 = vld [vmem:[%s14244_s1 + $0x18] sm:$0xff]  ;;  %v58_v10 = vld [vmem:[%s14245_s2 + $0x20] sm:$0xff]  ;;  %v59_v12 = vld [vmem:[%s14245_s2 + $0x28] sm:$0xff] }
   0x8   :  { %v26_v11 = vld [vmem:[%s14244_s1 + $0x20] sm:$0xff]  ;;  %v27_v13 = vld [vmem:[%s14244_s1 + $0x28] sm:$0xff]  ;;  %v60_v14 = vld [vmem:[%s14245_s2 + $0x30] sm:$0xff] }
   0x9   :  { %v28_v15 = vld [vmem:[%s14244_s1 + $0x30] sm:$0xff]  ;;  %v61_v16 = vld [vmem:[%s14245_s2 + $0x38] sm:$0xff]  ;;  %v62_v18 = vld [vmem:[%s14245_s2 + $0x40] sm:$0xff] }
   0xa   :  { %v29_v17 = vld [vmem:[%s14244_s1 + $0x38] sm:$0xff]  ;;  %v30_v19 = vld [vmem:[%s14244_s1 + $0x40] sm:$0xff]  ;;  %v63_v20 = vld [vmem:[%s14245_s2 + $0x48] sm:$0xff] }
   0xb   :  { %5187 = vmatmul.msk.f32.gmra.mxu0 %vm14250_vm0, %v55_v4  ;;  %v31_v21 = vld [vmem:[%s14244_s1 + $0x48] sm:$0xff]  ;;  %v64_v22 = vld [vmem:[%s14245_s2 + $0x50] sm:$0xff]  ;;  %v65_v24 = vld [vmem:[%s14245_s2 + $0x58] sm:$0xff] }
   0xc   :  { %5219 = vmatmul.msk.f32.gmra.mxu1 %vm14249_vm1, %v23_v5  ;;  %v32_v23 = vld [vmem:[%s14244_s1 + $0x50] sm:$0xff]  ;;  %v33_v25 = vld [vmem:[%s14244_s1 + $0x58] sm:$0xff]  ;;  %v66_v26 = vld [vmem:[%s14245_s2 + $0x60] sm:$0xff] }
   0xd   :  { %v34_v27 = vld [vmem:[%s14244_s1 + $0x60] sm:$0xff]  ;;  %v67_v28 = vld [vmem:[%s14245_s2 + $0x68] sm:$0xff]  ;;  %v68_v30 = vld [vmem:[%s14245_s2 + $0x70] sm:$0xff] }
   0xe   :  { %v35_v29 = vld [vmem:[%s14244_s1 + $0x68] sm:$0xff]  ;;  %v36_v31 = vld [vmem:[%s14244_s1 + $0x70] sm:$0xff]  ;;  %v69_v32 = vld [vmem:[%s14245_s2 + $0x78] sm:$0xff] }
   0xf   :  { %v37_v33 = vld [vmem:[%s14244_s1 + $0x78] sm:$0xff]  ;;  %v70_v36 = vld [vmem:[%s14245_s2 + $0x80] sm:$0xff]  ;;  %v71_v40 = vld [vmem:[%s14245_s2 + $0x88] sm:$0xff] }
  0x10   :  { %v38_v37 = vld [vmem:[%s14244_s1 + $0x80] sm:$0xff]  ;;  %v39_v41 = vld [vmem:[%s14244_s1 + $0x88] sm:$0xff]  ;;  %v72_v44 = vld [vmem:[%s14245_s2 + $0x90] sm:$0xff] }
  0x11   :  { %v40_v45 = vld [vmem:[%s14244_s1 + $0x90] sm:$0xff]  ;;  %v73_v48 = vld [vmem:[%s14245_s2 + $0x98] sm:$0xff]  ;;  %v74_v52 = vld [vmem:[%s14245_s2 + $0xa0] sm:$0xff] }
  0x12   :  { %v41_v49 = vld [vmem:[%s14244_s1 + $0x98] sm:$0xff]  ;;  %v42_v53 = vld [vmem:[%s14244_s1 + $0xa0] sm:$0xff]  ;;  %v75_v56 = vld [vmem:[%s14245_s2 + $0xa8] sm:$0xff] }
  0x13   :  { %5188 = vmatmul.msk.f32.gmra.mxu0 %vm14250_vm0, %v56_v6  ;;  %v43_v57 = vld [vmem:[%s14244_s1 + $0xa8] sm:$0xff]  ;;  %v76_v60 = vld [vmem:[%s14245_s2 + $0xb0] sm:$0xff]  ;;  %v77_v0 = vld [vmem:[%s14245_s2 + $0xb8] sm:$0xff] }
  0x14   :  { %5220 = vmatmul.msk.f32.gmra.mxu1 %vm14249_vm1, %v24_v7  ;;  %v44_v61 = vld [vmem:[%s14244_s1 + $0xb0] sm:$0xff]  ;;  %v45_v1 = vld [vmem:[%s14244_s1 + $0xb8] sm:$0xff]  ;;  %v78_v4 = vld [vmem:[%s14245_s2 + $0xc0] sm:$0xff] }
  0x15   :  { %v46_v5 = vld [vmem:[%s14244_s1 + $0xc0] sm:$0xff] }
  0x1b   :  { %5189 = vmatmul.msk.f32.gmra.mxu0 %vm14250_vm0, %v57_v8  ;;  %v79_v8 = vld [vmem:[%s14245_s2 + $0xc8] sm:$0xff] }
  0x1c   :  { %5221 = vmatmul.msk.f32.gmra.mxu1 %vm14249_vm1, %v25_v9  ;;  %v47_v9 = vld [vmem:[%s14244_s1 + $0xc8] sm:$0xff] }
  0x23   :  { %5190 = vmatmul.msk.f32.gmra.mxu0 %vm14250_vm0, %v58_v10 }
  0x24   :  { %5222 = vmatmul.msk.f32.gmra.mxu1 %vm14249_vm1, %v26_v11 }
  0x2b   :  { %5191 = vmatmul.msk.f32.gmra.mxu0 %vm14250_vm0, %v59_v12  ;;  %v80_v12 = vld [vmem:[%s14245_s2 + $0xd0] sm:$0xff] }
  0x2c   :  { %5223 = vmatmul.msk.f32.gmra.mxu1 %vm14249_vm1, %v27_v13  ;;  %v48_v13 = vld [vmem:[%s14244_s1 + $0xd0] sm:$0xff] }
  0x33   :  { %5192 = vmatmul.msk.f32.gmra.mxu0 %vm14250_vm0, %v60_v14 }
  0x34   :  { %5224 = vmatmul.msk.f32.gmra.mxu1 %vm14249_vm1, %v28_v15 }
  0x3b   :  { %5193 = vmatmul.msk.f32.gmra.mxu0 %vm14250_vm0, %v61_v16  ;;  %v81_v16 = vld [vmem:[%s14245_s2 + $0xd8] sm:$0xff] }
  0x3c   :  { %5225 = vmatmul.msk.f32.gmra.mxu1 %vm14249_vm1, %v29_v17  ;;  %v49_v17 = vld [vmem:[%s14244_s1 + $0xd8] sm:$0xff] }
  0x43   :  { %5194 = vmatmul.msk.f32.gmra.mxu0 %vm14250_vm0, %v62_v18 }
  0x44   :  { %5226 = vmatmul.msk.f32.gmra.mxu1 %vm14249_vm1, %v30_v19 }
  0x4b   :  { %5195 = vmatmul.msk.f32.gmra.mxu0 %vm14250_vm0, %v63_v20  ;;  %v82_v20 = vld [vmem:[%s14245_s2 + $0xe0] sm:$0xff] }
  0x4c   :  { %5227 = vmatmul.msk.f32.gmra.mxu1 %vm14249_vm1, %v31_v21  ;;  %v50_v21 = vld [vmem:[%s14244_s1 + $0xe0] sm:$0xff] }
  0x53   :  { %5196 = vmatmul.msk.f32.gmra.mxu0 %vm14250_vm0, %v64_v22 }
  0x54   :  { %5228 = vmatmul.msk.f32.gmra.mxu1 %vm14249_vm1, %v32_v23 }
  0x5b   :  { %5197 = vmatmul.msk.f32.gmra.mxu0 %vm14250_vm0, %v65_v24  ;;  %v83_v24 = vld [vmem:[%s14245_s2 + $0xe8] sm:$0xff] }
  0x5c   :  { %5229 = vmatmul.msk.f32.gmra.mxu1 %vm14249_vm1, %v33_v25  ;;  %v51_v25 = vld [vmem:[%s14244_s1 + $0xe8] sm:$0xff] }
  0x63   :  { %5198 = vmatmul.msk.f32.gmra.mxu0 %vm14250_vm0, %v66_v26 }
  0x64   :  { %5230 = vmatmul.msk.f32.gmra.mxu1 %vm14249_vm1, %v34_v27 }
  0x6b   :  { %5199 = vmatmul.msk.f32.gmra.mxu0 %vm14250_vm0, %v67_v28  ;;  %v84_v28 = vld [vmem:[%s14245_s2 + $0xf0] sm:$0xff] }
  0x6c   :  { %5231 = vmatmul.msk.f32.gmra.mxu1 %vm14249_vm1, %v35_v29  ;;  %v52_v29 = vld [vmem:[%s14244_s1 + $0xf0] sm:$0xff] }
  0x73   :  { %5200 = vmatmul.msk.f32.gmra.mxu0 %vm14250_vm0, %v68_v30 }
  0x74   :  { %5232 = vmatmul.msk.f32.gmra.mxu1 %vm14249_vm1, %v36_v31 }
  0x7b   :  { %5201 = vmatmul.msk.f32.gmra.mxu0 %vm14250_vm0, %v69_v32  ;;  %v85_v32 = vld [vmem:[%s14245_s2 + $0xf8] sm:$0xff] }
  0x7c   :  { %5233 = vmatmul.msk.f32.gmra.mxu1 %vm14249_vm1, %v37_v33  ;;  %v53_v33 = vld [vmem:[%s14244_s1 + $0xf8] sm:$0xff] }
  0x80   :  { %v7127_v34 = vpop.f32.mrf.mxu0 }
  0x81   :  { %v7129_v35 = vpop.f32.mrf.mxu1 }
  0x83   :  { %5202 = vmatmul.msk.f32.gmra.mxu0 %vm14250_vm0, %v70_v36 }
  0x84   :  { %5234 = vmatmul.msk.f32.gmra.mxu1 %vm14249_vm1, %v38_v37 }
  0x88   :  { %v7139_v38 = vpop.f32.mrf.mxu0 }
  0x89   :  { %v7141_v39 = vpop.f32.mrf.mxu1 }
  0x8b   :  { %5203 = vmatmul.msk.f32.gmra.mxu0 %vm14250_vm0, %v71_v40 }
  0x8c   :  { %5235 = vmatmul.msk.f32.gmra.mxu1 %vm14249_vm1, %v39_v41 }
  0x90   :  { %v7151_v42 = vpop.f32.mrf.mxu0 }
  0x91   :  { %v7153_v43 = vpop.f32.mrf.mxu1 }
  0x93   :  { %5204 = vmatmul.msk.f32.gmra.mxu0 %vm14250_vm0, %v72_v44 }
  0x94   :  { %5236 = vmatmul.msk.f32.gmra.mxu1 %vm14249_vm1, %v40_v45 }
  0x98   :  { %v7163_v46 = vpop.f32.mrf.mxu0 }
  0x99   :  { %v7165_v47 = vpop.f32.mrf.mxu1 }
  0x9b   :  { %5205 = vmatmul.msk.f32.gmra.mxu0 %vm14250_vm0, %v73_v48 }
  0x9c   :  { %5237 = vmatmul.msk.f32.gmra.mxu1 %vm14249_vm1, %v41_v49 }
  0xa0   :  { %v7175_v50 = vpop.f32.mrf.mxu0 }
  0xa1   :  { %v7177_v51 = vpop.f32.mrf.mxu1 }
  0xa3   :  { %5206 = vmatmul.msk.f32.gmra.mxu0 %vm14250_vm0, %v74_v52 }
  0xa4   :  { %5238 = vmatmul.msk.f32.gmra.mxu1 %vm14249_vm1, %v42_v53 }
  0xa8   :  { %v7187_v54 = vpop.f32.mrf.mxu0 }
  0xa9   :  { %v7189_v55 = vpop.f32.mrf.mxu1 }
  0xab   :  { %5207 = vmatmul.msk.f32.gmra.mxu0 %vm14250_vm0, %v75_v56  ;;  %v413_v56 = vadd.f32 %v7129_v35, %v7127_v34  ;;  %v422_v34 = vadd.f32 %v7165_v47, %v7163_v46 }
  0xac   :  { %5239 = vmatmul.msk.f32.gmra.mxu1 %vm14249_vm1, %v43_v57 }
  0xad   :  { %v5250_v57 = vmul.f32 -1.442695, %v413_v56 }
  0xaf   :  { %5843 = vpow2.f32 %v5250_v57 }
  0xb0   :  { %v7199_v58 = vpop.f32.mrf.mxu0 }
  0xb1   :  { %v7201_v59 = vpop.f32.mrf.mxu1 }
  0xb2   :  { %v431_v47 = vadd.f32 %v7201_v59, %v7199_v58 }
  0xb3   :  { %5208 = vmatmul.msk.f32.gmra.mxu0 %vm14250_vm0, %v76_v60  ;;  %v416_v60 = vadd.f32 %v7141_v39, %v7139_v38  ;;  %v5253_v39 = vmul.f32 -1.442695, %v422_v34 }
  0xb4   :  { %5240 = vmatmul.msk.f32.gmra.mxu1 %vm14249_vm1, %v44_v61 }
  0xb8   :  { %v7211_v62 = vpop.f32.mrf.mxu0 }
  0xb9   :  { %v7213_v63 = vpop.f32.mrf.mxu1 }
  0xbb   :  { %5209 = vmatmul.msk.f32.gmra.mxu0 %vm14250_vm0, %v77_v0 }
  0xbc   :  { %5241 = vmatmul.msk.f32.gmra.mxu1 %vm14249_vm1, %v45_v1  ;;  %v5251_v1 = vmul.f32 -1.442695, %v416_v60 }
  0xbe   :  { %5845 = vpow2.f32 %v5251_v1 }
  0xc0   :  { %v7223_v2 = vpop.f32.mrf.mxu0 }
  0xc1   :  { %v7225_v3 = vpop.f32.mrf.mxu1 }
  0xc2   :  { %v437_v56 = vadd.f32 %v7225_v3, %v7223_v2 }
  0xc3   :  { %5210 = vmatmul.msk.f32.gmra.mxu0 %vm14250_vm0, %v78_v4  ;;  %v419_v4 = vadd.f32 %v7153_v43, %v7151_v42  ;;  %v428_v42 = vadd.f32 %v7189_v55, %v7187_v54  ;;  %v5256_v55 = vmul.f32 -1.442695, %v431_v47 }
  0xc4   :  { %5242 = vmatmul.msk.f32.gmra.mxu1 %vm14249_vm1, %v46_v5 }
  0xc5   :  { %v5252_v5 = vmul.f32 -1.442695, %v419_v4 }
  0xc7   :  { %5847 = vpow2.f32 %v5252_v5 }
  0xc8   :  { %v7235_v6 = vpop.f32.mrf.mxu0 }
  0xc9   :  { %v7237_v7 = vpop.f32.mrf.mxu1 }
  0xcb   :  { %5211 = vmatmul.msk.f32.gmra.mxu0 %vm14250_vm0, %v79_v8  ;;  %v5844_v8 = vpop.eup %5843 }
  0xcc   :  { %5243 = vmatmul.msk.f32.gmra.mxu1 %vm14249_vm1, %v47_v9  ;;  %v7355_v35 = vadd.f32 1.0, %v5844_v8  ;;  %v5846_v38 = vpop.eup %5845  ;;  %v440_v8 = vadd.f32 %v7237_v7, %v7235_v6 }
  0xcd   :  { %v7362_v43 = vadd.f32 1.0, %v5846_v38  ;;  %v5848_v46 = vpop.eup %5847 }
  0xce   :  { %5849 = vrcp.f32 %v7355_v35  ;;  %v551_v1 = vand.u32 2147483648, %v7355_v35  ;;  %v549_v34 = vand.u32 2147483647, %v7355_v35  ;;  %vm545_vm2 = vweird.f32 %v7355_v35 }
  0xcf   :  { %5851 = vpow2.f32 %v5253_v39  ;;  %vm560_vm6 = vweird.f32 %v7362_v43 }
  0xd0   :  { %v7247_v10 = vpop.f32.mrf.mxu0  ;;  %5853 = vrcp.f32 %v7362_v43  ;;  %v552_v7 = vor.u32 1.1754944e-38, %v551_v1  ;;  %vm7421_vm4 = vcmp.eq.f32.partialorder %v549_v34, 8.507059e+37 }
  0xd1   :  { %v7249_v11 = vpop.f32.mrf.mxu1 }
  0xd2   :  { %v443_v2 = vadd.f32 %v7249_v11, %v7247_v10  ;;  %v5259_v11 = vmul.f32 -1.442695, %v440_v8 }
  0xd3   :  { %5212 = vmatmul.msk.f32.gmra.mxu0 %vm14250_vm0, %v80_v12 }
  0xd4   :  { %5244 = vmatmul.msk.f32.gmra.mxu1 %vm14249_vm1, %v48_v13  ;;  %v425_v13 = vadd.f32 %v7177_v51, %v7175_v50  ;;  %v7371_v50 = vadd.f32 1.0, %v5848_v46  ;;  %v434_v51 = vadd.f32 %v7213_v63, %v7211_v62  ;;  %v7375_v54 = vpop.eup %5849 }
  0xd5   :  { %v541_v59 = vmul.f32 %v7375_v54, %v7355_v35  ;;  %vm546_vm3 = vweird.f32 %v7375_v54 }
  0xd6   :  { %vm7442_vm5 = vmor %vm545_vm2, %vm546_vm3  ;;  %vm575_vm11 = vweird.f32 %v7371_v50 }
  0xd8   :  { %v7259_v14 = vpop.f32.mrf.mxu0 }
  0xd9   :  { %v7261_v15 = vpop.f32.mrf.mxu1 }
  0xda   :  { %v446_v6 = vadd.f32 %v7261_v15, %v7259_v14  ;;  %v5260_v14 = vmul.f32 -1.442695, %v443_v2 }
  0xdb   :  { %5213 = vmatmul.msk.f32.gmra.mxu0 %vm14250_vm0, %v81_v16 }
  0xdc   :  { %5245 = vmatmul.msk.f32.gmra.mxu1 %vm14249_vm1, %v49_v17 }
  0xe0   :  { %v7271_v18 = vpop.f32.mrf.mxu0 }
  0xe1   :  { %v7273_v19 = vpop.f32.mrf.mxu1 }
  0xe3   :  { %5214 = vmatmul.msk.f32.gmra.mxu0 %vm14250_vm0, %v82_v20  ;;  %v5254_v20 = vmul.f32 -1.442695, %v425_v13 }
  0xe4   :  { %5246 = vmatmul.msk.f32.gmra.mxu1 %vm14249_vm1, %v50_v21  ;;  %v5255_v21 = vmul.f32 -1.442695, %v428_v42  ;;  %v5258_v42 = vmul.f32 -1.442695, %v437_v56 }
  0xe5   :  { %5855 = vpow2.f32 %v5254_v20 }
  0xe6   :  { %5857 = vpow2.f32 %v5255_v21  ;;  %v449_v21 = vadd.f32 %v7273_v19, %v7271_v18 }
  0xe7   :  { %5859 = vrcp.f32 %v7371_v50 }
  0xe8   :  { %v7283_v22 = vpop.f32.mrf.mxu0  ;;  %5861 = vpow2.f32 %v5256_v55 }
  0xe9   :  { %v7285_v23 = vpop.f32.mrf.mxu1 }
  0xea   :  { %v452_v18 = vadd.f32 %v7285_v23, %v7283_v22 }
  0xeb   :  { %5215 = vmatmul.msk.f32.gmra.mxu0 %vm14250_vm0, %v83_v24  ;;  %v5852_v24 = vpop.eup %5851 }
  0xec   :  { %5247 = vmatmul.msk.f32.gmra.mxu1 %vm14249_vm1, %v51_v25  ;;  %v5257_v25 = vmul.f32 -1.442695, %v434_v51  ;;  %v7386_v62 = vadd.f32 1.0, %v5852_v24  ;;  %v564_v24 = vand.u32 2147483647, %v7362_v43 }
  0xee   :  { %5863 = vpow2.f32 %v5257_v25  ;;  %vm7466_vm8 = vcmp.eq.f32.partialorder %v564_v24, 8.507059e+37  ;;  %vm590_vm14 = vweird.f32 %v7386_v62 }
  0xef   :  { %5865 = vrcp.f32 %v7386_v62 }
  0xf0   :  { %v7295_v26 = vpop.f32.mrf.mxu0 }
  0xf1   :  { %v7297_v27 = vpop.f32.mrf.mxu1 }
  0xf3   :  { %5216 = vmatmul.msk.f32.gmra.mxu0 %vm14250_vm0, %v84_v28 }
  0xf4   :  { %5248 = vmatmul.msk.f32.gmra.mxu1 %vm14249_vm1, %v52_v29  ;;  %v7384_v29 = vpop.eup %5853 }
  0xf5   :  { %v5856_v63 = vpop.eup %5855  ;;  %v556_v57 = vmul.f32 %v7384_v29, %v7362_v43  ;;  %vm561_vm7 = vweird.f32 %v7384_v29 }
  0xf6   :  { %v7396_v5 = vadd.f32 1.0, %v5856_v63  ;;  %v455_v63 = vadd.f32 %v7297_v27, %v7295_v26  ;;  %v566_v27 = vand.u32 2147483648, %v7362_v43  ;;  %vm7481_vm9 = vmor %vm560_vm6, %vm561_vm7 }
  0xf7   :  { %v557_v46 = vsub.f32 1.0, %v556_v57 }
  0xf8   :  { %v7307_v30 = vpop.f32.mrf.mxu0  ;;  %5867 = vrcp.f32 %v7396_v5 }
  0xf9   :  { %v7309_v31 = vpop.f32.mrf.mxu1  ;;  %v558_v19 = vmul.f32 %v7384_v29, %v557_v46 }
  0xfa   :  { %v458_v23 = vadd.f32 %v7309_v31, %v7307_v30  ;;  %v5264_v31 = vmul.f32 -1.442695, %v455_v63 }
  0xfb   :  { %5217 = vmatmul.msk.f32.gmra.mxu0 %vm14250_vm0, %v85_v32  ;;  %v542_v32 = vsub.f32 1.0, %v541_v59  ;;  %v5261_v59 = vmul.f32 -1.442695, %v446_v6  ;;  %v559_v8 = vadd.f32 %v7384_v29, %v558_v19 }
  0xfc   :  { %5249 = vmatmul.msk.f32.gmra.mxu1 %vm14249_vm1, %v53_v33  ;;  %v5858_v33 = vpop.eup %5857  ;;  %v5265_v6 = vmul.f32 -1.442695, %v458_v23 }
  0xfd   :  { %v7392_v60 = vpop.eup %5859  ;;  %v7401_v38 = vadd.f32 1.0, %v5858_v33  ;;  %v543_v3 = vmul.f32 %v7375_v54, %v542_v32  ;;  %v5262_v33 = vmul.f32 -1.442695, %v449_v21  ;;  %v567_v21 = vor.u32 1.1754944e-38, %v566_v27 }
  0xfe   :  { %v5862_v4 = vpop.eup %5861  ;;  %v571_v10 = vmul.f32 %v7392_v60, %v7371_v50  ;;  %v563_v24 = vsel %vm7481_vm9, %v7384_v29, %v559_v8  ;;  %vm576_vm10 = vweird.f32 %v7392_v60 }
  0xff   :  { %v5864_v47 = vpop.eup %5863  ;;  %v7411_v20 = vadd.f32 1.0, %v5862_v4  ;;  %5869 = vrcp.f32 %v7401_v38  ;;  %v544_v15 = vadd.f32 %v7375_v54, %v543_v3  ;;  %v5263_v4 = vmul.f32 -1.442695, %v452_v18  ;;  %vm7520_vm13 = vmor %vm575_vm11, %vm576_vm10 }
 0x100   :  { %v7319_v36 = vpop.f32.mrf.mxu0  ;;  %v7425_v55 = vpop.eup %5865  ;;  %v7430_v25 = vadd.f32 1.0, %v5864_v47  ;;  %5871 = vpow2.f32 %v5258_v42  ;;  %v572_v32 = vsub.f32 1.0, %v571_v10  ;;  %v579_v3 = vand.u32 2147483647, %v7371_v50 }
 0x101   :  { %14291 = vst [vmem:[#allocation8_spill] sm:$0xff] %v7319_v36  ;;  %v7321_v37 = vpop.f32.mrf.mxu1  ;;  %5873 = vrcp.f32 %v7411_v20  ;;  %v586_v22 = vmul.f32 %v7425_v55, %v7386_v62  ;;  %v548_v26 = vsel %vm7442_vm5, %v7375_v54, %v544_v15  ;;  %v7459_v1 = vpop.eup %5867  ;;  %v581_v42 = vand.u32 2147483648, %v7371_v50 }
 0x102   :  { %14292 = vst [vmem:[#allocation9_spill] sm:$0xff] %v7321_v37  ;;  %5875 = vpow2.f32 %v5259_v11  ;;  %v573_v34 = vmul.f32 %v7392_v60, %v572_v32  ;;  %v7477_v10 = vsel %vm7421_vm4, %v552_v7, %v548_v26  ;;  %v594_v7 = vand.u32 2147483647, %v7386_v62 }
 0x103   :  { %5877 = vpow2.f32 %v5260_v14  ;;  %v587_v46 = vsub.f32 1.0, %v586_v22  ;;  %14303 = vst [vmem:[#allocation14_spill] sm:$0xff] %v7477_v10  ;;  %v601_v14 = vmul.f32 %v7459_v1, %v7396_v5  ;;  %vm7500_vm12 = vcmp.eq.f32.partialorder %v579_v3, 8.507059e+37 }
 0x104   :  { %5879 = vrcp.f32 %v7430_v25  ;;  %v574_v18 = vadd.f32 %v7392_v60, %v573_v34  ;;  %v582_v29 = vor.u32 1.1754944e-38, %v581_v42  ;;  %v596_v26 = vand.u32 2147483648, %v7386_v62 }
 0x105   :  { %v7464_v30 = vpop.eup %5869  ;;  %5881 = vpow2.f32 %v5261_v59  ;;  %v588_v32 = vmul.f32 %v7425_v55, %v587_v46  ;;  %v602_v27 = vsub.f32 1.0, %v601_v14  ;;  %v7516_v8 = vsel %vm7466_vm8, %v567_v21, %v563_v24 }
 0x106   :  { %v5872_v2 = vpop.eup %5871  ;;  %5883 = vpow2.f32 %v5262_v33  ;;  %v616_v19 = vmul.f32 %v7464_v30, %v7401_v38  ;;  %14308 = vst [vmem:[#allocation15_spill] sm:$0xff] %v7516_v8  ;;  %vm7531_vm15 = vcmp.eq.f32.partialorder %v594_v7, 8.507059e+37  ;;  %vm591_vm2 = vweird.f32 %v7425_v55 }
 0x107   :  { %v7473_v47 = vpop.eup %5873  ;;  %5885 = vpow2.f32 %v5263_v4  ;;  %v7492_v43 = vadd.f32 1.0, %v5872_v2  ;;  %v578_v2 = vsel %vm7520_vm13, %v7392_v60, %v574_v18  ;;  %v597_v60 = vor.u32 1.1754944e-38, %v596_v26  ;;  %vm7556_vm3 = vmor %vm590_vm14, %vm591_vm2 }
 0x108   :  { %v7323_v40 = vpop.f32.mrf.mxu0  ;;  %v5876_v15 = vpop.eup %5875  ;;  %5887 = vpow2.f32 %v5264_v31  ;;  %v631_v34 = vmul.f32 %v7473_v47, %v7411_v20  ;;  %v617_v3 = vsub.f32 1.0, %v616_v19  ;;  %v609_v24 = vand.u32 2147483647, %v7396_v5 }
 0x109   :  { %14293 = vst [vmem:[#allocation10_spill] sm:$0xff] %v7323_v40  ;;  %v7325_v41 = vpop.f32.mrf.mxu1  ;;  %v5878_v51 = vpop.eup %5877  ;;  %v7505_v56 = vadd.f32 1.0, %v5876_v15  ;;  %5889 = vpow2.f32 %v5265_v6  ;;  %v589_v6 = vadd.f32 %v7425_v55, %v588_v32  ;;  %v603_v15 = vmul.f32 %v7459_v1, %v602_v27 }
 0x10a   :  { %14294 = vst [vmem:[#allocation11_spill] sm:$0xff] %v7325_v41  ;;  %v7497_v59 = vpop.eup %5879  ;;  %v7512_v50 = vadd.f32 1.0, %v5878_v51  ;;  %5891 = vrcp.f32 %v7492_v43  ;;  %v611_v7 = vand.u32 2147483648, %v7396_v5  ;;  %v632_v51 = vsub.f32 1.0, %v631_v34 }
 0x10b   :  { %v5882_v33 = vpop.eup %5881  ;;  %v646_v11 = vmul.f32 %v7497_v59, %v7430_v25  ;;  %5893 = vrcp.f32 %v7505_v56  ;;  %v7552_v32 = vsel %vm7500_vm12, %v582_v29, %v578_v2  ;;  %vm605_vm4 = vweird.f32 %v7396_v5 }
 0x10c   :  { %v5884_v4 = vpop.eup %5883  ;;  %v7535_v46 = vadd.f32 1.0, %v5882_v33  ;;  %5895 = vrcp.f32 %v7512_v50  ;;  %14313 = vst [vmem:[#allocation16_spill] sm:$0xff] %v7552_v32  ;;  %v618_v26 = vmul.f32 %v7464_v30, %v617_v3  ;;  %v593_v63 = vsel %vm7556_vm3, %v7425_v55, %v589_v6 }
 0x10d   :  { %v5886_v42 = vpop.eup %5885  ;;  %v7542_v14 = vadd.f32 1.0, %v5884_v4  ;;  %v647_v29 = vsub.f32 1.0, %v646_v11  ;;  %v604_v34 = vadd.f32 %v7459_v1, %v603_v15  ;;  %vm606_vm5 = vweird.f32 %v7459_v1 }
 0x10e   :  { %v5888_v21 = vpop.eup %5887  ;;  %v7548_v19 = vadd.f32 1.0, %v5886_v42  ;;  %5897 = vrcp.f32 %v7535_v46  ;;  %v624_v2 = vand.u32 2147483647, %v7401_v38  ;;  %vm7580_vm6 = vcmp.eq.f32.partialorder %v609_v24, 8.507059e+37  ;;  %vm7601_vm8 = vmor %vm605_vm4, %vm606_vm5 }
 0x10f   :  { %v5890_v18 = vpop.eup %5889  ;;  %v7563_v27 = vadd.f32 1.0, %v5888_v21  ;;  %5899 = vrcp.f32 %v7542_v14  ;;  %v612_v55 = vor.u32 1.1754944e-38, %v611_v7  ;;  %v633_v6 = vmul.f32 %v7473_v47, %v632_v51 }
 0x110   :  { %v7327_v44 = vpop.f32.mrf.mxu0  ;;  %v7568_v4 = vpop.eup %5891  ;;  %v7578_v3 = vadd.f32 1.0, %v5890_v18  ;;  %5901 = vrcp.f32 %v7548_v19  ;;  %v7590_v21 = vsel %vm7531_vm15, %v597_v60, %v593_v63  ;;  %v619_v15 = vadd.f32 %v7464_v30, %v618_v26 }
 0x111   :  { %14295 = vst [vmem:[#allocation12_spill] sm:$0xff] %v7327_v44  ;;  %v7329_v45 = vpop.f32.mrf.mxu1  ;;  %v7585_v11 = vpop.eup %5893  ;;  %vm621_vm7 = vweird.f32 %v7464_v30  ;;  %v693_v24 = vmul.f32 %v7568_v4, %v7492_v43  ;;  %5903 = vrcp.f32 %v7563_v27  ;;  %vm620_vm9 = vweird.f32 %v7401_v38 }
 0x112   :  { %14296 = vst [vmem:[#allocation13_spill] sm:$0xff] %v7329_v45  ;;  %v7594_v18 = vpop.eup %5895  ;;  %v648_v54 = vmul.f32 %v7497_v59, %v647_v29  ;;  %v608_v60 = vsel %vm7601_vm8, %v7459_v1, %v604_v34  ;;  %vm7610_vm10 = vcmp.eq.f32.partialorder %v624_v2, 8.507059e+37  ;;  %v626_v33 = vand.u32 2147483648, %v7401_v38  ;;  %vm7621_vm12 = vmor %vm620_vm9, %vm621_vm7 }
 0x113   :  { %vm635_vm11 = vweird.f32 %v7411_v20  ;;  %v708_v26 = vmul.f32 %v7585_v11, %v7505_v56  ;;  %5905 = vrcp.f32 %v7578_v3  ;;  %v634_v1 = vadd.f32 %v7473_v47, %v633_v6 }
 0x114   :  { %v7616_v5 = vpop.eup %5897  ;;  %vm636_vm13 = vweird.f32 %v7473_v47  ;;  %v723_v38 = vmul.f32 %v7594_v18, %v7512_v50  ;;  %v623_v34 = vsel %vm7621_vm12, %v7464_v30, %v619_v15  ;;  %v639_v2 = vand.u32 2147483647, %v7411_v20 }
 0x115   :  { %v7627_v29 = vpop.eup %5899  ;;  %v641_v7 = vand.u32 2147483648, %v7411_v20  ;;  %v694_v37 = vsub.f32 1.0, %v693_v24  ;;  %v649_v36 = vadd.f32 %v7497_v59, %v648_v54  ;;  %vm651_vm14 = vweird.f32 %v7497_v59  ;;  %vm7651_vm15 = vmor %vm635_vm11, %vm636_vm13 }
 0x116   :  { %v654_v6 = vand.u32 2147483647, %v7430_v25  ;;  %v7639_v10 = vpop.eup %5901  ;;  %v738_v41 = vmul.f32 %v7616_v5, %v7535_v46  ;;  %v7645_v63 = vsel %vm7580_vm6, %v612_v55, %v608_v60  ;;  %v627_v40 = vor.u32 1.1754944e-38, %v626_v33 }
 0x117   :  { %v656_v54 = vand.u32 2147483648, %v7430_v25  ;;  %v7656_v8 = vpop.eup %5903  ;;  %v709_v45 = vsub.f32 1.0, %v708_v26  ;;  %v753_v42 = vmul.f32 %v7627_v29, %v7542_v14  ;;  %v638_v55 = vsel %vm7651_vm15, %v7473_v47, %v634_v1 }
 0x118   :  { %v7331_v48 = vpop.f32.mrf.mxu0  ;;  %vm650_vm2 = vweird.f32 %v7430_v25  ;;  %v724_v60 = vsub.f32 1.0, %v723_v38  ;;  %v628_v20 = vsel %vm7610_vm10, %v627_v40, %v623_v34  ;;  %vm640_vm3 = vcmp.eq.f32.partialorder %v639_v2, 8.507059e+37 }
 0x119   :  { %v7333_v49 = vpop.f32.mrf.mxu1  ;;  %v642_v33 = vor.u32 1.1754944e-38, %v641_v7  ;;  %vm7668_vm4 = vmor %vm650_vm2, %vm651_vm14  ;;  %v7672_v26 = vpop.eup %5905  ;;  %v768_v24 = vmul.f32 %v7639_v10, %v7548_v19  ;;  %vm655_vm5 = vcmp.eq.f32.partialorder %v654_v6, 8.507059e+37  ;;  %v695_v40 = vmul.f32 %v7568_v4, %v694_v37 }
 0x11a   :  { %v653_v25 = vsel %vm7668_vm4, %v7497_v59, %v649_v36  ;;  %v739_v47 = vsub.f32 1.0, %v738_v41  ;;  %v783_v51 = vmul.f32 %v7656_v8, %v7563_v27  ;;  %v657_v38 = vor.u32 1.1754944e-38, %v656_v54 }
 0x11b   :  { %v643_v1 = vsel %vm640_vm3, %v642_v33, %v638_v55  ;;  %v754_v34 = vsub.f32 1.0, %v753_v42  ;;  %v710_v2 = vmul.f32 %v7585_v11, %v709_v45  ;;  %v798_v44 = vmul.f32 %v7672_v26, %v7578_v3 }
 0x11c   :  { %v7687_v36 = vsel %vm655_vm5, %v657_v38, %v653_v25  ;;  %v725_v37 = vmul.f32 %v7594_v18, %v724_v60  ;;  %v769_v59 = vsub.f32 1.0, %v768_v24  ;;  %v7694_v45 = vadd.f32 %v7568_v4, %v695_v40 }
 0x11d   :  { %v784_v42 = vsub.f32 1.0, %v783_v51  ;;  %v778_v32 = vand.u32 2147483648, %v7548_v19  ;;  %v740_v25 = vmul.f32 %v7616_v5, %v739_v47  ;;  %v755_v7 = vmul.f32 %v7627_v29, %v754_v34 }
 0x11e   :  { %14328 = vst [vmem:[#allocation17_spill] sm:$0xff] %v7694_v45  ;;  %v746_v24 = vand.u32 2147483647, %v7535_v46  ;;  %v7702_v41 = vadd.f32 %v7585_v11, %v710_v2  ;;  %v799_v54 = vsub.f32 1.0, %v798_v44  ;;  %v748_v51 = vand.u32 2147483648, %v7535_v46 }
 0x11f   :  { %v7706_v6 = vadd.f32 %v7594_v18, %v725_v37  ;;  %v791_v45 = vand.u32 2147483647, %v7563_v27  ;;  %v770_v47 = vmul.f32 %v7639_v10, %v769_v59  ;;  %v763_v34 = vand.u32 2147483648, %v7542_v14 }
 0x120   :  { %v7335_v52 = vpop.f32.mrf.mxu0  ;;  %v776_v2 = vand.u32 2147483647, %v7548_v19  ;;  %v7714_v38 = vor.u32 1.1754944e-38, %v778_v32  ;;  %vm773_vm6 = vweird.f32 %v7639_v10  ;;  %v7723_v37 = vadd.f32 %v7627_v29, %v755_v7 }
 0x121   :  { %v7337_v53 = vpop.f32.mrf.mxu1  ;;  %vm787_vm7 = vweird.f32 %v7563_v27  ;;  %v793_v32 = vand.u32 2147483648, %v7563_v27  ;;  %vm772_vm8 = vweird.f32 %v7548_v19  ;;  %vm758_vm9 = vweird.f32 %v7627_v29  ;;  %v14354_v19 = vld [vmem:[#allocation8_spill] sm:$0xff] }
 0x122   :  { %vm788_vm10 = vweird.f32 %v7656_v8  ;;  %vm7735_vm11 = vcmp.eq.f32.partialorder %v791_v45, 8.507059e+37  ;;  %vm802_vm12 = vweird.f32 %v7578_v3  ;;  %vm757_vm13 = vweird.f32 %v7542_v14 }
 0x123   :  { %vm743_vm14 = vweird.f32 %v7616_v5  ;;  %vm728_vm15 = vweird.f32 %v7594_v18  ;;  %vm803_vm2 = vweird.f32 %v7672_v26  ;;  %vm742_vm3 = vweird.f32 %v7535_v46  ;;  %vm7768_vm4 = vmor %vm787_vm7, %vm788_vm10  ;;  %v6489_v46 = vld [vmem:[%s14245_s2 + $0x18] sm:$0xff] }
 0x124   :  { %vm727_vm5 = vweird.f32 %v7512_v50  ;;  %vm713_vm1 = vweird.f32 %v7585_v11  ;;  %vm7787_vm7 = vmor %vm802_vm12, %vm803_vm2  ;;  %vm712_vm10 = vweird.f32 %v7505_v56  ;;  %vm698_vm0 = vweird.f32 %v7568_v4 }
 0x125   :  { %vm7809_vm12 = vmor %vm772_vm8, %vm773_vm6  ;;  %vm697_vm2 = vweird.f32 %v7492_v43 }
 0x126   :  { %vm7833_vm8 = vmor %vm757_vm13, %vm758_vm9 }
 0x127   :  { %vm7860_vm13 = vmor %vm742_vm3, %vm743_vm14 }
 0x128   :  { %v7343_v61 = vpop.f32.mrf.mxu0  ;;  %vm7886_vm14 = vmor %vm712_vm10, %vm713_vm1 }
 0x129   :  { %v7345_v0 = vpop.f32.mrf.mxu1  ;;  %vm7904_vm1 = vmor %vm697_vm2, %vm698_vm0 }
 0x12a   :  { %v476_v7 = vadd.f32 %v7345_v0, %v7343_v61  ;;  %v473_v61 = vadd.f32 %v7337_v53, %v7335_v52  ;;  %v470_v53 = vadd.f32 %v7333_v49, %v7331_v48 }
 0x130   :  { %v7349_v9 = vpop.f32.mrf.mxu0 }
 0x131   :  { %v7351_v12 = vpop.f32.mrf.mxu1 }
 0x138   :  { %v7364_v16 = vpop.f32.mrf.mxu0 }
 0x139   :  { %v7366_v17 = vpop.f32.mrf.mxu1 }
 0x140   :  { %v7378_v28 = vpop.f32.mrf.mxu0 }
 0x141   :  { %v7380_v58 = vpop.f32.mrf.mxu1 }
 0x148   :  { %v7406_v39 = vpop.f32.mrf.mxu0 }
 0x149   :  { %v7408_v13 = vpop.f32.mrf.mxu1 }
 0x150   :  { %v7455_v35 = vpop.f32.mrf.mxu0 }
 0x151   :  { %v7457_v57 = vpop.f32.mrf.mxu1 }
 0x158   :  { %v7507_v22 = vpop.f32.mrf.mxu0 }
 0x159   :  { %v7509_v23 = vpop.f32.mrf.mxu1 }
 0x160   :  { %v7571_v62 = vpop.f32.mrf.mxu0 }
 0x161   :  { %v7573_v31 = vpop.f32.mrf.mxu1 }
 0x168   :  { %v289_v30 = vpop.f32.mrf.mxu0 }
 0x169   :  { %v499_v15 = vpop.f32.mrf.mxu1 }
 0x16a   :  { %v500_v40 = vadd.f32 %v499_v15, %v289_v30  ;;  %v7717_v30 = vadd.f32 %v7616_v5, %v740_v25  ;;  %v497_v15 = vadd.f32 %v7573_v31, %v7571_v62  ;;  %v479_v62 = vadd.f32 %v7351_v12, %v7349_v9 }
 0x16b   :  { %v494_v31 = vadd.f32 %v7509_v23, %v7507_v22  ;;  %v808_v9 = vand.u32 2147483648, %v7578_v3  ;;  %v491_v22 = vadd.f32 %v7457_v57, %v7455_v35  ;;  %v488_v35 = vadd.f32 %v7408_v13, %v7406_v39  ;;  %v14333_v13 = vld [vmem:[#allocation16_spill] sm:$0xff] }
 0x16c   :  { %v817_v59 = vmul.f32 %v628_v20, %v500_v40  ;;  %v816_v23 = vmul.f32 %v7645_v63, %v497_v15  ;;  %v482_v40 = vadd.f32 %v7366_v17, %v7364_v16  ;;  %v485_v16 = vadd.f32 %v7380_v58, %v7378_v28 }
 0x16d   :  { %v815_v57 = vmul.f32 %v7590_v21, %v494_v31  ;;  %v806_v17 = vand.u32 2147483647, %v7578_v3  ;;  %v814_v27 = vmul.f32 %v14333_v13, %v491_v22  ;;  %v809_v28 = vor.u32 1.1754944e-38, %v808_v9  ;;  %v14338_v3 = vld [vmem:[#allocation12_spill] sm:$0xff] }
 0x16e   :  { %v825_v0 = vadd.f32 %v817_v59, %v476_v7  ;;  %v824_v21 = vadd.f32 %v816_v23, %v473_v61  ;;  %v794_v58 = vor.u32 1.1754944e-38, %v793_v32  ;;  %v14344_v59 = vld [vmem:[#allocation11_spill] sm:$0xff]  ;;  %v14345_v7 = vand.u32 2147483647, %v7512_v50 }
 0x16f   :  { %v749_v23 = vor.u32 1.1754944e-38, %v748_v51  ;;  %v6483_v51 = vld [vmem:[%s14245_s2] sm:$0xff] }
 0x170   :  { %v292_v55 = vpop.f32.mrf.mxu0  ;;  %vm7824_vm6 = vcmp.eq.f32.partialorder %v14345_v7, 8.507059e+37 }
 0x171   :  { %v502_v33 = vpop.f32.mrf.mxu1 }
 0x172   :  { %v503_v60 = vadd.f32 %v502_v33, %v292_v55  ;;  %v785_v33 = vmul.f32 %v7656_v8, %v784_v42  ;;  %v800_v55 = vmul.f32 %v7672_v26, %v799_v54 }
 0x174   :  { %v818_v44 = vmul.f32 %v643_v1, %v503_v60  ;;  %v7740_v1 = vadd.f32 %v7639_v10, %v770_v47  ;;  %v786_v12 = vadd.f32 %v7656_v8, %v785_v33  ;;  %v801_v60 = vadd.f32 %v7672_v26, %v800_v55  ;;  %v14339_v47 = vld [vmem:[#allocation13_spill] sm:$0xff]  ;;  %v14340_v33 = vld [vmem:[#allocation15_spill] sm:$0xff] }
 0x175   :  { %v467_v55 = vadd.f32 %v14339_v47, %v14338_v3  ;;  %v813_v15 = vmul.f32 %v14340_v33, %v488_v35  ;;  %v14358_v35 = vand.u32 2147483647, %v7542_v14 }
 0x176   :  { %v826_v45 = vadd.f32 %v818_v44, %v479_v62  ;;  %v790_v39 = vsel %vm7768_vm4, %v7656_v8, %v786_v12  ;;  %v805_v49 = vsel %vm7787_vm7, %v7672_v26, %v801_v60  ;;  %vm7798_vm4 = vcmp.eq.f32.partialorder %v746_v24, 8.507059e+37  ;;  %v14343_v24 = vld [vmem:[#allocation10_spill] sm:$0xff]  ;;  %v14368_v8 = vld [vmem:[#allocation17_spill] sm:$0xff] }
 0x177   :  { %v823_v44 = vadd.f32 %v815_v57, %v470_v53  ;;  %v464_v32 = vadd.f32 %v14344_v59, %v14343_v24  ;;  %vm807_vm7 = vcmp.eq.f32.partialorder %v806_v17, 8.507059e+37  ;;  %v795_v62 = vsel %vm7735_vm11, %v794_v58, %v790_v39  ;;  %v6498_v17 = vld [vmem:[%s14244_s1 + $0x38] sm:$0xff] }
 0x178   :  { %v295_v54 = vpop.f32.mrf.mxu0  ;;  %5907 = vtanh.f32 %v826_v45  ;;  %v775_v31 = vsel %vm7809_vm12, %v7639_v10, %v7740_v1  ;;  %v822_v12 = vadd.f32 %v814_v27, %v467_v55  ;;  %v810_v22 = vsel %vm807_vm7, %v809_v28, %v805_v49  ;;  %vm7874_vm7 = vmor %vm727_vm5, %vm728_vm15  ;;  %v6507_v28 = vld [vmem:[%s14245_s2 + $0x60] sm:$0xff] }
 0x179   :  { %v505_v42 = vpop.f32.mrf.mxu1  ;;  %5909 = vtanh.f32 %v825_v0  ;;  %vm777_vm11 = vcmp.eq.f32.partialorder %v776_v2, 8.507059e+37  ;;  %v760_v10 = vsel %vm7833_vm8, %v7627_v29, %v7723_v37  ;;  %v764_v1 = vor.u32 1.1754944e-38, %v763_v34  ;;  %v14355_v2 = vld [vmem:[#allocation9_spill] sm:$0xff] }
 0x17a   :  { %v506_v25 = vadd.f32 %v505_v42, %v295_v54  ;;  %v14348_v42 = vld [vmem:[#allocation14_spill] sm:$0xff]  ;;  %v14351_v45 = vand.u32 2147483647, %v7505_v56  ;;  %v461_v0 = vadd.f32 %v14355_v2, %v14354_v19  ;;  %v821_v60 = vadd.f32 %v813_v15, %v464_v32 }
 0x17b   :  { %v812_v9 = vmul.f32 %v14348_v42, %v485_v16  ;;  %v780_v29 = vsel %vm777_vm11, %v7714_v38, %v775_v31  ;;  %v843_v37 = vsub.f32 1.0, %v810_v22  ;;  %vm762_vm12 = vcmp.eq.f32.partialorder %v14358_v35, 8.507059e+37  ;;  %v6487_v35 = vld [vmem:[%s14245_s2 + $0x10] sm:$0xff] }
 0x17c   :  { %v819_v63 = vmul.f32 %v7687_v36, %v506_v25  ;;  %vm7849_vm9 = vcmp.eq.f32.partialorder %v14351_v45, 8.507059e+37  ;;  %v745_v57 = vsel %vm7860_vm13, %v7616_v5, %v7717_v30  ;;  %v765_v52 = vsel %vm762_vm12, %v764_v1, %v760_v10 }
 0x17d   :  { %v730_v14 = vsel %vm7874_vm7, %v7594_v18, %v7706_v6  ;;  %v859_v16 = vmul.f32 0.0, %v810_v22  ;;  %v841_v30 = vsub.f32 1.0, %v780_v29  ;;  %v750_v13 = vsel %vm7798_vm4, %v749_v23, %v745_v57  ;;  %v6488_v57 = vld [vmem:[%s14244_s1 + $0x10] sm:$0xff] }
 0x17e   :  { %v827_v36 = vadd.f32 %v819_v63, %v482_v40  ;;  %v5908_v61 = vpop.eup %5907  ;;  %v842_v40 = vsub.f32 1.0, %v795_v62  ;;  %v820_v63 = vadd.f32 %v812_v9, %v461_v0  ;;  %v14363_v27 = vand.u32 2147483648, %v7512_v50 }
 0x17f   :  { %v5910_v34 = vpop.eup %5909  ;;  %v715_v6 = vsel %vm7886_vm14, %v7585_v11, %v7702_v41  ;;  %v840_v49 = vsub.f32 1.0, %v765_v52  ;;  %v14367_v11 = vand.u32 2147483648, %v7505_v56  ;;  %v700_v3 = vsel %vm7904_vm1, %v7568_v4, %v14368_v8  ;;  %v6512_v8 = vld [vmem:[%s14244_s1 + $0x70] sm:$0xff] }
 0x180   :  { %5911 = vtanh.f32 %v827_v36  ;;  %v850_v5 = vmul.f32 %v5908_v61, %v842_v40  ;;  %v734_v18 = vor.u32 1.1754944e-38, %v14363_v27  ;;  %v858_v36 = vmul.f32 0.0, %v795_v62  ;;  %v6486_v40 = vld [vmem:[%s14244_s1 + $0x8] sm:$0xff] }
 0x181   :  { %5913 = vtanh.f32 %v824_v21  ;;  %v849_v48 = vmul.f32 %v5910_v34, %v841_v30  ;;  %v719_v41 = vor.u32 1.1754944e-38, %v14367_v11  ;;  %v857_v55 = vmul.f32 0.0, %v780_v29  ;;  %v5267_v29 = vld [vmem:[%s14243_s0 + $0x8] sm:$0xff]  ;;  %v6484_v34 = vld [vmem:[%s14244_s1] sm:$0xff]  ;;  %v6497_v30 = vld [vmem:[%s14245_s2 + $0x38] sm:$0xff] }
 0x182   :  { %5915 = vtanh.f32 %v823_v44  ;;  %v735_v58 = vsel %vm7824_vm6, %v734_v18, %v730_v14  ;;  %v7918_v47 = vadd.f32 %v858_v36, %v850_v5  ;;  %v839_v15 = vsub.f32 1.0, %v750_v13  ;;  %v6493_v14 = vld [vmem:[%s14245_s2 + $0x28] sm:$0xff]  ;;  %v6496_v5 = vld [vmem:[%s14244_s1 + $0x30] sm:$0xff] }
 0x183   :  { %5917 = vtanh.f32 %v822_v12  ;;  %v720_v26 = vsel %vm7849_vm9, %v719_v41, %v715_v6  ;;  %v14370_v56 = vand.u32 2147483647, %v7492_v43  ;;  %v14371_v24 = vand.u32 2147483648, %v7492_v43  ;;  %v6501_v27 = vld [vmem:[%s14245_s2 + $0x48] sm:$0xff]  ;;  %v6503_v6 = vld [vmem:[%s14245_s2 + $0x50] sm:$0xff] }
 0x184   :  { %5919 = vtanh.f32 %v821_v60  ;;  %14369 = vst [vmem:[#allocation12_spill] sm:$0xff] %v7918_v47  ;;  %v7928_v4 = vadd.f32 %v857_v55, %v849_v48  ;;  %v856_v32 = vmul.f32 0.0, %v765_v52  ;;  %v838_v31 = vsub.f32 1.0, %v735_v58  ;;  %v86_v60 = vld [vmem:[%s14246_s3] sm:$0x3]  ;;  %v6502_v18 = vld [vmem:[%s14244_s1 + $0x48] sm:$0xff] }
 0x185   :  { %5921 = vtanh.f32 %v820_v63  ;;  %vm702_vm0 = vcmp.eq.f32.partialorder %v14370_v56, 8.507059e+37  ;;  %v704_v59 = vor.u32 1.1754944e-38, %v14371_v24  ;;  %v855_v9 = vmul.f32 0.0, %v750_v13  ;;  %v6491_v63 = vld [vmem:[%s14245_s2 + $0x20] sm:$0xff]  ;;  %v6504_v36 = vld [vmem:[%s14244_s1 + $0x50] sm:$0xff]  ;;  %v6505_v48 = vld [vmem:[%s14245_s2 + $0x58] sm:$0xff] }
 0x186   :  { %v5912_v38 = vpop.eup %5911  ;;  %14372 = vst [vmem:[#allocation13_spill] sm:$0xff] %v7928_v4  ;;  %v837_v12 = vsub.f32 1.0, %v720_v26  ;;  %v854_v10 = vmul.f32 0.0, %v735_v58  ;;  %v853_v25 = vmul.f32 0.0, %v720_v26  ;;  %vm14378_vm15 = vcmask 523264   ;;  %v6492_v52 = vld [vmem:[%s14244_s1 + $0x20] sm:$0xff] }
 0x187   :  { %v851_v53 = vmul.f32 %v5912_v38, %v843_v37  ;;  %v5914_v39 = vpop.eup %5913  ;;  %v705_v54 = vsel %vm702_vm0, %v704_v59, %v700_v3  ;;  %vm14379_vm3 = vmmov %vm14378_vm15  ;;  %vm14380_vm5 = vcmask 64512   ;;  %v6485_v37 = vld [vmem:[%s14245_s2 + $0x8] sm:$0xff]  ;;  %v6490_v38 = vld [vmem:[%s14244_s1 + $0x18] sm:$0xff] }
 0x188   :  { %v5916_v50 = vpop.eup %5915  ;;  %v848_v33 = vmul.f32 %v5914_v39, %v840_v49  ;;  %v836_v23 = vsub.f32 1.0, %v705_v54  ;;  %v852_v2 = vmul.f32 0.0, %v705_v54  ;;  %vm14381_vm10 = vmmov %vm14379_vm3  ;;  %v6499_v39 = vld [vmem:[%s14245_s2 + $0x40] sm:$0xff]  ;;  %v6506_v49 = vld [vmem:[%s14244_s1 + $0x58] sm:$0xff] }
 0x189   :  { %v7898_v21 = vadd.f32 %v859_v16, %v851_v53  ;;  %v5918_v44 = vpop.eup %5917  ;;  %v847_v62 = vmul.f32 %v5916_v50, %v839_v15  ;;  %vm14382_vm4 = vmmov %vm14380_vm5  ;;  %v6494_v53 = vld [vmem:[%s14244_s1 + $0x28] sm:$0xff]  ;;  %v6495_v16 = vld [vmem:[%s14245_s2 + $0x30] sm:$0xff] }
 0x18a   :  { %v5920_v7 = vpop.eup %5919  ;;  %v7932_v42 = vadd.f32 %v856_v32, %v848_v33  ;;  %v846_v43 = vmul.f32 %v5918_v44, %v838_v31  ;;  %vm14383_vm2 = vmmov %vm14379_vm3  ;;  %v6500_v13 = vld [vmem:[%s14244_s1 + $0x40] sm:$0xff]  ;;  %v6509_v58 = vld [vmem:[%s14245_s2 + $0x68] sm:$0xff] }
 0x18b   :  { %14364 = vst [vmem:[#allocation16_spill] sm:$0xff] %v7898_v21  ;;  %879 = vmatpush.msra.mxu2 %v7898_v21  ;;  %903 = vmatpush.msra.mxu3 %v7898_v21  ;;  %v5922_v22 = vpop.eup %5921  ;;  %v7936_v20 = vadd.f32 %v855_v9, %v847_v62  ;;  %v845_v1 = vmul.f32 %v5920_v7, %v837_v12  ;;  %vm14384_vm6 = vmmov %vm14382_vm4  ;;  %v6508_v50 = vld [vmem:[%s14244_s1 + $0x60] sm:$0xff]  ;;  %v6510_v11 = vld [vmem:[%s14244_s1 + $0x68] sm:$0xff] }
 0x18c   :  { %14373 = vst [vmem:[#allocation15_spill] sm:$0xff] %v7932_v42  ;;  %v7940_v45 = vadd.f32 %v854_v10, %v846_v43  ;;  %v844_v61 = vmul.f32 %v5922_v22, %v836_v23  ;;  %vm14385_vm8 = vmmov %vm14383_vm2  ;;  %v6511_v41 = vld [vmem:[%s14245_s2 + $0x70] sm:$0xff]  ;;  %v6513_v3 = vld [vmem:[%s14245_s2 + $0x78] sm:$0xff] }
 0x18d   :  { %880 = vmatpush.msra.mxu2 %v7918_v47  ;;  %904 = vmatpush.msra.mxu3 %v7918_v47  ;;  %14374 = vst [vmem:[#allocation10_spill] sm:$0xff] %v7936_v20  ;;  %v7944_v19 = vadd.f32 %v853_v25, %v845_v1  ;;  %vm14386_vm11 = vmmov %vm14382_vm4  ;;  %v6514_v55 = vld [vmem:[%s14244_s1 + $0x78] sm:$0xff]  ;;  %v6515_v33 = vld [vmem:[%s14245_s2 + $0x80] sm:$0xff] }
 0x18e   :  { %14375 = vst [vmem:[#allocation11_spill] sm:$0xff] %v7940_v45  ;;  %v7948_v0 = vadd.f32 %v852_v2, %v844_v61  ;;  %vm14387_vm9 = vmmov %vm14383_vm2  ;;  %v6516_v26 = vld [vmem:[%s14244_s1 + $0x80] sm:$0xff]  ;;  %v6517_v56 = vld [vmem:[%s14245_s2 + $0x88] sm:$0xff] }
 0x18f   :  { %881 = vmatpush.msra.mxu2 %v7928_v4  ;;  %905 = vmatpush.msra.mxu3 %v7928_v4  ;;  %14376 = vst [vmem:[#allocation14_spill] sm:$0xff] %v7944_v19  ;;  %vm14388_vm13 = vmmov %vm14382_vm4  ;;  %v6518_v62 = vld [vmem:[%s14244_s1 + $0x88] sm:$0xff]  ;;  %v6519_v31 = vld [vmem:[%s14245_s2 + $0x90] sm:$0xff] }
 0x190   :  { %14377 = vst [vmem:[#allocation8_spill] sm:$0xff] %v7948_v0  ;;  %vm14389_vm12 = vmmov %vm14383_vm2  ;;  %v6520_v43 = vld [vmem:[%s14244_s1 + $0x90] sm:$0xff]  ;;  %v6521_v12 = vld [vmem:[%s14245_s2 + $0x98] sm:$0xff] }
 0x191   :  { %882 = vmatpush.msra.mxu2 %v7932_v42  ;;  %906 = vmatpush.msra.mxu3 %v7932_v42  ;;  %vm14390_vm7 = vmmov %vm14382_vm4  ;;  %v6522_v23 = vld [vmem:[%s14244_s1 + $0x98] sm:$0xff]  ;;  %v6523_v25 = vld [vmem:[%s14245_s2 + $0xa0] sm:$0xff] }
 0x192   :  { %vm14391_vm14 = vmmov %vm14383_vm2 }
 0x193   :  { %883 = vmatpush.msra.mxu2 %v7936_v20  ;;  %907 = vmatpush.msra.mxu3 %v7936_v20  ;;  %vm14392_vm1 = vmmov %vm14382_vm4 }
 0x194   :  { %vm14393_vm0 = vmmov %vm14383_vm2 }
 0x195   :  { %884 = vmatpush.msra.mxu2 %v7940_v45  ;;  %908 = vmatpush.msra.mxu3 %v7940_v45 }
 0x197   :  { %885 = vmatpush.msra.mxu2 %v7944_v19  ;;  %909 = vmatpush.msra.mxu3 %v7944_v19 }
 0x199   :  { %886 = vmatpush.msra.mxu2 %v7948_v0  ;;  %910 = vmatpush.msra.mxu3 %v7948_v0 }
 0x19a   :  { %5266 = vmatmul.msk.f32.vlgmr.msra.gmra.mxu2 %vm14378_vm15, %v86_v60  ;;  %5268 = vmatmul.msk.f32.vlgmr.msra.gmra.mxu3 %vm14379_vm3, %v6483_v51  ;;  %vm14394_vm15 = vmmov %vm14392_vm1  ;;  %v6525_v51 = vld [vmem:[%s14245_s2 + $0xa8] sm:$0xff] }
 0x19b   :  { %1023 = vmatpush.msrb.mxu2 %v5267_v29  ;;  %vm14395_vm3 = vmmov %vm14393_vm0  ;;  %v6524_v29 = vld [vmem:[%s14244_s1 + $0xa0] sm:$0xff] }
 0x1a2   :  { %5300 = vmatmul.msk.f32.vlgmr.msrb.gmra.mxu2 %vm14380_vm5, %v6484_v34  ;;  %5269 = vmatmul.msk.f32.gmra.mxu3 %vm14381_vm10, %v6485_v37  ;;  %vm14396_vm5 = vmmov %vm14392_vm1 }
 0x1a3   :  { %vm14397_vm10 = vmmov %vm14393_vm0 }
 0x1aa   :  { %5301 = vmatmul.msk.f32.gmra.mxu2 %vm14382_vm4, %v6486_v40  ;;  %5270 = vmatmul.msk.f32.gmra.mxu3 %vm14383_vm2, %v6487_v35  ;;  %vm14398_vm4 = vmmov %vm14392_vm1  ;;  %v6526_v35 = vld [vmem:[%s14244_s1 + $0xa8] sm:$0xff] }
 0x1ab   :  { %vm14399_vm2 = vmmov %vm14393_vm0 }
 0x1b2   :  { %5302 = vmatmul.msk.f32.gmra.mxu2 %vm14384_vm6, %v6488_v57  ;;  %5271 = vmatmul.msk.f32.gmra.mxu3 %vm14385_vm8, %v6489_v46  ;;  %vm14400_vm6 = vmmov %vm14392_vm1  ;;  %v6527_v57 = vld [vmem:[%s14245_s2 + $0xb0] sm:$0xff] }
 0x1b3   :  { %vm14401_vm8 = vmmov %vm14393_vm0 }
 0x1ba   :  { %5303 = vmatmul.msk.f32.gmra.mxu2 %vm14386_vm11, %v6490_v38  ;;  %5272 = vmatmul.msk.f32.gmra.mxu3 %vm14387_vm9, %v6491_v63  ;;  %vm14402_vm11 = vmmov %vm14392_vm1 }
 0x1bb   :  { %vm14403_vm9 = vmmov %vm14393_vm0 }
 0x1c2   :  { %5304 = vmatmul.msk.f32.gmra.mxu2 %vm14388_vm13, %v6492_v52  ;;  %5273 = vmatmul.msk.f32.gmra.mxu3 %vm14389_vm12, %v6493_v14  ;;  %vm14404_vm13 = vmmov %vm14392_vm1  ;;  %v6528_v52 = vld [vmem:[%s14244_s1 + $0xb0] sm:$0xff]  ;;  %v6529_v14 = vld [vmem:[%s14245_s2 + $0xb8] sm:$0xff] }
 0x1c3   :  { %vm14405_vm12 = vmmov %vm14393_vm0 }
 0x1ca   :  { %5305 = vmatmul.msk.f32.gmra.mxu2 %vm14390_vm7, %v6494_v53  ;;  %5274 = vmatmul.msk.f32.gmra.mxu3 %vm14391_vm14, %v6495_v16  ;;  %vm14406_vm7 = vmmov %vm14392_vm1 }
 0x1cb   :  { %vm14407_vm14 = vmmov %vm14393_vm0 }
 0x1d2   :  { %5306 = vmatmul.msk.f32.gmra.mxu2 %vm14392_vm1, %v6496_v5  ;;  %5275 = vmatmul.msk.f32.gmra.mxu3 %vm14393_vm0, %v6497_v30  ;;  %v6530_v30 = vld [vmem:[%s14244_s1 + $0xb8] sm:$0xff] }
 0x1da   :  { %5307 = vmatmul.msk.f32.gmra.mxu2 %vm14394_vm15, %v6498_v17  ;;  %5276 = vmatmul.msk.f32.gmra.mxu3 %vm14395_vm3, %v6499_v39  ;;  %vm14408_vm15 = vmmov %vm14392_vm1  ;;  %v6531_v17 = vld [vmem:[%s14245_s2 + $0xc0] sm:$0xff] }
 0x1db   :  { %vm14409_vm3 = vmmov %vm14393_vm0 }
 0x1e2   :  { %5308 = vmatmul.msk.f32.gmra.mxu2 %vm14396_vm5, %v6500_v13  ;;  %5277 = vmatmul.msk.f32.gmra.mxu3 %vm14397_vm10, %v6501_v27  ;;  %vm14410_vm5 = vmmov %vm14392_vm1 }
 0x1e3   :  { %vm14411_vm10 = vmmov %vm14393_vm0 }
 0x1ea   :  { %5309 = vmatmul.msk.f32.gmra.mxu2 %vm14398_vm4, %v6502_v18  ;;  %5278 = vmatmul.msk.f32.gmra.mxu3 %vm14399_vm2, %v6503_v6  ;;  %vm14412_vm4 = vmmov %vm14392_vm1  ;;  %v6532_v18 = vld [vmem:[%s14244_s1 + $0xc0] sm:$0xff]  ;;  %v6533_v6 = vld [vmem:[%s14245_s2 + $0xc8] sm:$0xff] }
 0x1eb   :  { %vm14413_vm2 = vmmov %vm14393_vm0 }
 0x1f2   :  { %5310 = vmatmul.msk.f32.gmra.mxu2 %vm14400_vm6, %v6504_v36  ;;  %5279 = vmatmul.msk.f32.gmra.mxu3 %vm14401_vm8, %v6505_v48  ;;  %vm14414_vm6 = vmmov %vm14392_vm1 }
 0x1f3   :  { %vm14415_vm8 = vmmov %vm14393_vm0 }
 0x1fa   :  { %5311 = vmatmul.msk.f32.gmra.mxu2 %vm14402_vm11, %v6506_v49  ;;  %5280 = vmatmul.msk.f32.gmra.mxu3 %vm14403_vm9, %v6507_v28  ;;  %vm14416_vm11 = vmmov %vm14392_vm1  ;;  %v6534_v49 = vld [vmem:[%s14244_s1 + $0xc8] sm:$0xff]  ;;  %v6535_v28 = vld [vmem:[%s14245_s2 + $0xd0] sm:$0xff] }
 0x1fb   :  { %vm14417_vm9 = vmmov %vm14393_vm0 }
 0x202   :  { %5312 = vmatmul.msk.f32.gmra.mxu2 %vm14404_vm13, %v6508_v50  ;;  %5281 = vmatmul.msk.f32.gmra.mxu3 %vm14405_vm12, %v6509_v58  ;;  %vm14418_vm13 = vmmov %vm14392_vm1 }
 0x203   :  { %vm14419_vm12 = vmmov %vm14393_vm0 }
 0x20a   :  { %5313 = vmatmul.msk.f32.gmra.mxu2 %vm14406_vm7, %v6510_v11  ;;  %5282 = vmatmul.msk.f32.gmra.mxu3 %vm14407_vm14, %v6511_v41  ;;  %vm14420_vm7 = vmmov %vm14392_vm1  ;;  %v6536_v11 = vld [vmem:[%s14244_s1 + $0xd0] sm:$0xff]  ;;  %v6537_v41 = vld [vmem:[%s14245_s2 + $0xd8] sm:$0xff] }
 0x20b   :  { %vm14421_vm14 = vmmov %vm14393_vm0 }
 0x212   :  { %5314 = vmatmul.msk.f32.gmra.mxu2 %vm14392_vm1, %v6512_v8  ;;  %5283 = vmatmul.msk.f32.gmra.mxu3 %vm14393_vm0, %v6513_v3 }
 0x21a   :  { %5315 = vmatmul.msk.f32.gmra.mxu2 %vm14408_vm15, %v6514_v55  ;;  %5284 = vmatmul.msk.f32.gmra.mxu3 %vm14409_vm3, %v6515_v33  ;;  %vm14422_vm15 = vmmov %vm14392_vm1  ;;  %v6538_v55 = vld [vmem:[%s14244_s1 + $0xd8] sm:$0xff]  ;;  %v6539_v33 = vld [vmem:[%s14245_s2 + $0xe0] sm:$0xff] }
 0x21b   :  { %vm14423_vm3 = vmmov %vm14393_vm0 }
 0x21d   :  { %v888_v15 = vpop.f32.mrf.mxu2  ;;  %v912_v44 = vpop.f32.mrf.mxu3 }
 0x21e   :  { %891 = vst [vmem:[#allocation2] sm:$0x1] %v888_v15 }
 0x21f   :  { %892 = vst [vmem:[#allocation3 + $0x6] sm:$0x2] %v888_v15 }
 0x222   :  { %5316 = vmatmul.msk.f32.gmra.mxu2 %vm14410_vm5, %v6516_v26  ;;  %5285 = vmatmul.msk.f32.gmra.mxu3 %vm14411_vm10, %v6517_v56  ;;  %vm14424_vm5 = vmmov %vm14392_vm1  ;;  %v6540_v26 = vld [vmem:[%s14244_s1 + $0xe0] sm:$0xff]  ;;  %v6541_v56 = vld [vmem:[%s14245_s2 + $0xe8] sm:$0xff] }
 0x223   :  { %vm14425_vm10 = vmmov %vm14393_vm0 }
 0x225   :  { %v1025_v24 = vpop.f32.mrf.mxu2  ;;  %v915_v59 = vpop.f32.mrf.mxu3 }
 0x226   :  { %v8099_v32 = vadd.f32 %v1025_v24, %v912_v44 }
 0x22a   :  { %5317 = vmatmul.msk.f32.gmra.mxu2 %vm14412_vm4, %v6518_v62  ;;  %5286 = vmatmul.msk.f32.gmra.mxu3 %vm14413_vm2, %v6519_v31  ;;  %vm14426_vm4 = vmmov %vm14392_vm1  ;;  %v6542_v62 = vld [vmem:[%s14244_s1 + $0xe8] sm:$0xff]  ;;  %v6543_v31 = vld [vmem:[%s14245_s2 + $0xf0] sm:$0xff] }
 0x22b   :  { %vm14427_vm2 = vmmov %vm14393_vm0 }
 0x22d   :  { %v1028_v7 = vpop.f32.mrf.mxu2  ;;  %v918_v54 = vpop.f32.mrf.mxu3 }
 0x22e   :  { %v8109_v9 = vadd.f32 %v1028_v7, %v915_v59 }
 0x232   :  { %5318 = vmatmul.msk.f32.gmra.mxu2 %vm14414_vm6, %v6520_v43  ;;  %5287 = vmatmul.msk.f32.gmra.mxu3 %vm14415_vm8, %v6521_v12  ;;  %vm14428_vm6 = vmmov %vm14392_vm1  ;;  %v6544_v43 = vld [vmem:[%s14244_s1 + $0xf0] sm:$0xff]  ;;  %v6545_v12 = vld [vmem:[%s14245_s2 + $0xf8] sm:$0xff] }
 0x233   :  { %vm14429_vm8 = vmmov %vm14393_vm0 }
 0x235   :  { %v1031_v22 = vpop.f32.mrf.mxu2  ;;  %v921_v10 = vpop.f32.mrf.mxu3 }
 0x236   :  { %v8119_v1 = vadd.f32 %v1031_v22, %v918_v54 }
 0x23a   :  { %5319 = vmatmul.msk.f32.gmra.mxu2 %vm14416_vm11, %v6522_v23  ;;  %5288 = vmatmul.msk.f32.gmra.mxu3 %vm14417_vm9, %v6523_v25  ;;  %vm14430_vm11 = vmmov %vm14392_vm1  ;;  %v6546_v23 = vld [vmem:[%s14244_s1 + $0xf8] sm:$0xff] }
 0x23b   :  { %vm14431_vm9 = vmmov %vm14393_vm0 }
 0x23d   :  { %v1034_v61 = vpop.f32.mrf.mxu2  ;;  %v924_v2 = vpop.f32.mrf.mxu3 }
 0x23e   :  { %v8129_v60 = vadd.f32 %v1034_v61, %v921_v10 }
 0x242   :  { %5320 = vmatmul.msk.f32.gmra.mxu2 %vm14418_vm13, %v6524_v29  ;;  %5289 = vmatmul.msk.f32.gmra.mxu3 %vm14419_vm12, %v6525_v51  ;;  %vm14432_vm13 = vmmov %vm14392_vm1 }
 0x243   :  { %vm14433_vm12 = vmmov %vm14393_vm0 }
 0x245   :  { %v1037_v34 = vpop.f32.mrf.mxu2  ;;  %v927_v37 = vpop.f32.mrf.mxu3 }
 0x246   :  { %v8139_v40 = vadd.f32 %v1037_v34, %v924_v2 }
 0x24a   :  { %5321 = vmatmul.msk.f32.gmra.mxu2 %vm14420_vm7, %v6526_v35  ;;  %5290 = vmatmul.msk.f32.gmra.mxu3 %vm14421_vm14, %v6527_v57  ;;  %vm14434_vm7 = vmmov %vm14392_vm1 }
 0x24b   :  { %vm14435_vm14 = vmmov %vm14393_vm0 }
 0x24d   :  { %v1040_v46 = vpop.f32.mrf.mxu2  ;;  %v930_v38 = vpop.f32.mrf.mxu3 }
 0x24e   :  { %v8149_v63 = vadd.f32 %v1040_v46, %v927_v37 }
 0x252   :  { %5322 = vmatmul.msk.f32.gmra.mxu2 %vm14392_vm1, %v6528_v52  ;;  %5291 = vmatmul.msk.f32.gmra.mxu3 %vm14393_vm0, %v6529_v14  ;;  %v5332_v14 = vmul.f32 -1.442695, %v8099_v32  ;;  %v5335_v32 = vmul.f32 -1.442695, %v8129_v60 }
 0x254   :  { %5923 = vpow2.f32 %v5332_v14 }
 0x255   :  { %v1043_v53 = vpop.f32.mrf.mxu2  ;;  %v933_v16 = vpop.f32.mrf.mxu3 }
 0x256   :  { %v8159_v5 = vadd.f32 %v1043_v53, %v930_v38 }
 0x258   :  { %v5338_v60 = vmul.f32 -1.442695, %v8159_v5 }
 0x25a   :  { %5323 = vmatmul.msk.f32.gmra.mxu2 %vm14422_vm15, %v6530_v30  ;;  %5292 = vmatmul.msk.f32.gmra.mxu3 %vm14423_vm3, %v6531_v17  ;;  %vm14436_vm15 = vmmov %vm14392_vm1  ;;  %v5333_v30 = vmul.f32 -1.442695, %v8109_v9  ;;  %v5334_v17 = vmul.f32 -1.442695, %v8119_v1 }
 0x25c   :  { %5925 = vpow2.f32 %v5333_v30 }
 0x25d   :  { %v1046_v39 = vpop.f32.mrf.mxu2  ;;  %v8169_v13 = vpop.f32.mrf.mxu3  ;;  %5927 = vpow2.f32 %v5334_v17 }
 0x25e   :  { %v8171_v27 = vadd.f32 %v1046_v39, %v933_v16  ;;  %v5924_v39 = vpop.eup %5923 }
 0x262   :  { %5324 = vmatmul.msk.f32.gmra.mxu2 %vm14424_vm5, %v6532_v18  ;;  %5293 = vmatmul.msk.f32.gmra.mxu3 %vm14425_vm10, %v6533_v6 }
 0x265   :  { %v8181_v36 = vpop.f32.mrf.mxu2  ;;  %v8183_v48 = vpop.f32.mrf.mxu3 }
 0x266   :  { %v1050_v17 = vadd.f32 %v8181_v36, %v8169_v13 }
 0x26a   :  { %5325 = vmatmul.msk.f32.gmra.mxu2 %vm14426_vm4, %v6534_v49  ;;  %5294 = vmatmul.msk.f32.gmra.mxu3 %vm14427_vm2, %v6535_v28  ;;  %v8296_v49 = vadd.f32 1.0, %v5924_v39  ;;  %v5926_v28 = vpop.eup %5925 }
 0x26b   :  { %v5928_v1 = vpop.eup %5927 }
 0x26c   :  { %5929 = vrcp.f32 %v8296_v49  ;;  %vm1158_vm3 = vweird.f32 %v8296_v49 }
 0x26d   :  { %v8193_v50 = vpop.f32.mrf.mxu2  ;;  %v8195_v58 = vpop.f32.mrf.mxu3  ;;  %5931 = vpow2.f32 %v5335_v32 }
 0x272   :  { %5326 = vmatmul.msk.f32.gmra.mxu2 %vm14428_vm6, %v6536_v11  ;;  %5295 = vmatmul.msk.f32.gmra.mxu3 %vm14429_vm8, %v6537_v41  ;;  %v8300_v11 = vadd.f32 1.0, %v5926_v28  ;;  %v1164_v28 = vand.u32 2147483648, %v8296_v49 }
 0x274   :  { %5933 = vrcp.f32 %v8300_v11  ;;  %vm1173_vm2 = vweird.f32 %v8300_v11 }
 0x275   :  { %v8205_v8 = vpop.f32.mrf.mxu2  ;;  %v8207_v3 = vpop.f32.mrf.mxu3 }
 0x276   :  { %v1056_v13 = vadd.f32 %v8205_v8, %v8195_v58 }
 0x27a   :  { %5327 = vmatmul.msk.f32.gmra.mxu2 %vm14430_vm11, %v6538_v55  ;;  %5296 = vmatmul.msk.f32.gmra.mxu3 %vm14431_vm9, %v6539_v33  ;;  %v5336_v55 = vmul.f32 -1.442695, %v8139_v40  ;;  %v5337_v33 = vmul.f32 -1.442695, %v8149_v63 }
 0x27c   :  { %5935 = vpow2.f32 %v5336_v55  ;;  %v1053_v55 = vadd.f32 %v8193_v50, %v8183_v48  ;;  %v1165_v50 = vor.u32 1.1754944e-38, %v1164_v28 }
 0x27d   :  { %v8217_v15 = vpop.f32.mrf.mxu2  ;;  %v8219_v44 = vpop.f32.mrf.mxu3  ;;  %5937 = vpow2.f32 %v5337_v33  ;;  %v1162_v33 = vand.u32 2147483647, %v8296_v49 }
 0x27e   :  { %v1059_v48 = vadd.f32 %v8217_v15, %v8207_v3  ;;  %v5341_v8 = vmul.f32 -1.442695, %v1053_v55  ;;  %v5342_v3 = vmul.f32 -1.442695, %v1056_v13 }
 0x27f   :  { %vm8359_vm10 = vcmp.eq.f32.partialorder %v1162_v33, 8.507059e+37 }
 0x282   :  { %5328 = vmatmul.msk.f32.gmra.mxu2 %vm14432_vm13, %v6540_v26  ;;  %5297 = vmatmul.msk.f32.gmra.mxu3 %vm14433_vm12, %v6541_v56  ;;  %v8309_v26 = vadd.f32 1.0, %v5928_v1  ;;  %v8311_v56 = vpop.eup %5929 }
 0x283   :  { %v1154_v40 = vmul.f32 %v8311_v56, %v8296_v49  ;;  %vm1159_vm5 = vweird.f32 %v8311_v56 }
 0x284   :  { %5939 = vrcp.f32 %v8309_v26  ;;  %vm8380_vm4 = vmor %vm1158_vm3, %vm1159_vm5  ;;  %vm1188_vm13 = vweird.f32 %v8309_v26 }
 0x285   :  { %v8229_v24 = vpop.f32.mrf.mxu2  ;;  %v8231_v59 = vpop.f32.mrf.mxu3  ;;  %5941 = vpow2.f32 %v5338_v60  ;;  %v1155_v14 = vsub.f32 1.0, %v1154_v40  ;;  %v5340_v40 = vmul.f32 -1.442695, %v1050_v17 }
 0x287   :  { %v1156_v36 = vmul.f32 %v8311_v56, %v1155_v14  ;;  %v1062_v14 = vadd.f32 %v8229_v24, %v8219_v44 }
 0x289   :  { %v1157_v15 = vadd.f32 %v8311_v56, %v1156_v36  ;;  %v5344_v13 = vmul.f32 -1.442695, %v1062_v14  ;;  %v1192_v14 = vand.u32 2147483647, %v8309_v26 }
 0x28a   :  { %5329 = vmatmul.msk.f32.gmra.mxu2 %vm14434_vm7, %v6542_v62  ;;  %5298 = vmatmul.msk.f32.gmra.mxu3 %vm14435_vm14, %v6543_v31  ;;  %v5932_v62 = vpop.eup %5931  ;;  %v5339_v31 = vmul.f32 -1.442695, %v8171_v27 }
 0x28b   :  { %vm8438_vm12 = vcmp.eq.f32.partialorder %v1192_v14, 8.507059e+37 }
 0x28c   :  { %5943 = vpow2.f32 %v5339_v31 }
 0x28d   :  { %v8241_v7 = vpop.f32.mrf.mxu2  ;;  %v8243_v54 = vpop.f32.mrf.mxu3 }
 0x28e   :  { %v1065_v44 = vadd.f32 %v8241_v7, %v8231_v59 }
 0x292   :  { %5330 = vmatmul.msk.f32.gmra.mxu2 %vm14392_vm1, %v6544_v43  ;;  %5299 = vmatmul.msk.f32.gmra.mxu3 %vm14393_vm0, %v6545_v12  ;;  %v8322_v12 = vpop.eup %5933 }
 0x293   :  { %v5936_v5 = vpop.eup %5935  ;;  %v1169_v27 = vmul.f32 %v8322_v12, %v8300_v11  ;;  %vm1174_vm6 = vweird.f32 %v8322_v12 }
 0x294   :  { %v5938_v30 = vpop.eup %5937  ;;  %v8334_v1 = vadd.f32 1.0, %v5936_v5  ;;  %vm8419_vm11 = vmor %vm1173_vm2, %vm1174_vm6 }
 0x295   :  { %v8253_v22 = vpop.f32.mrf.mxu2  ;;  %v8255_v10 = vpop.f32.mrf.mxu3  ;;  %v8339_v60 = vadd.f32 1.0, %v5938_v30  ;;  %v1170_v5 = vsub.f32 1.0, %v1169_v27  ;;  %v1177_v27 = vand.u32 2147483647, %v8300_v11 }
 0x296   :  { %v8330_v39 = vpop.eup %5939  ;;  %v1068_v55 = vadd.f32 %v8253_v22, %v8243_v54  ;;  %v1161_v54 = vsel %vm8380_vm4, %v8311_v56, %v1157_v15  ;;  %v1179_v22 = vand.u32 2147483648, %v8300_v11  ;;  %vm1218_vm3 = vweird.f32 %v8334_v1 }
 0x297   :  { %v5942_v32 = vpop.eup %5941  ;;  %v1184_v58 = vmul.f32 %v8330_v39, %v8309_v26  ;;  %v1171_v24 = vmul.f32 %v8322_v12, %v1170_v5  ;;  %v5345_v5 = vmul.f32 -1.442695, %v1065_v44  ;;  %vm8404_vm8 = vcmp.eq.f32.partialorder %v1177_v27, 8.507059e+37 }
 0x298   :  { %v5944_v0 = vpop.eup %5943  ;;  %v8349_v19 = vadd.f32 1.0, %v5942_v32  ;;  %v5343_v32 = vmul.f32 -1.442695, %v1059_v48  ;;  %vm1189_vm9 = vweird.f32 %v8330_v39  ;;  %vm1233_vm6 = vweird.f32 %v8339_v60 }
 0x299   :  { %v8368_v28 = vadd.f32 1.0, %v5944_v0  ;;  %v1185_v33 = vsub.f32 1.0, %v1184_v58  ;;  %v1172_v48 = vadd.f32 %v8322_v12, %v1171_v24  ;;  %vm8458_vm7 = vmor %vm1188_vm13, %vm1189_vm9 }
 0x29a   :  { %5331 = vmatmul.msk.f32.gmra.mxu2 %vm14436_vm15, %v6546_v23  ;;  %v8324_v23 = vadd.f32 1.0, %v5932_v62  ;;  %v1252_v56 = vand.u32 2147483647, %v8349_v19 }
 0x29b   :  { %v1186_v58 = vmul.f32 %v8330_v39, %v1185_v33  ;;  %v1176_v0 = vsel %vm8419_vm11, %v8322_v12, %v1172_v48  ;;  %vm1248_vm11 = vweird.f32 %v8349_v19 }
 0x29c   :  { %5945 = vrcp.f32 %v8324_v23  ;;  %vm1203_vm14 = vweird.f32 %v8324_v23 }
 0x29d   :  { %v8261_v25 = vpop.f32.mrf.mxu2  ;;  %v8263_v61 = vpop.f32.mrf.mxu3  ;;  %5947 = vrcp.f32 %v8334_v1 }
 0x29e   :  { %14437 = vst [vmem:[#allocation9_spill] sm:$0xff] %v8263_v61  ;;  %5949 = vrcp.f32 %v8339_v60  ;;  %v1071_v7 = vadd.f32 %v8261_v25, %v8255_v10  ;;  %v5346_v25 = vmul.f32 -1.442695, %v1068_v55  ;;  %v1180_v55 = vor.u32 1.1754944e-38, %v1179_v22 }
 0x29f   :  { %5951 = vpow2.f32 %v5340_v40 }
 0x2a0   :  { %5953 = vrcp.f32 %v8349_v19  ;;  %v5347_v24 = vmul.f32 -1.442695, %v1071_v7  ;;  %v8454_v14 = vsel %vm8404_vm8, %v1180_v55, %v1176_v0 }
 0x2a1   :  { %5955 = vpow2.f32 %v5341_v8  ;;  %14455 = vst [vmem:[#allocation24_spill] sm:$0xff] %v8454_v14 }
 0x2a2   :  { %v8363_v17 = vpop.eup %5945  ;;  %5957 = vpow2.f32 %v5342_v3  ;;  %v1194_v3 = vand.u32 2147483648, %v8309_v26 }
 0x2a3   :  { %v1199_v59 = vmul.f32 %v8363_v17, %v8324_v23  ;;  %v8397_v40 = vpop.eup %5947  ;;  %5959 = vrcp.f32 %v8368_v28  ;;  %vm1204_vm0 = vweird.f32 %v8363_v17 }
 0x2a4   :  { %v8402_v10 = vpop.eup %5949  ;;  %5961 = vpow2.f32 %v5343_v32  ;;  %v8415_v32 = vsel %vm8359_vm10, %v1165_v50, %v1161_v54  ;;  %v1214_v33 = vmul.f32 %v8397_v40, %v8334_v1  ;;  %v1207_v50 = vand.u32 2147483647, %v8324_v23  ;;  %vm8494_vm15 = vmor %vm1203_vm14, %vm1204_vm0 }
 0x2a5   :  { %v8265_v2 = vpop.f32.mrf.mxu2  ;;  %v8267_v29 = vpop.f32.mrf.mxu3  ;;  %5963 = vpow2.f32 %v5344_v13  ;;  %v1200_v15 = vsub.f32 1.0, %v1199_v59  ;;  %14450 = vst [vmem:[#allocation23_spill] sm:$0xff] %v8415_v32  ;;  %v1187_v59 = vadd.f32 %v8330_v39, %v1186_v58  ;;  %v1229_v7 = vmul.f32 %v8402_v10, %v8339_v60 }
 0x2a6   :  { %14438 = vst [vmem:[#allocation17_spill] sm:$0xff] %v8265_v2  ;;  %v5952_v8 = vpop.eup %5951  ;;  %5965 = vpow2.f32 %v5345_v5  ;;  %v1195_v12 = vor.u32 1.1754944e-38, %v1194_v3  ;;  %v1209_v58 = vand.u32 2147483648, %v8324_v23  ;;  %v1215_v45 = vsub.f32 1.0, %v1214_v33 }
 0x2a7   :  { %14439 = vst [vmem:[#allocation18_spill] sm:$0xff] %v8267_v29  ;;  %v8411_v44 = vpop.eup %5953  ;;  %v8430_v11 = vadd.f32 1.0, %v5952_v8  ;;  %5967 = vpow2.f32 %v5346_v25  ;;  %v1201_v5 = vmul.f32 %v8363_v17, %v1200_v15  ;;  %vm8469_vm1 = vcmp.eq.f32.partialorder %v1207_v50, 8.507059e+37 }
 0x2a8   :  { %v5956_v13 = vpop.eup %5955  ;;  %5969 = vpow2.f32 %v5347_v24  ;;  %v1244_v15 = vmul.f32 %v8411_v44, %v8349_v19  ;;  %v1191_v24 = vsel %vm8458_vm7, %v8330_v39, %v1187_v59  ;;  %v1230_v55 = vsub.f32 1.0, %v1229_v7 }
 0x2a9   :  { %v5958_v30 = vpop.eup %5957  ;;  %v8443_v8 = vadd.f32 1.0, %v5956_v13  ;;  %5971 = vrcp.f32 %v8430_v11  ;;  %v1202_v0 = vadd.f32 %v8363_v17, %v1201_v5  ;;  %v1210_v39 = vor.u32 1.1754944e-38, %v1209_v58 }
 0x2aa   :  { %v8435_v54 = vpop.eup %5959  ;;  %v8450_v26 = vadd.f32 1.0, %v5958_v30  ;;  %v1216_v50 = vmul.f32 %v8397_v40, %v1215_v45  ;;  %v1222_v59 = vand.u32 2147483647, %v8334_v1  ;;  %v1224_v7 = vand.u32 2147483648, %v8334_v1 }
 0x2ab   :  { %v5962_v48 = vpop.eup %5961  ;;  %v1259_v30 = vmul.f32 %v8435_v54, %v8368_v28  ;;  %5973 = vrcp.f32 %v8443_v8  ;;  %v1245_v5 = vsub.f32 1.0, %v1244_v15  ;;  %v8490_v47 = vsel %vm8438_vm12, %v1195_v12, %v1191_v24 }
 0x2ac   :  { %v5964_v20 = vpop.eup %5963  ;;  %v8473_v13 = vadd.f32 1.0, %v5962_v48  ;;  %5975 = vrcp.f32 %v8450_v26  ;;  %14460 = vst [vmem:[#allocation25_spill] sm:$0xff] %v8490_v47  ;;  %v1231_v45 = vmul.f32 %v8402_v10, %v1230_v55  ;;  %v1206_v22 = vsel %vm8494_vm15, %v8363_v17, %v1202_v0 }
 0x2ad   :  { %v8269_v51 = vpop.f32.mrf.mxu2  ;;  %v8271_v34 = vpop.f32.mrf.mxu3  ;;  %v8480_v3 = vadd.f32 1.0, %v5964_v20  ;;  %v1260_v12 = vsub.f32 1.0, %v1259_v30  ;;  %v1217_v24 = vadd.f32 %v8397_v40, %v1216_v50  ;;  %vm1219_vm5 = vweird.f32 %v8397_v40 }
 0x2ae   :  { %14440 = vst [vmem:[#allocation19_spill] sm:$0xff] %v8269_v51  ;;  %v5966_v33 = vpop.eup %5965  ;;  %5977 = vrcp.f32 %v8473_v13  ;;  %v1237_v55 = vand.u32 2147483647, %v8339_v60  ;;  %vm8516_vm10 = vcmp.eq.f32.partialorder %v1222_v59, 8.507059e+37  ;;  %v1225_v17 = vor.u32 1.1754944e-38, %v1224_v7  ;;  %vm8541_vm2 = vmor %vm1218_vm3, %vm1219_vm5 }
 0x2af   :  { %14441 = vst [vmem:[#allocation20_spill] sm:$0xff] %v8271_v34  ;;  %v5968_v42 = vpop.eup %5967  ;;  %v8486_v4 = vadd.f32 1.0, %v5966_v33  ;;  %5979 = vrcp.f32 %v8480_v3  ;;  %v1246_v0 = vmul.f32 %v8411_v44, %v1245_v5  ;;  %v8526_v50 = vsel %vm8469_vm1, %v1210_v39, %v1206_v22 }
 0x2b0   :  { %v5970_v48 = vpop.eup %5969  ;;  %v8501_v58 = vadd.f32 1.0, %v5968_v42  ;;  %vm1234_vm4 = vweird.f32 %v8402_v10  ;;  %v1261_v39 = vmul.f32 %v8435_v54, %v1260_v12  ;;  %v1221_v5 = vsel %vm8541_vm2, %v8397_v40, %v1217_v24 }
 0x2b1   :  { %v8506_v15 = vpop.eup %5971  ;;  %v8514_v33 = vadd.f32 1.0, %v5970_v48  ;;  %5981 = vrcp.f32 %v8486_v4  ;;  %v1232_v48 = vadd.f32 %v8402_v10, %v1231_v45  ;;  %vm8550_vm8 = vcmp.eq.f32.partialorder %v1237_v55, 8.507059e+37  ;;  %vm8561_vm9 = vmor %vm1233_vm6, %vm1234_vm4 }
 0x2b2   :  { %v8521_v30 = vpop.eup %5973  ;;  %v1306_v7 = vmul.f32 %v8506_v15, %v8430_v11  ;;  %5983 = vrcp.f32 %v8501_v58  ;;  %v1239_v22 = vand.u32 2147483648, %v8339_v60  ;;  %v1247_v40 = vadd.f32 %v8411_v44, %v1246_v0 }
 0x2b3   :  { %v8532_v59 = vpop.eup %5975  ;;  %v1321_v21 = vmul.f32 %v8521_v30, %v8443_v8  ;;  %5985 = vrcp.f32 %v8514_v33  ;;  %vm1249_vm13 = vweird.f32 %v8411_v44  ;;  %v1236_v55 = vsel %vm8561_vm9, %v8402_v10, %v1232_v48 }
 0x2b4   :  { %v8556_v1 = vpop.eup %5977  ;;  %v1336_v60 = vmul.f32 %v8532_v59, %v8450_v26  ;;  %v1254_v2 = vand.u32 2147483648, %v8349_v19  ;;  %v1307_v61 = vsub.f32 1.0, %v1306_v7  ;;  %v1262_v32 = vadd.f32 %v8435_v54, %v1261_v39  ;;  %vm8591_vm7 = vmor %vm1248_vm11, %vm1249_vm13 }
 0x2b5   :  { %v8273_v37 = vpop.f32.mrf.mxu2  ;;  %v8275_v35 = vpop.f32.mrf.mxu3  ;;  %vm1264_vm12 = vweird.f32 %v8435_v54  ;;  %v1267_v0 = vand.u32 2147483647, %v8368_v28  ;;  %v1351_v29 = vmul.f32 %v8556_v1, %v8473_v13  ;;  %v8585_v12 = vsel %vm8516_vm10, %v1225_v17, %v1221_v5 }
 0x2b6   :  { %14442 = vst [vmem:[#allocation21_spill] sm:$0xff] %v8273_v37  ;;  %v8567_v24 = vpop.eup %5979  ;;  %v1240_v48 = vor.u32 1.1754944e-38, %v1239_v22  ;;  %v1269_v39 = vand.u32 2147483648, %v8368_v28  ;;  %v1322_v37 = vsub.f32 1.0, %v1321_v21  ;;  %v1251_v17 = vsel %vm8591_vm7, %v8411_v44, %v1247_v40 }
 0x2b7   :  { %v8579_v51 = vpop.eup %5981  ;;  %v1366_v42 = vmul.f32 %v8567_v24, %v8480_v3  ;;  %vm1263_vm14 = vweird.f32 %v8368_v28  ;;  %v1337_v5 = vsub.f32 1.0, %v1336_v60  ;;  %vm1253_vm1 = vcmp.eq.f32.partialorder %v1252_v56, 8.507059e+37 }
 0x2b8   :  { %v8596_v14 = vpop.eup %5983  ;;  %v1241_v19 = vsel %vm8550_vm8, %v1240_v48, %v1236_v55  ;;  %v1255_v22 = vor.u32 1.1754944e-38, %v1254_v2  ;;  %vm8608_vm0 = vmor %vm1263_vm14, %vm1264_vm12  ;;  %v1381_v7 = vmul.f32 %v8579_v51, %v8486_v4  ;;  %vm1268_vm15 = vcmp.eq.f32.partialorder %v1267_v0, 8.507059e+37 }
 0x2b9   :  { %v8612_v21 = vpop.eup %5985  ;;  %v1266_v28 = vsel %vm8608_vm0, %v8435_v54, %v1262_v32  ;;  %v1308_v44 = vmul.f32 %v8506_v15, %v1307_v61  ;;  %v1352_v45 = vsub.f32 1.0, %v1351_v29  ;;  %v1396_v2 = vmul.f32 %v8596_v14, %v8501_v58 }
 0x2ba   :  { %v1256_v60 = vsel %vm1253_vm1, %v1255_v22, %v1251_v17  ;;  %v1270_v55 = vor.u32 1.1754944e-38, %v1269_v39  ;;  %v1367_v56 = vsub.f32 1.0, %v1366_v42  ;;  %v1323_v48 = vmul.f32 %v8521_v30, %v1322_v37 }
 0x2bb   :  { %v1411_v34 = vmul.f32 %v8612_v21, %v8514_v33  ;;  %v1338_v61 = vmul.f32 %v8532_v59, %v1337_v5  ;;  %v1382_v54 = vsub.f32 1.0, %v1381_v7  ;;  %v1344_v0 = vand.u32 2147483647, %v8450_v26 }
 0x2bc   :  { %v8627_v32 = vsel %vm1268_vm15, %v1270_v55, %v1266_v28  ;;  %v8634_v37 = vadd.f32 %v8506_v15, %v1308_v44  ;;  %v1397_v42 = vsub.f32 1.0, %v1396_v2  ;;  %v1391_v22 = vand.u32 2147483648, %v8486_v4 }
 0x2bd   :  { %v8277_v57 = vpop.f32.mrf.mxu2  ;;  %v8279_v46 = vpop.f32.mrf.mxu3  ;;  %v1368_v5 = vmul.f32 %v8567_v24, %v1367_v56  ;;  %v1359_v7 = vand.u32 2147483647, %v8473_v13  ;;  %v8642_v47 = vadd.f32 %v8521_v30, %v1323_v48  ;;  %v1412_v39 = vsub.f32 1.0, %v1411_v34 }
 0x2be   :  { %v8647_v29 = vadd.f32 %v8532_v59, %v1338_v61  ;;  %v1383_v28 = vmul.f32 %v8579_v51, %v1382_v54  ;;  %v1376_v56 = vand.u32 2147483648, %v8480_v3  ;;  %v1389_v48 = vand.u32 2147483647, %v8486_v4 }
 0x2bf   :  { %v8655_v34 = vor.u32 1.1754944e-38, %v1391_v22  ;;  %vm1386_vm3 = vweird.f32 %v8579_v51  ;;  %v8664_v54 = vadd.f32 %v8567_v24, %v1368_v5  ;;  %vm1400_vm5 = vweird.f32 %v8501_v58 }
 0x2c0   :  { %v1406_v22 = vand.u32 2147483648, %v8501_v58  ;;  %vm1385_vm10 = vweird.f32 %v8486_v4  ;;  %vm1371_vm4 = vweird.f32 %v8567_v24  ;;  %vm1401_vm2 = vweird.f32 %v8596_v14  ;;  %v14501_v4 = vld [vmem:[#allocation9_spill] sm:$0xff] }
 0x2c1   :  { %vm1415_vm8 = vweird.f32 %v8514_v33  ;;  %vm1370_vm11 = vweird.f32 %v8480_v3  ;;  %vm1356_vm9 = vweird.f32 %v8556_v1  ;;  %vm1341_vm13 = vweird.f32 %v8532_v59  ;;  %vm8709_vm14 = vmor %vm1400_vm5, %vm1401_vm2 }
 0x2c2   :  { %vm1416_vm12 = vweird.f32 %v8612_v21  ;;  %vm1355_vm7 = vweird.f32 %v8473_v13  ;;  %vm1340_vm1 = vweird.f32 %v8450_v26  ;;  %vm1326_vm0 = vweird.f32 %v8521_v30 }
 0x2c3   :  { %vm8728_vm15 = vmor %vm1415_vm8, %vm1416_vm12  ;;  %vm1325_vm5 = vweird.f32 %v8443_v8  ;;  %vm1311_vm2 = vweird.f32 %v8506_v15  ;;  %vm1310_vm12 = vweird.f32 %v8430_v11 }
 0x2c4   :  { %vm8750_vm8 = vmor %vm1385_vm10, %vm1386_vm3  ;;  %vm8765_vm3 = vcmp.eq.f32.partialorder %v1344_v0, 8.507059e+37  ;;  %v1377_v0 = vor.u32 1.1754944e-38, %v1376_v56 }
 0x2c5   :  { %v8281_v38 = vpop.f32.mrf.mxu2  ;;  %v8283_v52 = vpop.f32.mrf.mxu3  ;;  %vm8774_vm10 = vmor %vm1370_vm11, %vm1371_vm4 }
 0x2c6   :  { %vm8801_vm11 = vmor %vm1355_vm7, %vm1356_vm9 }
 0x2c7   :  { %vm8828_vm9 = vmor %vm1325_vm5, %vm1326_vm0  ;;  %vm14534_vm5 = vcmask 64512  }
 0x2cd   :  { %v8286_v53 = vpop.f32.mrf.mxu2  ;;  %v8288_v16 = vpop.f32.mrf.mxu3 }
 0x2d5   :  { %v8292_v18 = vpop.f32.mrf.mxu2  ;;  %v8294_v6 = vpop.f32.mrf.mxu3 }
 0x2dd   :  { %v8302_v41 = vpop.f32.mrf.mxu2  ;;  %v8304_v9 = vpop.f32.mrf.mxu3 }
 0x2e5   :  { %v8316_v43 = vpop.f32.mrf.mxu2  ;;  %v8320_v63 = vpop.f32.mrf.mxu3 }
 0x2e6   :  { %14443 = vst [vmem:[#allocation22_spill] sm:$0xff] %v8316_v43  ;;  %v1353_v43 = vmul.f32 %v8556_v1, %v1352_v45  ;;  %v1404_v45 = vand.u32 2147483647, %v8501_v58  ;;  %v14480_v58 = vld [vmem:[#allocation25_spill] sm:$0xff] }
 0x2e8   :  { %vm8676_vm6 = vcmp.eq.f32.partialorder %v1404_v45, 8.507059e+37  ;;  %v6567_v45 = vld [vmem:[%s14244_s1 + $0x48] sm:$0xff] }
 0x2ed   :  { %v8344_v62 = vpop.f32.mrf.mxu2  ;;  %v8346_v31 = vpop.f32.mrf.mxu3 }
 0x2f5   :  { %v8393_v49 = vpop.f32.mrf.mxu2  ;;  %v8395_v36 = vpop.f32.mrf.mxu3 }
 0x2fd   :  { %v8445_v25 = vpop.f32.mrf.mxu2  ;;  %v8448_v27 = vpop.f32.mrf.mxu3 }
 0x305   :  { %v8509_v23 = vpop.f32.mrf.mxu2  ;;  %v8528_v20 = vpop.f32.mrf.mxu3 }
 0x30d   :  { %v1112_v10 = vpop.f32.mrf.mxu2  ;;  %v1002_v40 = vpop.f32.mrf.mxu3 }
 0x30e   :  { %v1113_v44 = vadd.f32 %v1112_v10, %v8528_v20  ;;  %v8658_v20 = vadd.f32 %v8556_v1, %v1353_v43  ;;  %v1110_v10 = vadd.f32 %v8509_v23, %v8448_v27  ;;  %v1092_v43 = vadd.f32 %v8292_v18, %v8288_v16 }
 0x30f   :  { %v1107_v27 = vadd.f32 %v8445_v25, %v8395_v36  ;;  %v1421_v16 = vand.u32 2147483648, %v8514_v33  ;;  %v1104_v36 = vadd.f32 %v8393_v49, %v8346_v31  ;;  %v1101_v31 = vadd.f32 %v8344_v62, %v8320_v63 }
 0x310   :  { %v1429_v25 = vmul.f32 %v8585_v12, %v1110_v10  ;;  %v1419_v63 = vand.u32 2147483647, %v8514_v33  ;;  %v14485_v33 = vld [vmem:[#allocation20_spill] sm:$0xff] }
 0x311   :  { %v1428_v49 = vmul.f32 %v8526_v50, %v1107_v27  ;;  %v1427_v50 = vmul.f32 %v14480_v58, %v1104_v36  ;;  %v14487_v10 = vld [vmem:[#allocation24_spill] sm:$0xff]  ;;  %v6557_v58 = vld [vmem:[%s14244_s1 + $0x20] sm:$0xff] }
 0x315   :  { %v1115_v17 = vpop.f32.mrf.mxu2  ;;  %v1005_v2 = vpop.f32.mrf.mxu3 }
 0x316   :  { %v1116_v55 = vadd.f32 %v1115_v17, %v1002_v40  ;;  %v1398_v17 = vmul.f32 %v8596_v14, %v1397_v42  ;;  %v1430_v40 = vmul.f32 %v1241_v19, %v1113_v44  ;;  %v1413_v42 = vmul.f32 %v8612_v21, %v1412_v39 }
 0x317   :  { %v8681_v19 = vadd.f32 %v8579_v51, %v1383_v28  ;;  %v1095_v44 = vadd.f32 %v8302_v41, %v8294_v6  ;;  %v14479_v6 = vld [vmem:[#allocation22_spill] sm:$0xff] }
 0x318   :  { %v1431_v61 = vmul.f32 %v1256_v60, %v1116_v55  ;;  %v1089_v60 = vadd.f32 %v8286_v53, %v8283_v52  ;;  %v1399_v18 = vadd.f32 %v8596_v14, %v1398_v17  ;;  %v1086_v52 = vadd.f32 %v8281_v38, %v8279_v46 }
 0x319   :  { %v1414_v5 = vadd.f32 %v8612_v21, %v1413_v42  ;;  %v1083_v38 = vadd.f32 %v8277_v57, %v8275_v35  ;;  %v1098_v41 = vadd.f32 %v14479_v6, %v8304_v9  ;;  %v1422_v9 = vor.u32 1.1754944e-38, %v1421_v16  ;;  %v14494_v16 = vld [vmem:[#allocation23_spill] sm:$0xff] }
 0x31a   :  { %v1439_v28 = vadd.f32 %v1431_v61, %v1092_v43  ;;  %v1438_v53 = vadd.f32 %v1430_v40, %v1089_v60  ;;  %v1403_v62 = vsel %vm8709_vm14, %v8596_v14, %v1399_v18  ;;  %v1407_v14 = vor.u32 1.1754944e-38, %v1406_v22  ;;  %v14486_v40 = vld [vmem:[#allocation21_spill] sm:$0xff]  ;;  %v14491_v22 = vld [vmem:[#allocation19_spill] sm:$0xff] }
 0x31b   :  { %v1418_v57 = vsel %vm8728_vm15, %v8612_v21, %v1414_v5  ;;  %vm8739_vm14 = vcmp.eq.f32.partialorder %v1359_v7, 8.507059e+37  ;;  %v1080_v17 = vadd.f32 %v14486_v40, %v14485_v33  ;;  %v1426_v61 = vmul.f32 %v14487_v10, %v1101_v31  ;;  %v14490_v7 = vld [vmem:[#allocation18_spill] sm:$0xff] }
 0x31c   :  { %5987 = vtanh.f32 %v1439_v28  ;;  %v1436_v42 = vadd.f32 %v1428_v49, %v1083_v38  ;;  %v1077_v43 = vadd.f32 %v14491_v22, %v14490_v7  ;;  %vm1420_vm15 = vcmp.eq.f32.partialorder %v1419_v63, 8.507059e+37  ;;  %v14508_v63 = vld [vmem:[#allocation16_spill] sm:$0xff] }
 0x31d   :  { %v1118_v39 = vpop.f32.mrf.mxu2  ;;  %5989 = vtanh.f32 %v1438_v53  ;;  %v1408_v27 = vsel %vm8676_vm6, %v1407_v14, %v1403_v62  ;;  %v1388_v60 = vsel %vm8750_vm8, %v8579_v51, %v8681_v19  ;;  %v1425_v18 = vmul.f32 %v14494_v16, %v1098_v41 }
 0x31e   :  { %v1119_v55 = vadd.f32 %v1118_v39, %v1005_v2  ;;  %v1435_v36 = vadd.f32 %v1427_v50, %v1080_v17  ;;  %vm1390_vm6 = vcmp.eq.f32.partialorder %v1389_v48, 8.507059e+37  ;;  %v1373_v51 = vsel %vm8774_vm10, %v8567_v24, %v8664_v54  ;;  %v14502_v48 = vld [vmem:[#allocation17_spill] sm:$0xff] }
 0x31f   :  { %v14497_v19 = vand.u32 2147483648, %v8473_v13  ;;  %v1074_v5 = vadd.f32 %v14502_v48, %v14501_v4  ;;  %v1393_v24 = vsel %vm1390_vm6, %v8655_v34, %v1388_v60  ;;  %v1455_v49 = vsub.f32 1.0, %v1408_v27  ;;  %v14522_v60 = vld [vmem:[#allocation15_spill] sm:$0xff]  ;;  %v6547_v13 = vld [vmem:[%s14246_s3] sm:$0x3] }
 0x320   :  { %v1432_v12 = vmul.f32 %v8627_v32, %v1119_v55  ;;  %v1437_v32 = vadd.f32 %v1429_v25, %v1086_v52  ;;  %v1423_v25 = vsel %vm1420_vm15, %v1422_v9, %v1418_v57  ;;  %v14498_v55 = vand.u32 2147483647, %v8443_v8  ;;  %vm8815_vm15 = vmor %vm1340_vm1, %vm1341_vm13  ;;  %v14513_v57 = vld [vmem:[#allocation12_spill] sm:$0xff]  ;;  %v14526_v52 = vld [vmem:[#allocation11_spill] sm:$0xff] }
 0x321   :  { %v1362_v28 = vor.u32 1.1754944e-38, %v14497_v19  ;;  %v1456_v31 = vsub.f32 1.0, %v1423_v25  ;;  %v1358_v46 = vsel %vm8801_vm11, %v8556_v1, %v8658_v20  ;;  %v1433_v38 = vadd.f32 %v1425_v18, %v1074_v5  ;;  %vm8847_vm13 = vmor %vm1310_vm12, %vm1311_vm2 }
 0x322   :  { %v1440_v2 = vadd.f32 %v1432_v12, %v1095_v44  ;;  %vm8790_vm4 = vcmp.eq.f32.partialorder %v14498_v55, 8.507059e+37  ;;  %v5988_v53 = vpop.eup %5987  ;;  %v1434_v44 = vadd.f32 %v1426_v61, %v1077_v43  ;;  %v14505_v12 = vand.u32 2147483647, %v8480_v3  ;;  %v14518_v61 = vld [vmem:[#allocation13_spill] sm:$0xff] }
 0x323   :  { %v5990_v54 = vpop.eup %5989  ;;  %v1343_v3 = vsel %vm8815_vm15, %v8532_v59, %v8647_v29  ;;  %v1472_v1 = vmul.f32 %v1423_v25, %v14508_v63  ;;  %v1463_v20 = vmul.f32 %v5988_v53, %v1455_v49  ;;  %v1454_v62 = vsub.f32 1.0, %v1393_v24  ;;  %v6553_v63 = vld [vmem:[%s14244_s1 + $0x10] sm:$0xff] }
 0x324   :  { %5991 = vtanh.f32 %v1440_v2  ;;  %vm1375_vm8 = vcmp.eq.f32.partialorder %v14505_v12, 8.507059e+37  ;;  %v14511_v59 = vand.u32 2147483648, %v8450_v26  ;;  %v1328_v2 = vsel %vm8828_vm9, %v8521_v30, %v8642_v47 }
 0x325   :  { %5993 = vtanh.f32 %v1437_v32  ;;  %v1378_v6 = vsel %vm1375_vm8, %v1377_v0, %v1373_v51  ;;  %v1363_v32 = vsel %vm8739_vm14, %v1362_v28, %v1358_v46  ;;  %v1471_v9 = vmul.f32 %v1408_v27, %v14513_v57  ;;  %v5349_v46 = vld [vmem:[%s14243_s0 + $0x10] sm:$0xff]  ;;  %vm14536_vm14 = vmmov %vm14534_vm5  ;;  %v6563_v57 = vld [vmem:[%s14244_s1 + $0x38] sm:$0xff] }
 0x326   :  { %5995 = vtanh.f32 %v1436_v42  ;;  %v1347_v29 = vor.u32 1.1754944e-38, %v14511_v59  ;;  %v1462_v14 = vmul.f32 %v5990_v54, %v1454_v62  ;;  %v1453_v33 = vsub.f32 1.0, %v1378_v6  ;;  %v6556_v62 = vld [vmem:[%s14245_s2 + $0x20] sm:$0xff]  ;;  %v6560_v59 = vld [vmem:[%s14245_s2 + $0x30] sm:$0xff] }
 0x327   :  { %5997 = vtanh.f32 %v1435_v36  ;;  %v14516_v47 = vand.u32 2147483648, %v8443_v8  ;;  %v1313_v17 = vsel %vm8847_vm13, %v8506_v15, %v8634_v37  ;;  %v8861_v10 = vadd.f32 %v1471_v9, %v1463_v20  ;;  %v6555_v20 = vld [vmem:[%s14244_s1 + $0x18] sm:$0xff]  ;;  %v6564_v9 = vld [vmem:[%s14245_s2 + $0x40] sm:$0xff] }
 0x328   :  { %5999 = vtanh.f32 %v1434_v44  ;;  %v1348_v40 = vsel %vm8765_vm3, %v1347_v29, %v1343_v3  ;;  %v1470_v42 = vmul.f32 %v1393_v24, %v14518_v61  ;;  %v1452_v7 = vsub.f32 1.0, %v1363_v32  ;;  %v14528_v44 = vld [vmem:[#allocation14_spill] sm:$0xff]  ;;  %vm14538_vm3 = vmmov %vm14534_vm5  ;;  %v6561_v29 = vld [vmem:[%s14244_s1 + $0x30] sm:$0xff] }
 0x329   :  { %6001 = vtanh.f32 %v1433_v38  ;;  %v1332_v30 = vor.u32 1.1754944e-38, %v14516_v47  ;;  %14517 = vst [vmem:[#allocation25_spill] sm:$0xff] %v8861_v10  ;;  %v14519_v43 = vand.u32 2147483647, %v8430_v11  ;;  %v14520_v27 = vand.u32 2147483648, %v8430_v11  ;;  %v14524_v11 = vld [vmem:[#allocation10_spill] sm:$0xff]  ;;  %vm14540_vm6 = vmmov %vm14538_vm3 }
 0x32a   :  { %v5992_v34 = vpop.eup %5991  ;;  %v8872_v37 = vadd.f32 %v1470_v42, %v1462_v14  ;;  %v1469_v39 = vmul.f32 %v1378_v6, %v14522_v60  ;;  %v1451_v18 = vsub.f32 1.0, %v1348_v40  ;;  %v1468_v51 = vmul.f32 %v1363_v32, %v14524_v11  ;;  %v6549_v38 = vld [vmem:[%s14244_s1] sm:$0xff]  ;;  %v6550_v6 = vld [vmem:[%s14245_s2 + $0x8] sm:$0xff]  ;;  %vm14542_vm11 = vmmov %vm14538_vm3 }
 0x32b   :  { %v1464_v41 = vmul.f32 %v5992_v34, %v1456_v31  ;;  %v5994_v50 = vpop.eup %5993  ;;  %v1333_v8 = vsel %vm8790_vm4, %v1332_v30, %v1328_v2  ;;  %vm1315_vm7 = vcmp.eq.f32.partialorder %v14519_v43, 8.507059e+37  ;;  %v1317_v15 = vor.u32 1.1754944e-38, %v14520_v27  ;;  %v14530_v31 = vld [vmem:[#allocation8_spill] sm:$0xff]  ;;  %v6548_v34 = vld [vmem:[%s14245_s2] sm:$0xff]  ;;  %v6551_v3 = vld [vmem:[%s14244_s1 + $0x8] sm:$0xff] }
 0x32c   :  { %v5996_v26 = vpop.eup %5995  ;;  %v1461_v21 = vmul.f32 %v5994_v50, %v1453_v33  ;;  %14521 = vst [vmem:[#allocation20_spill] sm:$0xff] %v8872_v37  ;;  %v1450_v19 = vsub.f32 1.0, %v1333_v8  ;;  %v1467_v53 = vmul.f32 %v1348_v40, %v14526_v52  ;;  %v1466_v24 = vmul.f32 %v1333_v8, %v14528_v44  ;;  %v6558_v50 = vld [vmem:[%s14245_s2 + $0x28] sm:$0xff]  ;;  %vm14544_vm15 = vmmov %vm14538_vm3  ;;  %v6562_v2 = vld [vmem:[%s14245_s2 + $0x38] sm:$0xff] }
 0x32d   :  { %v8840_v35 = vadd.f32 %v1472_v1, %v1464_v41  ;;  %v5998_v22 = vpop.eup %5997  ;;  %v1460_v16 = vmul.f32 %v5996_v26, %v1452_v7  ;;  %v1318_v25 = vsel %vm1315_vm7, %v1317_v15, %v1313_v17  ;;  %vm14532_vm1 = vcmask 523264   ;;  %v6552_v41 = vld [vmem:[%s14245_s2 + $0x10] sm:$0xff]  ;;  %v6554_v1 = vld [vmem:[%s14245_s2 + $0x18] sm:$0xff]  ;;  %v6559_v32 = vld [vmem:[%s14244_s1 + $0x28] sm:$0xff] }
 0x32e   :  { %v6000_v36 = vpop.eup %5999  ;;  %v8877_v23 = vadd.f32 %v1469_v39, %v1461_v21  ;;  %v1459_v0 = vmul.f32 %v5998_v22, %v1451_v18  ;;  %v1449_v48 = vsub.f32 1.0, %v1318_v25  ;;  %v1465_v49 = vmul.f32 %v1318_v25, %v14530_v31  ;;  %vm14533_vm0 = vmmov %vm14532_vm1  ;;  %v6565_v14 = vld [vmem:[%s14244_s1 + $0x40] sm:$0xff]  ;;  %v6566_v33 = vld [vmem:[%s14245_s2 + $0x48] sm:$0xff] }
 0x32f   :  { %14512 = vst [vmem:[#allocation22_spill] sm:$0xff] %v8840_v35  ;;  %1489 = vmatpush.msrb.mxu0 %v8840_v35  ;;  %1513 = vmatpush.msrb.mxu1 %v8840_v35  ;;  %v6002_v28 = vpop.eup %6001  ;;  %v8882_v55 = vadd.f32 %v1468_v51, %v1460_v16  ;;  %v1458_v4 = vmul.f32 %v6000_v36, %v1450_v19  ;;  %vm14535_vm2 = vmmov %vm14533_vm0  ;;  %v6568_v26 = vld [vmem:[%s14245_s2 + $0x50] sm:$0xff]  ;;  %v6570_v47 = vld [vmem:[%s14245_s2 + $0x58] sm:$0xff] }
 0x330   :  { %14523 = vst [vmem:[#allocation21_spill] sm:$0xff] %v8877_v23  ;;  %v8887_v5 = vadd.f32 %v1467_v53, %v1459_v0  ;;  %v1457_v56 = vmul.f32 %v6002_v28, %v1449_v48  ;;  %vm14537_vm12 = vmmov %vm14533_vm0  ;;  %v6569_v40 = vld [vmem:[%s14244_s1 + $0x50] sm:$0xff]  ;;  %v6571_v30 = vld [vmem:[%s14244_s1 + $0x58] sm:$0xff] }
 0x331   :  { %1490 = vmatpush.msrb.mxu0 %v8861_v10  ;;  %1514 = vmatpush.msrb.mxu1 %v8861_v10  ;;  %14525 = vst [vmem:[#allocation24_spill] sm:$0xff] %v8882_v55  ;;  %v8892_v54 = vadd.f32 %v1466_v24, %v1458_v4  ;;  %vm14539_vm10 = vmmov %vm14533_vm0  ;;  %v6572_v17 = vld [vmem:[%s14245_s2 + $0x60] sm:$0xff]  ;;  %v6574_v42 = vld [vmem:[%s14245_s2 + $0x68] sm:$0xff] }
 0x332   :  { %14527 = vst [vmem:[#allocation18_spill] sm:$0xff] %v8887_v5  ;;  %v8897_v12 = vadd.f32 %v1465_v49, %v1457_v56  ;;  %vm14541_vm4 = vmmov %vm14533_vm0  ;;  %v6573_v61 = vld [vmem:[%s14244_s1 + $0x60] sm:$0xff]  ;;  %v6575_v21 = vld [vmem:[%s14244_s1 + $0x68] sm:$0xff] }
 0x333   :  { %1491 = vmatpush.msrb.mxu0 %v8872_v37  ;;  %1515 = vmatpush.msrb.mxu1 %v8872_v37  ;;  %14529 = vst [vmem:[#allocation19_spill] sm:$0xff] %v8892_v54  ;;  %vm14543_vm8 = vmmov %vm14533_vm0  ;;  %v6576_v7 = vld [vmem:[%s14245_s2 + $0x70] sm:$0xff]  ;;  %v6578_v8 = vld [vmem:[%s14245_s2 + $0x78] sm:$0xff] }
 0x334   :  { %14531 = vst [vmem:[#allocation23_spill] sm:$0xff] %v8897_v12  ;;  %vm14545_vm9 = vmmov %vm14533_vm0  ;;  %v6577_v22 = vld [vmem:[%s14244_s1 + $0x70] sm:$0xff]  ;;  %v6579_v15 = vld [vmem:[%s14244_s1 + $0x78] sm:$0xff] }
 0x335   :  { %1492 = vmatpush.msrb.mxu0 %v8877_v23  ;;  %1516 = vmatpush.msrb.mxu1 %v8877_v23  ;;  %vm14546_vm13 = vmmov %vm14538_vm3  ;;  %v6580_v60 = vld [vmem:[%s14245_s2 + $0x80] sm:$0xff]  ;;  %v6582_v36 = vld [vmem:[%s14245_s2 + $0x88] sm:$0xff] }
 0x336   :  { %vm14547_vm7 = vmmov %vm14533_vm0  ;;  %v6581_v18 = vld [vmem:[%s14244_s1 + $0x80] sm:$0xff]  ;;  %v6583_v51 = vld [vmem:[%s14244_s1 + $0x88] sm:$0xff] }
 0x337   :  { %1493 = vmatpush.msrb.mxu0 %v8882_v55  ;;  %1517 = vmatpush.msrb.mxu1 %v8882_v55  ;;  %v6584_v0 = vld [vmem:[%s14245_s2 + $0x90] sm:$0xff]  ;;  %v6586_v53 = vld [vmem:[%s14245_s2 + $0x98] sm:$0xff]  ;;  %v6588_v24 = vld [vmem:[%s14245_s2 + $0xa0] sm:$0xff] }
 0x338   :  { %v6585_v52 = vld [vmem:[%s14244_s1 + $0x90] sm:$0xff]  ;;  %v6587_v44 = vld [vmem:[%s14244_s1 + $0x98] sm:$0xff]  ;;  %v6589_v49 = vld [vmem:[%s14244_s1 + $0xa0] sm:$0xff] }
 0x339   :  { %1494 = vmatpush.msrb.mxu0 %v8887_v5  ;;  %1518 = vmatpush.msrb.mxu1 %v8887_v5 }
 0x33b   :  { %1495 = vmatpush.msrb.mxu0 %v8892_v54  ;;  %1519 = vmatpush.msrb.mxu1 %v8892_v54 }
 0x33d   :  { %1496 = vmatpush.msrb.mxu0 %v8897_v12  ;;  %1520 = vmatpush.msrb.mxu1 %v8897_v12 }
 0x33e   :  { %5348 = vmatmul.msk.f32.vlgmr.msrb.gmra.mxu0 %vm14532_vm1, %v6547_v13  ;;  %5350 = vmatmul.msk.f32.vlgmr.msrb.gmra.mxu1 %vm14533_vm0, %v6548_v34  ;;  %vm14548_vm1 = vmmov %vm14538_vm3 }
 0x33f   :  { %1633 = vmatpush.msra.mxu0 %v5349_v46  ;;  %v6590_v46 = vld [vmem:[%s14245_s2 + $0xa8] sm:$0xff] }
 0x346   :  { %5382 = vmatmul.msk.f32.vlgmr.msra.gmra.mxu0 %vm14534_vm5, %v6549_v38  ;;  %5351 = vmatmul.msk.f32.gmra.mxu1 %vm14535_vm2, %v6550_v6  ;;  %vm14549_vm5 = vmmov %vm14548_vm1  ;;  %v6591_v38 = vld [vmem:[%s14244_s1 + $0xa8] sm:$0xff]  ;;  %v6592_v6 = vld [vmem:[%s14245_s2 + $0xb0] sm:$0xff] }
 0x347   :  { %vm14550_vm2 = vmmov %vm14533_vm0 }
 0x34e   :  { %5383 = vmatmul.msk.f32.gmra.mxu0 %vm14536_vm14, %v6551_v3  ;;  %5352 = vmatmul.msk.f32.gmra.mxu1 %vm14537_vm12, %v6552_v41  ;;  %vm14551_vm14 = vmmov %vm14548_vm1 }
 0x34f   :  { %vm14552_vm12 = vmmov %vm14533_vm0 }
 0x356   :  { %5384 = vmatmul.msk.f32.gmra.mxu0 %vm14538_vm3, %v6553_v63  ;;  %5353 = vmatmul.msk.f32.gmra.mxu1 %vm14539_vm10, %v6554_v1  ;;  %vm14553_vm3 = vmmov %vm14548_vm1  ;;  %v6593_v63 = vld [vmem:[%s14244_s1 + $0xb0] sm:$0xff]  ;;  %v6594_v1 = vld [vmem:[%s14245_s2 + $0xb8] sm:$0xff] }
 0x357   :  { %vm14554_vm10 = vmmov %vm14533_vm0 }
 0x35e   :  { %5385 = vmatmul.msk.f32.gmra.mxu0 %vm14540_vm6, %v6555_v20  ;;  %5354 = vmatmul.msk.f32.gmra.mxu1 %vm14541_vm4, %v6556_v62  ;;  %vm14555_vm6 = vmmov %vm14548_vm1 }
 0x35f   :  { %vm14556_vm4 = vmmov %vm14533_vm0 }
 0x366   :  { %5386 = vmatmul.msk.f32.gmra.mxu0 %vm14542_vm11, %v6557_v58  ;;  %5355 = vmatmul.msk.f32.gmra.mxu1 %vm14543_vm8, %v6558_v50  ;;  %vm14557_vm11 = vmmov %vm14548_vm1  ;;  %v6595_v58 = vld [vmem:[%s14244_s1 + $0xb8] sm:$0xff]  ;;  %v6596_v50 = vld [vmem:[%s14245_s2 + $0xc0] sm:$0xff] }
 0x367   :  { %vm14558_vm8 = vmmov %vm14533_vm0 }
 0x36e   :  { %5387 = vmatmul.msk.f32.gmra.mxu0 %vm14544_vm15, %v6559_v32  ;;  %5356 = vmatmul.msk.f32.gmra.mxu1 %vm14545_vm9, %v6560_v59  ;;  %vm14559_vm15 = vmmov %vm14548_vm1 }
 0x36f   :  { %vm14560_vm9 = vmmov %vm14533_vm0 }
 0x376   :  { %5388 = vmatmul.msk.f32.gmra.mxu0 %vm14546_vm13, %v6561_v29  ;;  %5357 = vmatmul.msk.f32.gmra.mxu1 %vm14547_vm7, %v6562_v2  ;;  %vm14561_vm13 = vmmov %vm14548_vm1  ;;  %v6597_v29 = vld [vmem:[%s14244_s1 + $0xc0] sm:$0xff]  ;;  %v6598_v2 = vld [vmem:[%s14245_s2 + $0xc8] sm:$0xff] }
 0x377   :  { %vm14562_vm7 = vmmov %vm14533_vm0 }
 0x37e   :  { %5389 = vmatmul.msk.f32.gmra.mxu0 %vm14548_vm1, %v6563_v57  ;;  %5358 = vmatmul.msk.f32.gmra.mxu1 %vm14533_vm0, %v6564_v9 }
 0x386   :  { %5390 = vmatmul.msk.f32.gmra.mxu0 %vm14549_vm5, %v6565_v14  ;;  %5359 = vmatmul.msk.f32.gmra.mxu1 %vm14550_vm2, %v6566_v33  ;;  %vm14563_vm5 = vmmov %vm14548_vm1  ;;  %v6599_v14 = vld [vmem:[%s14244_s1 + $0xc8] sm:$0xff]  ;;  %v6600_v33 = vld [vmem:[%s14245_s2 + $0xd0] sm:$0xff] }
 0x387   :  { %vm14564_vm2 = vmmov %vm14533_vm0 }
 0x38e   :  { %5391 = vmatmul.msk.f32.gmra.mxu0 %vm14551_vm14, %v6567_v45  ;;  %5360 = vmatmul.msk.f32.gmra.mxu1 %vm14552_vm12, %v6568_v26  ;;  %vm14565_vm14 = vmmov %vm14548_vm1 }
 0x38f   :  { %vm14566_vm12 = vmmov %vm14533_vm0 }
 0x396   :  { %5392 = vmatmul.msk.f32.gmra.mxu0 %vm14553_vm3, %v6569_v40  ;;  %5361 = vmatmul.msk.f32.gmra.mxu1 %vm14554_vm10, %v6570_v47  ;;  %vm14567_vm3 = vmmov %vm14548_vm1  ;;  %v6601_v40 = vld [vmem:[%s14244_s1 + $0xd0] sm:$0xff]  ;;  %v6602_v47 = vld [vmem:[%s14245_s2 + $0xd8] sm:$0xff] }
 0x397   :  { %vm14568_vm10 = vmmov %vm14533_vm0 }
 0x39e   :  { %5393 = vmatmul.msk.f32.gmra.mxu0 %vm14555_vm6, %v6571_v30  ;;  %5362 = vmatmul.msk.f32.gmra.mxu1 %vm14556_vm4, %v6572_v17  ;;  %vm14569_vm6 = vmmov %vm14548_vm1 }
 0x39f   :  { %vm14570_vm4 = vmmov %vm14533_vm0 }
 0x3a6   :  { %5394 = vmatmul.msk.f32.gmra.mxu0 %vm14557_vm11, %v6573_v61  ;;  %5363 = vmatmul.msk.f32.gmra.mxu1 %vm14558_vm8, %v6574_v42  ;;  %vm14571_vm11 = vmmov %vm14548_vm1  ;;  %v6603_v61 = vld [vmem:[%s14244_s1 + $0xd8] sm:$0xff]  ;;  %v6604_v42 = vld [vmem:[%s14245_s2 + $0xe0] sm:$0xff] }
 0x3a7   :  { %vm14572_vm8 = vmmov %vm14533_vm0 }
 0x3ae   :  { %5395 = vmatmul.msk.f32.gmra.mxu0 %vm14559_vm15, %v6575_v21  ;;  %5364 = vmatmul.msk.f32.gmra.mxu1 %vm14560_vm9, %v6576_v7  ;;  %vm14573_vm15 = vmmov %vm14548_vm1 }
 0x3af   :  { %vm14574_vm9 = vmmov %vm14533_vm0 }
 0x3b6   :  { %5396 = vmatmul.msk.f32.gmra.mxu0 %vm14561_vm13, %v6577_v22  ;;  %5365 = vmatmul.msk.f32.gmra.mxu1 %vm14562_vm7, %v6578_v8  ;;  %vm14575_vm13 = vmmov %vm14548_vm1  ;;  %v6605_v22 = vld [vmem:[%s14244_s1 + $0xe0] sm:$0xff]  ;;  %v6606_v8 = vld [vmem:[%s14245_s2 + $0xe8] sm:$0xff] }
 0x3b7   :  { %vm14576_vm7 = vmmov %vm14533_vm0 }
 0x3bb   :  { %v1498_v43 = vpop.f32.mrf.mxu0  ;;  %v9032_v27 = vpop.f32.mrf.mxu1 }
 0x3bc   :  { %1501 = vst [vmem:[#allocation2 + $0x1] sm:$0x1] %v1498_v43 }
 0x3bd   :  { %1502 = vst [vmem:[#allocation3 + $0x5] sm:$0x2] %v1498_v43 }
 0x3be   :  { %5397 = vmatmul.msk.f32.gmra.mxu0 %vm14548_vm1, %v6579_v15  ;;  %5366 = vmatmul.msk.f32.gmra.mxu1 %vm14533_vm0, %v6580_v60  ;;  %v6607_v60 = vld [vmem:[%s14244_s1 + $0xe8] sm:$0xff] }
 0x3c3   :  { %v9042_v39 = vpop.f32.mrf.mxu0  ;;  %v9044_v16 = vpop.f32.mrf.mxu1 }
 0x3c6   :  { %5398 = vmatmul.msk.f32.gmra.mxu0 %vm14563_vm5, %v6581_v18  ;;  %5367 = vmatmul.msk.f32.gmra.mxu1 %vm14564_vm2, %v6582_v36  ;;  %vm14577_vm5 = vmmov %vm14548_vm1  ;;  %v6608_v18 = vld [vmem:[%s14245_s2 + $0xf0] sm:$0xff] }
 0x3c7   :  { %vm14578_vm2 = vmmov %vm14533_vm0 }
 0x3cb   :  { %v9054_v25 = vpop.f32.mrf.mxu0  ;;  %v9056_v11 = vpop.f32.mrf.mxu1 }
 0x3ce   :  { %5399 = vmatmul.msk.f32.gmra.mxu0 %vm14565_vm14, %v6583_v51  ;;  %5368 = vmatmul.msk.f32.gmra.mxu1 %vm14566_vm12, %v6584_v0  ;;  %vm14579_vm14 = vmmov %vm14548_vm1  ;;  %v6609_v0 = vld [vmem:[%s14244_s1 + $0xf0] sm:$0xff] }
 0x3cf   :  { %vm14580_vm12 = vmmov %vm14533_vm0 }
 0x3d3   :  { %v9066_v19 = vpop.f32.mrf.mxu0  ;;  %v9068_v28 = vpop.f32.mrf.mxu1 }
 0x3d6   :  { %5400 = vmatmul.msk.f32.gmra.mxu0 %vm14567_vm3, %v6585_v52  ;;  %5369 = vmatmul.msk.f32.gmra.mxu1 %vm14568_vm10, %v6586_v53  ;;  %vm14581_vm3 = vmmov %vm14548_vm1  ;;  %v6610_v52 = vld [vmem:[%s14245_s2 + $0xf8] sm:$0xff] }
 0x3d7   :  { %vm14582_vm10 = vmmov %vm14533_vm0 }
 0x3db   :  { %v9078_v4 = vpop.f32.mrf.mxu0  ;;  %v9080_v48 = vpop.f32.mrf.mxu1 }
 0x3de   :  { %5401 = vmatmul.msk.f32.gmra.mxu0 %vm14569_vm6, %v6587_v44  ;;  %5370 = vmatmul.msk.f32.gmra.mxu1 %vm14570_vm4, %v6588_v24  ;;  %vm14583_vm6 = vmmov %vm14548_vm1  ;;  %v6611_v24 = vld [vmem:[%s14244_s1 + $0xf8] sm:$0xff] }
 0x3df   :  { %vm14584_vm4 = vmmov %vm14533_vm0 }
 0x3e3   :  { %v9090_v56 = vpop.f32.mrf.mxu0  ;;  %v9092_v31 = vpop.f32.mrf.mxu1 }
 0x3e6   :  { %5402 = vmatmul.msk.f32.gmra.mxu0 %vm14571_vm11, %v6589_v49  ;;  %5371 = vmatmul.msk.f32.gmra.mxu1 %vm14572_vm8, %v6590_v46  ;;  %vm14585_vm11 = vmmov %vm14548_vm1 }
 0x3e7   :  { %vm14586_vm8 = vmmov %vm14533_vm0 }
 0x3eb   :  { %v9102_v13 = vpop.f32.mrf.mxu0  ;;  %v9104_v34 = vpop.f32.mrf.mxu1 }
 0x3ee   :  { %5403 = vmatmul.msk.f32.gmra.mxu0 %vm14573_vm15, %v6591_v38  ;;  %5372 = vmatmul.msk.f32.gmra.mxu1 %vm14574_vm9, %v6592_v6  ;;  %vm14587_vm15 = vmmov %vm14548_vm1 }
 0x3ef   :  { %vm14588_vm9 = vmmov %vm14533_vm0 }
 0x3f3   :  { %v9114_v3 = vpop.f32.mrf.mxu0  ;;  %v9116_v41 = vpop.f32.mrf.mxu1 }
 0x3f6   :  { %5404 = vmatmul.msk.f32.gmra.mxu0 %vm14575_vm13, %v6593_v63  ;;  %5373 = vmatmul.msk.f32.gmra.mxu1 %vm14576_vm7, %v6594_v1  ;;  %vm14589_vm13 = vmmov %vm14548_vm1 }
 0x3f7   :  { %vm14590_vm7 = vmmov %vm14533_vm0 }
 0x3fb   :  { %v9126_v20 = vpop.f32.mrf.mxu0  ;;  %v9128_v62 = vpop.f32.mrf.mxu1 }
 0x3fe   :  { %5405 = vmatmul.msk.f32.gmra.mxu0 %vm14548_vm1, %v6595_v58  ;;  %5374 = vmatmul.msk.f32.gmra.mxu1 %vm14533_vm0, %v6596_v50 }
 0x403   :  { %v9138_v32 = vpop.f32.mrf.mxu0  ;;  %v9140_v59 = vpop.f32.mrf.mxu1 }
 0x406   :  { %5406 = vmatmul.msk.f32.gmra.mxu0 %vm14577_vm5, %v6597_v29  ;;  %5375 = vmatmul.msk.f32.gmra.mxu1 %vm14578_vm2, %v6598_v2 }
 0x40b   :  { %v9150_v57 = vpop.f32.mrf.mxu0  ;;  %v9152_v9 = vpop.f32.mrf.mxu1 }
 0x40e   :  { %5407 = vmatmul.msk.f32.gmra.mxu0 %vm14579_vm14, %v6599_v14  ;;  %5376 = vmatmul.msk.f32.gmra.mxu1 %vm14580_vm12, %v6600_v33  ;;  %v1636_v14 = vadd.f32 %v9042_v39, %v9032_v27  ;;  %v1645_v27 = vadd.f32 %v9078_v4, %v9068_v28  ;;  %v1654_v4 = vadd.f32 %v9114_v3, %v9104_v34 }
 0x410   :  { %v5414_v33 = vmul.f32 -1.442695, %v1636_v14 }
 0x412   :  { %6003 = vpow2.f32 %v5414_v33 }
 0x413   :  { %v9162_v45 = vpop.f32.mrf.mxu0  ;;  %v9164_v26 = vpop.f32.mrf.mxu1 }
 0x416   :  { %5408 = vmatmul.msk.f32.gmra.mxu0 %vm14581_vm3, %v6601_v40  ;;  %5377 = vmatmul.msk.f32.gmra.mxu1 %vm14582_vm10, %v6602_v47  ;;  %v1639_v40 = vadd.f32 %v9054_v25, %v9044_v16  ;;  %v5417_v25 = vmul.f32 -1.442695, %v1645_v27 }
 0x41b   :  { %v9174_v30 = vpop.f32.mrf.mxu0  ;;  %v9176_v17 = vpop.f32.mrf.mxu1 }
 0x41e   :  { %5409 = vmatmul.msk.f32.gmra.mxu0 %vm14583_vm6, %v6603_v61  ;;  %5378 = vmatmul.msk.f32.gmra.mxu1 %vm14584_vm4, %v6604_v42  ;;  %v5415_v42 = vmul.f32 -1.442695, %v1639_v40 }
 0x420   :  { %6005 = vpow2.f32 %v5415_v42 }
 0x423   :  { %v9186_v21 = vpop.f32.mrf.mxu0  ;;  %v9188_v7 = vpop.f32.mrf.mxu1 }
 0x426   :  { %5410 = vmatmul.msk.f32.gmra.mxu0 %vm14585_vm11, %v6605_v22  ;;  %5379 = vmatmul.msk.f32.gmra.mxu1 %vm14586_vm8, %v6606_v8  ;;  %v1642_v22 = vadd.f32 %v9066_v19, %v9056_v11  ;;  %v1651_v11 = vadd.f32 %v9102_v13, %v9092_v31  ;;  %v5420_v13 = vmul.f32 -1.442695, %v1654_v4 }
 0x428   :  { %v5416_v8 = vmul.f32 -1.442695, %v1642_v22  ;;  %v5419_v40 = vmul.f32 -1.442695, %v1651_v11 }
 0x42a   :  { %6007 = vpow2.f32 %v5416_v8 }
 0x42b   :  { %v9198_v43 = vpop.f32.mrf.mxu0  ;;  %v9200_v15 = vpop.f32.mrf.mxu1 }
 0x42e   :  { %5411 = vmatmul.msk.f32.gmra.mxu0 %vm14587_vm15, %v6607_v60  ;;  %5380 = vmatmul.msk.f32.gmra.mxu1 %vm14588_vm9, %v6608_v18  ;;  %v6004_v60 = vpop.eup %6003 }
 0x42f   :  { %v9266_v39 = vadd.f32 1.0, %v6004_v60  ;;  %v6006_v16 = vpop.eup %6005 }
 0x430   :  { %v9273_v19 = vadd.f32 1.0, %v6006_v16  ;;  %v6008_v28 = vpop.eup %6007 }
 0x431   :  { %6009 = vrcp.f32 %v9266_v39  ;;  %vm1768_vm0 = vweird.f32 %v9266_v39 }
 0x432   :  { %6011 = vpow2.f32 %v5417_v25  ;;  %v1660_v25 = vadd.f32 %v9138_v32, %v9128_v62  ;;  %v1666_v62 = vadd.f32 %v9162_v45, %v9152_v9  ;;  %vm1783_vm12 = vweird.f32 %v9273_v19 }
 0x433   :  { %v9210_v36 = vpop.f32.mrf.mxu0  ;;  %v9212_v51 = vpop.f32.mrf.mxu1  ;;  %6013 = vrcp.f32 %v9273_v19 }
 0x436   :  { %5412 = vmatmul.msk.f32.gmra.mxu0 %vm14589_vm13, %v6609_v0  ;;  %5381 = vmatmul.msk.f32.gmra.mxu1 %vm14590_vm7, %v6610_v52  ;;  %v1648_v52 = vadd.f32 %v9090_v56, %v9080_v48  ;;  %v9282_v48 = vadd.f32 1.0, %v6008_v28  ;;  %v1657_v56 = vadd.f32 %v9126_v20, %v9116_v41  ;;  %v1774_v28 = vand.u32 2147483648, %v9266_v39 }
 0x437   :  { %v9286_v31 = vpop.eup %6009 }
 0x438   :  { %v5418_v33 = vmul.f32 -1.442695, %v1648_v52  ;;  %v6012_v42 = vpop.eup %6011  ;;  %v5421_v22 = vmul.f32 -1.442695, %v1657_v56  ;;  %v1764_v34 = vmul.f32 %v9286_v31, %v9266_v39  ;;  %v1772_v56 = vand.u32 2147483647, %v9266_v39 }
 0x439   :  { %v9295_v60 = vpop.eup %6013  ;;  %v9297_v41 = vadd.f32 1.0, %v6012_v42  ;;  %vm1769_vm5 = vweird.f32 %v9286_v31  ;;  %vm1798_vm11 = vweird.f32 %v9282_v48 }
 0x43a   :  { %6015 = vpow2.f32 %v5418_v33  ;;  %v1765_v27 = vsub.f32 1.0, %v1764_v34  ;;  %v1779_v52 = vmul.f32 %v9295_v60, %v9273_v19  ;;  %v5422_v34 = vmul.f32 -1.442695, %v1660_v25  ;;  %vm9353_vm14 = vmor %vm1768_vm0, %vm1769_vm5 }
 0x43b   :  { %v9222_v53 = vpop.f32.mrf.mxu0  ;;  %v9224_v44 = vpop.f32.mrf.mxu1  ;;  %6017 = vpow2.f32 %v5419_v40  ;;  %v1663_v40 = vadd.f32 %v9150_v57, %v9140_v59  ;;  %v1669_v59 = vadd.f32 %v9174_v30, %v9164_v26  ;;  %v1775_v57 = vor.u32 1.1754944e-38, %v1774_v28 }
 0x43c   :  { %14591 = vst [vmem:[#allocation9_spill] sm:$0xff] %v9224_v44  ;;  %6019 = vrcp.f32 %v9282_v48  ;;  %v1766_v32 = vmul.f32 %v9286_v31, %v1765_v27  ;;  %v1672_v27 = vadd.f32 %v9186_v21, %v9176_v17  ;;  %vm9332_vm2 = vcmp.eq.f32.partialorder %v1772_v56, 8.507059e+37 }
 0x43d   :  { %6021 = vpow2.f32 %v5420_v13  ;;  %v5423_v45 = vmul.f32 -1.442695, %v1663_v40  ;;  %v5424_v26 = vmul.f32 -1.442695, %v1666_v62  ;;  %v1675_v17 = vadd.f32 %v9198_v43, %v9188_v7 }
 0x43e   :  { %5413 = vmatmul.msk.f32.gmra.mxu0 %vm14548_vm1, %v6611_v24  ;;  %6023 = vpow2.f32 %v5421_v22  ;;  %v1767_v30 = vadd.f32 %v9286_v31, %v1766_v32  ;;  %v1678_v40 = vadd.f32 %v9210_v36, %v9200_v15  ;;  %v5426_v62 = vmul.f32 -1.442695, %v1672_v27 }
 0x43f   :  { %6025 = vrcp.f32 %v9297_v41  ;;  %v1681_v43 = vadd.f32 %v9222_v53, %v9212_v51  ;;  %v1789_v36 = vand.u32 2147483648, %v9273_v19  ;;  %vm1784_vm3 = vweird.f32 %v9295_v60 }
 0x440   :  { %v6016_v20 = vpop.eup %6015  ;;  %v1771_v15 = vsel %vm9353_vm14, %v9286_v31, %v1767_v30  ;;  %v5428_v53 = vmul.f32 -1.442695, %v1678_v40  ;;  %v1802_v27 = vand.u32 2147483647, %v9282_v48  ;;  %vm9392_vm6 = vmor %vm1783_vm12, %vm1784_vm3  ;;  %vm1813_vm9 = vweird.f32 %v9297_v41 }
 0x441   :  { %v6018_v16 = vpop.eup %6017  ;;  %v9307_v33 = vadd.f32 1.0, %v6016_v20  ;;  %v1780_v20 = vsub.f32 1.0, %v1779_v52  ;;  %v1787_v52 = vand.u32 2147483647, %v9273_v19  ;;  %v1790_v40 = vor.u32 1.1754944e-38, %v1789_v36 }
 0x442   :  { %v9303_v11 = vpop.eup %6019  ;;  %v9312_v13 = vadd.f32 1.0, %v6018_v16  ;;  %vm9411_vm8 = vcmp.eq.f32.partialorder %v1802_v27, 8.507059e+37 }
 0x443   :  { %v9230_v49 = vpop.f32.mrf.mxu0  ;;  %v9232_v46 = vpop.f32.mrf.mxu1  ;;  %v1794_v9 = vmul.f32 %v9303_v11, %v9282_v48  ;;  %6027 = vrcp.f32 %v9307_v33  ;;  %v1781_v21 = vmul.f32 %v9295_v60, %v1780_v20  ;;  %v5427_v20 = vmul.f32 -1.442695, %v1675_v17 }
 0x444   :  { %14592 = vst [vmem:[#allocation17_spill] sm:$0xff] %v9230_v49  ;;  %v6022_v4 = vpop.eup %6021  ;;  %6029 = vrcp.f32 %v9312_v13  ;;  %vm9377_vm10 = vcmp.eq.f32.partialorder %v1787_v52, 8.507059e+37  ;;  %vm1799_vm4 = vweird.f32 %v9303_v11  ;;  %vm1828_vm0 = vweird.f32 %v9307_v33 }
 0x445   :  { %14593 = vst [vmem:[#allocation16_spill] sm:$0xff] %v9232_v46  ;;  %v6024_v12 = vpop.eup %6023  ;;  %v9322_v54 = vadd.f32 1.0, %v6022_v4  ;;  %6031 = vpow2.f32 %v5422_v34  ;;  %v5425_v4 = vmul.f32 -1.442695, %v1669_v59  ;;  %v1795_v56 = vsub.f32 1.0, %v1794_v9  ;;  %vm9431_vm15 = vmor %vm1798_vm11, %vm1799_vm4 }
 0x446   :  { %v9336_v25 = vpop.eup %6025  ;;  %v9341_v28 = vadd.f32 1.0, %v6024_v12  ;;  %v1782_v59 = vadd.f32 %v9295_v60, %v1781_v21  ;;  %v5429_v21 = vmul.f32 -1.442695, %v1681_v43  ;;  %vm1843_vm3 = vweird.f32 %v9312_v13 }
 0x447   :  { %6033 = vrcp.f32 %v9322_v54  ;;  %v1809_v7 = vmul.f32 %v9336_v25, %v9297_v41  ;;  %v1796_v9 = vmul.f32 %v9303_v11, %v1795_v56  ;;  %vm1814_vm7 = vweird.f32 %v9336_v25 }
 0x448   :  { %6035 = vpow2.f32 %v5423_v45  ;;  %v1786_v12 = vsel %vm9392_vm6, %v9295_v60, %v1782_v59  ;;  %vm9467_vm1 = vmor %vm1813_vm9, %vm1814_vm7  ;;  %vm1858_vm6 = vweird.f32 %v9322_v54  ;;  %v1862_v31 = vand.u32 2147483647, %v9322_v54 }
 0x449   :  { %6037 = vpow2.f32 %v5424_v26  ;;  %v9370_v34 = vpop.eup %6027  ;;  %v1804_v26 = vand.u32 2147483648, %v9282_v48  ;;  %v1810_v30 = vsub.f32 1.0, %v1809_v7  ;;  %v1797_v7 = vadd.f32 %v9303_v11, %v1796_v9 }
 0x44a   :  { %6039 = vrcp.f32 %v9341_v28  ;;  %v9375_v51 = vpop.eup %6029  ;;  %v1824_v56 = vmul.f32 %v9370_v34, %v9307_v33  ;;  %v1819_v9 = vand.u32 2147483648, %v9297_v41  ;;  %v9427_v27 = vsel %vm9377_vm10, %v1790_v40, %v1786_v12 }
 0x44b   :  { %v9234_v38 = vpop.f32.mrf.mxu0  ;;  %v9236_v6 = vpop.f32.mrf.mxu1  ;;  %6041 = vpow2.f32 %v5425_v4  ;;  %v9388_v4 = vsel %vm9332_vm2, %v1775_v57, %v1771_v15  ;;  %v1817_v57 = vand.u32 2147483647, %v9297_v41  ;;  %v1839_v43 = vmul.f32 %v9375_v51, %v9312_v13  ;;  %14609 = vst [vmem:[#allocation14_spill] sm:$0xff] %v9427_v27 }
 0x44c   :  { %14594 = vst [vmem:[#allocation12_spill] sm:$0xff] %v9234_v38  ;;  %v6032_v45 = vpop.eup %6031  ;;  %6043 = vpow2.f32 %v5426_v62  ;;  %v1805_v60 = vor.u32 1.1754944e-38, %v1804_v26  ;;  %v1825_v5 = vsub.f32 1.0, %v1824_v56  ;;  %vm1829_vm5 = vweird.f32 %v9370_v34 }
 0x44d   :  { %14595 = vst [vmem:[#allocation13_spill] sm:$0xff] %v9236_v6  ;;  %v9384_v17 = vpop.eup %6033  ;;  %6045 = vpow2.f32 %v5427_v20  ;;  %v9403_v19 = vadd.f32 1.0, %v6032_v45  ;;  %v1811_v20 = vmul.f32 %v9336_v25, %v1810_v30  ;;  %vm9442_vm13 = vcmp.eq.f32.partialorder %v1817_v57, 8.507059e+37  ;;  %vm9514_vm12 = vmor %vm1828_vm0, %vm1829_vm5 }
 0x44e   :  { %14604 = vst [vmem:[#allocation11_spill] sm:$0xff] %v9388_v4  ;;  %v6036_v62 = vpop.eup %6035  ;;  %6047 = vpow2.f32 %v5428_v53  ;;  %v1854_v30 = vmul.f32 %v9384_v17, %v9322_v54  ;;  %v1840_v40 = vsub.f32 1.0, %v1839_v43  ;;  %v1826_v57 = vmul.f32 %v9370_v34, %v1825_v5 }
 0x44f   :  { %v6038_v16 = vpop.eup %6037  ;;  %v9416_v45 = vadd.f32 1.0, %v6036_v62  ;;  %6049 = vpow2.f32 %v5429_v21  ;;  %v1801_v21 = vsel %vm9431_vm15, %v9303_v11, %v1797_v7  ;;  %v1812_v12 = vadd.f32 %v9336_v25, %v1811_v20 }
 0x450   :  { %v9408_v15 = vpop.eup %6039  ;;  %v9423_v48 = vadd.f32 1.0, %v6038_v16  ;;  %6051 = vrcp.f32 %v9403_v19  ;;  %v1820_v11 = vor.u32 1.1754944e-38, %v1819_v9  ;;  %v1832_v7 = vand.u32 2147483647, %v9307_v33 }
 0x451   :  { %v6042_v59 = vpop.eup %6041  ;;  %v1869_v16 = vmul.f32 %v9408_v15, %v9341_v28  ;;  %6053 = vrcp.f32 %v9416_v45  ;;  %v1834_v43 = vand.u32 2147483648, %v9307_v33  ;;  %v1855_v20 = vsub.f32 1.0, %v1854_v30 }
 0x452   :  { %v6044_v55 = vpop.eup %6043  ;;  %v9446_v62 = vadd.f32 1.0, %v6042_v59  ;;  %6055 = vrcp.f32 %v9423_v48  ;;  %v9463_v10 = vsel %vm9411_vm8, %v1805_v60, %v1801_v21  ;;  %v1841_v5 = vmul.f32 %v9375_v51, %v1840_v40 }
 0x453   :  { %v9238_v63 = vpop.f32.mrf.mxu0  ;;  %v9240_v1 = vpop.f32.mrf.mxu1  ;;  %v9453_v26 = vadd.f32 1.0, %v6044_v55  ;;  %14614 = vst [vmem:[#allocation8_spill] sm:$0xff] %v9463_v10  ;;  %v1816_v36 = vsel %vm9467_vm1, %v9336_v25, %v1812_v12  ;;  %v1870_v60 = vsub.f32 1.0, %v1869_v16  ;;  %v1827_v21 = vadd.f32 %v9370_v34, %v1826_v57 }
 0x454   :  { %14596 = vst [vmem:[#allocation15_spill] sm:$0xff] %v9238_v63  ;;  %v6046_v56 = vpop.eup %6045  ;;  %6057 = vrcp.f32 %v9446_v62  ;;  %v1847_v40 = vand.u32 2147483647, %v9312_v13  ;;  %vm9489_vm2 = vcmp.eq.f32.partialorder %v1832_v7, 8.507059e+37  ;;  %v1835_v25 = vor.u32 1.1754944e-38, %v1834_v43 }
 0x455   :  { %v6048_v23 = vpop.eup %6047  ;;  %v9459_v37 = vadd.f32 1.0, %v6046_v56  ;;  %6059 = vrcp.f32 %v9453_v26  ;;  %v1856_v12 = vmul.f32 %v9384_v17, %v1855_v20  ;;  %v9499_v57 = vsel %vm9442_vm13, %v1820_v11, %v1816_v36 }
 0x456   :  { %v6050_v59 = vpop.eup %6049  ;;  %v9474_v9 = vadd.f32 1.0, %v6048_v23  ;;  %vm1844_vm14 = vweird.f32 %v9375_v51  ;;  %v1871_v11 = vmul.f32 %v9408_v15, %v1870_v60  ;;  %v1831_v20 = vsel %vm9514_vm12, %v9370_v34, %v1827_v21 }
 0x457   :  { %v9479_v30 = vpop.eup %6051  ;;  %v9487_v56 = vadd.f32 1.0, %v6050_v59  ;;  %6061 = vrcp.f32 %v9459_v37  ;;  %v1842_v59 = vadd.f32 %v9375_v51, %v1841_v5  ;;  %vm9523_vm10 = vcmp.eq.f32.partialorder %v1847_v40, 8.507059e+37  ;;  %vm9534_vm4 = vmor %vm1843_vm3, %vm1844_vm14 }
 0x458   :  { %v9494_v16 = vpop.eup %6053  ;;  %v1916_v43 = vmul.f32 %v9479_v30, %v9403_v19  ;;  %6063 = vrcp.f32 %v9474_v9  ;;  %v1849_v36 = vand.u32 2147483648, %v9312_v13  ;;  %v1857_v34 = vadd.f32 %v9384_v17, %v1856_v12 }
 0x459   :  { %v9505_v7 = vpop.eup %6055  ;;  %v1931_v35 = vmul.f32 %v9494_v16, %v9416_v45  ;;  %6065 = vrcp.f32 %v9487_v56  ;;  %vm1859_vm11 = vweird.f32 %v9384_v17  ;;  %v1846_v40 = vsel %vm9534_vm4, %v9375_v51, %v1842_v59 }
 0x45a   :  { %v9529_v33 = vpop.eup %6057  ;;  %v1946_v13 = vmul.f32 %v9505_v7, %v9423_v48  ;;  %v1864_v49 = vand.u32 2147483648, %v9322_v54  ;;  %v1917_v44 = vsub.f32 1.0, %v1916_v43  ;;  %v1872_v4 = vadd.f32 %v9408_v15, %v1871_v11  ;;  %vm9564_vm15 = vmor %vm1858_vm6, %vm1859_vm11 }
 0x45b   :  { %v9242_v58 = vpop.f32.mrf.mxu0  ;;  %v9244_v50 = vpop.f32.mrf.mxu1  ;;  %vm1874_vm8 = vweird.f32 %v9408_v15  ;;  %v1877_v12 = vand.u32 2147483647, %v9341_v28  ;;  %v1961_v46 = vmul.f32 %v9529_v33, %v9446_v62  ;;  %v9558_v60 = vsel %vm9489_vm2, %v1835_v25, %v1831_v20 }
 0x45c   :  { %v9540_v21 = vpop.eup %6059  ;;  %v1850_v59 = vor.u32 1.1754944e-38, %v1849_v36  ;;  %v1879_v11 = vand.u32 2147483648, %v9341_v28  ;;  %v1932_v63 = vsub.f32 1.0, %v1931_v35  ;;  %v1861_v25 = vsel %vm9564_vm15, %v9384_v17, %v1857_v34 }
 0x45d   :  { %v9552_v38 = vpop.eup %6061  ;;  %v1976_v23 = vmul.f32 %v9540_v21, %v9453_v26  ;;  %vm1873_vm9 = vweird.f32 %v9341_v28  ;;  %v1947_v20 = vsub.f32 1.0, %v1946_v13  ;;  %vm1863_vm13 = vcmp.eq.f32.partialorder %v1862_v31, 8.507059e+37 }
 0x45e   :  { %v9569_v27 = vpop.eup %6063  ;;  %v1851_v54 = vsel %vm9523_vm10, %v1850_v59, %v1846_v40  ;;  %v1865_v36 = vor.u32 1.1754944e-38, %v1864_v49  ;;  %vm9581_vm7 = vmor %vm1873_vm9, %vm1874_vm8  ;;  %v1991_v43 = vmul.f32 %v9552_v38, %v9459_v37  ;;  %vm1878_vm1 = vcmp.eq.f32.partialorder %v1877_v12, 8.507059e+37 }
 0x45f   :  { %v9585_v35 = vpop.eup %6065  ;;  %v1876_v28 = vsel %vm9581_vm7, %v9408_v15, %v1872_v4  ;;  %v1918_v17 = vmul.f32 %v9479_v30, %v1917_v44  ;;  %v1962_v5 = vsub.f32 1.0, %v1961_v46  ;;  %v2006_v49 = vmul.f32 %v9569_v27, %v9474_v9 }
 0x460   :  { %v1866_v13 = vsel %vm1863_vm13, %v1865_v36, %v1861_v25  ;;  %v1880_v40 = vor.u32 1.1754944e-38, %v1879_v11  ;;  %v1977_v31 = vsub.f32 1.0, %v1976_v23  ;;  %v1933_v59 = vmul.f32 %v9494_v16, %v1932_v63 }
 0x461   :  { %v2021_v6 = vmul.f32 %v9585_v35, %v9487_v56  ;;  %v1948_v44 = vmul.f32 %v9505_v7, %v1947_v20  ;;  %v1992_v15 = vsub.f32 1.0, %v1991_v43  ;;  %v1954_v12 = vand.u32 2147483647, %v9423_v48 }
 0x462   :  { %v9600_v4 = vsel %vm1878_vm1, %v1880_v40, %v1876_v28  ;;  %v9607_v63 = vadd.f32 %v9479_v30, %v1918_v17  ;;  %v2007_v23 = vsub.f32 1.0, %v2006_v49  ;;  %v2001_v36 = vand.u32 2147483648, %v9459_v37 }
 0x463   :  { %v9246_v29 = vpop.f32.mrf.mxu0  ;;  %v9248_v2 = vpop.f32.mrf.mxu1  ;;  %v1978_v20 = vmul.f32 %v9540_v21, %v1977_v31  ;;  %v1969_v43 = vand.u32 2147483647, %v9446_v62  ;;  %v9615_v10 = vadd.f32 %v9494_v16, %v1933_v59  ;;  %v2022_v11 = vsub.f32 1.0, %v2021_v6 }
 0x464   :  { %v9620_v46 = vadd.f32 %v9505_v7, %v1948_v44  ;;  %v1993_v28 = vmul.f32 %v9552_v38, %v1992_v15  ;;  %v1986_v31 = vand.u32 2147483648, %v9453_v26  ;;  %v1999_v59 = vand.u32 2147483647, %v9459_v37 }
 0x465   :  { %v9628_v6 = vor.u32 1.1754944e-38, %v2001_v36  ;;  %vm1996_vm0 = vweird.f32 %v9552_v38  ;;  %v9637_v15 = vadd.f32 %v9540_v21, %v1978_v20  ;;  %vm2010_vm5 = vweird.f32 %v9474_v9 }
 0x466   :  { %v2016_v36 = vand.u32 2147483648, %v9474_v9  ;;  %vm1995_vm2 = vweird.f32 %v9459_v37  ;;  %vm1981_vm14 = vweird.f32 %v9540_v21  ;;  %vm2011_vm12 = vweird.f32 %v9569_v27  ;;  %v14655_v37 = vld [vmem:[#allocation9_spill] sm:$0xff] }
 0x467   :  { %vm2025_vm10 = vweird.f32 %v9487_v56  ;;  %vm1980_vm6 = vweird.f32 %v9453_v26  ;;  %vm1966_vm4 = vweird.f32 %v9529_v33  ;;  %vm1951_vm11 = vweird.f32 %v9505_v7  ;;  %vm9682_vm9 = vmor %vm2010_vm5, %vm2011_vm12 }
 0x468   :  { %vm2026_vm8 = vweird.f32 %v9585_v35  ;;  %vm1965_vm15 = vweird.f32 %v9446_v62  ;;  %vm1950_vm13 = vweird.f32 %v9423_v48  ;;  %vm1936_vm7 = vweird.f32 %v9494_v16 }
 0x469   :  { %vm9701_vm1 = vmor %vm2025_vm10, %vm2026_vm8  ;;  %vm1935_vm5 = vweird.f32 %v9416_v45  ;;  %vm1921_vm12 = vweird.f32 %v9479_v30  ;;  %vm1920_vm8 = vweird.f32 %v9403_v19 }
 0x46a   :  { %vm9723_vm10 = vmor %vm1995_vm2, %vm1996_vm0  ;;  %vm9738_vm0 = vcmp.eq.f32.partialorder %v1954_v12, 8.507059e+37  ;;  %v1987_v12 = vor.u32 1.1754944e-38, %v1986_v31 }
 0x46b   :  { %v9254_v47 = vpop.f32.mrf.mxu0  ;;  %v9256_v61 = vpop.f32.mrf.mxu1  ;;  %vm9747_vm2 = vmor %vm1980_vm6, %vm1981_vm14 }
 0x46c   :  { %vm9774_vm6 = vmor %vm1965_vm15, %vm1966_vm4 }
 0x46d   :  { %vm9801_vm4 = vmor %vm1935_vm5, %vm1936_vm7  ;;  %vm14688_vm5 = vcmask 64512  }
 0x473   :  { %v9260_v18 = vpop.f32.mrf.mxu0  ;;  %v9262_v0 = vpop.f32.mrf.mxu1 }
 0x47b   :  { %v9275_v24 = vpop.f32.mrf.mxu0  ;;  %v9277_v14 = vpop.f32.mrf.mxu1 }
 0x483   :  { %v9289_v8 = vpop.f32.mrf.mxu0  ;;  %v9293_v3 = vpop.f32.mrf.mxu1 }
 0x484   :  { %14597 = vst [vmem:[#allocation10_spill] sm:$0xff] %v9289_v8  ;;  %v1963_v8 = vmul.f32 %v9529_v33, %v1962_v5  ;;  %v2014_v5 = vand.u32 2147483647, %v9474_v9  ;;  %v14634_v9 = vld [vmem:[#allocation8_spill] sm:$0xff] }
 0x486   :  { %vm9649_vm3 = vcmp.eq.f32.partialorder %v2014_v5, 8.507059e+37  ;;  %v6632_v5 = vld [vmem:[%s14244_s1 + $0x48] sm:$0xff] }
 0x48b   :  { %v9317_v42 = vpop.f32.mrf.mxu0  ;;  %v9319_v22 = vpop.f32.mrf.mxu1 }
 0x493   :  { %v9366_v39 = vpop.f32.mrf.mxu0  ;;  %v9368_v32 = vpop.f32.mrf.mxu1 }
 0x49b   :  { %v9418_v53 = vpop.f32.mrf.mxu0  ;;  %v9421_v52 = vpop.f32.mrf.mxu1 }
 0x4a3   :  { %v9482_v41 = vpop.f32.mrf.mxu0  ;;  %v9501_v55 = vpop.f32.mrf.mxu1 }
 0x4ab   :  { %v1722_v51 = vpop.f32.mrf.mxu0  ;;  %v1612_v34 = vpop.f32.mrf.mxu1 }
 0x4ac   :  { %v1723_v17 = vadd.f32 %v1722_v51, %v9501_v55  ;;  %v9631_v55 = vadd.f32 %v9529_v33, %v1963_v8  ;;  %v1720_v51 = vadd.f32 %v9482_v41, %v9421_v52  ;;  %v1702_v8 = vadd.f32 %v9260_v18, %v9256_v61 }
 0x4ad   :  { %v1717_v52 = vadd.f32 %v9418_v53, %v9368_v32  ;;  %v2031_v61 = vand.u32 2147483648, %v9487_v56  ;;  %v1714_v32 = vadd.f32 %v9366_v39, %v9319_v22  ;;  %v1711_v22 = vadd.f32 %v9317_v42, %v9293_v3 }
 0x4ae   :  { %v2039_v53 = vmul.f32 %v9558_v60, %v1720_v51  ;;  %v2029_v3 = vand.u32 2147483647, %v9487_v56  ;;  %v14639_v56 = vld [vmem:[#allocation13_spill] sm:$0xff]  ;;  %v14641_v51 = vld [vmem:[#allocation14_spill] sm:$0xff] }
 0x4af   :  { %v2038_v39 = vmul.f32 %v9499_v57, %v1717_v52  ;;  %v2037_v57 = vmul.f32 %v14634_v9, %v1714_v32  ;;  %v6622_v9 = vld [vmem:[%s14244_s1 + $0x20] sm:$0xff] }
 0x4b3   :  { %v1725_v25 = vpop.f32.mrf.mxu0  ;;  %v1615_v49 = vpop.f32.mrf.mxu1 }
 0x4b4   :  { %v1726_v40 = vadd.f32 %v1725_v25, %v1612_v34  ;;  %v2008_v25 = vmul.f32 %v9569_v27, %v2007_v23  ;;  %v2040_v34 = vmul.f32 %v1851_v54, %v1723_v17  ;;  %v2023_v23 = vmul.f32 %v9585_v35, %v2022_v11 }
 0x4b5   :  { %v9654_v54 = vadd.f32 %v9552_v38, %v1993_v28  ;;  %v1705_v17 = vadd.f32 %v9275_v24, %v9262_v0  ;;  %v14633_v0 = vld [vmem:[#allocation10_spill] sm:$0xff] }
 0x4b6   :  { %v2041_v44 = vmul.f32 %v1866_v13, %v1726_v40  ;;  %v1699_v13 = vadd.f32 %v9254_v47, %v9248_v2  ;;  %v2009_v18 = vadd.f32 %v9569_v27, %v2008_v25  ;;  %v1696_v2 = vadd.f32 %v9246_v29, %v9244_v50 }
 0x4b7   :  { %v2024_v20 = vadd.f32 %v9585_v35, %v2023_v23  ;;  %v1693_v29 = vadd.f32 %v9242_v58, %v9240_v1  ;;  %v1708_v24 = vadd.f32 %v14633_v0, %v9277_v14  ;;  %v2032_v14 = vor.u32 1.1754944e-38, %v2031_v61  ;;  %v14648_v61 = vld [vmem:[#allocation11_spill] sm:$0xff] }
 0x4b8   :  { %v2049_v28 = vadd.f32 %v2041_v44, %v1702_v8  ;;  %v2048_v47 = vadd.f32 %v2040_v34, %v1699_v13  ;;  %v2013_v42 = vsel %vm9682_vm9, %v9569_v27, %v2009_v18  ;;  %v2017_v27 = vor.u32 1.1754944e-38, %v2016_v36  ;;  %v14640_v34 = vld [vmem:[#allocation15_spill] sm:$0xff]  ;;  %v14645_v36 = vld [vmem:[#allocation12_spill] sm:$0xff] }
 0x4b9   :  { %v2028_v58 = vsel %vm9701_vm1, %v9585_v35, %v2024_v20  ;;  %vm9712_vm9 = vcmp.eq.f32.partialorder %v1969_v43, 8.507059e+37  ;;  %v1690_v25 = vadd.f32 %v14640_v34, %v14639_v56  ;;  %v2036_v44 = vmul.f32 %v14641_v51, %v1711_v22  ;;  %v14644_v43 = vld [vmem:[#allocation16_spill] sm:$0xff] }
 0x4ba   :  { %6067 = vtanh.f32 %v2049_v28  ;;  %v2046_v23 = vadd.f32 %v2038_v39, %v1693_v29  ;;  %v1687_v8 = vadd.f32 %v14645_v36, %v14644_v43  ;;  %vm2030_vm1 = vcmp.eq.f32.partialorder %v2029_v3, 8.507059e+37  ;;  %v14662_v3 = vld [vmem:[#allocation22_spill] sm:$0xff] }
 0x4bb   :  { %v1728_v11 = vpop.f32.mrf.mxu0  ;;  %6069 = vtanh.f32 %v2048_v47  ;;  %v2018_v52 = vsel %vm9649_vm3, %v2017_v27, %v2013_v42  ;;  %v1998_v13 = vsel %vm9723_vm10, %v9552_v38, %v9654_v54  ;;  %v2035_v18 = vmul.f32 %v14648_v61, %v1708_v24 }
 0x4bc   :  { %v1729_v40 = vadd.f32 %v1728_v11, %v1615_v49  ;;  %v2045_v32 = vadd.f32 %v2037_v57, %v1690_v25  ;;  %vm2000_vm3 = vcmp.eq.f32.partialorder %v1999_v59, 8.507059e+37  ;;  %v1983_v38 = vsel %vm9747_vm2, %v9540_v21, %v9637_v15  ;;  %v14656_v59 = vld [vmem:[#allocation17_spill] sm:$0xff] }
 0x4bd   :  { %v14651_v54 = vand.u32 2147483648, %v9446_v62  ;;  %v1684_v20 = vadd.f32 %v14656_v59, %v14655_v37  ;;  %v2003_v21 = vsel %vm2000_vm3, %v9628_v6, %v1998_v13  ;;  %v2065_v39 = vsub.f32 1.0, %v2018_v52  ;;  %v14676_v13 = vld [vmem:[#allocation21_spill] sm:$0xff] }
 0x4be   :  { %v2042_v60 = vmul.f32 %v9600_v4, %v1729_v40  ;;  %v2047_v4 = vadd.f32 %v2039_v53, %v1696_v2  ;;  %v2033_v53 = vsel %vm2030_vm1, %v2032_v14, %v2028_v58  ;;  %v14652_v40 = vand.u32 2147483647, %v9416_v45  ;;  %vm9788_vm1 = vmor %vm1950_vm13, %vm1951_vm11  ;;  %v14667_v58 = vld [vmem:[#allocation25_spill] sm:$0xff]  ;;  %v14680_v2 = vld [vmem:[#allocation18_spill] sm:$0xff] }
 0x4bf   :  { %v1972_v28 = vor.u32 1.1754944e-38, %v14651_v54  ;;  %v2066_v22 = vsub.f32 1.0, %v2033_v53  ;;  %v1968_v50 = vsel %vm9774_vm6, %v9529_v33, %v9631_v55  ;;  %v2043_v29 = vadd.f32 %v2035_v18, %v1684_v20  ;;  %vm9820_vm11 = vmor %vm1920_vm8, %vm1921_vm12  ;;  %v6612_v62 = vld [vmem:[%s14246_s3] sm:$0x3] }
 0x4c0   :  { %v2050_v49 = vadd.f32 %v2042_v60, %v1705_v17  ;;  %vm9763_vm14 = vcmp.eq.f32.partialorder %v14652_v40, 8.507059e+37  ;;  %v6068_v47 = vpop.eup %6067  ;;  %v2044_v17 = vadd.f32 %v2036_v44, %v1687_v8  ;;  %v14659_v60 = vand.u32 2147483647, %v9453_v26  ;;  %v14672_v44 = vld [vmem:[#allocation20_spill] sm:$0xff] }
 0x4c1   :  { %v6070_v15 = vpop.eup %6069  ;;  %v1953_v26 = vsel %vm9788_vm1, %v9505_v7, %v9620_v46  ;;  %v2082_v33 = vmul.f32 %v2033_v53, %v14662_v3  ;;  %v2073_v55 = vmul.f32 %v6068_v47, %v2065_v39  ;;  %v2064_v42 = vsub.f32 1.0, %v2003_v21  ;;  %v6618_v3 = vld [vmem:[%s14244_s1 + $0x10] sm:$0xff] }
 0x4c2   :  { %6071 = vtanh.f32 %v2050_v49  ;;  %vm1985_vm10 = vcmp.eq.f32.partialorder %v14659_v60, 8.507059e+37  ;;  %v14665_v7 = vand.u32 2147483648, %v9423_v48  ;;  %v1938_v49 = vsel %vm9801_vm4, %v9494_v16, %v9615_v10 }
 0x4c3   :  { %6073 = vtanh.f32 %v2047_v4  ;;  %v1988_v0 = vsel %vm1985_vm10, %v1987_v12, %v1983_v38  ;;  %v1973_v4 = vsel %vm9712_vm9, %v1972_v28, %v1968_v50  ;;  %v2081_v14 = vmul.f32 %v2018_v52, %v14667_v58  ;;  %v5431_v50 = vld [vmem:[%s14243_s0 + $0x18] sm:$0xff]  ;;  %vm14690_vm9 = vmmov %vm14688_vm5 }
 0x4c4   :  { %6075 = vtanh.f32 %v2046_v23  ;;  %v1957_v46 = vor.u32 1.1754944e-38, %v14665_v7  ;;  %v2072_v27 = vmul.f32 %v6070_v15, %v2064_v42  ;;  %v2063_v56 = vsub.f32 1.0, %v1988_v0  ;;  %v6621_v42 = vld [vmem:[%s14245_s2 + $0x20] sm:$0xff]  ;;  %v6625_v7 = vld [vmem:[%s14245_s2 + $0x30] sm:$0xff]  ;;  %v6628_v58 = vld [vmem:[%s14244_s1 + $0x38] sm:$0xff] }
 0x4c5   :  { %6077 = vtanh.f32 %v2045_v32  ;;  %v14670_v10 = vand.u32 2147483648, %v9416_v45  ;;  %v1923_v25 = vsel %vm9820_vm11, %v9479_v30, %v9607_v63  ;;  %v9834_v51 = vadd.f32 %v2081_v14, %v2073_v55  ;;  %v6620_v55 = vld [vmem:[%s14244_s1 + $0x18] sm:$0xff]  ;;  %v6629_v14 = vld [vmem:[%s14245_s2 + $0x40] sm:$0xff] }
 0x4c6   :  { %6079 = vtanh.f32 %v2044_v17  ;;  %v1958_v34 = vsel %vm9738_vm0, %v1957_v46, %v1953_v26  ;;  %v2080_v23 = vmul.f32 %v2003_v21, %v14672_v44  ;;  %v2062_v43 = vsub.f32 1.0, %v1973_v4  ;;  %v14682_v17 = vld [vmem:[#allocation19_spill] sm:$0xff]  ;;  %v6616_v26 = vld [vmem:[%s14244_s1 + $0x8] sm:$0xff]  ;;  %vm14692_vm0 = vmmov %vm14688_vm5 }
 0x4c7   :  { %6081 = vtanh.f32 %v2043_v29  ;;  %v1942_v16 = vor.u32 1.1754944e-38, %v14670_v10  ;;  %14671 = vst [vmem:[#allocation8_spill] sm:$0xff] %v9834_v51  ;;  %v14673_v8 = vand.u32 2147483647, %v9403_v19  ;;  %v14674_v52 = vand.u32 2147483648, %v9403_v19  ;;  %v14678_v19 = vld [vmem:[#allocation24_spill] sm:$0xff]  ;;  %vm14694_vm3 = vmmov %vm14692_vm0 }
 0x4c8   :  { %v6072_v6 = vpop.eup %6071  ;;  %v9845_v63 = vadd.f32 %v2080_v23, %v2072_v27  ;;  %v2079_v11 = vmul.f32 %v1988_v0, %v14676_v13  ;;  %v2061_v18 = vsub.f32 1.0, %v1958_v34  ;;  %v2078_v38 = vmul.f32 %v1973_v4, %v14678_v19  ;;  %v6614_v29 = vld [vmem:[%s14244_s1] sm:$0xff]  ;;  %v6615_v0 = vld [vmem:[%s14245_s2 + $0x8] sm:$0xff]  ;;  %vm14696_vm6 = vmmov %vm14692_vm0 }
 0x4c9   :  { %v2074_v24 = vmul.f32 %v6072_v6, %v2066_v22  ;;  %v6074_v57 = vpop.eup %6073  ;;  %v1943_v45 = vsel %vm9763_vm14, %v1942_v16, %v1938_v49  ;;  %vm1925_vm15 = vcmp.eq.f32.partialorder %v14673_v8, 8.507059e+37  ;;  %v1927_v30 = vor.u32 1.1754944e-38, %v14674_v52  ;;  %v14684_v22 = vld [vmem:[#allocation23_spill] sm:$0xff]  ;;  %v6613_v6 = vld [vmem:[%s14245_s2] sm:$0xff]  ;;  %v6624_v4 = vld [vmem:[%s14244_s1 + $0x28] sm:$0xff] }
 0x4ca   :  { %v6076_v48 = vpop.eup %6075  ;;  %v2071_v35 = vmul.f32 %v6074_v57, %v2063_v56  ;;  %14675 = vst [vmem:[#allocation13_spill] sm:$0xff] %v9845_v63  ;;  %v2060_v54 = vsub.f32 1.0, %v1943_v45  ;;  %v2077_v47 = vmul.f32 %v1958_v34, %v14680_v2  ;;  %v2076_v21 = vmul.f32 %v1943_v45, %v14682_v17  ;;  %v6623_v57 = vld [vmem:[%s14245_s2 + $0x28] sm:$0xff]  ;;  %vm14698_vm1 = vmmov %vm14692_vm0  ;;  %v6626_v46 = vld [vmem:[%s14244_s1 + $0x30] sm:$0xff] }
 0x4cb   :  { %v9813_v1 = vadd.f32 %v2082_v33, %v2074_v24  ;;  %v6078_v36 = vpop.eup %6077  ;;  %v2070_v61 = vmul.f32 %v6076_v48, %v2062_v43  ;;  %v1928_v53 = vsel %vm1925_vm15, %v1927_v30, %v1923_v25  ;;  %vm14686_vm13 = vcmask 523264   ;;  %v6617_v24 = vld [vmem:[%s14245_s2 + $0x10] sm:$0xff]  ;;  %v6619_v33 = vld [vmem:[%s14245_s2 + $0x18] sm:$0xff]  ;;  %vm14700_vm11 = vmmov %vm14692_vm0 }
 0x4cc   :  { %v6080_v32 = vpop.eup %6079  ;;  %v9850_v41 = vadd.f32 %v2079_v11, %v2071_v35  ;;  %v2069_v12 = vmul.f32 %v6078_v36, %v2061_v18  ;;  %v2059_v59 = vsub.f32 1.0, %v1928_v53  ;;  %v2075_v39 = vmul.f32 %v1928_v53, %v14684_v22  ;;  %vm14687_vm7 = vmmov %vm14686_vm13  ;;  %v6627_v49 = vld [vmem:[%s14245_s2 + $0x38] sm:$0xff]  ;;  %v6630_v27 = vld [vmem:[%s14244_s1 + $0x40] sm:$0xff] }
 0x4cd   :  { %14666 = vst [vmem:[#allocation10_spill] sm:$0xff] %v9813_v1  ;;  %2099 = vmatpush.msrb.mxu3 %v9813_v1  ;;  %2123 = vmatpush.msra.mxu2 %v9813_v1  ;;  %v6082_v28 = vpop.eup %6081  ;;  %v9855_v40 = vadd.f32 %v2078_v38, %v2070_v61  ;;  %v2068_v37 = vmul.f32 %v6080_v32, %v2060_v54  ;;  %vm14689_vm12 = vmmov %vm14687_vm7  ;;  %v6631_v56 = vld [vmem:[%s14245_s2 + $0x48] sm:$0xff]  ;;  %v6633_v48 = vld [vmem:[%s14245_s2 + $0x50] sm:$0xff] }
 0x4ce   :  { %14677 = vst [vmem:[#allocation15_spill] sm:$0xff] %v9850_v41  ;;  %v9860_v20 = vadd.f32 %v2077_v47, %v2069_v12  ;;  %v2067_v31 = vmul.f32 %v6082_v28, %v2059_v59  ;;  %vm14691_vm8 = vmmov %vm14687_vm7  ;;  %v6634_v34 = vld [vmem:[%s14244_s1 + $0x50] sm:$0xff]  ;;  %v6635_v10 = vld [vmem:[%s14245_s2 + $0x58] sm:$0xff] }
 0x4cf   :  { %2100 = vmatpush.msrb.mxu3 %v9834_v51  ;;  %2124 = vmatpush.msra.mxu2 %v9834_v51  ;;  %14679 = vst [vmem:[#allocation14_spill] sm:$0xff] %v9855_v40  ;;  %v9865_v15 = vadd.f32 %v2076_v21, %v2068_v37  ;;  %vm14693_vm2 = vmmov %vm14687_vm7  ;;  %v6636_v16 = vld [vmem:[%s14244_s1 + $0x58] sm:$0xff]  ;;  %v6637_v25 = vld [vmem:[%s14245_s2 + $0x60] sm:$0xff] }
 0x4d0   :  { %14681 = vst [vmem:[#allocation16_spill] sm:$0xff] %v9860_v20  ;;  %v9870_v60 = vadd.f32 %v2075_v39, %v2067_v31  ;;  %vm14695_vm14 = vmmov %vm14693_vm2  ;;  %v6638_v44 = vld [vmem:[%s14244_s1 + $0x60] sm:$0xff]  ;;  %v6639_v23 = vld [vmem:[%s14245_s2 + $0x68] sm:$0xff] }
 0x4d1   :  { %2101 = vmatpush.msrb.mxu3 %v9845_v63  ;;  %2125 = vmatpush.msra.mxu2 %v9845_v63  ;;  %14683 = vst [vmem:[#allocation12_spill] sm:$0xff] %v9865_v15  ;;  %vm14697_vm10 = vmmov %vm14693_vm2  ;;  %v6640_v35 = vld [vmem:[%s14244_s1 + $0x68] sm:$0xff]  ;;  %v6641_v43 = vld [vmem:[%s14245_s2 + $0x70] sm:$0xff] }
 0x4d2   :  { %14685 = vst [vmem:[#allocation11_spill] sm:$0xff] %v9870_v60  ;;  %vm14699_vm4 = vmmov %vm14693_vm2  ;;  %v6642_v36 = vld [vmem:[%s14244_s1 + $0x70] sm:$0xff]  ;;  %v6643_v45 = vld [vmem:[%s14245_s2 + $0x78] sm:$0xff] }
 0x4d3   :  { %2102 = vmatpush.msrb.mxu3 %v9850_v41  ;;  %2126 = vmatpush.msra.mxu2 %v9850_v41  ;;  %vm14701_vm15 = vmmov %vm14693_vm2  ;;  %v6644_v8 = vld [vmem:[%s14244_s1 + $0x78] sm:$0xff]  ;;  %v6645_v52 = vld [vmem:[%s14245_s2 + $0x80] sm:$0xff] }
 0x4d4   :  { %v6646_v11 = vld [vmem:[%s14244_s1 + $0x80] sm:$0xff]  ;;  %v6647_v61 = vld [vmem:[%s14245_s2 + $0x88] sm:$0xff]  ;;  %v6649_v38 = vld [vmem:[%s14245_s2 + $0x90] sm:$0xff] }
 0x4d5   :  { %2103 = vmatpush.msrb.mxu3 %v9855_v40  ;;  %2127 = vmatpush.msra.mxu2 %v9855_v40  ;;  %v6648_v19 = vld [vmem:[%s14244_s1 + $0x88] sm:$0xff]  ;;  %v6650_v2 = vld [vmem:[%s14244_s1 + $0x90] sm:$0xff]  ;;  %v6651_v47 = vld [vmem:[%s14245_s2 + $0x98] sm:$0xff] }
 0x4d6   :  { %v6652_v21 = vld [vmem:[%s14244_s1 + $0x98] sm:$0xff]  ;;  %v6653_v31 = vld [vmem:[%s14245_s2 + $0xa0] sm:$0xff] }
 0x4d7   :  { %2104 = vmatpush.msrb.mxu3 %v9860_v20  ;;  %2128 = vmatpush.msra.mxu2 %v9860_v20 }
 0x4d9   :  { %2105 = vmatpush.msrb.mxu3 %v9865_v15  ;;  %2129 = vmatpush.msra.mxu2 %v9865_v15 }
 0x4db   :  { %2106 = vmatpush.msrb.mxu3 %v9870_v60  ;;  %2130 = vmatpush.msra.mxu2 %v9870_v60 }
 0x4dc   :  { %5430 = vmatmul.msk.f32.vlgmr.msrb.gmra.mxu3 %vm14686_vm13, %v6612_v62  ;;  %5432 = vmatmul.msk.f32.vlgmr.msra.gmra.mxu2 %vm14687_vm7, %v6613_v6  ;;  %vm14702_vm13 = vmmov %vm14692_vm0  ;;  %v6654_v62 = vld [vmem:[%s14244_s1 + $0xa0] sm:$0xff]  ;;  %v6655_v6 = vld [vmem:[%s14245_s2 + $0xa8] sm:$0xff] }
 0x4dd   :  { %2243 = vmatpush.msra.mxu3 %v5431_v50  ;;  %vm14703_vm7 = vmmov %vm14693_vm2 }
 0x4e4   :  { %5464 = vmatmul.msk.f32.vlgmr.msra.gmra.mxu3 %vm14688_vm5, %v6614_v29  ;;  %5433 = vmatmul.msk.f32.gmra.mxu2 %vm14689_vm12, %v6615_v0  ;;  %vm14704_vm5 = vmmov %vm14692_vm0 }
 0x4e5   :  { %vm14705_vm12 = vmmov %vm14693_vm2 }
 0x4ec   :  { %5465 = vmatmul.msk.f32.gmra.mxu3 %vm14690_vm9, %v6616_v26  ;;  %5434 = vmatmul.msk.f32.gmra.mxu2 %vm14691_vm8, %v6617_v24  ;;  %vm14706_vm9 = vmmov %vm14692_vm0  ;;  %v6656_v24 = vld [vmem:[%s14244_s1 + $0xa8] sm:$0xff] }
 0x4ed   :  { %vm14707_vm8 = vmmov %vm14693_vm2 }
 0x4f4   :  { %5466 = vmatmul.msk.f32.gmra.mxu3 %vm14692_vm0, %v6618_v3  ;;  %5435 = vmatmul.msk.f32.gmra.mxu2 %vm14693_vm2, %v6619_v33  ;;  %v6657_v3 = vld [vmem:[%s14245_s2 + $0xb0] sm:$0xff] }
 0x4fc   :  { %5467 = vmatmul.msk.f32.gmra.mxu3 %vm14694_vm3, %v6620_v55  ;;  %5436 = vmatmul.msk.f32.gmra.mxu2 %vm14695_vm14, %v6621_v42  ;;  %vm14708_vm3 = vmmov %vm14692_vm0 }
 0x4fd   :  { %vm14709_vm14 = vmmov %vm14693_vm2 }
 0x504   :  { %5468 = vmatmul.msk.f32.gmra.mxu3 %vm14696_vm6, %v6622_v9  ;;  %5437 = vmatmul.msk.f32.gmra.mxu2 %vm14697_vm10, %v6623_v57  ;;  %vm14710_vm6 = vmmov %vm14692_vm0  ;;  %v6658_v9 = vld [vmem:[%s14244_s1 + $0xb0] sm:$0xff]  ;;  %v6659_v57 = vld [vmem:[%s14245_s2 + $0xb8] sm:$0xff] }
 0x505   :  { %vm14711_vm10 = vmmov %vm14693_vm2 }
 0x50c   :  { %5469 = vmatmul.msk.f32.gmra.mxu3 %vm14698_vm1, %v6624_v4  ;;  %5438 = vmatmul.msk.f32.gmra.mxu2 %vm14699_vm4, %v6625_v7  ;;  %vm14712_vm1 = vmmov %vm14692_vm0 }
 0x50d   :  { %vm14713_vm4 = vmmov %vm14693_vm2 }
 0x514   :  { %5470 = vmatmul.msk.f32.gmra.mxu3 %vm14700_vm11, %v6626_v46  ;;  %5439 = vmatmul.msk.f32.gmra.mxu2 %vm14701_vm15, %v6627_v49  ;;  %vm14714_vm11 = vmmov %vm14692_vm0  ;;  %v6660_v49 = vld [vmem:[%s14244_s1 + $0xb8] sm:$0xff] }
 0x515   :  { %vm14715_vm15 = vmmov %vm14693_vm2 }
 0x51c   :  { %5471 = vmatmul.msk.f32.gmra.mxu3 %vm14702_vm13, %v6628_v58  ;;  %5440 = vmatmul.msk.f32.gmra.mxu2 %vm14703_vm7, %v6629_v14  ;;  %vm14716_vm13 = vmmov %vm14692_vm0  ;;  %v6661_v58 = vld [vmem:[%s14245_s2 + $0xc0] sm:$0xff] }
 0x51d   :  { %vm14717_vm7 = vmmov %vm14693_vm2 }
 0x524   :  { %5472 = vmatmul.msk.f32.gmra.mxu3 %vm14704_vm5, %v6630_v27  ;;  %5441 = vmatmul.msk.f32.gmra.mxu2 %vm14705_vm12, %v6631_v56  ;;  %vm14718_vm5 = vmmov %vm14692_vm0 }
 0x525   :  { %vm14719_vm12 = vmmov %vm14693_vm2 }
 0x52c   :  { %5473 = vmatmul.msk.f32.gmra.mxu3 %vm14706_vm9, %v6632_v5  ;;  %5442 = vmatmul.msk.f32.gmra.mxu2 %vm14707_vm8, %v6633_v48  ;;  %vm14720_vm9 = vmmov %vm14692_vm0  ;;  %v6662_v5 = vld [vmem:[%s14244_s1 + $0xc0] sm:$0xff]  ;;  %v6663_v48 = vld [vmem:[%s14245_s2 + $0xc8] sm:$0xff] }
 0x52d   :  { %vm14721_vm8 = vmmov %vm14693_vm2 }
 0x534   :  { %5474 = vmatmul.msk.f32.gmra.mxu3 %vm14692_vm0, %v6634_v34  ;;  %5443 = vmatmul.msk.f32.gmra.mxu2 %vm14693_vm2, %v6635_v10 }
 0x53c   :  { %5475 = vmatmul.msk.f32.gmra.mxu3 %vm14708_vm3, %v6636_v16  ;;  %5444 = vmatmul.msk.f32.gmra.mxu2 %vm14709_vm14, %v6637_v25  ;;  %vm14722_vm3 = vmmov %vm14692_vm0  ;;  %v6664_v16 = vld [vmem:[%s14244_s1 + $0xc8] sm:$0xff]  ;;  %v6665_v25 = vld [vmem:[%s14245_s2 + $0xd0] sm:$0xff] }
 0x53d   :  { %vm14723_vm14 = vmmov %vm14693_vm2 }
 0x544   :  { %5476 = vmatmul.msk.f32.gmra.mxu3 %vm14710_vm6, %v6638_v44  ;;  %5445 = vmatmul.msk.f32.gmra.mxu2 %vm14711_vm10, %v6639_v23  ;;  %vm14724_vm6 = vmmov %vm14692_vm0 }
 0x545   :  { %vm14725_vm10 = vmmov %vm14693_vm2 }
 0x54c   :  { %5477 = vmatmul.msk.f32.gmra.mxu3 %vm14712_vm1, %v6640_v35  ;;  %5446 = vmatmul.msk.f32.gmra.mxu2 %vm14713_vm4, %v6641_v43  ;;  %vm14726_vm1 = vmmov %vm14692_vm0  ;;  %v6666_v35 = vld [vmem:[%s14244_s1 + $0xd0] sm:$0xff]  ;;  %v6667_v43 = vld [vmem:[%s14245_s2 + $0xd8] sm:$0xff] }
 0x54d   :  { %vm14727_vm4 = vmmov %vm14693_vm2 }
 0x554   :  { %5478 = vmatmul.msk.f32.gmra.mxu3 %vm14714_vm11, %v6642_v36  ;;  %5447 = vmatmul.msk.f32.gmra.mxu2 %vm14715_vm15, %v6643_v45  ;;  %vm14728_vm11 = vmmov %vm14692_vm0 }
 0x555   :  { %vm14729_vm15 = vmmov %vm14693_vm2 }
 0x55c   :  { %5479 = vmatmul.msk.f32.gmra.mxu3 %vm14716_vm13, %v6644_v8  ;;  %5448 = vmatmul.msk.f32.gmra.mxu2 %vm14717_vm7, %v6645_v52  ;;  %vm14730_vm13 = vmmov %vm14692_vm0  ;;  %v6668_v8 = vld [vmem:[%s14244_s1 + $0xd8] sm:$0xff]  ;;  %v6669_v52 = vld [vmem:[%s14245_s2 + $0xe0] sm:$0xff] }
 0x55d   :  { %vm14731_vm7 = vmmov %vm14693_vm2 }
 0x55f   :  { %v2108_v30 = vpop.f32.mrf.mxu3  ;;  %v2132_v13 = vpop.f32.mrf.mxu2 }
 0x560   :  { %2111 = vst [vmem:[#allocation2 + $0x2] sm:$0x1] %v2108_v30 }
 0x561   :  { %2112 = vst [vmem:[#allocation3 + $0x4] sm:$0x2] %v2108_v30 }
 0x564   :  { %5480 = vmatmul.msk.f32.gmra.mxu3 %vm14718_vm5, %v6646_v11  ;;  %5449 = vmatmul.msk.f32.gmra.mxu2 %vm14719_vm12, %v6647_v61  ;;  %vm14732_vm5 = vmmov %vm14692_vm0  ;;  %v6670_v11 = vld [vmem:[%s14244_s1 + $0xe0] sm:$0xff]  ;;  %v6671_v61 = vld [vmem:[%s14245_s2 + $0xe8] sm:$0xff] }
 0x565   :  { %vm14733_vm12 = vmmov %vm14693_vm2 }
 0x567   :  { %v2245_v18 = vpop.f32.mrf.mxu3  ;;  %v2135_v32 = vpop.f32.mrf.mxu2 }
 0x568   :  { %v10021_v53 = vadd.f32 %v2245_v18, %v2132_v13 }
 0x56c   :  { %5481 = vmatmul.msk.f32.gmra.mxu3 %vm14720_vm9, %v6648_v19  ;;  %5450 = vmatmul.msk.f32.gmra.mxu2 %vm14721_vm8, %v6649_v38  ;;  %vm14734_vm9 = vmmov %vm14692_vm0  ;;  %v6672_v19 = vld [vmem:[%s14244_s1 + $0xe8] sm:$0xff]  ;;  %v6673_v38 = vld [vmem:[%s14245_s2 + $0xf0] sm:$0xff] }
 0x56d   :  { %vm14735_vm8 = vmmov %vm14693_vm2 }
 0x56f   :  { %v2248_v12 = vpop.f32.mrf.mxu3  ;;  %v2138_v54 = vpop.f32.mrf.mxu2 }
 0x570   :  { %v10031_v28 = vadd.f32 %v2248_v12, %v2135_v32 }
 0x574   :  { %5482 = vmatmul.msk.f32.gmra.mxu3 %vm14692_vm0, %v6650_v2  ;;  %5451 = vmatmul.msk.f32.gmra.mxu2 %vm14693_vm2, %v6651_v47  ;;  %v6674_v2 = vld [vmem:[%s14244_s1 + $0xf0] sm:$0xff]  ;;  %v6675_v47 = vld [vmem:[%s14245_s2 + $0xf8] sm:$0xff] }
 0x577   :  { %v2251_v37 = vpop.f32.mrf.mxu3  ;;  %v2141_v59 = vpop.f32.mrf.mxu2 }
 0x578   :  { %v10041_v17 = vadd.f32 %v2251_v37, %v2138_v54 }
 0x57c   :  { %5483 = vmatmul.msk.f32.gmra.mxu3 %vm14722_vm3, %v6652_v21  ;;  %5452 = vmatmul.msk.f32.gmra.mxu2 %vm14723_vm14, %v6653_v31  ;;  %vm14736_vm3 = vmmov %vm14692_vm0  ;;  %v6676_v21 = vld [vmem:[%s14244_s1 + $0xf8] sm:$0xff] }
 0x57d   :  { %vm14737_vm14 = vmmov %vm14693_vm2 }
 0x57f   :  { %v2254_v22 = vpop.f32.mrf.mxu3  ;;  %v2144_v39 = vpop.f32.mrf.mxu2 }
 0x580   :  { %v10051_v50 = vadd.f32 %v2254_v22, %v2141_v59 }
 0x584   :  { %5484 = vmatmul.msk.f32.gmra.mxu3 %vm14724_vm6, %v6654_v62  ;;  %5453 = vmatmul.msk.f32.gmra.mxu2 %vm14725_vm10, %v6655_v6  ;;  %vm14738_vm6 = vmmov %vm14692_vm0 }
 0x585   :  { %vm14739_vm10 = vmmov %vm14693_vm2 }
 0x587   :  { %v2257_v29 = vpop.f32.mrf.mxu3  ;;  %v2147_v0 = vpop.f32.mrf.mxu2 }
 0x588   :  { %v10061_v26 = vadd.f32 %v2257_v29, %v2144_v39 }
 0x58c   :  { %5485 = vmatmul.msk.f32.gmra.mxu3 %vm14726_vm1, %v6656_v24  ;;  %5454 = vmatmul.msk.f32.gmra.mxu2 %vm14727_vm4, %v6657_v3  ;;  %vm14740_vm1 = vmmov %vm14692_vm0 }
 0x58d   :  { %vm14741_vm4 = vmmov %vm14693_vm2 }
 0x58f   :  { %v2260_v33 = vpop.f32.mrf.mxu3  ;;  %v2150_v55 = vpop.f32.mrf.mxu2 }
 0x590   :  { %v10071_v42 = vadd.f32 %v2260_v33, %v2147_v0 }
 0x594   :  { %5486 = vmatmul.msk.f32.gmra.mxu3 %vm14728_vm11, %v6658_v9  ;;  %5455 = vmatmul.msk.f32.gmra.mxu2 %vm14729_vm15, %v6659_v57  ;;  %vm14742_vm11 = vmmov %vm14692_vm0  ;;  %v5496_v57 = vmul.f32 -1.442695, %v10021_v53  ;;  %v5499_v53 = vmul.f32 -1.442695, %v10051_v50 }
 0x595   :  { %vm14743_vm15 = vmmov %vm14693_vm2 }
 0x596   :  { %6083 = vpow2.f32 %v5496_v57 }
 0x597   :  { %v2263_v4 = vpop.f32.mrf.mxu3  ;;  %v2153_v7 = vpop.f32.mrf.mxu2 }
 0x598   :  { %v10081_v46 = vadd.f32 %v2263_v4, %v2150_v55 }
 0x59a   :  { %v5502_v50 = vmul.f32 -1.442695, %v10081_v46 }
 0x59c   :  { %5487 = vmatmul.msk.f32.gmra.mxu3 %vm14730_vm13, %v6660_v49  ;;  %5456 = vmatmul.msk.f32.gmra.mxu2 %vm14731_vm7, %v6661_v58  ;;  %vm14744_vm13 = vmmov %vm14692_vm0  ;;  %v5497_v49 = vmul.f32 -1.442695, %v10031_v28  ;;  %v5498_v58 = vmul.f32 -1.442695, %v10041_v17 }
 0x59e   :  { %6085 = vpow2.f32 %v5497_v49 }
 0x59f   :  { %v2266_v14 = vpop.f32.mrf.mxu3  ;;  %v10091_v27 = vpop.f32.mrf.mxu2  ;;  %6087 = vpow2.f32 %v5498_v58 }
 0x5a0   :  { %v10093_v56 = vadd.f32 %v2266_v14, %v2153_v7  ;;  %v6084_v14 = vpop.eup %6083 }
 0x5a4   :  { %5488 = vmatmul.msk.f32.gmra.mxu3 %vm14732_vm5, %v6662_v5  ;;  %5457 = vmatmul.msk.f32.gmra.mxu2 %vm14733_vm12, %v6663_v48 }
 0x5a7   :  { %v10103_v34 = vpop.f32.mrf.mxu3  ;;  %v10105_v10 = vpop.f32.mrf.mxu2 }
 0x5a8   :  { %v2270_v58 = vadd.f32 %v10103_v34, %v10091_v27 }
 0x5ac   :  { %5489 = vmatmul.msk.f32.gmra.mxu3 %vm14734_vm9, %v6664_v16  ;;  %5458 = vmatmul.msk.f32.gmra.mxu2 %vm14735_vm8, %v6665_v25  ;;  %v10218_v16 = vadd.f32 1.0, %v6084_v14  ;;  %v6086_v25 = vpop.eup %6085 }
 0x5ad   :  { %v6088_v17 = vpop.eup %6087 }
 0x5ae   :  { %6089 = vrcp.f32 %v10218_v16  ;;  %vm2378_vm7 = vweird.f32 %v10218_v16 }
 0x5af   :  { %v10115_v44 = vpop.f32.mrf.mxu3  ;;  %v10117_v23 = vpop.f32.mrf.mxu2  ;;  %6091 = vpow2.f32 %v5499_v53 }
 0x5b4   :  { %5490 = vmatmul.msk.f32.gmra.mxu3 %vm14692_vm0, %v6666_v35  ;;  %5459 = vmatmul.msk.f32.gmra.mxu2 %vm14693_vm2, %v6667_v43  ;;  %v10222_v35 = vadd.f32 1.0, %v6086_v25  ;;  %v2384_v25 = vand.u32 2147483648, %v10218_v16 }
 0x5b6   :  { %6093 = vrcp.f32 %v10222_v35  ;;  %vm2393_vm8 = vweird.f32 %v10222_v35 }
 0x5b7   :  { %v10127_v36 = vpop.f32.mrf.mxu3  ;;  %v10129_v45 = vpop.f32.mrf.mxu2 }
 0x5b8   :  { %v2276_v27 = vadd.f32 %v10127_v36, %v10117_v23 }
 0x5bc   :  { %5491 = vmatmul.msk.f32.gmra.mxu3 %vm14736_vm3, %v6668_v8  ;;  %5460 = vmatmul.msk.f32.gmra.mxu2 %vm14737_vm14, %v6669_v52  ;;  %v5500_v8 = vmul.f32 -1.442695, %v10061_v26  ;;  %v5501_v52 = vmul.f32 -1.442695, %v10071_v42 }
 0x5be   :  { %6095 = vpow2.f32 %v5500_v8  ;;  %v2273_v8 = vadd.f32 %v10115_v44, %v10105_v10  ;;  %v2385_v44 = vor.u32 1.1754944e-38, %v2384_v25 }
 0x5bf   :  { %v10139_v30 = vpop.f32.mrf.mxu3  ;;  %v10141_v13 = vpop.f32.mrf.mxu2  ;;  %6097 = vpow2.f32 %v5501_v52  ;;  %v2382_v52 = vand.u32 2147483647, %v10218_v16 }
 0x5c0   :  { %v2279_v10 = vadd.f32 %v10139_v30, %v10129_v45  ;;  %v5505_v36 = vmul.f32 -1.442695, %v2273_v8  ;;  %v5506_v45 = vmul.f32 -1.442695, %v2276_v27 }
 0x5c1   :  { %vm10281_vm12 = vcmp.eq.f32.partialorder %v2382_v52, 8.507059e+37 }
 0x5c4   :  { %5492 = vmatmul.msk.f32.gmra.mxu3 %vm14738_vm6, %v6670_v11  ;;  %5461 = vmatmul.msk.f32.gmra.mxu2 %vm14739_vm10, %v6671_v61  ;;  %v10231_v11 = vadd.f32 1.0, %v6088_v17  ;;  %v10233_v61 = vpop.eup %6089 }
 0x5c5   :  { %v2374_v26 = vmul.f32 %v10233_v61, %v10218_v16  ;;  %vm2379_vm5 = vweird.f32 %v10233_v61 }
 0x5c6   :  { %6099 = vrcp.f32 %v10231_v11  ;;  %vm10302_vm9 = vmor %vm2378_vm7, %vm2379_vm5  ;;  %vm2408_vm6 = vweird.f32 %v10231_v11 }
 0x5c7   :  { %v10151_v18 = vpop.f32.mrf.mxu3  ;;  %v10153_v32 = vpop.f32.mrf.mxu2  ;;  %6101 = vpow2.f32 %v5502_v50  ;;  %v2375_v57 = vsub.f32 1.0, %v2374_v26  ;;  %v5504_v26 = vmul.f32 -1.442695, %v2270_v58 }
 0x5c9   :  { %v2376_v34 = vmul.f32 %v10233_v61, %v2375_v57  ;;  %v2282_v57 = vadd.f32 %v10151_v18, %v10141_v13 }
 0x5cb   :  { %v2377_v30 = vadd.f32 %v10233_v61, %v2376_v34  ;;  %v5508_v27 = vmul.f32 -1.442695, %v2282_v57  ;;  %v2412_v57 = vand.u32 2147483647, %v10231_v11 }
 0x5cc   :  { %5493 = vmatmul.msk.f32.gmra.mxu3 %vm14740_vm1, %v6672_v19  ;;  %5462 = vmatmul.msk.f32.gmra.mxu2 %vm14741_vm4, %v6673_v38  ;;  %v6092_v19 = vpop.eup %6091  ;;  %v5503_v38 = vmul.f32 -1.442695, %v10093_v56 }
 0x5cd   :  { %vm10360_vm10 = vcmp.eq.f32.partialorder %v2412_v57, 8.507059e+37 }
 0x5ce   :  { %6103 = vpow2.f32 %v5503_v38 }
 0x5cf   :  { %v10163_v12 = vpop.f32.mrf.mxu3  ;;  %v10165_v54 = vpop.f32.mrf.mxu2 }
 0x5d0   :  { %v2285_v13 = vadd.f32 %v10163_v12, %v10153_v32 }
 0x5d4   :  { %5494 = vmatmul.msk.f32.gmra.mxu3 %vm14742_vm11, %v6674_v2  ;;  %5463 = vmatmul.msk.f32.gmra.mxu2 %vm14743_vm15, %v6675_v47  ;;  %v10244_v47 = vpop.eup %6093 }
 0x5d5   :  { %v6096_v46 = vpop.eup %6095  ;;  %v2389_v56 = vmul.f32 %v10244_v47, %v10222_v35  ;;  %vm2394_vm0 = vweird.f32 %v10244_v47 }
 0x5d6   :  { %v6098_v49 = vpop.eup %6097  ;;  %v10256_v17 = vadd.f32 1.0, %v6096_v46  ;;  %vm10341_vm3 = vmor %vm2393_vm8, %vm2394_vm0 }
 0x5d7   :  { %v10175_v37 = vpop.f32.mrf.mxu3  ;;  %v10177_v59 = vpop.f32.mrf.mxu2  ;;  %v10261_v50 = vadd.f32 1.0, %v6098_v49  ;;  %v2390_v46 = vsub.f32 1.0, %v2389_v56  ;;  %v2397_v56 = vand.u32 2147483647, %v10222_v35 }
 0x5d8   :  { %v10252_v14 = vpop.eup %6099  ;;  %v2288_v8 = vadd.f32 %v10175_v37, %v10165_v54  ;;  %v2381_v54 = vsel %vm10302_vm9, %v10233_v61, %v2377_v30  ;;  %v2399_v37 = vand.u32 2147483648, %v10222_v35  ;;  %vm2438_vm7 = vweird.f32 %v10256_v17 }
 0x5d9   :  { %v6102_v53 = vpop.eup %6101  ;;  %v2404_v23 = vmul.f32 %v10252_v14, %v10231_v11  ;;  %v2391_v18 = vmul.f32 %v10244_v47, %v2390_v46  ;;  %v5509_v46 = vmul.f32 -1.442695, %v2285_v13  ;;  %vm10326_vm2 = vcmp.eq.f32.partialorder %v2397_v56, 8.507059e+37 }
 0x5da   :  { %v6104_v60 = vpop.eup %6103  ;;  %v10271_v15 = vadd.f32 1.0, %v6102_v53  ;;  %v5507_v53 = vmul.f32 -1.442695, %v2279_v10  ;;  %vm2409_vm14 = vweird.f32 %v10252_v14  ;;  %vm2453_vm0 = vweird.f32 %v10261_v50 }
 0x5db   :  { %v10290_v25 = vadd.f32 1.0, %v6104_v60  ;;  %v2405_v52 = vsub.f32 1.0, %v2404_v23  ;;  %v2392_v10 = vadd.f32 %v10244_v47, %v2391_v18  ;;  %vm10380_vm1 = vmor %vm2408_vm6, %vm2409_vm14 }
 0x5dc   :  { %5495 = vmatmul.msk.f32.gmra.mxu3 %vm14744_vm13, %v6676_v21  ;;  %v10246_v21 = vadd.f32 1.0, %v6092_v19  ;;  %v2472_v61 = vand.u32 2147483647, %v10271_v15 }
 0x5dd   :  { %v2406_v23 = vmul.f32 %v10252_v14, %v2405_v52  ;;  %v2396_v60 = vsel %vm10341_vm3, %v10244_v47, %v2392_v10  ;;  %vm2468_vm3 = vweird.f32 %v10271_v15 }
 0x5de   :  { %6105 = vrcp.f32 %v10246_v21  ;;  %vm2423_vm4 = vweird.f32 %v10246_v21 }
 0x5df   :  { %v10183_v31 = vpop.f32.mrf.mxu3  ;;  %v10185_v22 = vpop.f32.mrf.mxu2  ;;  %6107 = vrcp.f32 %v10256_v17 }
 0x5e0   :  { %14745 = vst [vmem:[#allocation9_spill] sm:$0xff] %v10185_v22  ;;  %6109 = vrcp.f32 %v10261_v50  ;;  %v2291_v12 = vadd.f32 %v10183_v31, %v10177_v59  ;;  %v5510_v31 = vmul.f32 -1.442695, %v2288_v8  ;;  %v2400_v8 = vor.u32 1.1754944e-38, %v2399_v37 }
 0x5e1   :  { %6111 = vpow2.f32 %v5504_v26 }
 0x5e2   :  { %6113 = vrcp.f32 %v10271_v15  ;;  %v5511_v18 = vmul.f32 -1.442695, %v2291_v12  ;;  %v10376_v57 = vsel %vm10326_vm2, %v2400_v8, %v2396_v60 }
 0x5e3   :  { %6115 = vpow2.f32 %v5505_v36  ;;  %14763 = vst [vmem:[#allocation19_spill] sm:$0xff] %v10376_v57 }
 0x5e4   :  { %v10285_v58 = vpop.eup %6105  ;;  %6117 = vpow2.f32 %v5506_v45  ;;  %v2414_v45 = vand.u32 2147483648, %v10231_v11 }
 0x5e5   :  { %v2419_v32 = vmul.f32 %v10285_v58, %v10246_v21  ;;  %v10319_v26 = vpop.eup %6107  ;;  %6119 = vrcp.f32 %v10290_v25  ;;  %vm2424_vm15 = vweird.f32 %v10285_v58 }
 0x5e6   :  { %v10324_v59 = vpop.eup %6109  ;;  %6121 = vpow2.f32 %v5507_v53  ;;  %v10337_v53 = vsel %vm10281_vm12, %v2385_v44, %v2381_v54  ;;  %v2434_v52 = vmul.f32 %v10319_v26, %v10256_v17  ;;  %v2427_v44 = vand.u32 2147483647, %v10246_v21  ;;  %vm10416_vm13 = vmor %vm2423_vm4, %vm2424_vm15 }
 0x5e7   :  { %v10187_v39 = vpop.f32.mrf.mxu3  ;;  %v10189_v62 = vpop.f32.mrf.mxu2  ;;  %6123 = vpow2.f32 %v5508_v27  ;;  %v2420_v30 = vsub.f32 1.0, %v2419_v32  ;;  %14758 = vst [vmem:[#allocation18_spill] sm:$0xff] %v10337_v53  ;;  %v2407_v32 = vadd.f32 %v10252_v14, %v2406_v23  ;;  %v2449_v12 = vmul.f32 %v10324_v59, %v10261_v50 }
 0x5e8   :  { %14746 = vst [vmem:[#allocation17_spill] sm:$0xff] %v10187_v39  ;;  %v6112_v36 = vpop.eup %6111  ;;  %6125 = vpow2.f32 %v5509_v46  ;;  %v2415_v47 = vor.u32 1.1754944e-38, %v2414_v45  ;;  %v2429_v23 = vand.u32 2147483648, %v10246_v21  ;;  %v2435_v20 = vsub.f32 1.0, %v2434_v52 }
 0x5e9   :  { %14747 = vst [vmem:[#allocation22_spill] sm:$0xff] %v10189_v62  ;;  %v10333_v13 = vpop.eup %6113  ;;  %v10352_v35 = vadd.f32 1.0, %v6112_v36  ;;  %6127 = vpow2.f32 %v5510_v31  ;;  %v2421_v46 = vmul.f32 %v10285_v58, %v2420_v30  ;;  %vm10391_vm11 = vcmp.eq.f32.partialorder %v2427_v44, 8.507059e+37 }
 0x5ea   :  { %v6116_v27 = vpop.eup %6115  ;;  %6129 = vpow2.f32 %v5511_v18  ;;  %v2464_v30 = vmul.f32 %v10333_v13, %v10271_v15  ;;  %v2411_v18 = vsel %vm10380_vm1, %v10252_v14, %v2407_v32  ;;  %v2450_v8 = vsub.f32 1.0, %v2449_v12 }
 0x5eb   :  { %v6118_v49 = vpop.eup %6117  ;;  %v10365_v36 = vadd.f32 1.0, %v6116_v27  ;;  %6131 = vrcp.f32 %v10352_v35  ;;  %v2422_v60 = vadd.f32 %v10285_v58, %v2421_v46  ;;  %v2430_v14 = vor.u32 1.1754944e-38, %v2429_v23 }
 0x5ec   :  { %v10357_v54 = vpop.eup %6119  ;;  %v10372_v11 = vadd.f32 1.0, %v6118_v49  ;;  %v2436_v44 = vmul.f32 %v10319_v26, %v2435_v20  ;;  %v2442_v32 = vand.u32 2147483647, %v10256_v17  ;;  %v2444_v12 = vand.u32 2147483648, %v10256_v17 }
 0x5ed   :  { %v6122_v10 = vpop.eup %6121  ;;  %v2479_v49 = vmul.f32 %v10357_v54, %v10290_v25  ;;  %6133 = vrcp.f32 %v10365_v36  ;;  %v2465_v46 = vsub.f32 1.0, %v2464_v30  ;;  %v10412_v51 = vsel %vm10360_vm10, %v2415_v47, %v2411_v18 }
 0x5ee   :  { %v6124_v40 = vpop.eup %6123  ;;  %v10395_v27 = vadd.f32 1.0, %v6122_v10  ;;  %6135 = vrcp.f32 %v10372_v11  ;;  %14768 = vst [vmem:[#allocation23_spill] sm:$0xff] %v10412_v51  ;;  %v2451_v20 = vmul.f32 %v10324_v59, %v2450_v8  ;;  %v2426_v37 = vsel %vm10416_vm13, %v10285_v58, %v2422_v60 }
 0x5ef   :  { %v10191_v6 = vpop.f32.mrf.mxu3  ;;  %v10193_v29 = vpop.f32.mrf.mxu2  ;;  %v10402_v45 = vadd.f32 1.0, %v6124_v40  ;;  %v2480_v47 = vsub.f32 1.0, %v2479_v49  ;;  %v2437_v18 = vadd.f32 %v10319_v26, %v2436_v44  ;;  %vm2439_vm5 = vweird.f32 %v10319_v26 }
 0x5f0   :  { %14748 = vst [vmem:[#allocation25_spill] sm:$0xff] %v10191_v6  ;;  %v6126_v52 = vpop.eup %6125  ;;  %6137 = vrcp.f32 %v10395_v27  ;;  %v2457_v8 = vand.u32 2147483647, %v10261_v50  ;;  %vm10438_vm12 = vcmp.eq.f32.partialorder %v2442_v32, 8.507059e+37  ;;  %v2445_v58 = vor.u32 1.1754944e-38, %v2444_v12  ;;  %vm10463_vm8 = vmor %vm2438_vm7, %vm2439_vm5 }
 0x5f1   :  { %14749 = vst [vmem:[#allocation20_spill] sm:$0xff] %v10193_v29  ;;  %v6128_v41 = vpop.eup %6127  ;;  %v10408_v63 = vadd.f32 1.0, %v6126_v52  ;;  %6139 = vrcp.f32 %v10402_v45  ;;  %v2466_v60 = vmul.f32 %v10333_v13, %v2465_v46  ;;  %v10448_v44 = vsel %vm10391_vm11, %v2430_v14, %v2426_v37 }
 0x5f2   :  { %v6130_v10 = vpop.eup %6129  ;;  %v10423_v23 = vadd.f32 1.0, %v6128_v41  ;;  %vm2454_vm9 = vweird.f32 %v10324_v59  ;;  %v2481_v14 = vmul.f32 %v10357_v54, %v2480_v47  ;;  %v2441_v46 = vsel %vm10463_vm8, %v10319_v26, %v2437_v18 }
 0x5f3   :  { %v10428_v30 = vpop.eup %6131  ;;  %v10436_v52 = vadd.f32 1.0, %v6130_v10  ;;  %6141 = vrcp.f32 %v10408_v63  ;;  %v2452_v10 = vadd.f32 %v10324_v59, %v2451_v20  ;;  %vm10472_vm2 = vcmp.eq.f32.partialorder %v2457_v8, 8.507059e+37  ;;  %vm10483_vm14 = vmor %vm2453_vm0, %vm2454_vm9 }
 0x5f4   :  { %v10443_v49 = vpop.eup %6133  ;;  %v2526_v12 = vmul.f32 %v10428_v30, %v10352_v35  ;;  %6143 = vrcp.f32 %v10423_v23  ;;  %v2459_v37 = vand.u32 2147483648, %v10261_v50  ;;  %v2467_v26 = vadd.f32 %v10333_v13, %v2466_v60 }
 0x5f5   :  { %v10454_v32 = vpop.eup %6135  ;;  %v2541_v1 = vmul.f32 %v10443_v49, %v10365_v36  ;;  %6145 = vrcp.f32 %v10436_v52  ;;  %vm2469_vm6 = vweird.f32 %v10333_v13  ;;  %v2456_v8 = vsel %vm10483_vm14, %v10324_v59, %v2452_v10 }
 0x5f6   :  { %v10478_v17 = vpop.eup %6137  ;;  %v2556_v50 = vmul.f32 %v10454_v32, %v10372_v11  ;;  %v2474_v39 = vand.u32 2147483648, %v10271_v15  ;;  %v2527_v22 = vsub.f32 1.0, %v2526_v12  ;;  %v2482_v53 = vadd.f32 %v10357_v54, %v2481_v14  ;;  %vm10513_vm1 = vmor %vm2468_vm3, %vm2469_vm6 }
 0x5f7   :  { %v10195_v0 = vpop.f32.mrf.mxu3  ;;  %v10197_v24 = vpop.f32.mrf.mxu2  ;;  %vm2484_vm10 = vweird.f32 %v10357_v54  ;;  %v2487_v60 = vand.u32 2147483647, %v10290_v25  ;;  %v2571_v62 = vmul.f32 %v10478_v17, %v10395_v27  ;;  %v10507_v47 = vsel %vm10438_vm12, %v2445_v58, %v2441_v46 }
 0x5f8   :  { %14750 = vst [vmem:[#allocation21_spill] sm:$0xff] %v10195_v0  ;;  %v10489_v18 = vpop.eup %6139  ;;  %v2460_v10 = vor.u32 1.1754944e-38, %v2459_v37  ;;  %v2489_v14 = vand.u32 2147483648, %v10290_v25  ;;  %v2542_v0 = vsub.f32 1.0, %v2541_v1  ;;  %v2471_v58 = vsel %vm10513_vm1, %v10333_v13, %v2467_v26 }
 0x5f9   :  { %v10501_v6 = vpop.eup %6141  ;;  %v2586_v41 = vmul.f32 %v10489_v18, %v10402_v45  ;;  %vm2483_vm4 = vweird.f32 %v10290_v25  ;;  %v2557_v46 = vsub.f32 1.0, %v2556_v50  ;;  %vm2473_vm11 = vcmp.eq.f32.partialorder %v2472_v61, 8.507059e+37 }
 0x5fa   :  { %v10518_v57 = vpop.eup %6143  ;;  %v2461_v15 = vsel %vm10472_vm2, %v2460_v10, %v2456_v8  ;;  %v2475_v37 = vor.u32 1.1754944e-38, %v2474_v39  ;;  %vm10530_vm15 = vmor %vm2483_vm4, %vm2484_vm10  ;;  %v2601_v12 = vmul.f32 %v10501_v6, %v10408_v63  ;;  %vm2488_vm13 = vcmp.eq.f32.partialorder %v2487_v60, 8.507059e+37 }
 0x5fb   :  { %v10534_v1 = vpop.eup %6145  ;;  %v2486_v25 = vsel %vm10530_vm15, %v10357_v54, %v2482_v53  ;;  %v2528_v13 = vmul.f32 %v10428_v30, %v2527_v22  ;;  %v2572_v20 = vsub.f32 1.0, %v2571_v62  ;;  %v2616_v39 = vmul.f32 %v10518_v57, %v10423_v23 }
 0x5fc   :  { %v2476_v50 = vsel %vm2473_vm11, %v2475_v37, %v2471_v58  ;;  %v2490_v8 = vor.u32 1.1754944e-38, %v2489_v14  ;;  %v2587_v61 = vsub.f32 1.0, %v2586_v41  ;;  %v2543_v10 = vmul.f32 %v10443_v49, %v2542_v0 }
 0x5fd   :  { %v2631_v29 = vmul.f32 %v10534_v1, %v10436_v52  ;;  %v2558_v22 = vmul.f32 %v10454_v32, %v2557_v46  ;;  %v2602_v54 = vsub.f32 1.0, %v2601_v12  ;;  %v2564_v60 = vand.u32 2147483647, %v10372_v11 }
 0x5fe   :  { %v10549_v53 = vsel %vm2488_vm13, %v2490_v8, %v2486_v25  ;;  %v10556_v0 = vadd.f32 %v10428_v30, %v2528_v13  ;;  %v2617_v41 = vsub.f32 1.0, %v2616_v39  ;;  %v2611_v37 = vand.u32 2147483648, %v10408_v63 }
 0x5ff   :  { %v10199_v3 = vpop.f32.mrf.mxu3  ;;  %v10201_v33 = vpop.f32.mrf.mxu2  ;;  %v2588_v46 = vmul.f32 %v10489_v18, %v2587_v61  ;;  %v2579_v12 = vand.u32 2147483647, %v10395_v27  ;;  %v10564_v51 = vadd.f32 %v10443_v49, %v2543_v10  ;;  %v2632_v14 = vsub.f32 1.0, %v2631_v29 }
 0x600   :  { %v10569_v62 = vadd.f32 %v10454_v32, %v2558_v22  ;;  %v2603_v25 = vmul.f32 %v10501_v6, %v2602_v54  ;;  %v2596_v61 = vand.u32 2147483648, %v10402_v45  ;;  %v2609_v10 = vand.u32 2147483647, %v10408_v63 }
 0x601   :  { %v10577_v29 = vor.u32 1.1754944e-38, %v2611_v37  ;;  %vm2606_vm7 = vweird.f32 %v10501_v6  ;;  %v10586_v54 = vadd.f32 %v10489_v18, %v2588_v46  ;;  %vm2620_vm5 = vweird.f32 %v10423_v23 }
 0x602   :  { %v2626_v37 = vand.u32 2147483648, %v10423_v23  ;;  %vm2605_vm12 = vweird.f32 %v10408_v63  ;;  %vm2591_vm9 = vweird.f32 %v10489_v18  ;;  %vm2621_vm8 = vweird.f32 %v10518_v57  ;;  %v14809_v63 = vld [vmem:[#allocation9_spill] sm:$0xff] }
 0x603   :  { %vm2635_vm2 = vweird.f32 %v10436_v52  ;;  %vm2590_vm3 = vweird.f32 %v10402_v45  ;;  %vm2576_vm14 = vweird.f32 %v10478_v17  ;;  %vm2561_vm6 = vweird.f32 %v10454_v32  ;;  %vm10631_vm4 = vmor %vm2620_vm5, %vm2621_vm8 }
 0x604   :  { %vm2636_vm10 = vweird.f32 %v10534_v1  ;;  %vm2575_vm1 = vweird.f32 %v10395_v27  ;;  %vm2560_vm11 = vweird.f32 %v10372_v11  ;;  %vm2546_vm15 = vweird.f32 %v10443_v49 }
 0x605   :  { %vm10650_vm13 = vmor %vm2635_vm2, %vm2636_vm10  ;;  %vm2545_vm5 = vweird.f32 %v10365_v36  ;;  %vm2531_vm8 = vweird.f32 %v10428_v30  ;;  %vm2530_vm10 = vweird.f32 %v10352_v35 }
 0x606   :  { %vm10672_vm2 = vmor %vm2605_vm12, %vm2606_vm7  ;;  %vm10687_vm7 = vcmp.eq.f32.partialorder %v2564_v60, 8.507059e+37  ;;  %v2597_v60 = vor.u32 1.1754944e-38, %v2596_v61 }
 0x607   :  { %v10203_v55 = vpop.f32.mrf.mxu3  ;;  %v10205_v9 = vpop.f32.mrf.mxu2  ;;  %vm10696_vm12 = vmor %vm2590_vm3, %vm2591_vm9 }
 0x608   :  { %vm10723_vm3 = vmor %vm2575_vm1, %vm2576_vm14 }
 0x609   :  { %vm10750_vm14 = vmor %vm2545_vm5, %vm2546_vm15  ;;  %vm14842_vm5 = vcmask 64512  }
 0x60f   :  { %v10208_v4 = vpop.f32.mrf.mxu3  ;;  %v10210_v7 = vpop.f32.mrf.mxu2 }
 0x617   :  { %v10214_v5 = vpop.f32.mrf.mxu3  ;;  %v10216_v48 = vpop.f32.mrf.mxu2 }
 0x61f   :  { %v10224_v43 = vpop.f32.mrf.mxu3  ;;  %v10226_v28 = vpop.f32.mrf.mxu2 }
 0x627   :  { %v10238_v2 = vpop.f32.mrf.mxu3  ;;  %v10242_v42 = vpop.f32.mrf.mxu2 }
 0x628   :  { %14751 = vst [vmem:[#allocation24_spill] sm:$0xff] %v10238_v2  ;;  %v2573_v2 = vmul.f32 %v10478_v17, %v2572_v20  ;;  %v2624_v20 = vand.u32 2147483647, %v10423_v23  ;;  %v14788_v23 = vld [vmem:[#allocation23_spill] sm:$0xff] }
 0x62a   :  { %vm10598_vm0 = vcmp.eq.f32.partialorder %v2624_v20, 8.507059e+37  ;;  %v6697_v20 = vld [vmem:[%s14244_s1 + $0x48] sm:$0xff] }
 0x62f   :  { %v10266_v19 = vpop.f32.mrf.mxu3  ;;  %v10268_v38 = vpop.f32.mrf.mxu2 }
 0x637   :  { %v10315_v16 = vpop.f32.mrf.mxu3  ;;  %v10317_v34 = vpop.f32.mrf.mxu2 }
 0x63f   :  { %v10367_v31 = vpop.f32.mrf.mxu3  ;;  %v10370_v56 = vpop.f32.mrf.mxu2 }
 0x647   :  { %v10431_v21 = vpop.f32.mrf.mxu3  ;;  %v10450_v40 = vpop.f32.mrf.mxu2 }
 0x64f   :  { %v2332_v59 = vpop.f32.mrf.mxu3  ;;  %v2222_v26 = vpop.f32.mrf.mxu2 }
 0x650   :  { %v2333_v13 = vadd.f32 %v2332_v59, %v10450_v40  ;;  %v10580_v40 = vadd.f32 %v10478_v17, %v2573_v2  ;;  %v2330_v59 = vadd.f32 %v10431_v21, %v10370_v56  ;;  %v2312_v2 = vadd.f32 %v10214_v5, %v10210_v7 }
 0x651   :  { %v2327_v56 = vadd.f32 %v10367_v31, %v10317_v34  ;;  %v2641_v7 = vand.u32 2147483648, %v10436_v52  ;;  %v2324_v34 = vadd.f32 %v10315_v16, %v10268_v38  ;;  %v2321_v38 = vadd.f32 %v10266_v19, %v10242_v42 }
 0x652   :  { %v2649_v31 = vmul.f32 %v10507_v47, %v2330_v59  ;;  %v2639_v42 = vand.u32 2147483647, %v10436_v52  ;;  %v14793_v52 = vld [vmem:[#allocation20_spill] sm:$0xff]  ;;  %v14795_v59 = vld [vmem:[#allocation19_spill] sm:$0xff] }
 0x653   :  { %v2648_v16 = vmul.f32 %v10448_v44, %v2327_v56  ;;  %v2647_v44 = vmul.f32 %v14788_v23, %v2324_v34  ;;  %v6687_v23 = vld [vmem:[%s14244_s1 + $0x20] sm:$0xff] }
 0x657   :  { %v2335_v58 = vpop.f32.mrf.mxu3  ;;  %v2225_v39 = vpop.f32.mrf.mxu2 }
 0x658   :  { %v2336_v8 = vadd.f32 %v2335_v58, %v2222_v26  ;;  %v2618_v58 = vmul.f32 %v10518_v57, %v2617_v41  ;;  %v2650_v26 = vmul.f32 %v2461_v15, %v2333_v13  ;;  %v2633_v41 = vmul.f32 %v10534_v1, %v2632_v14 }
 0x659   :  { %v10603_v15 = vadd.f32 %v10501_v6, %v2603_v25  ;;  %v2315_v13 = vadd.f32 %v10224_v43, %v10216_v48  ;;  %v14787_v48 = vld [vmem:[#allocation24_spill] sm:$0xff] }
 0x65a   :  { %v2651_v22 = vmul.f32 %v2476_v50, %v2336_v8  ;;  %v2309_v50 = vadd.f32 %v10208_v4, %v10205_v9  ;;  %v2619_v5 = vadd.f32 %v10518_v57, %v2618_v58  ;;  %v2306_v9 = vadd.f32 %v10203_v55, %v10201_v33 }
 0x65b   :  { %v2634_v46 = vadd.f32 %v10534_v1, %v2633_v41  ;;  %v2303_v55 = vadd.f32 %v10199_v3, %v10197_v24  ;;  %v2318_v43 = vadd.f32 %v14787_v48, %v10226_v28  ;;  %v2642_v28 = vor.u32 1.1754944e-38, %v2641_v7  ;;  %v14802_v7 = vld [vmem:[#allocation18_spill] sm:$0xff] }
 0x65c   :  { %v2659_v25 = vadd.f32 %v2651_v22, %v2312_v2  ;;  %v2658_v4 = vadd.f32 %v2650_v26, %v2309_v50  ;;  %v2623_v19 = vsel %vm10631_vm4, %v10518_v57, %v2619_v5  ;;  %v2627_v57 = vor.u32 1.1754944e-38, %v2626_v37  ;;  %v14794_v26 = vld [vmem:[#allocation21_spill] sm:$0xff] }
 0x65d   :  { %v2638_v3 = vsel %vm10650_vm13, %v10534_v1, %v2634_v46  ;;  %vm10661_vm4 = vcmp.eq.f32.partialorder %v2579_v12, 8.507059e+37  ;;  %v2300_v58 = vadd.f32 %v14794_v26, %v14793_v52  ;;  %v2646_v22 = vmul.f32 %v14795_v59, %v2321_v38  ;;  %v14798_v12 = vld [vmem:[#allocation22_spill] sm:$0xff]  ;;  %v14799_v37 = vld [vmem:[#allocation25_spill] sm:$0xff] }
 0x65e   :  { %6147 = vtanh.f32 %v2659_v25  ;;  %v2656_v41 = vadd.f32 %v2648_v16, %v2303_v55  ;;  %v2297_v2 = vadd.f32 %v14799_v37, %v14798_v12  ;;  %vm2640_vm13 = vcmp.eq.f32.partialorder %v2639_v42, 8.507059e+37  ;;  %v14816_v42 = vld [vmem:[#allocation10_spill] sm:$0xff] }
 0x65f   :  { %v2338_v14 = vpop.f32.mrf.mxu3  ;;  %6149 = vtanh.f32 %v2658_v4  ;;  %v2628_v56 = vsel %vm10598_vm0, %v2627_v57, %v2623_v19  ;;  %v2608_v50 = vsel %vm10672_vm2, %v10501_v6, %v10603_v15  ;;  %v2645_v5 = vmul.f32 %v14802_v7, %v2318_v43 }
 0x660   :  { %v2339_v8 = vadd.f32 %v2338_v14, %v2225_v39  ;;  %v2655_v34 = vadd.f32 %v2647_v44, %v2300_v58  ;;  %vm2610_vm0 = vcmp.eq.f32.partialorder %v2609_v10, 8.507059e+37  ;;  %v2593_v6 = vsel %vm10696_vm12, %v10489_v18, %v10586_v54  ;;  %v14810_v10 = vld [vmem:[#allocation17_spill] sm:$0xff] }
 0x661   :  { %v14805_v15 = vand.u32 2147483648, %v10395_v27  ;;  %v2294_v46 = vadd.f32 %v14810_v10, %v14809_v63  ;;  %v2613_v18 = vsel %vm2610_vm0, %v10577_v29, %v2608_v50  ;;  %v2675_v16 = vsub.f32 1.0, %v2628_v56  ;;  %v14830_v50 = vld [vmem:[#allocation15_spill] sm:$0xff]  ;;  %v6677_v27 = vld [vmem:[%s14246_s3] sm:$0x3] }
 0x662   :  { %v2652_v47 = vmul.f32 %v10549_v53, %v2339_v8  ;;  %v2657_v53 = vadd.f32 %v2649_v31, %v2306_v9  ;;  %v2643_v31 = vsel %vm2640_vm13, %v2642_v28, %v2638_v3  ;;  %v14806_v8 = vand.u32 2147483647, %v10365_v36  ;;  %vm10737_vm13 = vmor %vm2560_vm11, %vm2561_vm6  ;;  %v14821_v3 = vld [vmem:[#allocation8_spill] sm:$0xff] }
 0x663   :  { %v2582_v25 = vor.u32 1.1754944e-38, %v14805_v15  ;;  %v2676_v38 = vsub.f32 1.0, %v2643_v31  ;;  %v2578_v33 = vsel %vm10723_vm3, %v10478_v17, %v10580_v40  ;;  %v2653_v55 = vadd.f32 %v2645_v5, %v2294_v46  ;;  %vm10769_vm6 = vmor %vm2530_vm10, %vm2531_vm8  ;;  %v14834_v9 = vld [vmem:[#allocation16_spill] sm:$0xff] }
 0x664   :  { %v2660_v39 = vadd.f32 %v2652_v47, %v2315_v13  ;;  %vm10712_vm9 = vcmp.eq.f32.partialorder %v14806_v8, 8.507059e+37  ;;  %v6148_v4 = vpop.eup %6147  ;;  %v2654_v13 = vadd.f32 %v2646_v22, %v2297_v2  ;;  %v14813_v47 = vand.u32 2147483647, %v10402_v45  ;;  %v14826_v22 = vld [vmem:[#allocation13_spill] sm:$0xff] }
 0x665   :  { %v6150_v54 = vpop.eup %6149  ;;  %v2563_v45 = vsel %vm10737_vm13, %v10454_v32, %v10569_v62  ;;  %v2692_v17 = vmul.f32 %v2643_v31, %v14816_v42  ;;  %v2683_v40 = vmul.f32 %v6148_v4, %v2675_v16  ;;  %v2674_v19 = vsub.f32 1.0, %v2613_v18  ;;  %v6683_v42 = vld [vmem:[%s14244_s1 + $0x10] sm:$0xff] }
 0x666   :  { %6151 = vtanh.f32 %v2660_v39  ;;  %vm2595_vm2 = vcmp.eq.f32.partialorder %v14813_v47, 8.507059e+37  ;;  %v14819_v32 = vand.u32 2147483648, %v10372_v11  ;;  %v2548_v39 = vsel %vm10750_vm14, %v10443_v49, %v10564_v51 }
 0x667   :  { %6153 = vtanh.f32 %v2657_v53  ;;  %v2598_v48 = vsel %vm2595_vm2, %v2597_v60, %v2593_v6  ;;  %v2583_v53 = vsel %vm10661_vm4, %v2582_v25, %v2578_v33  ;;  %v2691_v28 = vmul.f32 %v2628_v56, %v14821_v3  ;;  %v5513_v33 = vld [vmem:[%s14243_s0 + $0x20] sm:$0xff]  ;;  %vm14844_vm4 = vmmov %vm14842_vm5  ;;  %v6693_v3 = vld [vmem:[%s14244_s1 + $0x38] sm:$0xff] }
 0x668   :  { %6155 = vtanh.f32 %v2656_v41  ;;  %v2567_v62 = vor.u32 1.1754944e-38, %v14819_v32  ;;  %v2682_v57 = vmul.f32 %v6150_v54, %v2674_v19  ;;  %v2673_v52 = vsub.f32 1.0, %v2598_v48  ;;  %vm14848_vm0 = vmmov %vm14844_vm4  ;;  %v6686_v19 = vld [vmem:[%s14245_s2 + $0x20] sm:$0xff]  ;;  %v6690_v32 = vld [vmem:[%s14245_s2 + $0x30] sm:$0xff] }
 0x669   :  { %6157 = vtanh.f32 %v2655_v34  ;;  %v14824_v51 = vand.u32 2147483648, %v10365_v36  ;;  %v2533_v58 = vsel %vm10769_vm6, %v10428_v30, %v10556_v0  ;;  %v10783_v59 = vadd.f32 %v2691_v28, %v2683_v40  ;;  %v6685_v40 = vld [vmem:[%s14244_s1 + $0x18] sm:$0xff]  ;;  %vm14850_vm3 = vmmov %vm14848_vm0  ;;  %v6694_v28 = vld [vmem:[%s14245_s2 + $0x40] sm:$0xff] }
 0x66a   :  { %6159 = vtanh.f32 %v2654_v13  ;;  %v2568_v26 = vsel %vm10687_vm7, %v2567_v62, %v2563_v45  ;;  %v2690_v41 = vmul.f32 %v2613_v18, %v14826_v22  ;;  %v2672_v12 = vsub.f32 1.0, %v2583_v53  ;;  %v14836_v13 = vld [vmem:[#allocation12_spill] sm:$0xff]  ;;  %v6681_v45 = vld [vmem:[%s14244_s1 + $0x8] sm:$0xff]  ;;  %vm14846_vm7 = vmmov %vm14844_vm4 }
 0x66b   :  { %6161 = vtanh.f32 %v2653_v55  ;;  %v2552_v49 = vor.u32 1.1754944e-38, %v14824_v51  ;;  %14825 = vst [vmem:[#allocation23_spill] sm:$0xff] %v10783_v59  ;;  %v14827_v2 = vand.u32 2147483647, %v10352_v35  ;;  %v14828_v56 = vand.u32 2147483648, %v10352_v35  ;;  %v14832_v35 = vld [vmem:[#allocation14_spill] sm:$0xff]  ;;  %vm14852_vm13 = vmmov %vm14848_vm0 }
 0x66c   :  { %v6152_v29 = vpop.eup %6151  ;;  %v10794_v0 = vadd.f32 %v2690_v41, %v2682_v57  ;;  %v2689_v14 = vmul.f32 %v2598_v48, %v14830_v50  ;;  %v2671_v5 = vsub.f32 1.0, %v2568_v26  ;;  %v2688_v6 = vmul.f32 %v2583_v53, %v14832_v35  ;;  %v6679_v55 = vld [vmem:[%s14244_s1] sm:$0xff]  ;;  %v6680_v48 = vld [vmem:[%s14245_s2 + $0x8] sm:$0xff]  ;;  %v6691_v62 = vld [vmem:[%s14244_s1 + $0x30] sm:$0xff] }
 0x66d   :  { %v2684_v43 = vmul.f32 %v6152_v29, %v2676_v38  ;;  %v6154_v44 = vpop.eup %6153  ;;  %v2553_v36 = vsel %vm10712_vm9, %v2552_v49, %v2548_v39  ;;  %vm2535_vm1 = vcmp.eq.f32.partialorder %v14827_v2, 8.507059e+37  ;;  %v2537_v30 = vor.u32 1.1754944e-38, %v14828_v56  ;;  %v14838_v38 = vld [vmem:[#allocation11_spill] sm:$0xff]  ;;  %v6678_v29 = vld [vmem:[%s14245_s2] sm:$0xff]  ;;  %v6689_v53 = vld [vmem:[%s14244_s1 + $0x28] sm:$0xff] }
 0x66e   :  { %v6156_v11 = vpop.eup %6155  ;;  %v2681_v1 = vmul.f32 %v6154_v44, %v2673_v52  ;;  %14829 = vst [vmem:[#allocation20_spill] sm:$0xff] %v10794_v0  ;;  %v2670_v15 = vsub.f32 1.0, %v2553_v36  ;;  %v2687_v4 = vmul.f32 %v2568_v26, %v14834_v9  ;;  %v2686_v18 = vmul.f32 %v2553_v36, %v14836_v13  ;;  %v6688_v44 = vld [vmem:[%s14245_s2 + $0x28] sm:$0xff]  ;;  %vm14854_vm6 = vmmov %vm14848_vm0  ;;  %v6692_v39 = vld [vmem:[%s14245_s2 + $0x38] sm:$0xff] }
 0x66f   :  { %v10762_v24 = vadd.f32 %v2692_v17, %v2684_v43  ;;  %v6158_v37 = vpop.eup %6157  ;;  %v2680_v7 = vmul.f32 %v6156_v11, %v2672_v12  ;;  %v2538_v31 = vsel %vm2535_vm1, %v2537_v30, %v2533_v58  ;;  %vm14840_vm11 = vcmask 523264   ;;  %v6682_v43 = vld [vmem:[%s14245_s2 + $0x10] sm:$0xff]  ;;  %v6684_v17 = vld [vmem:[%s14245_s2 + $0x18] sm:$0xff]  ;;  %v6695_v57 = vld [vmem:[%s14244_s1 + $0x40] sm:$0xff] }
 0x670   :  { %v6160_v34 = vpop.eup %6159  ;;  %v10799_v21 = vadd.f32 %v2689_v14, %v2681_v1  ;;  %v2679_v60 = vmul.f32 %v6158_v37, %v2671_v5  ;;  %v2669_v10 = vsub.f32 1.0, %v2538_v31  ;;  %v2685_v16 = vmul.f32 %v2538_v31, %v14838_v38  ;;  %vm14841_vm15 = vmmov %vm14840_vm11  ;;  %v6696_v52 = vld [vmem:[%s14245_s2 + $0x48] sm:$0xff]  ;;  %v6698_v11 = vld [vmem:[%s14245_s2 + $0x50] sm:$0xff] }
 0x671   :  { %14820 = vst [vmem:[#allocation24_spill] sm:$0xff] %v10762_v24  ;;  %2709 = vmatpush.msra.mxu1 %v10762_v24  ;;  %2733 = vmatpush.msrb.mxu0 %v10762_v24  ;;  %v6162_v25 = vpop.eup %6161  ;;  %v10804_v8 = vadd.f32 %v2688_v6, %v2680_v7  ;;  %v2678_v63 = vmul.f32 %v6160_v34, %v2670_v15  ;;  %vm14843_vm8 = vmmov %vm14840_vm11  ;;  %v6699_v26 = vld [vmem:[%s14244_s1 + $0x50] sm:$0xff]  ;;  %v6700_v51 = vld [vmem:[%s14245_s2 + $0x58] sm:$0xff] }
 0x672   :  { %14831 = vst [vmem:[#allocation21_spill] sm:$0xff] %v10799_v21  ;;  %v10809_v46 = vadd.f32 %v2687_v4, %v2679_v60  ;;  %v2677_v61 = vmul.f32 %v6162_v25, %v2669_v10  ;;  %vm14845_vm10 = vmmov %vm14843_vm8  ;;  %v6701_v49 = vld [vmem:[%s14244_s1 + $0x58] sm:$0xff]  ;;  %v6702_v58 = vld [vmem:[%s14245_s2 + $0x60] sm:$0xff] }
 0x673   :  { %2710 = vmatpush.msra.mxu1 %v10783_v59  ;;  %2734 = vmatpush.msrb.mxu0 %v10783_v59  ;;  %14833 = vst [vmem:[#allocation19_spill] sm:$0xff] %v10804_v8  ;;  %v10814_v54 = vadd.f32 %v2686_v18, %v2678_v63  ;;  %vm14847_vm12 = vmmov %vm14843_vm8  ;;  %v6703_v22 = vld [vmem:[%s14244_s1 + $0x60] sm:$0xff]  ;;  %v6704_v41 = vld [vmem:[%s14245_s2 + $0x68] sm:$0xff] }
 0x674   :  { %14835 = vst [vmem:[#allocation22_spill] sm:$0xff] %v10809_v46  ;;  %v10819_v47 = vadd.f32 %v2685_v16, %v2677_v61  ;;  %vm14849_vm9 = vmmov %vm14843_vm8  ;;  %v6705_v1 = vld [vmem:[%s14244_s1 + $0x68] sm:$0xff]  ;;  %v6706_v12 = vld [vmem:[%s14245_s2 + $0x70] sm:$0xff] }
 0x675   :  { %2711 = vmatpush.msra.mxu1 %v10794_v0  ;;  %2735 = vmatpush.msrb.mxu0 %v10794_v0  ;;  %14837 = vst [vmem:[#allocation25_spill] sm:$0xff] %v10814_v54  ;;  %vm14851_vm2 = vmmov %vm14843_vm8  ;;  %v6707_v37 = vld [vmem:[%s14244_s1 + $0x70] sm:$0xff]  ;;  %v6708_v36 = vld [vmem:[%s14245_s2 + $0x78] sm:$0xff] }
 0x676   :  { %14839 = vst [vmem:[#allocation18_spill] sm:$0xff] %v10819_v47  ;;  %vm14853_vm14 = vmmov %vm14851_vm2  ;;  %v6709_v30 = vld [vmem:[%s14244_s1 + $0x78] sm:$0xff]  ;;  %v6710_v50 = vld [vmem:[%s14245_s2 + $0x80] sm:$0xff] }
 0x677   :  { %2712 = vmatpush.msra.mxu1 %v10799_v21  ;;  %2736 = vmatpush.msrb.mxu0 %v10799_v21  ;;  %vm14855_vm1 = vmmov %vm14851_vm2  ;;  %v6711_v5 = vld [vmem:[%s14244_s1 + $0x80] sm:$0xff]  ;;  %v6712_v34 = vld [vmem:[%s14245_s2 + $0x88] sm:$0xff] }
 0x678   :  { %v6713_v6 = vld [vmem:[%s14244_s1 + $0x88] sm:$0xff]  ;;  %v6714_v60 = vld [vmem:[%s14245_s2 + $0x90] sm:$0xff]  ;;  %v6716_v4 = vld [vmem:[%s14245_s2 + $0x98] sm:$0xff] }
 0x679   :  { %2713 = vmatpush.msra.mxu1 %v10804_v8  ;;  %2737 = vmatpush.msrb.mxu0 %v10804_v8  ;;  %v6715_v9 = vld [vmem:[%s14244_s1 + $0x90] sm:$0xff]  ;;  %v6717_v13 = vld [vmem:[%s14244_s1 + $0x98] sm:$0xff]  ;;  %v6718_v18 = vld [vmem:[%s14245_s2 + $0xa0] sm:$0xff] }
 0x67a   :  { %v6719_v16 = vld [vmem:[%s14244_s1 + $0xa0] sm:$0xff] }
 0x67b   :  { %2714 = vmatpush.msra.mxu1 %v10809_v46  ;;  %2738 = vmatpush.msrb.mxu0 %v10809_v46 }
 0x67d   :  { %2715 = vmatpush.msra.mxu1 %v10814_v54  ;;  %2739 = vmatpush.msrb.mxu0 %v10814_v54 }
 0x67f   :  { %2716 = vmatpush.msra.mxu1 %v10819_v47  ;;  %2740 = vmatpush.msrb.mxu0 %v10819_v47 }
 0x680   :  { %5512 = vmatmul.msk.f32.vlgmr.msra.gmra.mxu1 %vm14840_vm11, %v6677_v27  ;;  %5514 = vmatmul.msk.f32.vlgmr.msrb.gmra.mxu0 %vm14841_vm15, %v6678_v29  ;;  %vm14856_vm11 = vmmov %vm14848_vm0 }
 0x681   :  { %2853 = vmatpush.msrb.mxu1 %v5513_v33  ;;  %vm14857_vm15 = vmmov %vm14855_vm1  ;;  %v6720_v33 = vld [vmem:[%s14245_s2 + $0xa8] sm:$0xff] }
 0x688   :  { %5546 = vmatmul.msk.f32.vlgmr.msrb.gmra.mxu1 %vm14842_vm5, %v6679_v55  ;;  %5515 = vmatmul.msk.f32.gmra.mxu0 %vm14843_vm8, %v6680_v48  ;;  %vm14858_vm5 = vmmov %vm14848_vm0  ;;  %v6721_v55 = vld [vmem:[%s14244_s1 + $0xa8] sm:$0xff]  ;;  %v6722_v48 = vld [vmem:[%s14245_s2 + $0xb0] sm:$0xff] }
 0x689   :  { %vm14859_vm8 = vmmov %vm14855_vm1 }
 0x690   :  { %5547 = vmatmul.msk.f32.gmra.mxu1 %vm14844_vm4, %v6681_v45  ;;  %5516 = vmatmul.msk.f32.gmra.mxu0 %vm14845_vm10, %v6682_v43  ;;  %vm14860_vm4 = vmmov %vm14848_vm0 }
 0x691   :  { %vm14861_vm10 = vmmov %vm14855_vm1 }
 0x698   :  { %5548 = vmatmul.msk.f32.gmra.mxu1 %vm14846_vm7, %v6683_v42  ;;  %5517 = vmatmul.msk.f32.gmra.mxu0 %vm14847_vm12, %v6684_v17  ;;  %vm14862_vm7 = vmmov %vm14848_vm0  ;;  %v6723_v42 = vld [vmem:[%s14244_s1 + $0xb0] sm:$0xff]  ;;  %v6724_v17 = vld [vmem:[%s14245_s2 + $0xb8] sm:$0xff] }
 0x699   :  { %vm14863_vm12 = vmmov %vm14855_vm1 }
 0x6a0   :  { %5549 = vmatmul.msk.f32.gmra.mxu1 %vm14848_vm0, %v6685_v40  ;;  %5518 = vmatmul.msk.f32.gmra.mxu0 %vm14849_vm9, %v6686_v19  ;;  %vm14864_vm9 = vmmov %vm14855_vm1 }
 0x6a8   :  { %5550 = vmatmul.msk.f32.gmra.mxu1 %vm14850_vm3, %v6687_v23  ;;  %5519 = vmatmul.msk.f32.gmra.mxu0 %vm14851_vm2, %v6688_v44  ;;  %vm14865_vm3 = vmmov %vm14848_vm0  ;;  %v6725_v23 = vld [vmem:[%s14244_s1 + $0xb8] sm:$0xff]  ;;  %v6726_v44 = vld [vmem:[%s14245_s2 + $0xc0] sm:$0xff] }
 0x6a9   :  { %vm14866_vm2 = vmmov %vm14855_vm1 }
 0x6b0   :  { %5551 = vmatmul.msk.f32.gmra.mxu1 %vm14852_vm13, %v6689_v53  ;;  %5520 = vmatmul.msk.f32.gmra.mxu0 %vm14853_vm14, %v6690_v32  ;;  %vm14867_vm13 = vmmov %vm14848_vm0 }
 0x6b1   :  { %vm14868_vm14 = vmmov %vm14855_vm1 }
 0x6b8   :  { %5552 = vmatmul.msk.f32.gmra.mxu1 %vm14854_vm6, %v6691_v62  ;;  %5521 = vmatmul.msk.f32.gmra.mxu0 %vm14855_vm1, %v6692_v39  ;;  %vm14869_vm6 = vmmov %vm14848_vm0  ;;  %v6727_v62 = vld [vmem:[%s14244_s1 + $0xc0] sm:$0xff]  ;;  %v6728_v39 = vld [vmem:[%s14245_s2 + $0xc8] sm:$0xff] }
 0x6c0   :  { %5553 = vmatmul.msk.f32.gmra.mxu1 %vm14856_vm11, %v6693_v3  ;;  %5522 = vmatmul.msk.f32.gmra.mxu0 %vm14857_vm15, %v6694_v28  ;;  %vm14870_vm11 = vmmov %vm14848_vm0 }
 0x6c1   :  { %vm14871_vm15 = vmmov %vm14855_vm1 }
 0x6c8   :  { %5554 = vmatmul.msk.f32.gmra.mxu1 %vm14858_vm5, %v6695_v57  ;;  %5523 = vmatmul.msk.f32.gmra.mxu0 %vm14859_vm8, %v6696_v52  ;;  %vm14872_vm5 = vmmov %vm14848_vm0  ;;  %v6729_v57 = vld [vmem:[%s14244_s1 + $0xc8] sm:$0xff]  ;;  %v6730_v52 = vld [vmem:[%s14245_s2 + $0xd0] sm:$0xff] }
 0x6c9   :  { %vm14873_vm8 = vmmov %vm14855_vm1 }
 0x6d0   :  { %5555 = vmatmul.msk.f32.gmra.mxu1 %vm14860_vm4, %v6697_v20  ;;  %5524 = vmatmul.msk.f32.gmra.mxu0 %vm14861_vm10, %v6698_v11  ;;  %vm14874_vm4 = vmmov %vm14848_vm0 }
 0x6d1   :  { %vm14875_vm10 = vmmov %vm14855_vm1 }
 0x6d8   :  { %5556 = vmatmul.msk.f32.gmra.mxu1 %vm14862_vm7, %v6699_v26  ;;  %5525 = vmatmul.msk.f32.gmra.mxu0 %vm14863_vm12, %v6700_v51  ;;  %vm14876_vm7 = vmmov %vm14848_vm0  ;;  %v6731_v26 = vld [vmem:[%s14244_s1 + $0xd0] sm:$0xff]  ;;  %v6732_v51 = vld [vmem:[%s14245_s2 + $0xd8] sm:$0xff] }
 0x6d9   :  { %vm14877_vm12 = vmmov %vm14855_vm1 }
 0x6e0   :  { %5557 = vmatmul.msk.f32.gmra.mxu1 %vm14848_vm0, %v6701_v49  ;;  %5526 = vmatmul.msk.f32.gmra.mxu0 %vm14864_vm9, %v6702_v58  ;;  %vm14878_vm9 = vmmov %vm14855_vm1 }
 0x6e8   :  { %5558 = vmatmul.msk.f32.gmra.mxu1 %vm14865_vm3, %v6703_v22  ;;  %5527 = vmatmul.msk.f32.gmra.mxu0 %vm14866_vm2, %v6704_v41  ;;  %vm14879_vm3 = vmmov %vm14848_vm0  ;;  %v6733_v22 = vld [vmem:[%s14244_s1 + $0xd8] sm:$0xff]  ;;  %v6734_v41 = vld [vmem:[%s14245_s2 + $0xe0] sm:$0xff] }
 0x6e9   :  { %vm14880_vm2 = vmmov %vm14855_vm1 }
 0x6f0   :  { %5559 = vmatmul.msk.f32.gmra.mxu1 %vm14867_vm13, %v6705_v1  ;;  %5528 = vmatmul.msk.f32.gmra.mxu0 %vm14868_vm14, %v6706_v12  ;;  %vm14881_vm13 = vmmov %vm14848_vm0 }
 0x6f1   :  { %vm14882_vm14 = vmmov %vm14855_vm1 }
 0x6f8   :  { %5560 = vmatmul.msk.f32.gmra.mxu1 %vm14869_vm6, %v6707_v37  ;;  %5529 = vmatmul.msk.f32.gmra.mxu0 %vm14855_vm1, %v6708_v36  ;;  %vm14883_vm6 = vmmov %vm14848_vm0  ;;  %v6735_v37 = vld [vmem:[%s14244_s1 + $0xe0] sm:$0xff]  ;;  %v6736_v36 = vld [vmem:[%s14245_s2 + $0xe8] sm:$0xff] }
 0x6fd   :  { %v2718_v2 = vpop.f32.mrf.mxu1  ;;  %v10954_v56 = vpop.f32.mrf.mxu0 }
 0x6fe   :  { %2721 = vst [vmem:[#allocation2 + $0x3] sm:$0x1] %v2718_v2 }
 0x6ff   :  { %2722 = vst [vmem:[#allocation3 + $0x3] sm:$0x2] %v2718_v2 }
 0x700   :  { %5561 = vmatmul.msk.f32.gmra.mxu1 %vm14870_vm11, %v6709_v30  ;;  %5530 = vmatmul.msk.f32.gmra.mxu0 %vm14871_vm15, %v6710_v50  ;;  %vm14884_vm11 = vmmov %vm14848_vm0  ;;  %v6737_v50 = vld [vmem:[%s14244_s1 + $0xe8] sm:$0xff] }
 0x701   :  { %vm14885_vm15 = vmmov %vm14855_vm1 }
 0x705   :  { %v10964_v14 = vpop.f32.mrf.mxu1  ;;  %v10966_v7 = vpop.f32.mrf.mxu0 }
 0x708   :  { %5562 = vmatmul.msk.f32.gmra.mxu1 %vm14872_vm5, %v6711_v5  ;;  %5531 = vmatmul.msk.f32.gmra.mxu0 %vm14873_vm8, %v6712_v34  ;;  %vm14886_vm5 = vmmov %vm14848_vm0  ;;  %v6738_v5 = vld [vmem:[%s14245_s2 + $0xf0] sm:$0xff] }
 0x709   :  { %vm14887_vm8 = vmmov %vm14855_vm1 }
 0x70d   :  { %v10976_v31 = vpop.f32.mrf.mxu1  ;;  %v10978_v35 = vpop.f32.mrf.mxu0 }
 0x710   :  { %5563 = vmatmul.msk.f32.gmra.mxu1 %vm14874_vm4, %v6713_v6  ;;  %5532 = vmatmul.msk.f32.gmra.mxu0 %vm14875_vm10, %v6714_v60  ;;  %vm14888_vm4 = vmmov %vm14848_vm0  ;;  %v6739_v60 = vld [vmem:[%s14244_s1 + $0xf0] sm:$0xff] }
 0x711   :  { %vm14889_vm10 = vmmov %vm14855_vm1 }
 0x715   :  { %v10988_v15 = vpop.f32.mrf.mxu1  ;;  %v10990_v25 = vpop.f32.mrf.mxu0 }
 0x718   :  { %5564 = vmatmul.msk.f32.gmra.mxu1 %vm14876_vm7, %v6715_v9  ;;  %5533 = vmatmul.msk.f32.gmra.mxu0 %vm14877_vm12, %v6716_v4  ;;  %vm14890_vm7 = vmmov %vm14848_vm0  ;;  %v6740_v9 = vld [vmem:[%s14245_s2 + $0xf8] sm:$0xff] }
 0x719   :  { %vm14891_vm12 = vmmov %vm14855_vm1 }
 0x71d   :  { %v11000_v63 = vpop.f32.mrf.mxu1  ;;  %v11002_v10 = vpop.f32.mrf.mxu0 }
 0x720   :  { %5565 = vmatmul.msk.f32.gmra.mxu1 %vm14848_vm0, %v6717_v13  ;;  %5534 = vmatmul.msk.f32.gmra.mxu0 %vm14878_vm9, %v6718_v18  ;;  %vm14892_vm9 = vmmov %vm14855_vm1  ;;  %v6741_v18 = vld [vmem:[%s14244_s1 + $0xf8] sm:$0xff] }
 0x725   :  { %v11012_v61 = vpop.f32.mrf.mxu1  ;;  %v11014_v38 = vpop.f32.mrf.mxu0 }
 0x728   :  { %5566 = vmatmul.msk.f32.gmra.mxu1 %vm14879_vm3, %v6719_v16  ;;  %5535 = vmatmul.msk.f32.gmra.mxu0 %vm14880_vm2, %v6720_v33  ;;  %vm14893_vm3 = vmmov %vm14848_vm0 }
 0x729   :  { %vm14894_vm2 = vmmov %vm14855_vm1 }
 0x72d   :  { %v11024_v27 = vpop.f32.mrf.mxu1  ;;  %v11026_v29 = vpop.f32.mrf.mxu0 }
 0x730   :  { %5567 = vmatmul.msk.f32.gmra.mxu1 %vm14881_vm13, %v6721_v55  ;;  %5536 = vmatmul.msk.f32.gmra.mxu0 %vm14882_vm14, %v6722_v48  ;;  %vm14895_vm13 = vmmov %vm14848_vm0 }
 0x731   :  { %vm14896_vm14 = vmmov %vm14855_vm1 }
 0x735   :  { %v11036_v45 = vpop.f32.mrf.mxu1  ;;  %v11038_v43 = vpop.f32.mrf.mxu0 }
 0x738   :  { %5568 = vmatmul.msk.f32.gmra.mxu1 %vm14883_vm6, %v6723_v42  ;;  %5537 = vmatmul.msk.f32.gmra.mxu0 %vm14855_vm1, %v6724_v17  ;;  %vm14897_vm6 = vmmov %vm14848_vm0 }
 0x73d   :  { %v11048_v40 = vpop.f32.mrf.mxu1  ;;  %v11050_v19 = vpop.f32.mrf.mxu0 }
 0x740   :  { %5569 = vmatmul.msk.f32.gmra.mxu1 %vm14884_vm11, %v6725_v23  ;;  %5538 = vmatmul.msk.f32.gmra.mxu0 %vm14885_vm15, %v6726_v44  ;;  %vm14899_vm11 = vmmov %vm14848_vm0 }
 0x745   :  { %v11060_v53 = vpop.f32.mrf.mxu1  ;;  %v11062_v32 = vpop.f32.mrf.mxu0 }
 0x748   :  { %5570 = vmatmul.msk.f32.gmra.mxu1 %vm14886_vm5, %v6727_v62  ;;  %5539 = vmatmul.msk.f32.gmra.mxu0 %vm14887_vm8, %v6728_v39 }
 0x74d   :  { %v11072_v3 = vpop.f32.mrf.mxu1  ;;  %v11074_v28 = vpop.f32.mrf.mxu0 }
 0x750   :  { %5571 = vmatmul.msk.f32.gmra.mxu1 %vm14888_vm4, %v6729_v57  ;;  %5540 = vmatmul.msk.f32.gmra.mxu0 %vm14889_vm10, %v6730_v52  ;;  %v2856_v57 = vadd.f32 %v10964_v14, %v10954_v56  ;;  %v2865_v56 = vadd.f32 %v11000_v63, %v10990_v25  ;;  %v2874_v63 = vadd.f32 %v11036_v45, %v11026_v29 }
 0x752   :  { %v5578_v52 = vmul.f32 -1.442695, %v2856_v57 }
 0x754   :  { %6163 = vpow2.f32 %v5578_v52 }
 0x755   :  { %v11084_v20 = vpop.f32.mrf.mxu1  ;;  %v11086_v11 = vpop.f32.mrf.mxu0 }
 0x758   :  { %5572 = vmatmul.msk.f32.gmra.mxu1 %vm14890_vm7, %v6731_v26  ;;  %5541 = vmatmul.msk.f32.gmra.mxu0 %vm14891_vm12, %v6732_v51  ;;  %v2859_v26 = vadd.f32 %v10976_v31, %v10966_v7  ;;  %v5581_v31 = vmul.f32 -1.442695, %v2865_v56 }
 0x75d   :  { %v11096_v49 = vpop.f32.mrf.mxu1  ;;  %v11098_v58 = vpop.f32.mrf.mxu0 }
 0x760   :  { %5573 = vmatmul.msk.f32.gmra.mxu1 %vm14848_vm0, %v6733_v22  ;;  %5542 = vmatmul.msk.f32.gmra.mxu0 %vm14892_vm9, %v6734_v41  ;;  %v5579_v41 = vmul.f32 -1.442695, %v2859_v26 }
 0x762   :  { %6165 = vpow2.f32 %v5579_v41 }
 0x765   :  { %v11108_v1 = vpop.f32.mrf.mxu1  ;;  %v11110_v12 = vpop.f32.mrf.mxu0 }
 0x768   :  { %5574 = vmatmul.msk.f32.gmra.mxu1 %vm14893_vm3, %v6735_v37  ;;  %5543 = vmatmul.msk.f32.gmra.mxu0 %vm14894_vm2, %v6736_v36  ;;  %v2862_v37 = vadd.f32 %v10988_v15, %v10978_v35  ;;  %v2871_v35 = vadd.f32 %v11024_v27, %v11014_v38  ;;  %v5584_v27 = vmul.f32 -1.442695, %v2874_v63 }
 0x76a   :  { %v5580_v36 = vmul.f32 -1.442695, %v2862_v37  ;;  %v5583_v26 = vmul.f32 -1.442695, %v2871_v35 }
 0x76c   :  { %6167 = vpow2.f32 %v5580_v36 }
 0x76d   :  { %v11120_v2 = vpop.f32.mrf.mxu1  ;;  %v11122_v30 = vpop.f32.mrf.mxu0 }
 0x770   :  { %5575 = vmatmul.msk.f32.gmra.mxu1 %vm14895_vm13, %v6737_v50  ;;  %5544 = vmatmul.msk.f32.gmra.mxu0 %vm14896_vm14, %v6738_v5  ;;  %v6164_v50 = vpop.eup %6163 }
 0x771   :  { %v11188_v14 = vadd.f32 1.0, %v6164_v50  ;;  %v6166_v7 = vpop.eup %6165 }
 0x772   :  { %v11195_v15 = vadd.f32 1.0, %v6166_v7  ;;  %v6168_v25 = vpop.eup %6167 }
 0x773   :  { %6169 = vrcp.f32 %v11188_v14  ;;  %vm2988_vm15 = vweird.f32 %v11188_v14 }
 0x774   :  { %6171 = vpow2.f32 %v5581_v31  ;;  %v2880_v31 = vadd.f32 %v11060_v53, %v11050_v19  ;;  %v2886_v19 = vadd.f32 %v11084_v20, %v11074_v28  ;;  %vm3003_vm10 = vweird.f32 %v11195_v15 }
 0x775   :  { %v11132_v34 = vpop.f32.mrf.mxu1  ;;  %v11134_v6 = vpop.f32.mrf.mxu0  ;;  %6173 = vrcp.f32 %v11195_v15 }
 0x778   :  { %5576 = vmatmul.msk.f32.gmra.mxu1 %vm14897_vm6, %v6739_v60  ;;  %5545 = vmatmul.msk.f32.gmra.mxu0 %vm14855_vm1, %v6740_v9  ;;  %v2868_v9 = vadd.f32 %v11012_v61, %v11002_v10  ;;  %v11204_v10 = vadd.f32 1.0, %v6168_v25  ;;  %v2877_v61 = vadd.f32 %v11048_v40, %v11038_v43  ;;  %v2994_v25 = vand.u32 2147483648, %v11188_v14 }
 0x779   :  { %v11208_v38 = vpop.eup %6169 }
 0x77a   :  { %v5582_v52 = vmul.f32 -1.442695, %v2868_v9  ;;  %v6172_v41 = vpop.eup %6171  ;;  %v5585_v37 = vmul.f32 -1.442695, %v2877_v61  ;;  %v2984_v29 = vmul.f32 %v11208_v38, %v11188_v14  ;;  %v2992_v61 = vand.u32 2147483647, %v11188_v14 }
 0x77b   :  { %v11217_v50 = vpop.eup %6173  ;;  %v11219_v43 = vadd.f32 1.0, %v6172_v41  ;;  %vm2989_vm5 = vweird.f32 %v11208_v38  ;;  %vm3018_vm3 = vweird.f32 %v11204_v10 }
 0x77c   :  { %6175 = vpow2.f32 %v5582_v52  ;;  %v2985_v56 = vsub.f32 1.0, %v2984_v29  ;;  %v2999_v9 = vmul.f32 %v11217_v50, %v11195_v15  ;;  %v5586_v29 = vmul.f32 -1.442695, %v2880_v31  ;;  %vm11275_vm4 = vmor %vm2988_vm15, %vm2989_vm5 }
 0x77d   :  { %v11144_v4 = vpop.f32.mrf.mxu1  ;;  %v11146_v13 = vpop.f32.mrf.mxu0  ;;  %6177 = vpow2.f32 %v5583_v26  ;;  %v2883_v26 = vadd.f32 %v11072_v3, %v11062_v32  ;;  %v2889_v32 = vadd.f32 %v11096_v49, %v11086_v11  ;;  %v2995_v3 = vor.u32 1.1754944e-38, %v2994_v25 }
 0x77e   :  { %14898 = vst [vmem:[#allocation9_spill] sm:$0xff] %v11146_v13  ;;  %6179 = vrcp.f32 %v11204_v10  ;;  %v2986_v53 = vmul.f32 %v11208_v38, %v2985_v56  ;;  %v2892_v56 = vadd.f32 %v11108_v1, %v11098_v58  ;;  %vm11254_vm8 = vcmp.eq.f32.partialorder %v2992_v61, 8.507059e+37 }
 0x77f   :  { %6181 = vpow2.f32 %v5584_v27  ;;  %v5587_v20 = vmul.f32 -1.442695, %v2883_v26  ;;  %v5588_v11 = vmul.f32 -1.442695, %v2886_v19  ;;  %v2895_v58 = vadd.f32 %v11120_v2, %v11110_v12 }
 0x780   :  { %5577 = vmatmul.msk.f32.gmra.mxu1 %vm14899_vm11, %v6741_v18  ;;  %6183 = vpow2.f32 %v5585_v37  ;;  %v2987_v49 = vadd.f32 %v11208_v38, %v2986_v53  ;;  %v2898_v26 = vadd.f32 %v11132_v34, %v11122_v30  ;;  %v5590_v19 = vmul.f32 -1.442695, %v2892_v56 }
 0x781   :  { %6185 = vrcp.f32 %v11219_v43  ;;  %v2901_v2 = vadd.f32 %v11144_v4, %v11134_v6  ;;  %v3009_v34 = vand.u32 2147483648, %v11195_v15  ;;  %vm3004_vm7 = vweird.f32 %v11217_v50 }
 0x782   :  { %v6176_v40 = vpop.eup %6175  ;;  %v2991_v30 = vsel %vm11275_vm4, %v11208_v38, %v2987_v49  ;;  %v5592_v4 = vmul.f32 -1.442695, %v2898_v26  ;;  %v3022_v56 = vand.u32 2147483647, %v11204_v10  ;;  %vm11314_vm0 = vmor %vm3003_vm10, %vm3004_vm7  ;;  %vm3033_vm14 = vweird.f32 %v11219_v43 }
 0x783   :  { %v6178_v7 = vpop.eup %6177  ;;  %v11229_v52 = vadd.f32 1.0, %v6176_v40  ;;  %v3000_v40 = vsub.f32 1.0, %v2999_v9  ;;  %v3007_v9 = vand.u32 2147483647, %v11195_v15  ;;  %v3010_v26 = vor.u32 1.1754944e-38, %v3009_v34 }
 0x784   :  { %v11225_v35 = vpop.eup %6179  ;;  %v11234_v27 = vadd.f32 1.0, %v6178_v7  ;;  %vm11333_vm2 = vcmp.eq.f32.partialorder %v3022_v56, 8.507059e+37 }
 0x785   :  { %v11152_v16 = vpop.f32.mrf.mxu1  ;;  %v11154_v33 = vpop.f32.mrf.mxu0  ;;  %v3014_v28 = vmul.f32 %v11225_v35, %v11204_v10  ;;  %6187 = vrcp.f32 %v11229_v52  ;;  %v3001_v1 = vmul.f32 %v11217_v50, %v3000_v40  ;;  %v5591_v40 = vmul.f32 -1.442695, %v2895_v58 }
 0x786   :  { %14900 = vst [vmem:[#allocation17_spill] sm:$0xff] %v11152_v16  ;;  %v6182_v63 = vpop.eup %6181  ;;  %6189 = vrcp.f32 %v11234_v27  ;;  %vm11299_vm12 = vcmp.eq.f32.partialorder %v3007_v9, 8.507059e+37  ;;  %vm3019_vm9 = vweird.f32 %v11225_v35  ;;  %vm3048_vm15 = vweird.f32 %v11229_v52 }
 0x787   :  { %14901 = vst [vmem:[#allocation10_spill] sm:$0xff] %v11154_v33  ;;  %v6184_v47 = vpop.eup %6183  ;;  %v11244_v54 = vadd.f32 1.0, %v6182_v63  ;;  %6191 = vpow2.f32 %v5586_v29  ;;  %v5589_v63 = vmul.f32 -1.442695, %v2889_v32  ;;  %v3015_v61 = vsub.f32 1.0, %v3014_v28  ;;  %vm11353_vm13 = vmor %vm3018_vm3, %vm3019_vm9 }
 0x788   :  { %v11258_v31 = vpop.eup %6185  ;;  %v11263_v25 = vadd.f32 1.0, %v6184_v47  ;;  %v3002_v32 = vadd.f32 %v11217_v50, %v3001_v1  ;;  %v5593_v1 = vmul.f32 -1.442695, %v2901_v2  ;;  %vm3063_vm7 = vweird.f32 %v11234_v27 }
 0x789   :  { %6193 = vrcp.f32 %v11244_v54  ;;  %v3029_v12 = vmul.f32 %v11258_v31, %v11219_v43  ;;  %v3016_v28 = vmul.f32 %v11225_v35, %v3015_v61  ;;  %vm3034_vm1 = vweird.f32 %v11258_v31 }
 0x78a   :  { %6195 = vpow2.f32 %v5587_v20  ;;  %v3006_v47 = vsel %vm11314_vm0, %v11217_v50, %v3002_v32  ;;  %vm11389_vm11 = vmor %vm3033_vm14, %vm3034_vm1  ;;  %vm3078_vm0 = vweird.f32 %v11244_v54  ;;  %v3082_v38 = vand.u32 2147483647, %v11244_v54 }
 0x78b   :  { %6197 = vpow2.f32 %v5588_v11  ;;  %v11292_v29 = vpop.eup %6187  ;;  %v3024_v11 = vand.u32 2147483648, %v11204_v10  ;;  %v3030_v49 = vsub.f32 1.0, %v3029_v12  ;;  %v3017_v12 = vadd.f32 %v11225_v35, %v3016_v28 }
 0x78c   :  { %6199 = vrcp.f32 %v11263_v25  ;;  %v11297_v6 = vpop.eup %6189  ;;  %v3044_v61 = vmul.f32 %v11292_v29, %v11229_v52  ;;  %v3039_v28 = vand.u32 2147483648, %v11219_v43  ;;  %v11349_v56 = vsel %vm11299_vm12, %v3010_v26, %v3006_v47 }
 0x78d   :  { %v11156_v55 = vpop.f32.mrf.mxu1  ;;  %v11158_v48 = vpop.f32.mrf.mxu0  ;;  %6201 = vpow2.f32 %v5589_v63  ;;  %v11310_v63 = vsel %vm11254_vm8, %v2995_v3, %v2991_v30  ;;  %v3037_v3 = vand.u32 2147483647, %v11219_v43  ;;  %v3059_v2 = vmul.f32 %v11297_v6, %v11234_v27  ;;  %14917 = vst [vmem:[#allocation12_spill] sm:$0xff] %v11349_v56 }
 0x78e   :  { %14902 = vst [vmem:[#allocation8_spill] sm:$0xff] %v11156_v55  ;;  %v6192_v20 = vpop.eup %6191  ;;  %6203 = vpow2.f32 %v5590_v19  ;;  %v3025_v50 = vor.u32 1.1754944e-38, %v3024_v11  ;;  %v3045_v46 = vsub.f32 1.0, %v3044_v61  ;;  %vm3049_vm5 = vweird.f32 %v11292_v29 }
 0x78f   :  { %14903 = vst [vmem:[#allocation13_spill] sm:$0xff] %v11158_v48  ;;  %v11306_v58 = vpop.eup %6193  ;;  %6205 = vpow2.f32 %v5591_v40  ;;  %v11325_v15 = vadd.f32 1.0, %v6192_v20  ;;  %v3031_v40 = vmul.f32 %v11258_v31, %v3030_v49  ;;  %vm11364_vm6 = vcmp.eq.f32.partialorder %v3037_v3, 8.507059e+37  ;;  %vm11436_vm10 = vmor %vm3048_vm15, %vm3049_vm5 }
 0x790   :  { %14912 = vst [vmem:[#allocation16_spill] sm:$0xff] %v11310_v63  ;;  %v6196_v19 = vpop.eup %6195  ;;  %6207 = vpow2.f32 %v5592_v4  ;;  %v3074_v49 = vmul.f32 %v11306_v58, %v11244_v54  ;;  %v3060_v26 = vsub.f32 1.0, %v3059_v2  ;;  %v3046_v3 = vmul.f32 %v11292_v29, %v3045_v46 }
 0x791   :  { %v6198_v7 = vpop.eup %6197  ;;  %v11338_v20 = vadd.f32 1.0, %v6196_v19  ;;  %6209 = vpow2.f32 %v5593_v1  ;;  %v3021_v1 = vsel %vm11353_vm13, %v11225_v35, %v3017_v12  ;;  %v3032_v47 = vadd.f32 %v11258_v31, %v3031_v40 }
 0x792   :  { %v11330_v30 = vpop.eup %6199  ;;  %v11345_v10 = vadd.f32 1.0, %v6198_v7  ;;  %6211 = vrcp.f32 %v11325_v15  ;;  %v3040_v35 = vor.u32 1.1754944e-38, %v3039_v28  ;;  %v3052_v12 = vand.u32 2147483647, %v11229_v52 }
 0x793   :  { %v6202_v32 = vpop.eup %6201  ;;  %v3089_v7 = vmul.f32 %v11330_v30, %v11263_v25  ;;  %6213 = vrcp.f32 %v11338_v20  ;;  %v3054_v2 = vand.u32 2147483648, %v11229_v52  ;;  %v3075_v40 = vsub.f32 1.0, %v3074_v49 }
 0x794   :  { %v6204_v8 = vpop.eup %6203  ;;  %v11368_v19 = vadd.f32 1.0, %v6202_v32  ;;  %6215 = vrcp.f32 %v11345_v10  ;;  %v11385_v59 = vsel %vm11333_vm2, %v3025_v50, %v3021_v1  ;;  %v3061_v46 = vmul.f32 %v11297_v6, %v3060_v26 }
 0x795   :  { %v11160_v42 = vpop.f32.mrf.mxu1  ;;  %v11162_v17 = vpop.f32.mrf.mxu0  ;;  %v11375_v11 = vadd.f32 1.0, %v6204_v8  ;;  %14922 = vst [vmem:[#allocation11_spill] sm:$0xff] %v11385_v59  ;;  %v3036_v34 = vsel %vm11389_vm11, %v11258_v31, %v3032_v47  ;;  %v3090_v50 = vsub.f32 1.0, %v3089_v7  ;;  %v3047_v1 = vadd.f32 %v11292_v29, %v3046_v3 }
 0x796   :  { %14904 = vst [vmem:[#allocation15_spill] sm:$0xff] %v11160_v42  ;;  %v6206_v61 = vpop.eup %6205  ;;  %6217 = vrcp.f32 %v11368_v19  ;;  %v3067_v26 = vand.u32 2147483647, %v11234_v27  ;;  %vm11411_vm8 = vcmp.eq.f32.partialorder %v3052_v12, 8.507059e+37  ;;  %v3055_v31 = vor.u32 1.1754944e-38, %v3054_v2 }
 0x797   :  { %v6208_v21 = vpop.eup %6207  ;;  %v11381_v0 = vadd.f32 1.0, %v6206_v61  ;;  %6219 = vrcp.f32 %v11375_v11  ;;  %v3076_v47 = vmul.f32 %v11306_v58, %v3075_v40  ;;  %v11421_v3 = vsel %vm11364_vm6, %v3040_v35, %v3036_v34 }
 0x798   :  { %v6210_v32 = vpop.eup %6209  ;;  %v11396_v28 = vadd.f32 1.0, %v6208_v21  ;;  %vm3064_vm4 = vweird.f32 %v11297_v6  ;;  %v3091_v35 = vmul.f32 %v11330_v30, %v3090_v50  ;;  %v3051_v40 = vsel %vm11436_vm10, %v11292_v29, %v3047_v1 }
 0x799   :  { %v11401_v49 = vpop.eup %6211  ;;  %v11409_v61 = vadd.f32 1.0, %v6210_v32  ;;  %6221 = vrcp.f32 %v11381_v0  ;;  %v3062_v32 = vadd.f32 %v11297_v6, %v3061_v46  ;;  %vm11445_vm12 = vcmp.eq.f32.partialorder %v3067_v26, 8.507059e+37  ;;  %vm11456_vm9 = vmor %vm3063_vm7, %vm3064_vm4 }
 0x79a   :  { %v11416_v7 = vpop.eup %6213  ;;  %v3136_v2 = vmul.f32 %v11401_v49, %v11325_v15  ;;  %6223 = vrcp.f32 %v11396_v28  ;;  %v3069_v34 = vand.u32 2147483648, %v11234_v27  ;;  %v3077_v29 = vadd.f32 %v11306_v58, %v3076_v47 }
 0x79b   :  { %v11427_v12 = vpop.eup %6215  ;;  %v3151_v24 = vmul.f32 %v11416_v7, %v11338_v20  ;;  %6225 = vrcp.f32 %v11409_v61  ;;  %vm3079_vm3 = vweird.f32 %v11306_v58  ;;  %v3066_v26 = vsel %vm11456_vm9, %v11297_v6, %v3062_v32 }
 0x79c   :  { %v11451_v52 = vpop.eup %6217  ;;  %v3166_v27 = vmul.f32 %v11427_v12, %v11345_v10  ;;  %v3084_v16 = vand.u32 2147483648, %v11244_v54  ;;  %v3137_v13 = vsub.f32 1.0, %v3136_v2  ;;  %v3092_v63 = vadd.f32 %v11330_v30, %v3091_v35  ;;  %vm11486_vm13 = vmor %vm3078_vm0, %vm3079_vm3 }
 0x79d   :  { %v11164_v23 = vpop.f32.mrf.mxu1  ;;  %v11166_v44 = vpop.f32.mrf.mxu0  ;;  %vm3094_vm2 = vweird.f32 %v11330_v30  ;;  %v3097_v47 = vand.u32 2147483647, %v11263_v25  ;;  %v3181_v33 = vmul.f32 %v11451_v52, %v11368_v19  ;;  %v11480_v50 = vsel %vm11411_vm8, %v3055_v31, %v3051_v40 }
 0x79e   :  { %v11462_v1 = vpop.eup %6219  ;;  %v3070_v32 = vor.u32 1.1754944e-38, %v3069_v34  ;;  %v3099_v35 = vand.u32 2147483648, %v11263_v25  ;;  %v3152_v42 = vsub.f32 1.0, %v3151_v24  ;;  %v3081_v31 = vsel %vm11486_vm13, %v11306_v58, %v3077_v29 }
 0x79f   :  { %v11474_v55 = vpop.eup %6221  ;;  %v3196_v21 = vmul.f32 %v11462_v1, %v11375_v11  ;;  %vm3093_vm14 = vweird.f32 %v11263_v25  ;;  %v3167_v40 = vsub.f32 1.0, %v3166_v27  ;;  %vm3083_vm6 = vcmp.eq.f32.partialorder %v3082_v38, 8.507059e+37 }
 0x7a0   :  { %v11491_v56 = vpop.eup %6223  ;;  %v3071_v54 = vsel %vm11445_vm12, %v3070_v32, %v3066_v26  ;;  %v3085_v34 = vor.u32 1.1754944e-38, %v3084_v16  ;;  %vm11503_vm1 = vmor %vm3093_vm14, %vm3094_vm2  ;;  %v3211_v2 = vmul.f32 %v11474_v55, %v11381_v0  ;;  %vm3098_vm11 = vcmp.eq.f32.partialorder %v3097_v47, 8.507059e+37 }
 0x7a1   :  { %v11507_v24 = vpop.eup %6225  ;;  %v3096_v25 = vsel %vm11503_vm1, %v11330_v30, %v3092_v63  ;;  %v3138_v58 = vmul.f32 %v11401_v49, %v3137_v13  ;;  %v3182_v46 = vsub.f32 1.0, %v3181_v33  ;;  %v3226_v16 = vmul.f32 %v11491_v56, %v11396_v28 }
 0x7a2   :  { %v3086_v27 = vsel %vm3083_vm6, %v3085_v34, %v3081_v31  ;;  %v3100_v26 = vor.u32 1.1754944e-38, %v3099_v35  ;;  %v3197_v38 = vsub.f32 1.0, %v3196_v21  ;;  %v3153_v32 = vmul.f32 %v11416_v7, %v3152_v42 }
 0x7a3   :  { %v3241_v48 = vmul.f32 %v11507_v24, %v11409_v61  ;;  %v3168_v13 = vmul.f32 %v11427_v12, %v3167_v40  ;;  %v3212_v30 = vsub.f32 1.0, %v3211_v2  ;;  %v3174_v47 = vand.u32 2147483647, %v11345_v10 }
 0x7a4   :  { %v11522_v63 = vsel %vm3098_vm11, %v3100_v26, %v3096_v25  ;;  %v11529_v42 = vadd.f32 %v11401_v49, %v3138_v58  ;;  %v3227_v21 = vsub.f32 1.0, %v3226_v16  ;;  %v3221_v34 = vand.u32 2147483648, %v11381_v0 }
 0x7a5   :  { %v11168_v62 = vpop.f32.mrf.mxu1  ;;  %v11170_v39 = vpop.f32.mrf.mxu0  ;;  %v3198_v40 = vmul.f32 %v11462_v1, %v3197_v38  ;;  %v3189_v2 = vand.u32 2147483647, %v11368_v19  ;;  %v11537_v59 = vadd.f32 %v11416_v7, %v3153_v32  ;;  %v3242_v35 = vsub.f32 1.0, %v3241_v48 }
 0x7a6   :  { %v11542_v33 = vadd.f32 %v11427_v12, %v3168_v13  ;;  %v3213_v25 = vmul.f32 %v11474_v55, %v3212_v30  ;;  %v3206_v38 = vand.u32 2147483648, %v11375_v11  ;;  %v3219_v32 = vand.u32 2147483647, %v11381_v0 }
 0x7a7   :  { %v11550_v48 = vor.u32 1.1754944e-38, %v3221_v34  ;;  %vm3216_vm15 = vweird.f32 %v11474_v55  ;;  %v11559_v30 = vadd.f32 %v11462_v1, %v3198_v40  ;;  %vm3230_vm5 = vweird.f32 %v11396_v28 }
 0x7a8   :  { %v3236_v34 = vand.u32 2147483648, %v11396_v28  ;;  %vm3215_vm8 = vweird.f32 %v11381_v0  ;;  %vm3201_vm4 = vweird.f32 %v11462_v1  ;;  %vm3231_vm10 = vweird.f32 %v11491_v56  ;;  %v14963_v0 = vld [vmem:[#allocation9_spill] sm:$0xff] }
 0x7a9   :  { %vm3245_vm12 = vweird.f32 %v11409_v61  ;;  %vm3200_vm0 = vweird.f32 %v11375_v11  ;;  %vm3186_vm9 = vweird.f32 %v11451_v52  ;;  %vm3171_vm3 = vweird.f32 %v11427_v12  ;;  %vm11604_vm14 = vmor %vm3230_vm5, %vm3231_vm10 }
 0x7aa   :  { %vm3246_vm2 = vweird.f32 %v11507_v24  ;;  %vm3185_vm13 = vweird.f32 %v11368_v19  ;;  %vm3170_vm6 = vweird.f32 %v11345_v10  ;;  %vm3156_vm1 = vweird.f32 %v11416_v7 }
 0x7ab   :  { %vm11623_vm11 = vmor %vm3245_vm12, %vm3246_vm2  ;;  %vm3155_vm5 = vweird.f32 %v11338_v20  ;;  %vm3141_vm10 = vweird.f32 %v11401_v49  ;;  %vm3140_vm2 = vweird.f32 %v11325_v15 }
 0x7ac   :  { %vm11645_vm12 = vmor %vm3215_vm8, %vm3216_vm15  ;;  %vm11660_vm15 = vcmp.eq.f32.partialorder %v3174_v47, 8.507059e+37  ;;  %v3207_v47 = vor.u32 1.1754944e-38, %v3206_v38 }
 0x7ad   :  { %v11176_v51 = vpop.f32.mrf.mxu1  ;;  %v11178_v22 = vpop.f32.mrf.mxu0  ;;  %vm11669_vm8 = vmor %vm3200_vm0, %vm3201_vm4 }
 0x7ae   :  { %vm11696_vm0 = vmor %vm3185_vm13, %vm3186_vm9 }
 0x7af   :  { %vm11723_vm9 = vmor %vm3155_vm5, %vm3156_vm1  ;;  %vm14996_vm5 = vcmask 64512  }
 0x7b5   :  { %v11182_v5 = vpop.f32.mrf.mxu1  ;;  %v11184_v60 = vpop.f32.mrf.mxu0 }
 0x7bd   :  { %v11197_v18 = vpop.f32.mrf.mxu1  ;;  %v11199_v57 = vpop.f32.mrf.mxu0 }
 0x7c5   :  { %v11211_v36 = vpop.f32.mrf.mxu1  ;;  %v11215_v45 = vpop.f32.mrf.mxu0 }
 0x7c6   :  { %14905 = vst [vmem:[#allocation14_spill] sm:$0xff] %v11211_v36  ;;  %v3183_v36 = vmul.f32 %v11451_v52, %v3182_v46  ;;  %v3234_v46 = vand.u32 2147483647, %v11396_v28  ;;  %v14942_v28 = vld [vmem:[#allocation11_spill] sm:$0xff] }
 0x7c8   :  { %vm11571_vm7 = vcmp.eq.f32.partialorder %v3234_v46, 8.507059e+37  ;;  %v6762_v46 = vld [vmem:[%s14244_s1 + $0x48] sm:$0xff] }
 0x7cd   :  { %v11239_v41 = vpop.f32.mrf.mxu1  ;;  %v11241_v37 = vpop.f32.mrf.mxu0 }
 0x7d5   :  { %v11288_v14 = vpop.f32.mrf.mxu1  ;;  %v11290_v53 = vpop.f32.mrf.mxu0 }
 0x7dd   :  { %v11340_v4 = vpop.f32.mrf.mxu1  ;;  %v11343_v9 = vpop.f32.mrf.mxu0 }
 0x7e5   :  { %v11404_v43 = vpop.f32.mrf.mxu1  ;;  %v11423_v8 = vpop.f32.mrf.mxu0 }
 0x7ed   :  { %v2942_v6 = vpop.f32.mrf.mxu1  ;;  %v2832_v29 = vpop.f32.mrf.mxu0 }
 0x7ee   :  { %v2943_v58 = vadd.f32 %v2942_v6, %v11423_v8  ;;  %v11553_v8 = vadd.f32 %v11451_v52, %v3183_v36  ;;  %v2940_v6 = vadd.f32 %v11404_v43, %v11343_v9  ;;  %v2922_v36 = vadd.f32 %v11182_v5, %v11178_v22 }
 0x7ef   :  { %v2937_v9 = vadd.f32 %v11340_v4, %v11290_v53  ;;  %v3251_v22 = vand.u32 2147483648, %v11409_v61  ;;  %v2934_v53 = vadd.f32 %v11288_v14, %v11241_v37  ;;  %v2931_v37 = vadd.f32 %v11239_v41, %v11215_v45 }
 0x7f0   :  { %v3259_v4 = vmul.f32 %v11480_v50, %v2940_v6  ;;  %v3249_v45 = vand.u32 2147483647, %v11409_v61  ;;  %v14947_v61 = vld [vmem:[#allocation13_spill] sm:$0xff]  ;;  %v14949_v6 = vld [vmem:[#allocation12_spill] sm:$0xff] }
 0x7f1   :  { %v3258_v14 = vmul.f32 %v11421_v3, %v2937_v9  ;;  %v3257_v3 = vmul.f32 %v14942_v28, %v2934_v53  ;;  %v6752_v28 = vld [vmem:[%s14244_s1 + $0x20] sm:$0xff] }
 0x7f5   :  { %v2945_v31 = vpop.f32.mrf.mxu1  ;;  %v2835_v16 = vpop.f32.mrf.mxu0 }
 0x7f6   :  { %v2946_v26 = vadd.f32 %v2945_v31, %v2832_v29  ;;  %v3228_v31 = vmul.f32 %v11491_v56, %v3227_v21  ;;  %v3260_v29 = vmul.f32 %v3071_v54, %v2943_v58  ;;  %v3243_v21 = vmul.f32 %v11507_v24, %v3242_v35 }
 0x7f7   :  { %v11576_v54 = vadd.f32 %v11474_v55, %v3213_v25  ;;  %v2925_v58 = vadd.f32 %v11197_v18, %v11184_v60  ;;  %v14941_v60 = vld [vmem:[#allocation14_spill] sm:$0xff] }
 0x7f8   :  { %v3261_v13 = vmul.f32 %v3086_v27, %v2946_v26  ;;  %v2919_v27 = vadd.f32 %v11176_v51, %v11170_v39  ;;  %v3229_v5 = vadd.f32 %v11491_v56, %v3228_v31  ;;  %v2916_v39 = vadd.f32 %v11168_v62, %v11166_v44 }
 0x7f9   :  { %v3244_v40 = vadd.f32 %v11507_v24, %v3243_v21  ;;  %v2913_v62 = vadd.f32 %v11164_v23, %v11162_v17  ;;  %v2928_v18 = vadd.f32 %v14941_v60, %v11199_v57  ;;  %v3252_v57 = vor.u32 1.1754944e-38, %v3251_v22  ;;  %v14956_v22 = vld [vmem:[#allocation16_spill] sm:$0xff] }
 0x7fa   :  { %v3269_v25 = vadd.f32 %v3261_v13, %v2922_v36  ;;  %v3268_v51 = vadd.f32 %v3260_v29, %v2919_v27  ;;  %v3233_v41 = vsel %vm11604_vm14, %v11491_v56, %v3229_v5  ;;  %v3237_v56 = vor.u32 1.1754944e-38, %v3236_v34  ;;  %v14948_v29 = vld [vmem:[#allocation15_spill] sm:$0xff]  ;;  %v14953_v34 = vld [vmem:[#allocation8_spill] sm:$0xff] }
 0x7fb   :  { %v3248_v23 = vsel %vm11623_vm11, %v11507_v24, %v3244_v40  ;;  %vm11634_vm14 = vcmp.eq.f32.partialorder %v3189_v2, 8.507059e+37  ;;  %v2910_v31 = vadd.f32 %v14948_v29, %v14947_v61  ;;  %v3256_v13 = vmul.f32 %v14949_v6, %v2931_v37  ;;  %v14952_v2 = vld [vmem:[#allocation10_spill] sm:$0xff] }
 0x7fc   :  { %6227 = vtanh.f32 %v3269_v25  ;;  %v3266_v21 = vadd.f32 %v3258_v14, %v2913_v62  ;;  %v2907_v36 = vadd.f32 %v14953_v34, %v14952_v2  ;;  %vm3250_vm11 = vcmp.eq.f32.partialorder %v3249_v45, 8.507059e+37  ;;  %v14970_v45 = vld [vmem:[#allocation24_spill] sm:$0xff] }
 0x7fd   :  { %v2948_v35 = vpop.f32.mrf.mxu1  ;;  %6229 = vtanh.f32 %v3268_v51  ;;  %v3238_v9 = vsel %vm11571_vm7, %v3237_v56, %v3233_v41  ;;  %v3218_v27 = vsel %vm11645_vm12, %v11474_v55, %v11576_v54  ;;  %v3255_v5 = vmul.f32 %v14956_v22, %v2928_v18 }
 0x7fe   :  { %v2949_v26 = vadd.f32 %v2948_v35, %v2835_v16  ;;  %v3265_v53 = vadd.f32 %v3257_v3, %v2910_v31  ;;  %vm3220_vm7 = vcmp.eq.f32.partialorder %v3219_v32, 8.507059e+37  ;;  %v3203_v55 = vsel %vm11669_vm8, %v11462_v1, %v11559_v30  ;;  %v14964_v32 = vld [vmem:[#allocation17_spill] sm:$0xff] }
 0x7ff   :  { %v14959_v54 = vand.u32 2147483648, %v11368_v19  ;;  %v2904_v40 = vadd.f32 %v14964_v32, %v14963_v0  ;;  %v3223_v1 = vsel %vm3220_vm7, %v11550_v48, %v3218_v27  ;;  %v3285_v14 = vsub.f32 1.0, %v3238_v9  ;;  %v14984_v27 = vld [vmem:[#allocation21_spill] sm:$0xff]  ;;  %vm15002_vm7 = vmmov %vm14996_vm5 }
 0x800   :  { %v3262_v50 = vmul.f32 %v11522_v63, %v2949_v26  ;;  %v3267_v63 = vadd.f32 %v3259_v4, %v2916_v39  ;;  %v3253_v4 = vsel %vm3250_vm11, %v3252_v57, %v3248_v23  ;;  %v14960_v26 = vand.u32 2147483647, %v11338_v20  ;;  %vm11710_vm11 = vmor %vm3170_vm6, %vm3171_vm3  ;;  %v14975_v23 = vld [vmem:[#allocation23_spill] sm:$0xff]  ;;  %v14988_v39 = vld [vmem:[#allocation22_spill] sm:$0xff] }
 0x801   :  { %v3192_v25 = vor.u32 1.1754944e-38, %v14959_v54  ;;  %v3286_v37 = vsub.f32 1.0, %v3253_v4  ;;  %v3188_v44 = vsel %vm11696_vm0, %v11451_v52, %v11553_v8  ;;  %v3263_v62 = vadd.f32 %v3255_v5, %v2904_v40  ;;  %vm11742_vm3 = vmor %vm3140_vm2, %vm3141_vm10  ;;  %v6742_v19 = vld [vmem:[%s14246_s3] sm:$0x3] }
 0x802   :  { %v3270_v16 = vadd.f32 %v3262_v50, %v2925_v58  ;;  %vm11685_vm4 = vcmp.eq.f32.partialorder %v14960_v26, 8.507059e+37  ;;  %v6228_v51 = vpop.eup %6227  ;;  %v3264_v58 = vadd.f32 %v3256_v13, %v2907_v36  ;;  %v14967_v50 = vand.u32 2147483647, %v11375_v11  ;;  %v14980_v13 = vld [vmem:[#allocation20_spill] sm:$0xff]  ;;  %vm15004_vm0 = vmmov %vm14996_vm5 }
 0x803   :  { %v6230_v30 = vpop.eup %6229  ;;  %v3173_v11 = vsel %vm11710_vm11, %v11427_v12, %v11542_v33  ;;  %v3302_v52 = vmul.f32 %v3253_v4, %v14970_v45  ;;  %v3293_v8 = vmul.f32 %v6228_v51, %v3285_v14  ;;  %v3284_v41 = vsub.f32 1.0, %v3223_v1  ;;  %v6748_v45 = vld [vmem:[%s14244_s1 + $0x10] sm:$0xff]  ;;  %vm15006_vm11 = vmmov %vm15004_vm0 }
 0x804   :  { %6231 = vtanh.f32 %v3270_v16  ;;  %vm3205_vm12 = vcmp.eq.f32.partialorder %v14967_v50, 8.507059e+37  ;;  %v14973_v12 = vand.u32 2147483648, %v11345_v10  ;;  %v3158_v16 = vsel %vm11723_vm9, %v11416_v7, %v11537_v59 }
 0x805   :  { %6233 = vtanh.f32 %v3267_v63  ;;  %v3208_v60 = vsel %vm3205_vm12, %v3207_v47, %v3203_v55  ;;  %v3193_v63 = vsel %vm11634_vm14, %v3192_v25, %v3188_v44  ;;  %v3301_v57 = vmul.f32 %v3238_v9, %v14975_v23  ;;  %v5595_v44 = vld [vmem:[%s14243_s0 + $0x28] sm:$0xff]  ;;  %vm14998_vm14 = vmmov %vm14996_vm5  ;;  %v6758_v23 = vld [vmem:[%s14244_s1 + $0x38] sm:$0xff] }
 0x806   :  { %6235 = vtanh.f32 %v3266_v21  ;;  %v3177_v33 = vor.u32 1.1754944e-38, %v14973_v12  ;;  %v3292_v56 = vmul.f32 %v6230_v30, %v3284_v41  ;;  %v3283_v61 = vsub.f32 1.0, %v3208_v60  ;;  %v6751_v41 = vld [vmem:[%s14245_s2 + $0x20] sm:$0xff]  ;;  %v6755_v12 = vld [vmem:[%s14245_s2 + $0x30] sm:$0xff] }
 0x807   :  { %6237 = vtanh.f32 %v3265_v53  ;;  %v14978_v59 = vand.u32 2147483648, %v11338_v20  ;;  %v3143_v31 = vsel %vm11742_vm3, %v11401_v49, %v11529_v42  ;;  %v11756_v6 = vadd.f32 %v3301_v57, %v3293_v8  ;;  %v6750_v8 = vld [vmem:[%s14244_s1 + $0x18] sm:$0xff]  ;;  %vm15008_vm3 = vmmov %vm15004_vm0  ;;  %v6759_v57 = vld [vmem:[%s14245_s2 + $0x40] sm:$0xff] }
 0x808   :  { %6239 = vtanh.f32 %v3264_v58  ;;  %v3178_v29 = vsel %vm11660_vm15, %v3177_v33, %v3173_v11  ;;  %v3300_v21 = vmul.f32 %v3223_v1, %v14980_v13  ;;  %v3282_v2 = vsub.f32 1.0, %v3193_v63  ;;  %v14990_v58 = vld [vmem:[#allocation25_spill] sm:$0xff]  ;;  %v6746_v11 = vld [vmem:[%s14244_s1 + $0x8] sm:$0xff]  ;;  %vm15000_vm15 = vmmov %vm14996_vm5 }
 0x809   :  { %6241 = vtanh.f32 %v3263_v62  ;;  %v3162_v7 = vor.u32 1.1754944e-38, %v14978_v59  ;;  %14979 = vst [vmem:[#allocation11_spill] sm:$0xff] %v11756_v6  ;;  %v14981_v36 = vand.u32 2147483647, %v11325_v15  ;;  %v14982_v9 = vand.u32 2147483648, %v11325_v15  ;;  %v14986_v15 = vld [vmem:[#allocation19_spill] sm:$0xff] }
 0x80a   :  { %v6232_v48 = vpop.eup %6231  ;;  %v11767_v42 = vadd.f32 %v3300_v21, %v3292_v56  ;;  %v3299_v35 = vmul.f32 %v3208_v60, %v14984_v27  ;;  %v3281_v5 = vsub.f32 1.0, %v3178_v29  ;;  %v3298_v55 = vmul.f32 %v3193_v63, %v14986_v15  ;;  %v6744_v62 = vld [vmem:[%s14244_s1] sm:$0xff]  ;;  %v6745_v60 = vld [vmem:[%s14245_s2 + $0x8] sm:$0xff]  ;;  %v6756_v33 = vld [vmem:[%s14244_s1 + $0x30] sm:$0xff] }
 0x80b   :  { %v3294_v18 = vmul.f32 %v6232_v48, %v3286_v37  ;;  %v6234_v3 = vpop.eup %6233  ;;  %v3163_v20 = vsel %vm11685_vm4, %v3162_v7, %v3158_v16  ;;  %vm3145_vm13 = vcmp.eq.f32.partialorder %v14981_v36, 8.507059e+37  ;;  %v3147_v49 = vor.u32 1.1754944e-38, %v14982_v9  ;;  %v14992_v37 = vld [vmem:[#allocation18_spill] sm:$0xff]  ;;  %v6743_v48 = vld [vmem:[%s14245_s2] sm:$0xff]  ;;  %v6757_v16 = vld [vmem:[%s14245_s2 + $0x38] sm:$0xff] }
 0x80c   :  { %v6236_v10 = vpop.eup %6235  ;;  %v3291_v24 = vmul.f32 %v6234_v3, %v3283_v61  ;;  %14983 = vst [vmem:[#allocation13_spill] sm:$0xff] %v11767_v42  ;;  %v3280_v54 = vsub.f32 1.0, %v3163_v20  ;;  %v3297_v51 = vmul.f32 %v3178_v29, %v14988_v39  ;;  %v3296_v1 = vmul.f32 %v3163_v20, %v14990_v58  ;;  %v6753_v3 = vld [vmem:[%s14245_s2 + $0x28] sm:$0xff]  ;;  %v6760_v56 = vld [vmem:[%s14244_s1 + $0x40] sm:$0xff]  ;;  %v6764_v29 = vld [vmem:[%s14244_s1 + $0x50] sm:$0xff] }
 0x80d   :  { %v11735_v17 = vadd.f32 %v3302_v52, %v3294_v18  ;;  %v6238_v34 = vpop.eup %6237  ;;  %v3290_v22 = vmul.f32 %v6236_v10, %v3282_v2  ;;  %v3148_v4 = vsel %vm3145_vm13, %v3147_v49, %v3143_v31  ;;  %vm14994_vm6 = vcmask 523264   ;;  %v6747_v18 = vld [vmem:[%s14245_s2 + $0x10] sm:$0xff]  ;;  %v6749_v52 = vld [vmem:[%s14245_s2 + $0x18] sm:$0xff]  ;;  %v6754_v63 = vld [vmem:[%s14244_s1 + $0x28] sm:$0xff] }
 0x80e   :  { %v6240_v53 = vpop.eup %6239  ;;  %v11772_v43 = vadd.f32 %v3299_v35, %v3291_v24  ;;  %v3289_v47 = vmul.f32 %v6238_v34, %v3281_v5  ;;  %v3279_v32 = vsub.f32 1.0, %v3148_v4  ;;  %v3295_v14 = vmul.f32 %v3148_v4, %v14992_v37  ;;  %vm14995_vm1 = vmmov %vm14994_vm6  ;;  %v6761_v61 = vld [vmem:[%s14245_s2 + $0x48] sm:$0xff]  ;;  %v6763_v10 = vld [vmem:[%s14245_s2 + $0x50] sm:$0xff] }
 0x80f   :  { %14974 = vst [vmem:[#allocation14_spill] sm:$0xff] %v11735_v17  ;;  %3319 = vmatpush.msrb.mxu2 %v11735_v17  ;;  %3343 = vmatpush.msrb.mxu3 %v11735_v17  ;;  %v6242_v25 = vpop.eup %6241  ;;  %v11777_v26 = vadd.f32 %v3298_v55, %v3290_v22  ;;  %v3288_v0 = vmul.f32 %v6240_v53, %v3280_v54  ;;  %vm14997_vm10 = vmmov %vm14995_vm1  ;;  %v6765_v59 = vld [vmem:[%s14245_s2 + $0x58] sm:$0xff]  ;;  %v6767_v31 = vld [vmem:[%s14245_s2 + $0x60] sm:$0xff] }
 0x810   :  { %14985 = vst [vmem:[#allocation15_spill] sm:$0xff] %v11772_v43  ;;  %v11782_v40 = vadd.f32 %v3297_v51, %v3289_v47  ;;  %v3287_v38 = vmul.f32 %v6242_v25, %v3279_v32  ;;  %vm14999_vm2 = vmmov %vm14995_vm1  ;;  %v6766_v7 = vld [vmem:[%s14244_s1 + $0x58] sm:$0xff]  ;;  %v6768_v13 = vld [vmem:[%s14244_s1 + $0x60] sm:$0xff] }
 0x811   :  { %3320 = vmatpush.msrb.mxu2 %v11756_v6  ;;  %3344 = vmatpush.msrb.mxu3 %v11756_v6  ;;  %14987 = vst [vmem:[#allocation12_spill] sm:$0xff] %v11777_v26  ;;  %v11787_v30 = vadd.f32 %v3296_v1, %v3288_v0  ;;  %vm15001_vm8 = vmmov %vm14995_vm1  ;;  %v6769_v21 = vld [vmem:[%s14245_s2 + $0x68] sm:$0xff]  ;;  %v6771_v2 = vld [vmem:[%s14245_s2 + $0x70] sm:$0xff] }
 0x812   :  { %14989 = vst [vmem:[#allocation10_spill] sm:$0xff] %v11782_v40  ;;  %v11792_v50 = vadd.f32 %v3295_v14, %v3287_v38  ;;  %vm15003_vm4 = vmmov %vm14995_vm1  ;;  %v6770_v24 = vld [vmem:[%s14244_s1 + $0x68] sm:$0xff]  ;;  %v6772_v34 = vld [vmem:[%s14244_s1 + $0x70] sm:$0xff] }
 0x813   :  { %3321 = vmatpush.msrb.mxu2 %v11767_v42  ;;  %3345 = vmatpush.msrb.mxu3 %v11767_v42  ;;  %14991 = vst [vmem:[#allocation8_spill] sm:$0xff] %v11787_v30  ;;  %vm15005_vm12 = vmmov %vm14995_vm1  ;;  %v6773_v20 = vld [vmem:[%s14245_s2 + $0x78] sm:$0xff]  ;;  %v6775_v9 = vld [vmem:[%s14245_s2 + $0x80] sm:$0xff] }
 0x814   :  { %14993 = vst [vmem:[#allocation16_spill] sm:$0xff] %v11792_v50  ;;  %vm15007_vm9 = vmmov %vm14995_vm1  ;;  %v6774_v36 = vld [vmem:[%s14244_s1 + $0x78] sm:$0xff]  ;;  %v6776_v35 = vld [vmem:[%s14244_s1 + $0x80] sm:$0xff] }
 0x815   :  { %3322 = vmatpush.msrb.mxu2 %v11772_v43  ;;  %3346 = vmatpush.msrb.mxu3 %v11772_v43  ;;  %vm15009_vm13 = vmmov %vm14995_vm1  ;;  %v6777_v22 = vld [vmem:[%s14245_s2 + $0x88] sm:$0xff]  ;;  %v6779_v55 = vld [vmem:[%s14245_s2 + $0x90] sm:$0xff] }
 0x816   :  { %v6778_v15 = vld [vmem:[%s14244_s1 + $0x88] sm:$0xff]  ;;  %v6780_v39 = vld [vmem:[%s14244_s1 + $0x90] sm:$0xff]  ;;  %v6781_v51 = vld [vmem:[%s14245_s2 + $0x98] sm:$0xff] }
 0x817   :  { %3323 = vmatpush.msrb.mxu2 %v11777_v26  ;;  %3347 = vmatpush.msrb.mxu3 %v11777_v26  ;;  %v6782_v1 = vld [vmem:[%s14244_s1 + $0x98] sm:$0xff]  ;;  %v6783_v38 = vld [vmem:[%s14245_s2 + $0xa0] sm:$0xff] }
 0x819   :  { %3324 = vmatpush.msrb.mxu2 %v11782_v40  ;;  %3348 = vmatpush.msrb.mxu3 %v11782_v40 }
 0x81b   :  { %3325 = vmatpush.msrb.mxu2 %v11787_v30  ;;  %3349 = vmatpush.msrb.mxu3 %v11787_v30 }
 0x81d   :  { %3326 = vmatpush.msrb.mxu2 %v11792_v50  ;;  %3350 = vmatpush.msrb.mxu3 %v11792_v50 }
 0x81e   :  { %5594 = vmatmul.msk.f32.vlgmr.msrb.gmra.mxu2 %vm14994_vm6, %v6742_v19  ;;  %5596 = vmatmul.msk.f32.vlgmr.msrb.gmra.mxu3 %vm14995_vm1, %v6743_v48  ;;  %vm15010_vm6 = vmmov %vm15004_vm0  ;;  %v6784_v19 = vld [vmem:[%s14244_s1 + $0xa0] sm:$0xff]  ;;  %v6785_v48 = vld [vmem:[%s14245_s2 + $0xa8] sm:$0xff] }
 0x81f   :  { %3463 = vmatpush.msra.mxu2 %v5595_v44 }
 0x826   :  { %5628 = vmatmul.msk.f32.vlgmr.msra.gmra.mxu2 %vm14996_vm5, %v6744_v62  ;;  %5597 = vmatmul.msk.f32.gmra.mxu3 %vm14997_vm10, %v6745_v60  ;;  %vm15011_vm5 = vmmov %vm15004_vm0 }
 0x827   :  { %vm15012_vm10 = vmmov %vm14995_vm1 }
 0x82e   :  { %5629 = vmatmul.msk.f32.gmra.mxu2 %vm14998_vm14, %v6746_v11  ;;  %5598 = vmatmul.msk.f32.gmra.mxu3 %vm14999_vm2, %v6747_v18  ;;  %vm15013_vm14 = vmmov %vm15004_vm0  ;;  %v6786_v18 = vld [vmem:[%s14244_s1 + $0xa8] sm:$0xff] }
 0x82f   :  { %vm15014_vm2 = vmmov %vm14995_vm1 }
 0x836   :  { %5630 = vmatmul.msk.f32.gmra.mxu2 %vm15000_vm15, %v6748_v45  ;;  %5599 = vmatmul.msk.f32.gmra.mxu3 %vm15001_vm8, %v6749_v52  ;;  %vm15015_vm15 = vmmov %vm15004_vm0  ;;  %v6787_v45 = vld [vmem:[%s14245_s2 + $0xb0] sm:$0xff] }
 0x837   :  { %vm15016_vm8 = vmmov %vm14995_vm1 }
 0x83e   :  { %5631 = vmatmul.msk.f32.gmra.mxu2 %vm15002_vm7, %v6750_v8  ;;  %5600 = vmatmul.msk.f32.gmra.mxu3 %vm15003_vm4, %v6751_v41  ;;  %vm15017_vm7 = vmmov %vm15004_vm0 }
 0x83f   :  { %vm15018_vm4 = vmmov %vm14995_vm1 }
 0x846   :  { %5632 = vmatmul.msk.f32.gmra.mxu2 %vm15004_vm0, %v6752_v28  ;;  %5601 = vmatmul.msk.f32.gmra.mxu3 %vm15005_vm12, %v6753_v3  ;;  %vm15019_vm12 = vmmov %vm14995_vm1  ;;  %v6788_v28 = vld [vmem:[%s14244_s1 + $0xb0] sm:$0xff]  ;;  %v6789_v3 = vld [vmem:[%s14245_s2 + $0xb8] sm:$0xff] }
 0x84e   :  { %5633 = vmatmul.msk.f32.gmra.mxu2 %vm15006_vm11, %v6754_v63  ;;  %5602 = vmatmul.msk.f32.gmra.mxu3 %vm15007_vm9, %v6755_v12  ;;  %vm15020_vm11 = vmmov %vm15004_vm0 }
 0x84f   :  { %vm15021_vm9 = vmmov %vm14995_vm1 }
 0x856   :  { %5634 = vmatmul.msk.f32.gmra.mxu2 %vm15008_vm3, %v6756_v33  ;;  %5603 = vmatmul.msk.f32.gmra.mxu3 %vm15009_vm13, %v6757_v16  ;;  %vm15022_vm3 = vmmov %vm15004_vm0  ;;  %v6790_v16 = vld [vmem:[%s14244_s1 + $0xb8] sm:$0xff] }
 0x857   :  { %vm15023_vm13 = vmmov %vm14995_vm1 }
 0x85e   :  { %5635 = vmatmul.msk.f32.gmra.mxu2 %vm15010_vm6, %v6758_v23  ;;  %5604 = vmatmul.msk.f32.gmra.mxu3 %vm14995_vm1, %v6759_v57  ;;  %vm15024_vm6 = vmmov %vm15004_vm0  ;;  %v6791_v23 = vld [vmem:[%s14245_s2 + $0xc0] sm:$0xff] }
 0x866   :  { %5636 = vmatmul.msk.f32.gmra.mxu2 %vm15011_vm5, %v6760_v56  ;;  %5605 = vmatmul.msk.f32.gmra.mxu3 %vm15012_vm10, %v6761_v61  ;;  %vm15025_vm5 = vmmov %vm15004_vm0 }
 0x867   :  { %vm15026_vm10 = vmmov %vm14995_vm1 }
 0x86e   :  { %5637 = vmatmul.msk.f32.gmra.mxu2 %vm15013_vm14, %v6762_v46  ;;  %5606 = vmatmul.msk.f32.gmra.mxu3 %vm15014_vm2, %v6763_v10  ;;  %vm15027_vm14 = vmmov %vm15004_vm0  ;;  %v6792_v46 = vld [vmem:[%s14244_s1 + $0xc0] sm:$0xff]  ;;  %v6793_v10 = vld [vmem:[%s14245_s2 + $0xc8] sm:$0xff] }
 0x86f   :  { %vm15028_vm2 = vmmov %vm14995_vm1 }
 0x876   :  { %5638 = vmatmul.msk.f32.gmra.mxu2 %vm15015_vm15, %v6764_v29  ;;  %5607 = vmatmul.msk.f32.gmra.mxu3 %vm15016_vm8, %v6765_v59  ;;  %vm15029_vm15 = vmmov %vm15004_vm0 }
 0x877   :  { %vm15030_vm8 = vmmov %vm14995_vm1 }
 0x87e   :  { %5639 = vmatmul.msk.f32.gmra.mxu2 %vm15017_vm7, %v6766_v7  ;;  %5608 = vmatmul.msk.f32.gmra.mxu3 %vm15018_vm4, %v6767_v31  ;;  %vm15031_vm7 = vmmov %vm15004_vm0  ;;  %v6794_v7 = vld [vmem:[%s14244_s1 + $0xc8] sm:$0xff]  ;;  %v6795_v31 = vld [vmem:[%s14245_s2 + $0xd0] sm:$0xff] }
 0x87f   :  { %vm15032_vm4 = vmmov %vm14995_vm1 }
 0x886   :  { %5640 = vmatmul.msk.f32.gmra.mxu2 %vm15004_vm0, %v6768_v13  ;;  %5609 = vmatmul.msk.f32.gmra.mxu3 %vm15019_vm12, %v6769_v21  ;;  %vm15033_vm12 = vmmov %vm14995_vm1 }
 0x88e   :  { %5641 = vmatmul.msk.f32.gmra.mxu2 %vm15020_vm11, %v6770_v24  ;;  %5610 = vmatmul.msk.f32.gmra.mxu3 %vm15021_vm9, %v6771_v2  ;;  %vm15034_vm11 = vmmov %vm15004_vm0  ;;  %v6796_v24 = vld [vmem:[%s14244_s1 + $0xd0] sm:$0xff]  ;;  %v6797_v2 = vld [vmem:[%s14245_s2 + $0xd8] sm:$0xff] }
 0x88f   :  { %vm15035_vm9 = vmmov %vm14995_vm1 }
 0x896   :  { %5642 = vmatmul.msk.f32.gmra.mxu2 %vm15022_vm3, %v6772_v34  ;;  %5611 = vmatmul.msk.f32.gmra.mxu3 %vm15023_vm13, %v6773_v20  ;;  %vm15036_vm3 = vmmov %vm15004_vm0 }
 0x897   :  { %vm15037_vm13 = vmmov %vm14995_vm1 }
 0x89e   :  { %5643 = vmatmul.msk.f32.gmra.mxu2 %vm15024_vm6, %v6774_v36  ;;  %5612 = vmatmul.msk.f32.gmra.mxu3 %vm14995_vm1, %v6775_v9  ;;  %vm15038_vm6 = vmmov %vm15004_vm0  ;;  %v6798_v36 = vld [vmem:[%s14244_s1 + $0xd8] sm:$0xff]  ;;  %v6799_v9 = vld [vmem:[%s14245_s2 + $0xe0] sm:$0xff] }
 0x8a1   :  { %v3328_v49 = vpop.f32.mrf.mxu2  ;;  %v3352_v27 = vpop.f32.mrf.mxu3 }
 0x8a2   :  { %3331 = vst [vmem:[#allocation2 + $0x4] sm:$0x1] %v3328_v49 }
 0x8a3   :  { %3332 = vst [vmem:[#allocation3 + $0x2] sm:$0x2] %v3328_v49 }
 0x8a6   :  { %5644 = vmatmul.msk.f32.gmra.mxu2 %vm15025_vm5, %v6776_v35  ;;  %5613 = vmatmul.msk.f32.gmra.mxu3 %vm15026_vm10, %v6777_v22  ;;  %vm15039_vm5 = vmmov %vm15004_vm0  ;;  %v6800_v35 = vld [vmem:[%s14244_s1 + $0xe0] sm:$0xff]  ;;  %v6801_v22 = vld [vmem:[%s14245_s2 + $0xe8] sm:$0xff] }
 0x8a7   :  { %vm15040_vm10 = vmmov %vm14995_vm1 }
 0x8a9   :  { %v3465_v5 = vpop.f32.mrf.mxu2  ;;  %v3355_v53 = vpop.f32.mrf.mxu3 }
 0x8aa   :  { %v11943_v4 = vadd.f32 %v3465_v5, %v3352_v27 }
 0x8ae   :  { %5645 = vmatmul.msk.f32.gmra.mxu2 %vm15027_vm14, %v6778_v15  ;;  %5614 = vmatmul.msk.f32.gmra.mxu3 %vm15028_vm2, %v6779_v55  ;;  %vm15041_vm14 = vmmov %vm15004_vm0  ;;  %v6802_v15 = vld [vmem:[%s14244_s1 + $0xe8] sm:$0xff]  ;;  %v6803_v55 = vld [vmem:[%s14245_s2 + $0xf0] sm:$0xff] }
 0x8af   :  { %vm15042_vm2 = vmmov %vm14995_vm1 }
 0x8b1   :  { %v3468_v47 = vpop.f32.mrf.mxu2  ;;  %v3358_v54 = vpop.f32.mrf.mxu3 }
 0x8b2   :  { %v11953_v25 = vadd.f32 %v3468_v47, %v3355_v53 }
 0x8b6   :  { %5646 = vmatmul.msk.f32.gmra.mxu2 %vm15029_vm15, %v6780_v39  ;;  %5615 = vmatmul.msk.f32.gmra.mxu3 %vm15030_vm8, %v6781_v51  ;;  %vm15043_vm15 = vmmov %vm15004_vm0  ;;  %v6804_v39 = vld [vmem:[%s14244_s1 + $0xf0] sm:$0xff]  ;;  %v6805_v51 = vld [vmem:[%s14245_s2 + $0xf8] sm:$0xff] }
 0x8b7   :  { %vm15044_vm8 = vmmov %vm14995_vm1 }
 0x8b9   :  { %v3471_v0 = vpop.f32.mrf.mxu2  ;;  %v3361_v32 = vpop.f32.mrf.mxu3 }
 0x8ba   :  { %v11963_v58 = vadd.f32 %v3471_v0, %v3358_v54 }
 0x8be   :  { %5647 = vmatmul.msk.f32.gmra.mxu2 %vm15031_vm7, %v6782_v1  ;;  %5616 = vmatmul.msk.f32.gmra.mxu3 %vm15032_vm4, %v6783_v38  ;;  %vm15045_vm7 = vmmov %vm15004_vm0  ;;  %v6806_v1 = vld [vmem:[%s14244_s1 + $0xf8] sm:$0xff] }
 0x8bf   :  { %vm15046_vm4 = vmmov %vm14995_vm1 }
 0x8c1   :  { %v3474_v37 = vpop.f32.mrf.mxu2  ;;  %v3364_v14 = vpop.f32.mrf.mxu3 }
 0x8c2   :  { %v11973_v44 = vadd.f32 %v3474_v37, %v3361_v32 }
 0x8c6   :  { %5648 = vmatmul.msk.f32.gmra.mxu2 %vm15004_vm0, %v6784_v19  ;;  %5617 = vmatmul.msk.f32.gmra.mxu3 %vm15033_vm12, %v6785_v48  ;;  %vm15047_vm12 = vmmov %vm14995_vm1 }
 0x8c9   :  { %v3477_v62 = vpop.f32.mrf.mxu2  ;;  %v3367_v60 = vpop.f32.mrf.mxu3 }
 0x8ca   :  { %v11983_v11 = vadd.f32 %v3477_v62, %v3364_v14 }
 0x8ce   :  { %5649 = vmatmul.msk.f32.gmra.mxu2 %vm15034_vm11, %v6786_v18  ;;  %5618 = vmatmul.msk.f32.gmra.mxu3 %vm15035_vm9, %v6787_v45  ;;  %vm15048_vm11 = vmmov %vm15004_vm0 }
 0x8cf   :  { %vm15049_vm9 = vmmov %vm14995_vm1 }
 0x8d1   :  { %v3480_v52 = vpop.f32.mrf.mxu2  ;;  %v3370_v8 = vpop.f32.mrf.mxu3 }
 0x8d2   :  { %v11993_v41 = vadd.f32 %v3480_v52, %v3367_v60 }
 0x8d6   :  { %5650 = vmatmul.msk.f32.gmra.mxu2 %vm15036_vm3, %v6788_v28  ;;  %5619 = vmatmul.msk.f32.gmra.mxu3 %vm15037_vm13, %v6789_v3  ;;  %vm15050_vm3 = vmmov %vm15004_vm0  ;;  %v5660_v3 = vmul.f32 -1.442695, %v11943_v4  ;;  %v5663_v4 = vmul.f32 -1.442695, %v11973_v44 }
 0x8d7   :  { %vm15051_vm13 = vmmov %vm14995_vm1 }
 0x8d8   :  { %6243 = vpow2.f32 %v5660_v3 }
 0x8d9   :  { %v3483_v63 = vpop.f32.mrf.mxu2  ;;  %v3373_v12 = vpop.f32.mrf.mxu3 }
 0x8da   :  { %v12003_v33 = vadd.f32 %v3483_v63, %v3370_v8 }
 0x8dc   :  { %v5666_v44 = vmul.f32 -1.442695, %v12003_v33 }
 0x8de   :  { %5651 = vmatmul.msk.f32.gmra.mxu2 %vm15038_vm6, %v6790_v16  ;;  %5620 = vmatmul.msk.f32.gmra.mxu3 %vm14995_vm1, %v6791_v23  ;;  %vm15052_vm6 = vmmov %vm15004_vm0  ;;  %v5661_v16 = vmul.f32 -1.442695, %v11953_v25  ;;  %v5662_v23 = vmul.f32 -1.442695, %v11963_v58 }
 0x8e0   :  { %6245 = vpow2.f32 %v5661_v16 }
 0x8e1   :  { %v3486_v57 = vpop.f32.mrf.mxu2  ;;  %v12013_v56 = vpop.f32.mrf.mxu3  ;;  %6247 = vpow2.f32 %v5662_v23 }
 0x8e2   :  { %v12015_v61 = vadd.f32 %v3486_v57, %v3373_v12  ;;  %v6244_v57 = vpop.eup %6243 }
 0x8e6   :  { %5652 = vmatmul.msk.f32.gmra.mxu2 %vm15039_vm5, %v6792_v46  ;;  %5621 = vmatmul.msk.f32.gmra.mxu3 %vm15040_vm10, %v6793_v10 }
 0x8e9   :  { %v12025_v29 = vpop.f32.mrf.mxu2  ;;  %v12027_v59 = vpop.f32.mrf.mxu3 }
 0x8ea   :  { %v3490_v23 = vadd.f32 %v12025_v29, %v12013_v56 }
 0x8ee   :  { %5653 = vmatmul.msk.f32.gmra.mxu2 %vm15041_vm14, %v6794_v7  ;;  %5622 = vmatmul.msk.f32.gmra.mxu3 %vm15042_vm2, %v6795_v31  ;;  %v12140_v7 = vadd.f32 1.0, %v6244_v57  ;;  %v6246_v31 = vpop.eup %6245 }
 0x8ef   :  { %v6248_v58 = vpop.eup %6247 }
 0x8f0   :  { %6249 = vrcp.f32 %v12140_v7  ;;  %vm3598_vm1 = vweird.f32 %v12140_v7 }
 0x8f1   :  { %v12037_v13 = vpop.f32.mrf.mxu2  ;;  %v12039_v21 = vpop.f32.mrf.mxu3  ;;  %6251 = vpow2.f32 %v5663_v4 }
 0x8f6   :  { %5654 = vmatmul.msk.f32.gmra.mxu2 %vm15043_vm15, %v6796_v24  ;;  %5623 = vmatmul.msk.f32.gmra.mxu3 %vm15044_vm8, %v6797_v2  ;;  %v12144_v24 = vadd.f32 1.0, %v6246_v31  ;;  %v3604_v31 = vand.u32 2147483648, %v12140_v7 }
 0x8f8   :  { %6253 = vrcp.f32 %v12144_v24  ;;  %vm3613_vm2 = vweird.f32 %v12144_v24 }
 0x8f9   :  { %v12049_v34 = vpop.f32.mrf.mxu2  ;;  %v12051_v20 = vpop.f32.mrf.mxu3 }
 0x8fa   :  { %v3496_v56 = vadd.f32 %v12049_v34, %v12039_v21 }
 0x8fe   :  { %5655 = vmatmul.msk.f32.gmra.mxu2 %vm15045_vm7, %v6798_v36  ;;  %5624 = vmatmul.msk.f32.gmra.mxu3 %vm15046_vm4, %v6799_v9  ;;  %v5664_v36 = vmul.f32 -1.442695, %v11983_v11  ;;  %v5665_v9 = vmul.f32 -1.442695, %v11993_v41 }
 0x900   :  { %6255 = vpow2.f32 %v5664_v36  ;;  %v3493_v36 = vadd.f32 %v12037_v13, %v12027_v59  ;;  %v3605_v13 = vor.u32 1.1754944e-38, %v3604_v31 }
 0x901   :  { %v12061_v49 = vpop.f32.mrf.mxu2  ;;  %v12063_v27 = vpop.f32.mrf.mxu3  ;;  %6257 = vpow2.f32 %v5665_v9  ;;  %v3602_v9 = vand.u32 2147483647, %v12140_v7 }
 0x902   :  { %v3499_v59 = vadd.f32 %v12061_v49, %v12051_v20  ;;  %v5669_v34 = vmul.f32 -1.442695, %v3493_v36  ;;  %v5670_v20 = vmul.f32 -1.442695, %v3496_v56 }
 0x903   :  { %vm12203_vm10 = vcmp.eq.f32.partialorder %v3602_v9, 8.507059e+37 }
 0x906   :  { %5656 = vmatmul.msk.f32.gmra.mxu2 %vm15004_vm0, %v6800_v35  ;;  %5625 = vmatmul.msk.f32.gmra.mxu3 %vm15047_vm12, %v6801_v22  ;;  %v12153_v35 = vadd.f32 1.0, %v6248_v58  ;;  %v12155_v22 = vpop.eup %6249 }
 0x907   :  { %v3594_v11 = vmul.f32 %v12155_v22, %v12140_v7  ;;  %vm3599_vm5 = vweird.f32 %v12155_v22 }
 0x908   :  { %6259 = vrcp.f32 %v12153_v35  ;;  %vm12224_vm14 = vmor %vm3598_vm1, %vm3599_vm5  ;;  %vm3628_vm0 = vweird.f32 %v12153_v35 }
 0x909   :  { %v12073_v5 = vpop.f32.mrf.mxu2  ;;  %v12075_v53 = vpop.f32.mrf.mxu3  ;;  %6261 = vpow2.f32 %v5666_v44  ;;  %v3595_v3 = vsub.f32 1.0, %v3594_v11  ;;  %v5668_v11 = vmul.f32 -1.442695, %v3490_v23 }
 0x90b   :  { %v3596_v29 = vmul.f32 %v12155_v22, %v3595_v3  ;;  %v3502_v3 = vadd.f32 %v12073_v5, %v12063_v27 }
 0x90d   :  { %v3597_v49 = vadd.f32 %v12155_v22, %v3596_v29  ;;  %v5672_v56 = vmul.f32 -1.442695, %v3502_v3  ;;  %v3632_v3 = vand.u32 2147483647, %v12153_v35 }
 0x90e   :  { %5657 = vmatmul.msk.f32.gmra.mxu2 %vm15048_vm11, %v6802_v15  ;;  %5626 = vmatmul.msk.f32.gmra.mxu3 %vm15049_vm9, %v6803_v55  ;;  %v6252_v15 = vpop.eup %6251  ;;  %v5667_v55 = vmul.f32 -1.442695, %v12015_v61 }
 0x90f   :  { %vm12282_vm12 = vcmp.eq.f32.partialorder %v3632_v3, 8.507059e+37 }
 0x910   :  { %6263 = vpow2.f32 %v5667_v55 }
 0x911   :  { %v12085_v47 = vpop.f32.mrf.mxu2  ;;  %v12087_v54 = vpop.f32.mrf.mxu3 }
 0x912   :  { %v3505_v27 = vadd.f32 %v12085_v47, %v12075_v53 }
 0x916   :  { %5658 = vmatmul.msk.f32.gmra.mxu2 %vm15050_vm3, %v6804_v39  ;;  %5627 = vmatmul.msk.f32.gmra.mxu3 %vm15051_vm13, %v6805_v51  ;;  %v12166_v51 = vpop.eup %6253 }
 0x917   :  { %v6256_v33 = vpop.eup %6255  ;;  %v3609_v61 = vmul.f32 %v12166_v51, %v12144_v24  ;;  %vm3614_vm15 = vweird.f32 %v12166_v51 }
 0x918   :  { %v6258_v16 = vpop.eup %6257  ;;  %v12178_v58 = vadd.f32 1.0, %v6256_v33  ;;  %vm12263_vm7 = vmor %vm3613_vm2, %vm3614_vm15 }
 0x919   :  { %v12097_v0 = vpop.f32.mrf.mxu2  ;;  %v12099_v32 = vpop.f32.mrf.mxu3  ;;  %v12183_v44 = vadd.f32 1.0, %v6258_v16  ;;  %v3610_v33 = vsub.f32 1.0, %v3609_v61  ;;  %v3617_v61 = vand.u32 2147483647, %v12144_v24 }
 0x91a   :  { %v12174_v57 = vpop.eup %6259  ;;  %v3508_v36 = vadd.f32 %v12097_v0, %v12087_v54  ;;  %v3601_v54 = vsel %vm12224_vm14, %v12155_v22, %v3597_v49  ;;  %v3619_v0 = vand.u32 2147483648, %v12144_v24  ;;  %vm3658_vm1 = vweird.f32 %v12178_v58 }
 0x91b   :  { %v6262_v4 = vpop.eup %6261  ;;  %v3624_v21 = vmul.f32 %v12174_v57, %v12153_v35  ;;  %v3611_v5 = vmul.f32 %v12166_v51, %v3610_v33  ;;  %v5673_v33 = vmul.f32 -1.442695, %v3505_v27  ;;  %vm12248_vm8 = vcmp.eq.f32.partialorder %v3617_v61, 8.507059e+37 }
 0x91c   :  { %v6264_v50 = vpop.eup %6263  ;;  %v12193_v30 = vadd.f32 1.0, %v6262_v4  ;;  %v5671_v4 = vmul.f32 -1.442695, %v3499_v59  ;;  %vm3629_vm4 = vweird.f32 %v12174_v57  ;;  %vm3673_vm15 = vweird.f32 %v12183_v44 }
 0x91d   :  { %v12212_v31 = vadd.f32 1.0, %v6264_v50  ;;  %v3625_v9 = vsub.f32 1.0, %v3624_v21  ;;  %v3612_v59 = vadd.f32 %v12166_v51, %v3611_v5  ;;  %vm12302_vm11 = vmor %vm3628_vm0, %vm3629_vm4 }
 0x91e   :  { %5659 = vmatmul.msk.f32.gmra.mxu2 %vm15052_vm6, %v6806_v1  ;;  %v12168_v1 = vadd.f32 1.0, %v6252_v15  ;;  %v3692_v22 = vand.u32 2147483647, %v12193_v30 }
 0x91f   :  { %v3626_v21 = vmul.f32 %v12174_v57, %v3625_v9  ;;  %v3616_v50 = vsel %vm12263_vm7, %v12166_v51, %v3612_v59  ;;  %vm3688_vm7 = vweird.f32 %v12193_v30 }
 0x920   :  { %6265 = vrcp.f32 %v12168_v1  ;;  %vm3643_vm9 = vweird.f32 %v12168_v1 }
 0x921   :  { %v12105_v38 = vpop.f32.mrf.mxu2  ;;  %v12107_v37 = vpop.f32.mrf.mxu3  ;;  %6267 = vrcp.f32 %v12178_v58 }
 0x922   :  { %15053 = vst [vmem:[#allocation9_spill] sm:$0xff] %v12107_v37  ;;  %6269 = vrcp.f32 %v12183_v44  ;;  %v3511_v47 = vadd.f32 %v12105_v38, %v12099_v32  ;;  %v5674_v38 = vmul.f32 -1.442695, %v3508_v36  ;;  %v3620_v36 = vor.u32 1.1754944e-38, %v3619_v0 }
 0x923   :  { %6271 = vpow2.f32 %v5668_v11 }
 0x924   :  { %6273 = vrcp.f32 %v12193_v30  ;;  %v5675_v5 = vmul.f32 -1.442695, %v3511_v47  ;;  %v12298_v3 = vsel %vm12248_vm8, %v3620_v36, %v3616_v50 }
 0x925   :  { %6275 = vpow2.f32 %v5669_v34  ;;  %15071 = vst [vmem:[#allocation25_spill] sm:$0xff] %v12298_v3 }
 0x926   :  { %v12207_v23 = vpop.eup %6265  ;;  %6277 = vpow2.f32 %v5670_v20  ;;  %v3634_v20 = vand.u32 2147483648, %v12153_v35 }
 0x927   :  { %v3639_v53 = vmul.f32 %v12207_v23, %v12168_v1  ;;  %v12241_v11 = vpop.eup %6267  ;;  %6279 = vrcp.f32 %v12212_v31  ;;  %vm3644_vm13 = vweird.f32 %v12207_v23 }
 0x928   :  { %v12246_v32 = vpop.eup %6269  ;;  %6281 = vpow2.f32 %v5671_v4  ;;  %v12259_v4 = vsel %vm12203_vm10, %v3605_v13, %v3601_v54  ;;  %v3654_v9 = vmul.f32 %v12241_v11, %v12178_v58  ;;  %v3647_v13 = vand.u32 2147483647, %v12168_v1  ;;  %vm12338_vm6 = vmor %vm3643_vm9, %vm3644_vm13 }
 0x929   :  { %v12109_v14 = vpop.f32.mrf.mxu2  ;;  %v12111_v19 = vpop.f32.mrf.mxu3  ;;  %6283 = vpow2.f32 %v5672_v56  ;;  %v3640_v49 = vsub.f32 1.0, %v3639_v53  ;;  %15066 = vst [vmem:[#allocation22_spill] sm:$0xff] %v12259_v4  ;;  %v3627_v53 = vadd.f32 %v12174_v57, %v3626_v21  ;;  %v3669_v47 = vmul.f32 %v12246_v32, %v12183_v44 }
 0x92a   :  { %15054 = vst [vmem:[#allocation17_spill] sm:$0xff] %v12109_v14  ;;  %v6272_v34 = vpop.eup %6271  ;;  %6285 = vpow2.f32 %v5673_v33  ;;  %v3635_v51 = vor.u32 1.1754944e-38, %v3634_v20  ;;  %v3649_v21 = vand.u32 2147483648, %v12168_v1  ;;  %v3655_v40 = vsub.f32 1.0, %v3654_v9 }
 0x92b   :  { %15055 = vst [vmem:[#allocation24_spill] sm:$0xff] %v12111_v19  ;;  %v12255_v27 = vpop.eup %6273  ;;  %v12274_v24 = vadd.f32 1.0, %v6272_v34  ;;  %6287 = vpow2.f32 %v5674_v38  ;;  %v3641_v33 = vmul.f32 %v12207_v23, %v3640_v49  ;;  %vm12313_vm3 = vcmp.eq.f32.partialorder %v3647_v13, 8.507059e+37 }
 0x92c   :  { %v6276_v56 = vpop.eup %6275  ;;  %6289 = vpow2.f32 %v5675_v5  ;;  %v3684_v49 = vmul.f32 %v12255_v27, %v12193_v30  ;;  %v3631_v5 = vsel %vm12302_vm11, %v12174_v57, %v3627_v53  ;;  %v3670_v36 = vsub.f32 1.0, %v3669_v47 }
 0x92d   :  { %v6278_v16 = vpop.eup %6277  ;;  %v12287_v34 = vadd.f32 1.0, %v6276_v56  ;;  %6291 = vrcp.f32 %v12274_v24  ;;  %v3642_v50 = vadd.f32 %v12207_v23, %v3641_v33  ;;  %v3650_v57 = vor.u32 1.1754944e-38, %v3649_v21 }
 0x92e   :  { %v12279_v54 = vpop.eup %6279  ;;  %v12294_v35 = vadd.f32 1.0, %v6278_v16  ;;  %v3656_v13 = vmul.f32 %v12241_v11, %v3655_v40  ;;  %v3662_v53 = vand.u32 2147483647, %v12178_v58  ;;  %v3664_v47 = vand.u32 2147483648, %v12178_v58 }
 0x92f   :  { %v6282_v59 = vpop.eup %6281  ;;  %v3699_v16 = vmul.f32 %v12279_v54, %v12212_v31  ;;  %6293 = vrcp.f32 %v12287_v34  ;;  %v3685_v33 = vsub.f32 1.0, %v3684_v49  ;;  %v12334_v6 = vsel %vm12282_vm12, %v3635_v51, %v3631_v5 }
 0x930   :  { %v6284_v26 = vpop.eup %6283  ;;  %v12317_v56 = vadd.f32 1.0, %v6282_v59  ;;  %6295 = vrcp.f32 %v12294_v35  ;;  %15076 = vst [vmem:[#allocation18_spill] sm:$0xff] %v12334_v6  ;;  %v3671_v40 = vmul.f32 %v12246_v32, %v3670_v36  ;;  %v3646_v0 = vsel %vm12338_vm6, %v12207_v23, %v3642_v50 }
 0x931   :  { %v12113_v48 = vpop.f32.mrf.mxu2  ;;  %v12115_v62 = vpop.f32.mrf.mxu3  ;;  %v12324_v20 = vadd.f32 1.0, %v6284_v26  ;;  %v3700_v51 = vsub.f32 1.0, %v3699_v16  ;;  %v3657_v5 = vadd.f32 %v12241_v11, %v3656_v13  ;;  %vm3659_vm5 = vweird.f32 %v12241_v11 }
 0x932   :  { %15056 = vst [vmem:[#allocation23_spill] sm:$0xff] %v12113_v48  ;;  %v6286_v9 = vpop.eup %6285  ;;  %6297 = vrcp.f32 %v12317_v56  ;;  %v3677_v36 = vand.u32 2147483647, %v12183_v44  ;;  %vm12360_vm10 = vcmp.eq.f32.partialorder %v3662_v53, 8.507059e+37  ;;  %v3665_v23 = vor.u32 1.1754944e-38, %v3664_v47  ;;  %vm12385_vm2 = vmor %vm3658_vm1, %vm3659_vm5 }
 0x933   :  { %15057 = vst [vmem:[#allocation20_spill] sm:$0xff] %v12115_v62  ;;  %v6288_v43 = vpop.eup %6287  ;;  %v12330_v42 = vadd.f32 1.0, %v6286_v9  ;;  %6299 = vrcp.f32 %v12324_v20  ;;  %v3686_v50 = vmul.f32 %v12255_v27, %v3685_v33  ;;  %v12370_v13 = vsel %vm12313_vm3, %v3650_v57, %v3646_v0 }
 0x934   :  { %v6290_v59 = vpop.eup %6289  ;;  %v12345_v21 = vadd.f32 1.0, %v6288_v43  ;;  %vm3674_vm14 = vweird.f32 %v12246_v32  ;;  %v3701_v57 = vmul.f32 %v12279_v54, %v3700_v51  ;;  %v3661_v33 = vsel %vm12385_vm2, %v12241_v11, %v3657_v5 }
 0x935   :  { %v12350_v49 = vpop.eup %6291  ;;  %v12358_v9 = vadd.f32 1.0, %v6290_v59  ;;  %6301 = vrcp.f32 %v12330_v42  ;;  %v3672_v59 = vadd.f32 %v12246_v32, %v3671_v40  ;;  %vm12394_vm8 = vcmp.eq.f32.partialorder %v3677_v36, 8.507059e+37  ;;  %vm12405_vm4 = vmor %vm3673_vm15, %vm3674_vm14 }
 0x936   :  { %v12365_v16 = vpop.eup %6293  ;;  %v3746_v47 = vmul.f32 %v12350_v49, %v12274_v24  ;;  %6303 = vrcp.f32 %v12345_v21  ;;  %v3679_v0 = vand.u32 2147483648, %v12183_v44  ;;  %v3687_v11 = vadd.f32 %v12255_v27, %v3686_v50 }
 0x937   :  { %v12376_v53 = vpop.eup %6295  ;;  %v3761_v17 = vmul.f32 %v12365_v16, %v12287_v34  ;;  %6305 = vrcp.f32 %v12358_v9  ;;  %vm3689_vm0 = vweird.f32 %v12255_v27  ;;  %v3676_v36 = vsel %vm12405_vm4, %v12246_v32, %v3672_v59 }
 0x938   :  { %v12400_v58 = vpop.eup %6297  ;;  %v3776_v44 = vmul.f32 %v12376_v53, %v12294_v35  ;;  %v3694_v14 = vand.u32 2147483648, %v12193_v30  ;;  %v3747_v37 = vsub.f32 1.0, %v3746_v47  ;;  %v3702_v4 = vadd.f32 %v12279_v54, %v3701_v57  ;;  %vm12435_vm11 = vmor %vm3688_vm7, %vm3689_vm0 }
 0x939   :  { %v12117_v60 = vpop.f32.mrf.mxu2  ;;  %v12119_v18 = vpop.f32.mrf.mxu3  ;;  %vm3704_vm12 = vweird.f32 %v12279_v54  ;;  %v3707_v50 = vand.u32 2147483647, %v12212_v31  ;;  %v3791_v19 = vmul.f32 %v12400_v58, %v12317_v56  ;;  %v12429_v51 = vsel %vm12360_vm10, %v3665_v23, %v3661_v33 }
 0x93a   :  { %15058 = vst [vmem:[#allocation21_spill] sm:$0xff] %v12117_v60  ;;  %v12411_v5 = vpop.eup %6299  ;;  %v3680_v59 = vor.u32 1.1754944e-38, %v3679_v0  ;;  %v3709_v57 = vand.u32 2147483648, %v12212_v31  ;;  %v3762_v60 = vsub.f32 1.0, %v3761_v17  ;;  %v3691_v23 = vsel %vm12435_vm11, %v12255_v27, %v3687_v11 }
 0x93b   :  { %v12423_v48 = vpop.eup %6301  ;;  %v3806_v43 = vmul.f32 %v12411_v5, %v12324_v20  ;;  %vm3703_vm9 = vweird.f32 %v12212_v31  ;;  %v3777_v33 = vsub.f32 1.0, %v3776_v44  ;;  %vm3693_vm3 = vcmp.eq.f32.partialorder %v3692_v22, 8.507059e+37 }
 0x93c   :  { %v12440_v3 = vpop.eup %6303  ;;  %v3681_v30 = vsel %vm12394_vm8, %v3680_v59, %v3676_v36  ;;  %v3695_v0 = vor.u32 1.1754944e-38, %v3694_v14  ;;  %vm12452_vm13 = vmor %vm3703_vm9, %vm3704_vm12  ;;  %v3821_v47 = vmul.f32 %v12423_v48, %v12330_v42  ;;  %vm3708_vm6 = vcmp.eq.f32.partialorder %v3707_v50, 8.507059e+37 }
 0x93d   :  { %v12456_v17 = vpop.eup %6305  ;;  %v3706_v31 = vsel %vm12452_vm13, %v12279_v54, %v3702_v4  ;;  %v3748_v27 = vmul.f32 %v12350_v49, %v3747_v37  ;;  %v3792_v40 = vsub.f32 1.0, %v3791_v19  ;;  %v3836_v14 = vmul.f32 %v12440_v3, %v12345_v21 }
 0x93e   :  { %v3696_v44 = vsel %vm3693_vm3, %v3695_v0, %v3691_v23  ;;  %v3710_v36 = vor.u32 1.1754944e-38, %v3709_v57  ;;  %v3807_v22 = vsub.f32 1.0, %v3806_v43  ;;  %v3763_v59 = vmul.f32 %v12365_v16, %v3762_v60 }
 0x93f   :  { %v3851_v62 = vmul.f32 %v12456_v17, %v12358_v9  ;;  %v3778_v37 = vmul.f32 %v12376_v53, %v3777_v33  ;;  %v3822_v54 = vsub.f32 1.0, %v3821_v47  ;;  %v3784_v50 = vand.u32 2147483647, %v12294_v35 }
 0x940   :  { %v12471_v4 = vsel %vm3708_vm6, %v3710_v36, %v3706_v31  ;;  %v12478_v60 = vadd.f32 %v12350_v49, %v3748_v27  ;;  %v3837_v43 = vsub.f32 1.0, %v3836_v14  ;;  %v3831_v0 = vand.u32 2147483648, %v12330_v42 }
 0x941   :  { %v12121_v45 = vpop.f32.mrf.mxu2  ;;  %v12123_v52 = vpop.f32.mrf.mxu3  ;;  %v3808_v33 = vmul.f32 %v12411_v5, %v3807_v22  ;;  %v3799_v47 = vand.u32 2147483647, %v12317_v56  ;;  %v12486_v6 = vadd.f32 %v12365_v16, %v3763_v59  ;;  %v3852_v57 = vsub.f32 1.0, %v3851_v62 }
 0x942   :  { %v12491_v19 = vadd.f32 %v12376_v53, %v3778_v37  ;;  %v3823_v31 = vmul.f32 %v12423_v48, %v3822_v54  ;;  %v3816_v22 = vand.u32 2147483648, %v12324_v20  ;;  %v3829_v59 = vand.u32 2147483647, %v12330_v42 }
 0x943   :  { %v12499_v62 = vor.u32 1.1754944e-38, %v3831_v0  ;;  %vm3826_vm1 = vweird.f32 %v12423_v48  ;;  %v12508_v54 = vadd.f32 %v12411_v5, %v3808_v33  ;;  %vm3840_vm5 = vweird.f32 %v12345_v21 }
 0x944   :  { %v3846_v0 = vand.u32 2147483648, %v12345_v21  ;;  %vm3825_vm10 = vweird.f32 %v12330_v42  ;;  %vm3811_vm14 = vweird.f32 %v12411_v5  ;;  %vm3841_vm2 = vweird.f32 %v12440_v3  ;;  %v15117_v42 = vld [vmem:[#allocation9_spill] sm:$0xff] }
 0x945   :  { %vm3855_vm8 = vweird.f32 %v12358_v9  ;;  %vm3810_vm7 = vweird.f32 %v12324_v20  ;;  %vm3796_vm4 = vweird.f32 %v12400_v58  ;;  %vm3781_vm0 = vweird.f32 %v12376_v53  ;;  %vm12553_vm9 = vmor %vm3840_vm5, %vm3841_vm2 }
 0x946   :  { %vm3856_vm12 = vweird.f32 %v12456_v17  ;;  %vm3795_vm11 = vweird.f32 %v12317_v56  ;;  %vm3780_vm3 = vweird.f32 %v12294_v35  ;;  %vm3766_vm13 = vweird.f32 %v12365_v16 }
 0x947   :  { %vm12572_vm6 = vmor %vm3855_vm8, %vm3856_vm12  ;;  %vm3765_vm5 = vweird.f32 %v12287_v34  ;;  %vm3751_vm2 = vweird.f32 %v12350_v49  ;;  %vm3750_vm12 = vweird.f32 %v12274_v24 }
 0x948   :  { %vm12594_vm8 = vmor %vm3825_vm10, %vm3826_vm1  ;;  %vm12609_vm1 = vcmp.eq.f32.partialorder %v3784_v50, 8.507059e+37  ;;  %v3817_v50 = vor.u32 1.1754944e-38, %v3816_v22 }
 0x949   :  { %v12125_v8 = vpop.f32.mrf.mxu2  ;;  %v12127_v28 = vpop.f32.mrf.mxu3  ;;  %vm12618_vm10 = vmor %vm3810_vm7, %vm3811_vm14 }
 0x94a   :  { %vm12645_vm7 = vmor %vm3795_vm11, %vm3796_vm4 }
 0x94b   :  { %vm12672_vm4 = vmor %vm3765_vm5, %vm3766_vm13  ;;  %vm15142_vm5 = vcmask 64512  }
 0x951   :  { %v12130_v63 = vpop.f32.mrf.mxu2  ;;  %v12132_v12 = vpop.f32.mrf.mxu3 }
 0x959   :  { %v12136_v46 = vpop.f32.mrf.mxu2  ;;  %v12138_v10 = vpop.f32.mrf.mxu3 }
 0x961   :  { %v12146_v2 = vpop.f32.mrf.mxu2  ;;  %v12148_v25 = vpop.f32.mrf.mxu3 }
 0x969   :  { %v12160_v39 = vpop.f32.mrf.mxu2  ;;  %v12164_v41 = vpop.f32.mrf.mxu3 }
 0x96a   :  { %15059 = vst [vmem:[#allocation19_spill] sm:$0xff] %v12160_v39  ;;  %v3793_v39 = vmul.f32 %v12400_v58, %v3792_v40  ;;  %v3844_v40 = vand.u32 2147483647, %v12345_v21  ;;  %v15096_v21 = vld [vmem:[#allocation18_spill] sm:$0xff] }
 0x96c   :  { %vm12520_vm15 = vcmp.eq.f32.partialorder %v3844_v40, 8.507059e+37  ;;  %v6827_v40 = vld [vmem:[%s14244_s1 + $0x48] sm:$0xff] }
 0x971   :  { %v12188_v15 = vpop.f32.mrf.mxu2  ;;  %v12190_v55 = vpop.f32.mrf.mxu3 }
 0x979   :  { %v12237_v7 = vpop.f32.mrf.mxu2  ;;  %v12239_v29 = vpop.f32.mrf.mxu3 }
 0x981   :  { %v12289_v38 = vpop.f32.mrf.mxu2  ;;  %v12292_v61 = vpop.f32.mrf.mxu3 }
 0x989   :  { %v12353_v1 = vpop.f32.mrf.mxu2  ;;  %v12372_v26 = vpop.f32.mrf.mxu3 }
 0x991   :  { %v3552_v32 = vpop.f32.mrf.mxu2  ;;  %v3442_v11 = vpop.f32.mrf.mxu3 }
 0x992   :  { %v3553_v27 = vadd.f32 %v3552_v32, %v12372_v26  ;;  %v12502_v26 = vadd.f32 %v12400_v58, %v3793_v39  ;;  %v3550_v32 = vadd.f32 %v12353_v1, %v12292_v61  ;;  %v3532_v39 = vadd.f32 %v12136_v46, %v12132_v12 }
 0x993   :  { %v3547_v61 = vadd.f32 %v12289_v38, %v12239_v29  ;;  %v3861_v12 = vand.u32 2147483648, %v12358_v9  ;;  %v3544_v29 = vadd.f32 %v12237_v7, %v12190_v55  ;;  %v3541_v55 = vadd.f32 %v12188_v15, %v12164_v41 }
 0x994   :  { %v3869_v38 = vmul.f32 %v12429_v51, %v3550_v32  ;;  %v3859_v41 = vand.u32 2147483647, %v12358_v9  ;;  %v15101_v9 = vld [vmem:[#allocation20_spill] sm:$0xff]  ;;  %v15103_v32 = vld [vmem:[#allocation25_spill] sm:$0xff] }
 0x995   :  { %v3868_v7 = vmul.f32 %v12370_v13, %v3547_v61  ;;  %v3867_v13 = vmul.f32 %v15096_v21, %v3544_v29  ;;  %v6817_v21 = vld [vmem:[%s14244_s1 + $0x20] sm:$0xff] }
 0x999   :  { %v3555_v23 = vpop.f32.mrf.mxu2  ;;  %v3445_v14 = vpop.f32.mrf.mxu3 }
 0x99a   :  { %v3556_v36 = vadd.f32 %v3555_v23, %v3442_v11  ;;  %v3838_v23 = vmul.f32 %v12440_v3, %v3837_v43  ;;  %v3870_v11 = vmul.f32 %v3681_v30, %v3553_v27  ;;  %v3853_v43 = vmul.f32 %v12456_v17, %v3852_v57 }
 0x99b   :  { %v12525_v30 = vadd.f32 %v12423_v48, %v3823_v31  ;;  %v3535_v27 = vadd.f32 %v12146_v2, %v12138_v10  ;;  %v15095_v10 = vld [vmem:[#allocation19_spill] sm:$0xff] }
 0x99c   :  { %v3871_v37 = vmul.f32 %v3696_v44, %v3556_v36  ;;  %v3529_v44 = vadd.f32 %v12130_v63, %v12127_v28  ;;  %v3839_v46 = vadd.f32 %v12440_v3, %v3838_v23  ;;  %v3526_v28 = vadd.f32 %v12125_v8, %v12123_v52 }
 0x99d   :  { %v3854_v33 = vadd.f32 %v12456_v17, %v3853_v43  ;;  %v3523_v8 = vadd.f32 %v12121_v45, %v12119_v18  ;;  %v3538_v2 = vadd.f32 %v15095_v10, %v12148_v25  ;;  %v3862_v25 = vor.u32 1.1754944e-38, %v3861_v12  ;;  %v15110_v12 = vld [vmem:[#allocation22_spill] sm:$0xff] }
 0x99e   :  { %v3879_v31 = vadd.f32 %v3871_v37, %v3532_v39  ;;  %v3878_v63 = vadd.f32 %v3870_v11, %v3529_v44  ;;  %v3843_v15 = vsel %vm12553_vm9, %v12440_v3, %v3839_v46  ;;  %v3847_v3 = vor.u32 1.1754944e-38, %v3846_v0  ;;  %v15102_v11 = vld [vmem:[#allocation21_spill] sm:$0xff]  ;;  %v15107_v0 = vld [vmem:[#allocation23_spill] sm:$0xff] }
 0x99f   :  { %v3858_v45 = vsel %vm12572_vm6, %v12456_v17, %v3854_v33  ;;  %vm12583_vm9 = vcmp.eq.f32.partialorder %v3799_v47, 8.507059e+37  ;;  %v3520_v23 = vadd.f32 %v15102_v11, %v15101_v9  ;;  %v3866_v37 = vmul.f32 %v15103_v32, %v3541_v55  ;;  %v15106_v47 = vld [vmem:[#allocation24_spill] sm:$0xff] }
 0x9a0   :  { %6307 = vtanh.f32 %v3879_v31  ;;  %v3876_v43 = vadd.f32 %v3868_v7, %v3523_v8  ;;  %v3517_v39 = vadd.f32 %v15107_v0, %v15106_v47  ;;  %vm3860_vm6 = vcmp.eq.f32.partialorder %v3859_v41, 8.507059e+37  ;;  %v15124_v41 = vld [vmem:[#allocation14_spill] sm:$0xff] }
 0x9a1   :  { %v3558_v57 = vpop.f32.mrf.mxu2  ;;  %6309 = vtanh.f32 %v3878_v63  ;;  %v3848_v61 = vsel %vm12520_vm15, %v3847_v3, %v3843_v15  ;;  %v3828_v44 = vsel %vm12594_vm8, %v12423_v48, %v12525_v30  ;;  %v3865_v46 = vmul.f32 %v15110_v12, %v3538_v2 }
 0x9a2   :  { %v3559_v36 = vadd.f32 %v3558_v57, %v3445_v14  ;;  %v3875_v29 = vadd.f32 %v3867_v13, %v3520_v23  ;;  %vm3830_vm15 = vcmp.eq.f32.partialorder %v3829_v59, 8.507059e+37  ;;  %v3813_v48 = vsel %vm12618_vm10, %v12411_v5, %v12508_v54  ;;  %v15118_v59 = vld [vmem:[#allocation17_spill] sm:$0xff] }
 0x9a3   :  { %v15113_v30 = vand.u32 2147483648, %v12317_v56  ;;  %v3514_v33 = vadd.f32 %v15118_v59, %v15117_v42  ;;  %v3833_v5 = vsel %vm3830_vm15, %v12499_v62, %v3828_v44  ;;  %v3895_v7 = vsub.f32 1.0, %v3848_v61  ;;  %v15135_v44 = vld [vmem:[#allocation15_spill] sm:$0xff]  ;;  %v6807_v56 = vld [vmem:[%s14246_s3] sm:$0x3] }
 0x9a4   :  { %v3872_v51 = vmul.f32 %v12471_v4, %v3559_v36  ;;  %v3877_v4 = vadd.f32 %v3869_v38, %v3526_v28  ;;  %v3863_v38 = vsel %vm3860_vm6, %v3862_v25, %v3858_v45  ;;  %v15114_v36 = vand.u32 2147483647, %v12287_v34  ;;  %vm12659_vm6 = vmor %vm3780_vm3, %vm3781_vm0  ;;  %v15128_v45 = vld [vmem:[#allocation11_spill] sm:$0xff]  ;;  %v15137_v28 = vld [vmem:[#allocation10_spill] sm:$0xff] }
 0x9a5   :  { %v3802_v31 = vor.u32 1.1754944e-38, %v15113_v30  ;;  %v3896_v55 = vsub.f32 1.0, %v3863_v38  ;;  %v3798_v52 = vsel %vm12645_vm7, %v12400_v58, %v12502_v26  ;;  %v3873_v8 = vadd.f32 %v3865_v46, %v3514_v33  ;;  %vm12691_vm0 = vmor %vm3750_vm12, %vm3751_vm2 }
 0x9a6   :  { %v3880_v14 = vadd.f32 %v3872_v51, %v3535_v27  ;;  %vm12634_vm14 = vcmp.eq.f32.partialorder %v15114_v36, 8.507059e+37  ;;  %v6308_v63 = vpop.eup %6307  ;;  %v3874_v27 = vadd.f32 %v3866_v37, %v3517_v39  ;;  %v15121_v51 = vand.u32 2147483647, %v12324_v20  ;;  %v15132_v37 = vld [vmem:[#allocation13_spill] sm:$0xff] }
 0x9a7   :  { %v6310_v54 = vpop.eup %6309  ;;  %v3783_v20 = vsel %vm12659_vm6, %v12376_v53, %v12491_v19  ;;  %v3912_v58 = vmul.f32 %v3863_v38, %v15124_v41  ;;  %v3903_v26 = vmul.f32 %v6308_v63, %v3895_v7  ;;  %v3894_v15 = vsub.f32 1.0, %v3833_v5  ;;  %v6813_v41 = vld [vmem:[%s14244_s1 + $0x10] sm:$0xff] }
 0x9a8   :  { %6311 = vtanh.f32 %v3880_v14  ;;  %vm3815_vm8 = vcmp.eq.f32.partialorder %v15121_v51, 8.507059e+37  ;;  %v15127_v53 = vand.u32 2147483648, %v12294_v35  ;;  %v3768_v14 = vsel %vm12672_vm4, %v12365_v16, %v12486_v6 }
 0x9a9   :  { %6313 = vtanh.f32 %v3877_v4  ;;  %v3818_v10 = vsel %vm3815_vm8, %v3817_v50, %v3813_v48  ;;  %v3803_v4 = vsel %vm12583_vm9, %v3802_v31, %v3798_v52  ;;  %v3911_v25 = vmul.f32 %v3848_v61, %v15128_v45  ;;  %v5677_v52 = vld [vmem:[%s14243_s0 + $0x30] sm:$0xff]  ;;  %vm15144_vm9 = vmmov %vm15142_vm5  ;;  %v6823_v45 = vld [vmem:[%s14244_s1 + $0x38] sm:$0xff] }
 0x9aa   :  { %6315 = vtanh.f32 %v3876_v43  ;;  %v3787_v19 = vor.u32 1.1754944e-38, %v15127_v53  ;;  %v3902_v3 = vmul.f32 %v6310_v54, %v3894_v15  ;;  %v3893_v9 = vsub.f32 1.0, %v3818_v10  ;;  %v6816_v15 = vld [vmem:[%s14245_s2 + $0x20] sm:$0xff]  ;;  %v6820_v53 = vld [vmem:[%s14245_s2 + $0x30] sm:$0xff] }
 0x9ab   :  { %6317 = vtanh.f32 %v3875_v29  ;;  %v15131_v6 = vand.u32 2147483648, %v12287_v34  ;;  %v3753_v23 = vsel %vm12691_vm0, %v12350_v49, %v12478_v60  ;;  %v12705_v32 = vadd.f32 %v3911_v25, %v3903_v26  ;;  %v6815_v26 = vld [vmem:[%s14244_s1 + $0x18] sm:$0xff]  ;;  %v6824_v25 = vld [vmem:[%s14245_s2 + $0x40] sm:$0xff] }
 0x9ac   :  { %6319 = vtanh.f32 %v3874_v27  ;;  %v3788_v11 = vsel %vm12609_vm1, %v3787_v19, %v3783_v20  ;;  %v3910_v43 = vmul.f32 %v3833_v5, %v15132_v37  ;;  %v3892_v47 = vsub.f32 1.0, %v3803_v4  ;;  %v15138_v27 = vld [vmem:[#allocation8_spill] sm:$0xff]  ;;  %v6811_v20 = vld [vmem:[%s14244_s1 + $0x8] sm:$0xff]  ;;  %vm15146_vm1 = vmmov %vm15142_vm5 }
 0x9ad   :  { %6321 = vtanh.f32 %v3873_v8  ;;  %v3772_v16 = vor.u32 1.1754944e-38, %v15131_v6  ;;  %v15133_v39 = vand.u32 2147483647, %v12274_v24  ;;  %v15134_v61 = vand.u32 2147483648, %v12274_v24  ;;  %v15136_v24 = vld [vmem:[#allocation12_spill] sm:$0xff]  ;;  %v6809_v8 = vld [vmem:[%s14244_s1] sm:$0xff]  ;;  %vm15148_vm15 = vmmov %vm15146_vm1 }
 0x9ae   :  { %v6312_v62 = vpop.eup %6311  ;;  %v12716_v60 = vadd.f32 %v3910_v43, %v3902_v3  ;;  %v3909_v57 = vmul.f32 %v3818_v10, %v15135_v44  ;;  %v3891_v46 = vsub.f32 1.0, %v3788_v11  ;;  %v3908_v48 = vmul.f32 %v3803_v4, %v15136_v24  ;;  %v6810_v10 = vld [vmem:[%s14245_s2 + $0x8] sm:$0xff]  ;;  %vm15150_vm7 = vmmov %vm15146_vm1  ;;  %v6821_v19 = vld [vmem:[%s14244_s1 + $0x30] sm:$0xff] }
 0x9af   :  { %v3904_v2 = vmul.f32 %v6312_v62, %v3896_v55  ;;  %v6314_v13 = vpop.eup %6313  ;;  %v3773_v34 = vsel %vm12634_vm14, %v3772_v16, %v3768_v14  ;;  %vm3755_vm11 = vcmp.eq.f32.partialorder %v15133_v39, 8.507059e+37  ;;  %v3757_v49 = vor.u32 1.1754944e-38, %v15134_v61  ;;  %v15139_v55 = vld [vmem:[#allocation16_spill] sm:$0xff]  ;;  %v6808_v62 = vld [vmem:[%s14245_s2] sm:$0xff]  ;;  %v6819_v4 = vld [vmem:[%s14244_s1 + $0x28] sm:$0xff] }
 0x9b0   :  { %v6316_v35 = vpop.eup %6315  ;;  %v3901_v17 = vmul.f32 %v6314_v13, %v3893_v9  ;;  %v3890_v30 = vsub.f32 1.0, %v3773_v34  ;;  %v3907_v63 = vmul.f32 %v3788_v11, %v15137_v28  ;;  %v3906_v5 = vmul.f32 %v3773_v34, %v15138_v27  ;;  %v6818_v13 = vld [vmem:[%s14245_s2 + $0x28] sm:$0xff]  ;;  %vm15152_vm6 = vmmov %vm15146_vm1  ;;  %v6822_v14 = vld [vmem:[%s14245_s2 + $0x38] sm:$0xff] }
 0x9b1   :  { %v12684_v18 = vadd.f32 %v3912_v58, %v3904_v2  ;;  %v6318_v0 = vpop.eup %6317  ;;  %v3900_v12 = vmul.f32 %v6316_v35, %v3892_v47  ;;  %v3758_v38 = vsel %vm3755_vm11, %v3757_v49, %v3753_v23  ;;  %vm15140_vm3 = vcmask 523264   ;;  %v6812_v2 = vld [vmem:[%s14245_s2 + $0x10] sm:$0xff]  ;;  %v6814_v58 = vld [vmem:[%s14245_s2 + $0x18] sm:$0xff]  ;;  %vm15154_vm0 = vmmov %vm15146_vm1 }
 0x9b2   :  { %v6320_v29 = vpop.eup %6319  ;;  %v12721_v1 = vadd.f32 %v3909_v57, %v3901_v17  ;;  %v3899_v50 = vmul.f32 %v6318_v0, %v3891_v46  ;;  %v3889_v59 = vsub.f32 1.0, %v3758_v38  ;;  %v3905_v7 = vmul.f32 %v3758_v38, %v15139_v55  ;;  %vm15141_vm13 = vmmov %vm15140_vm3  ;;  %v6825_v3 = vld [vmem:[%s14244_s1 + $0x40] sm:$0xff]  ;;  %v6826_v9 = vld [vmem:[%s14245_s2 + $0x48] sm:$0xff] }
 0x9b3   :  { %3929 = vmatpush.msra.mxu0 %v12684_v18  ;;  %3953 = vmatpush.msra.mxu1 %v12684_v18  ;;  %v6322_v31 = vpop.eup %6321  ;;  %v12726_v36 = vadd.f32 %v3908_v48, %v3900_v12  ;;  %v3898_v42 = vmul.f32 %v6320_v29, %v3890_v30  ;;  %vm15143_vm2 = vmmov %vm15140_vm3  ;;  %v6828_v35 = vld [vmem:[%s14245_s2 + $0x50] sm:$0xff]  ;;  %v6830_v6 = vld [vmem:[%s14245_s2 + $0x58] sm:$0xff] }
 0x9b4   :  { %v12731_v33 = vadd.f32 %v3907_v63, %v3899_v50  ;;  %v3897_v22 = vmul.f32 %v6322_v31, %v3889_v59  ;;  %vm15145_vm12 = vmmov %vm15143_vm2  ;;  %v6829_v11 = vld [vmem:[%s14244_s1 + $0x50] sm:$0xff]  ;;  %v6831_v16 = vld [vmem:[%s14244_s1 + $0x58] sm:$0xff] }
 0x9b5   :  { %3930 = vmatpush.msra.mxu0 %v12705_v32  ;;  %3954 = vmatpush.msra.mxu1 %v12705_v32  ;;  %v12736_v54 = vadd.f32 %v3906_v5, %v3898_v42  ;;  %vm15147_vm10 = vmmov %vm15143_vm2  ;;  %v6832_v23 = vld [vmem:[%s14245_s2 + $0x60] sm:$0xff]  ;;  %v6834_v43 = vld [vmem:[%s14245_s2 + $0x68] sm:$0xff] }
 0x9b6   :  { %v12741_v51 = vadd.f32 %v3905_v7, %v3897_v22  ;;  %vm15149_vm14 = vmmov %vm15143_vm2  ;;  %v6833_v37 = vld [vmem:[%s14244_s1 + $0x60] sm:$0xff]  ;;  %v6835_v17 = vld [vmem:[%s14244_s1 + $0x68] sm:$0xff] }
 0x9b7   :  { %3931 = vmatpush.msra.mxu0 %v12716_v60  ;;  %3955 = vmatpush.msra.mxu1 %v12716_v60  ;;  %vm15151_vm8 = vmmov %vm15143_vm2  ;;  %v6836_v47 = vld [vmem:[%s14245_s2 + $0x70] sm:$0xff]  ;;  %v6838_v34 = vld [vmem:[%s14245_s2 + $0x78] sm:$0xff] }
 0x9b8   :  { %vm15153_vm4 = vmmov %vm15143_vm2  ;;  %v6837_v0 = vld [vmem:[%s14244_s1 + $0x70] sm:$0xff]  ;;  %v6839_v49 = vld [vmem:[%s14244_s1 + $0x78] sm:$0xff] }
 0x9b9   :  { %3932 = vmatpush.msra.mxu0 %v12721_v1  ;;  %3956 = vmatpush.msra.mxu1 %v12721_v1  ;;  %vm15155_vm11 = vmmov %vm15143_vm2  ;;  %v6840_v44 = vld [vmem:[%s14245_s2 + $0x80] sm:$0xff]  ;;  %v6842_v29 = vld [vmem:[%s14245_s2 + $0x88] sm:$0xff] }
 0x9ba   :  { %v6841_v46 = vld [vmem:[%s14244_s1 + $0x80] sm:$0xff]  ;;  %v6843_v48 = vld [vmem:[%s14244_s1 + $0x88] sm:$0xff]  ;;  %v6844_v50 = vld [vmem:[%s14245_s2 + $0x90] sm:$0xff] }
 0x9bb   :  { %3933 = vmatpush.msra.mxu0 %v12726_v36  ;;  %3957 = vmatpush.msra.mxu1 %v12726_v36  ;;  %v6845_v28 = vld [vmem:[%s14244_s1 + $0x90] sm:$0xff]  ;;  %v6846_v63 = vld [vmem:[%s14245_s2 + $0x98] sm:$0xff]  ;;  %v6848_v5 = vld [vmem:[%s14245_s2 + $0xa0] sm:$0xff] }
 0x9bc   :  { %v6847_v27 = vld [vmem:[%s14244_s1 + $0x98] sm:$0xff]  ;;  %v6849_v7 = vld [vmem:[%s14244_s1 + $0xa0] sm:$0xff] }
 0x9bd   :  { %3934 = vmatpush.msra.mxu0 %v12731_v33  ;;  %3958 = vmatpush.msra.mxu1 %v12731_v33 }
 0x9bf   :  { %3935 = vmatpush.msra.mxu0 %v12736_v54  ;;  %3959 = vmatpush.msra.mxu1 %v12736_v54 }
 0x9c1   :  { %3936 = vmatpush.msra.mxu0 %v12741_v51  ;;  %3960 = vmatpush.msra.mxu1 %v12741_v51 }
 0x9c2   :  { %5676 = vmatmul.msk.f32.vlgmr.msra.gmra.mxu0 %vm15140_vm3, %v6807_v56  ;;  %5678 = vmatmul.msk.f32.vlgmr.msra.gmra.mxu1 %vm15141_vm13, %v6808_v62  ;;  %vm15156_vm3 = vmmov %vm15154_vm0 }
 0x9c3   :  { %4073 = vmatpush.msrb.mxu0 %v5677_v52  ;;  %vm15157_vm13 = vmmov %vm15143_vm2  ;;  %v6850_v52 = vld [vmem:[%s14245_s2 + $0xa8] sm:$0xff] }
 0x9ca   :  { %5710 = vmatmul.msk.f32.vlgmr.msrb.gmra.mxu0 %vm15142_vm5, %v6809_v8  ;;  %5679 = vmatmul.msk.f32.gmra.mxu1 %vm15143_vm2, %v6810_v10  ;;  %vm15158_vm5 = vmmov %vm15154_vm0  ;;  %v6851_v8 = vld [vmem:[%s14244_s1 + $0xa8] sm:$0xff]  ;;  %v6852_v10 = vld [vmem:[%s14245_s2 + $0xb0] sm:$0xff] }
 0x9d2   :  { %5711 = vmatmul.msk.f32.gmra.mxu0 %vm15144_vm9, %v6811_v20  ;;  %5680 = vmatmul.msk.f32.gmra.mxu1 %vm15145_vm12, %v6812_v2  ;;  %vm15159_vm9 = vmmov %vm15154_vm0 }
 0x9d3   :  { %vm15160_vm12 = vmmov %vm15143_vm2 }
 0x9da   :  { %5712 = vmatmul.msk.f32.gmra.mxu0 %vm15146_vm1, %v6813_v41  ;;  %5681 = vmatmul.msk.f32.gmra.mxu1 %vm15147_vm10, %v6814_v58  ;;  %vm15161_vm1 = vmmov %vm15154_vm0  ;;  %v6853_v41 = vld [vmem:[%s14244_s1 + $0xb0] sm:$0xff]  ;;  %v6854_v58 = vld [vmem:[%s14245_s2 + $0xb8] sm:$0xff] }
 0x9db   :  { %vm15162_vm10 = vmmov %vm15143_vm2 }
 0x9e2   :  { %5713 = vmatmul.msk.f32.gmra.mxu0 %vm15148_vm15, %v6815_v26  ;;  %5682 = vmatmul.msk.f32.gmra.mxu1 %vm15149_vm14, %v6816_v15  ;;  %vm15163_vm15 = vmmov %vm15154_vm0 }
 0x9e3   :  { %vm15164_vm14 = vmmov %vm15143_vm2 }
 0x9ea   :  { %5714 = vmatmul.msk.f32.gmra.mxu0 %vm15150_vm7, %v6817_v21  ;;  %5683 = vmatmul.msk.f32.gmra.mxu1 %vm15151_vm8, %v6818_v13  ;;  %vm15165_vm7 = vmmov %vm15154_vm0  ;;  %v6855_v21 = vld [vmem:[%s14244_s1 + $0xb8] sm:$0xff]  ;;  %v6856_v13 = vld [vmem:[%s14245_s2 + $0xc0] sm:$0xff] }
 0x9eb   :  { %vm15166_vm8 = vmmov %vm15143_vm2 }
 0x9f2   :  { %5715 = vmatmul.msk.f32.gmra.mxu0 %vm15152_vm6, %v6819_v4  ;;  %5684 = vmatmul.msk.f32.gmra.mxu1 %vm15153_vm4, %v6820_v53  ;;  %vm15167_vm6 = vmmov %vm15154_vm0 }
 0x9f3   :  { %vm15168_vm4 = vmmov %vm15143_vm2 }
 0x9fa   :  { %5716 = vmatmul.msk.f32.gmra.mxu0 %vm15154_vm0, %v6821_v19  ;;  %5685 = vmatmul.msk.f32.gmra.mxu1 %vm15155_vm11, %v6822_v14  ;;  %vm15169_vm11 = vmmov %vm15143_vm2  ;;  %v6857_v19 = vld [vmem:[%s14244_s1 + $0xc0] sm:$0xff]  ;;  %v6858_v14 = vld [vmem:[%s14245_s2 + $0xc8] sm:$0xff] }
 0xa02   :  { %5717 = vmatmul.msk.f32.gmra.mxu0 %vm15156_vm3, %v6823_v45  ;;  %5686 = vmatmul.msk.f32.gmra.mxu1 %vm15157_vm13, %v6824_v25  ;;  %vm15170_vm3 = vmmov %vm15154_vm0 }
 0xa03   :  { %vm15171_vm13 = vmmov %vm15143_vm2 }
 0xa0a   :  { %5718 = vmatmul.msk.f32.gmra.mxu0 %vm15158_vm5, %v6825_v3  ;;  %5687 = vmatmul.msk.f32.gmra.mxu1 %vm15143_vm2, %v6826_v9  ;;  %vm15172_vm5 = vmmov %vm15154_vm0  ;;  %v6859_v9 = vld [vmem:[%s14244_s1 + $0xc8] sm:$0xff] }
 0xa12   :  { %5719 = vmatmul.msk.f32.gmra.mxu0 %vm15159_vm9, %v6827_v40  ;;  %5688 = vmatmul.msk.f32.gmra.mxu1 %vm15160_vm12, %v6828_v35  ;;  %vm15173_vm9 = vmmov %vm15154_vm0  ;;  %v6860_v40 = vld [vmem:[%s14245_s2 + $0xd0] sm:$0xff] }
 0xa13   :  { %vm15174_vm12 = vmmov %vm15143_vm2 }
 0xa1a   :  { %5720 = vmatmul.msk.f32.gmra.mxu0 %vm15161_vm1, %v6829_v11  ;;  %5689 = vmatmul.msk.f32.gmra.mxu1 %vm15162_vm10, %v6830_v6  ;;  %vm15175_vm1 = vmmov %vm15154_vm0 }
 0xa1b   :  { %vm15176_vm10 = vmmov %vm15143_vm2 }
 0xa22   :  { %5721 = vmatmul.msk.f32.gmra.mxu0 %vm15163_vm15, %v6831_v16  ;;  %5690 = vmatmul.msk.f32.gmra.mxu1 %vm15164_vm14, %v6832_v23  ;;  %vm15177_vm15 = vmmov %vm15154_vm0  ;;  %v6861_v16 = vld [vmem:[%s14244_s1 + $0xd0] sm:$0xff]  ;;  %v6862_v23 = vld [vmem:[%s14245_s2 + $0xd8] sm:$0xff] }
 0xa23   :  { %vm15178_vm14 = vmmov %vm15143_vm2 }
 0xa2a   :  { %5722 = vmatmul.msk.f32.gmra.mxu0 %vm15165_vm7, %v6833_v37  ;;  %5691 = vmatmul.msk.f32.gmra.mxu1 %vm15166_vm8, %v6834_v43  ;;  %vm15179_vm7 = vmmov %vm15154_vm0 }
 0xa2b   :  { %vm15180_vm8 = vmmov %vm15143_vm2 }
 0xa32   :  { %5723 = vmatmul.msk.f32.gmra.mxu0 %vm15167_vm6, %v6835_v17  ;;  %5692 = vmatmul.msk.f32.gmra.mxu1 %vm15168_vm4, %v6836_v47  ;;  %vm15181_vm6 = vmmov %vm15154_vm0  ;;  %v6863_v47 = vld [vmem:[%s14244_s1 + $0xd8] sm:$0xff] }
 0xa33   :  { %vm15182_vm4 = vmmov %vm15143_vm2 }
 0xa3a   :  { %5724 = vmatmul.msk.f32.gmra.mxu0 %vm15154_vm0, %v6837_v0  ;;  %5693 = vmatmul.msk.f32.gmra.mxu1 %vm15169_vm11, %v6838_v34  ;;  %vm15183_vm11 = vmmov %vm15143_vm2  ;;  %v6864_v0 = vld [vmem:[%s14245_s2 + $0xe0] sm:$0xff] }
 0xa3f   :  { %v3938_v39 = vpop.f32.mrf.mxu0  ;;  %v12876_v61 = vpop.f32.mrf.mxu1 }
 0xa40   :  { %3941 = vst [vmem:[#allocation2 + $0x5] sm:$0x1] %v3938_v39 }
 0xa41   :  { %3942 = vst [vmem:[#allocation3 + $0x1] sm:$0x2] %v3938_v39 }
 0xa42   :  { %5725 = vmatmul.msk.f32.gmra.mxu0 %vm15170_vm3, %v6839_v49  ;;  %5694 = vmatmul.msk.f32.gmra.mxu1 %vm15171_vm13, %v6840_v44  ;;  %vm15184_vm3 = vmmov %vm15154_vm0  ;;  %v6865_v44 = vld [vmem:[%s14244_s1 + $0xe0] sm:$0xff] }
 0xa43   :  { %vm15185_vm13 = vmmov %vm15143_vm2 }
 0xa47   :  { %v12886_v57 = vpop.f32.mrf.mxu0  ;;  %v12888_v12 = vpop.f32.mrf.mxu1 }
 0xa4a   :  { %5726 = vmatmul.msk.f32.gmra.mxu0 %vm15172_vm5, %v6841_v46  ;;  %5695 = vmatmul.msk.f32.gmra.mxu1 %vm15143_vm2, %v6842_v29  ;;  %vm15186_vm5 = vmmov %vm15154_vm0  ;;  %v6866_v46 = vld [vmem:[%s14245_s2 + $0xe8] sm:$0xff] }
 0xa4f   :  { %v12898_v38 = vpop.f32.mrf.mxu0  ;;  %v12900_v24 = vpop.f32.mrf.mxu1 }
 0xa52   :  { %5727 = vmatmul.msk.f32.gmra.mxu0 %vm15173_vm9, %v6843_v48  ;;  %5696 = vmatmul.msk.f32.gmra.mxu1 %vm15174_vm12, %v6844_v50  ;;  %vm15187_vm9 = vmmov %vm15154_vm0 }
 0xa53   :  { %vm15188_vm12 = vmmov %vm15143_vm2 }
 0xa57   :  { %v12910_v30 = vpop.f32.mrf.mxu0  ;;  %v12912_v31 = vpop.f32.mrf.mxu1 }
 0xa5a   :  { %5728 = vmatmul.msk.f32.gmra.mxu0 %vm15175_vm1, %v6845_v28  ;;  %5697 = vmatmul.msk.f32.gmra.mxu1 %vm15176_vm10, %v6846_v63  ;;  %vm15189_vm1 = vmmov %vm15154_vm0  ;;  %v6867_v28 = vld [vmem:[%s14244_s1 + $0xe8] sm:$0xff]  ;;  %v6868_v63 = vld [vmem:[%s14245_s2 + $0xf0] sm:$0xff] }
 0xa5b   :  { %vm15190_vm10 = vmmov %vm15143_vm2 }
 0xa5f   :  { %v12922_v42 = vpop.f32.mrf.mxu0  ;;  %v12924_v59 = vpop.f32.mrf.mxu1 }
 0xa62   :  { %5729 = vmatmul.msk.f32.gmra.mxu0 %vm15177_vm15, %v6847_v27  ;;  %5698 = vmatmul.msk.f32.gmra.mxu1 %vm15178_vm14, %v6848_v5  ;;  %vm15191_vm15 = vmmov %vm15154_vm0 }
 0xa63   :  { %vm15192_vm14 = vmmov %vm15143_vm2 }
 0xa67   :  { %v12934_v22 = vpop.f32.mrf.mxu0  ;;  %v12936_v55 = vpop.f32.mrf.mxu1 }
 0xa6a   :  { %5730 = vmatmul.msk.f32.gmra.mxu0 %vm15179_vm7, %v6849_v7  ;;  %5699 = vmatmul.msk.f32.gmra.mxu1 %vm15180_vm8, %v6850_v52  ;;  %vm15193_vm7 = vmmov %vm15154_vm0  ;;  %v6869_v52 = vld [vmem:[%s14244_s1 + $0xf0] sm:$0xff] }
 0xa6b   :  { %vm15194_vm8 = vmmov %vm15143_vm2 }
 0xa6f   :  { %v12946_v56 = vpop.f32.mrf.mxu0  ;;  %v12948_v62 = vpop.f32.mrf.mxu1 }
 0xa72   :  { %5731 = vmatmul.msk.f32.gmra.mxu0 %vm15181_vm6, %v6851_v8  ;;  %5700 = vmatmul.msk.f32.gmra.mxu1 %vm15182_vm4, %v6852_v10  ;;  %vm15195_vm6 = vmmov %vm15154_vm0  ;;  %v6870_v8 = vld [vmem:[%s14245_s2 + $0xf8] sm:$0xff] }
 0xa73   :  { %vm15196_vm4 = vmmov %vm15143_vm2 }
 0xa77   :  { %v12958_v20 = vpop.f32.mrf.mxu0  ;;  %v12960_v2 = vpop.f32.mrf.mxu1 }
 0xa7a   :  { %5732 = vmatmul.msk.f32.gmra.mxu0 %vm15154_vm0, %v6853_v41  ;;  %5701 = vmatmul.msk.f32.gmra.mxu1 %vm15183_vm11, %v6854_v58  ;;  %vm15197_vm11 = vmmov %vm15143_vm2 }
 0xa7f   :  { %v12970_v26 = vpop.f32.mrf.mxu0  ;;  %v12972_v15 = vpop.f32.mrf.mxu1 }
 0xa82   :  { %5733 = vmatmul.msk.f32.gmra.mxu0 %vm15184_vm3, %v6855_v21  ;;  %5702 = vmatmul.msk.f32.gmra.mxu1 %vm15185_vm13, %v6856_v13  ;;  %v6871_v21 = vld [vmem:[%s14244_s1 + $0xf8] sm:$0xff]  ;;  %vm15198_vm3 = vmmov %vm15154_vm0 }
 0xa87   :  { %v12982_v4 = vpop.f32.mrf.mxu0  ;;  %v3989_v53 = vpop.f32.mrf.mxu1 }
 0xa8a   :  { %5734 = vmatmul.msk.f32.gmra.mxu0 %vm15186_vm5, %v6857_v19  ;;  %5703 = vmatmul.msk.f32.gmra.mxu1 %vm15143_vm2, %v6858_v14 }
 0xa8f   :  { %v4102_v45 = vpop.f32.mrf.mxu0  ;;  %v3992_v25 = vpop.f32.mrf.mxu1 }
 0xa90   :  { %v12992_v3 = vadd.f32 %v4102_v45, %v3989_v53 }
 0xa92   :  { %5735 = vmatmul.msk.f32.gmra.mxu0 %vm15187_vm9, %v6859_v9  ;;  %5704 = vmatmul.msk.f32.gmra.mxu1 %vm15188_vm12, %v6860_v40  ;;  %v4076_v9 = vadd.f32 %v12886_v57, %v12876_v61  ;;  %v4079_v40 = vadd.f32 %v12898_v38, %v12888_v12 }
 0xa97   :  { %v4105_v35 = vpop.f32.mrf.mxu0  ;;  %v3995_v11 = vpop.f32.mrf.mxu1 }
 0xa98   :  { %v13002_v6 = vadd.f32 %v4105_v35, %v3992_v25 }
 0xa9a   :  { %5736 = vmatmul.msk.f32.gmra.mxu0 %vm15189_vm1, %v6861_v16  ;;  %5705 = vmatmul.msk.f32.gmra.mxu1 %vm15190_vm10, %v6862_v23  ;;  %v5742_v16 = vmul.f32 -1.442695, %v4076_v9 }
 0xa9c   :  { %6323 = vpow2.f32 %v5742_v16 }
 0xa9f   :  { %v4108_v37 = vpop.f32.mrf.mxu0  ;;  %v3998_v43 = vpop.f32.mrf.mxu1 }
 0xaa0   :  { %v13012_v17 = vadd.f32 %v4108_v37, %v3995_v11  ;;  %v5743_v37 = vmul.f32 -1.442695, %v4079_v40 }
 0xaa2   :  { %5737 = vmatmul.msk.f32.gmra.mxu0 %vm15191_vm15, %v6863_v47  ;;  %5706 = vmatmul.msk.f32.gmra.mxu1 %vm15192_vm14, %v6864_v0  ;;  %6325 = vpow2.f32 %v5743_v37  ;;  %v4100_v47 = vadd.f32 %v12982_v4, %v12972_v15  ;;  %v6324_v12 = vpop.eup %6323  ;;  %v5751_v15 = vmul.f32 -1.442695, %v12992_v3 }
 0xaa4   :  { %v5750_v38 = vmul.f32 -1.442695, %v4100_v47 }
 0xaa7   :  { %v4111_v34 = vpop.f32.mrf.mxu0  ;;  %v4001_v39 = vpop.f32.mrf.mxu1 }
 0xaa8   :  { %v13022_v49 = vadd.f32 %v4111_v34, %v3998_v43  ;;  %v4082_v43 = vadd.f32 %v12910_v30, %v12900_v24 }
 0xaaa   :  { %5738 = vmatmul.msk.f32.gmra.mxu0 %vm15193_vm7, %v6865_v44  ;;  %5707 = vmatmul.msk.f32.gmra.mxu1 %vm15194_vm8, %v6866_v46  ;;  %v5744_v61 = vmul.f32 -1.442695, %v4082_v43  ;;  %v13074_v44 = vadd.f32 1.0, %v6324_v12 }
 0xaac   :  { %6327 = vpow2.f32 %v5744_v61  ;;  %v4212_v12 = vand.u32 2147483647, %v13074_v44  ;;  %vm4208_vm5 = vweird.f32 %v13074_v44 }
 0xaad   :  { %6329 = vpow2.f32 %v5750_v38 }
 0xaae   :  { %6331 = vrcp.f32 %v13074_v44  ;;  %vm13141_vm9 = vcmp.eq.f32.partialorder %v4212_v12, 8.507059e+37 }
 0xaaf   :  { %v4114_v29 = vpop.f32.mrf.mxu0  ;;  %v4004_v48 = vpop.f32.mrf.mxu1 }
 0xab0   :  { %v13032_v50 = vadd.f32 %v4114_v29, %v4001_v39  ;;  %v6326_v39 = vpop.eup %6325 }
 0xab2   :  { %5739 = vmatmul.msk.f32.gmra.mxu0 %vm15195_vm6, %v6867_v28  ;;  %5708 = vmatmul.msk.f32.gmra.mxu1 %vm15196_vm4, %v6868_v63  ;;  %v6328_v30 = vpop.eup %6327  ;;  %v4085_v63 = vadd.f32 %v12922_v42, %v12912_v31 }
 0xab3   :  { %v6330_v4 = vpop.eup %6329  ;;  %v13083_v28 = vadd.f32 1.0, %v6328_v30  ;;  %v4214_v30 = vand.u32 2147483648, %v13074_v44 }
 0xab4   :  { %v5745_v3 = vmul.f32 -1.442695, %v4085_v63 }
 0xab5   :  { %vm4238_vm14 = vweird.f32 %v13083_v28 }
 0xab7   :  { %v4117_v27 = vpop.f32.mrf.mxu0  ;;  %v4007_v5 = vpop.f32.mrf.mxu1 }
 0xab8   :  { %v13042_v7 = vadd.f32 %v4117_v27, %v4004_v48  ;;  %v13076_v48 = vadd.f32 1.0, %v6326_v39  ;;  %v13087_v27 = vpop.eup %6331 }
 0xab9   :  { %vm4209_vm13 = vweird.f32 %v13087_v27 }
 0xaba   :  { %5740 = vmatmul.msk.f32.gmra.mxu0 %vm15154_vm0, %v6869_v52  ;;  %5709 = vmatmul.msk.f32.gmra.mxu1 %vm15197_vm11, %v6870_v8  ;;  %6333 = vrcp.f32 %v13076_v48  ;;  %v13089_v8 = vadd.f32 1.0, %v6330_v4  ;;  %v4227_v63 = vand.u32 2147483647, %v13076_v48  ;;  %vm13137_vm2 = vmor %vm4208_vm5, %vm4209_vm13  ;;  %vm4223_vm1 = vweird.f32 %v13076_v48 }
 0xabb   :  { %6335 = vpow2.f32 %v5751_v15 }
 0xabc   :  { %6337 = vrcp.f32 %v13083_v28  ;;  %vm13163_vm15 = vcmp.eq.f32.partialorder %v4227_v63, 8.507059e+37  ;;  %vm4360_vm0 = vweird.f32 %v13089_v8 }
 0xabd   :  { %6339 = vrcp.f32 %v13089_v8 }
 0xabe   :  { %6341 = vpow2.f32 %v5745_v3 }
 0xabf   :  { %v4120_v10 = vpop.f32.mrf.mxu0  ;;  %v4010_v41 = vpop.f32.mrf.mxu1 }
 0xac0   :  { %v13052_v58 = vadd.f32 %v4120_v10, %v4007_v5 }
 0xac2   :  { %5741 = vmatmul.msk.f32.gmra.mxu0 %vm15198_vm3, %v6871_v21  ;;  %v4204_v21 = vmul.f32 %v13087_v27, %v13074_v44 }
 0xac7   :  { %v4123_v13 = vpop.f32.mrf.mxu0  ;;  %v4013_v53 = vpop.f32.mrf.mxu1 }
 0xac8   :  { %v13058_v19 = vadd.f32 %v4123_v13, %v4010_v41  ;;  %v13094_v41 = vpop.eup %6333  ;;  %v5752_v13 = vmul.f32 -1.442695, %v13002_v6 }
 0xac9   :  { %v6336_v31 = vpop.eup %6335  ;;  %v4219_v42 = vmul.f32 %v13094_v41, %v13076_v48  ;;  %vm4224_vm12 = vweird.f32 %v13094_v41 }
 0xaca   :  { %6343 = vpow2.f32 %v5752_v13  ;;  %vm13159_vm10 = vmor %vm4223_vm1, %vm4224_vm12 }
 0xacb   :  { %v4220_v6 = vsub.f32 1.0, %v4219_v42 }
 0xacd   :  { %v4221_v38 = vmul.f32 %v13094_v41, %v4220_v6  ;;  %v4215_v6 = vor.u32 1.1754944e-38, %v4214_v30 }
 0xacf   :  { %v4126_v14 = vpop.f32.mrf.mxu0  ;;  %v4016_v45 = vpop.f32.mrf.mxu1  ;;  %v4222_v44 = vadd.f32 %v13094_v41, %v4221_v38 }
 0xad0   :  { %v13060_v25 = vadd.f32 %v4126_v14, %v4013_v53  ;;  %v4088_v53 = vadd.f32 %v12934_v22, %v12924_v59  ;;  %v4205_v14 = vsub.f32 1.0, %v4204_v21  ;;  %v4091_v22 = vadd.f32 %v12946_v56, %v12936_v55 }
 0xad1   :  { %v4097_v21 = vadd.f32 %v12970_v26, %v12960_v2 }
 0xad2   :  { %v5746_v37 = vmul.f32 -1.442695, %v4088_v53  ;;  %v4206_v43 = vmul.f32 %v13087_v27, %v4205_v14  ;;  %v5747_v56 = vmul.f32 -1.442695, %v4091_v22  ;;  %v5754_v53 = vmul.f32 -1.442695, %v13022_v49 }
 0xad3   :  { %v4242_v14 = vand.u32 2147483647, %v13083_v28  ;;  %v4094_v49 = vadd.f32 %v12958_v20, %v12948_v62 }
 0xad5   :  { %vm13182_vm8 = vcmp.eq.f32.partialorder %v4242_v14, 8.507059e+37  ;;  %v5748_v63 = vmul.f32 -1.442695, %v4094_v49 }
 0xad7   :  { %v4129_v35 = vpop.f32.mrf.mxu0  ;;  %v4019_v11 = vpop.f32.mrf.mxu1 }
 0xad8   :  { %v13066_v23 = vadd.f32 %v4129_v35, %v4016_v45  ;;  %v13104_v45 = vpop.eup %6337  ;;  %v13106_v35 = vadd.f32 1.0, %v6336_v31 }
 0xad9   :  { %v13110_v16 = vpop.eup %6339  ;;  %v4234_v47 = vmul.f32 %v13104_v45, %v13083_v28  ;;  %vm4239_vm7 = vweird.f32 %v13104_v45 }
 0xada   :  { %v6342_v59 = vpop.eup %6341  ;;  %6345 = vrcp.f32 %v13106_v35  ;;  %v4356_v61 = vmul.f32 %v13110_v16, %v13089_v8  ;;  %vm13197_vm6 = vmor %vm4238_vm14, %vm4239_vm7  ;;  %vm4361_vm4 = vweird.f32 %v13110_v16 }
 0xadb   :  { %v13124_v39 = vadd.f32 1.0, %v6342_v59  ;;  %6347 = vpow2.f32 %v5746_v37  ;;  %v4235_v55 = vsub.f32 1.0, %v4234_v47  ;;  %v4226_v59 = vsel %vm13159_vm10, %v13094_v41, %v4222_v44  ;;  %vm13221_vm11 = vmor %vm4360_vm0, %vm4361_vm4 }
 0xadd   :  { %v4236_v42 = vmul.f32 %v13104_v45, %v4235_v55 }
 0xadf   :  { %v4132_v0 = vpop.f32.mrf.mxu0  ;;  %v4022_v34 = vpop.f32.mrf.mxu1 }
 0xae0   :  { %v13072_v57 = vadd.f32 %v4132_v0, %v4019_v11  ;;  %v5753_v0 = vmul.f32 -1.442695, %v13012_v17 }
 0xae2   :  { %6349 = vpow2.f32 %v5753_v0 }
 0xae3   :  { %6351 = vrcp.f32 %v13124_v39 }
 0xae4   :  { %6353 = vpow2.f32 %v5747_v56 }
 0xae7   :  { %v4135_v46 = vpop.f32.mrf.mxu0  ;;  %v4025_v29 = vpop.f32.mrf.mxu1 }
 0xae8   :  { %v13078_v24 = vadd.f32 %v4135_v46, %v4022_v34  ;;  %v6344_v34 = vpop.eup %6343  ;;  %v4207_v46 = vadd.f32 %v13087_v27, %v4206_v43 }
 0xae9   :  { %v13129_v15 = vadd.f32 1.0, %v6344_v34  ;;  %v13147_v13 = vpop.eup %6345  ;;  %v4237_v34 = vadd.f32 %v13104_v45, %v4236_v42  ;;  %v5755_v42 = vmul.f32 -1.442695, %v13032_v50 }
 0xaea   :  { %v4211_v31 = vsel %vm13137_vm2, %v13087_v27, %v4207_v46  ;;  %v4371_v47 = vmul.f32 %v13147_v13, %v13106_v35  ;;  %vm4376_vm13 = vweird.f32 %v13147_v13  ;;  %vm4375_vm2 = vweird.f32 %v13106_v35 }
 0xaeb   :  { %6355 = vrcp.f32 %v13129_v15  ;;  %v4216_v0 = vsel %vm13141_vm9, %v4215_v6, %v4211_v31  ;;  %v4241_v31 = vsel %vm13197_vm6, %v13104_v45, %v4237_v34  ;;  %v5749_v6 = vmul.f32 -1.442695, %v4097_v21  ;;  %vm13257_vm12 = vmor %vm4375_vm2, %vm4376_vm13 }
 0xaec   :  { %6357 = vpow2.f32 %v5754_v53  ;;  %v4364_v53 = vand.u32 2147483647, %v13089_v8  ;;  %vm4253_vm9 = vweird.f32 %v13124_v39  ;;  %vm4390_vm14 = vweird.f32 %v13129_v15 }
 0xaee   :  { %vm4365_vm3 = vcmp.eq.f32.partialorder %v4364_v53, 8.507059e+37 }
 0xaef   :  { %v4138_v5 = vpop.f32.mrf.mxu0  ;;  %v4028_v52 = vpop.f32.mrf.mxu1 }
 0xaf0   :  { %v13091_v10 = vadd.f32 %v4138_v5, %v4025_v29  ;;  %v4229_v5 = vand.u32 2147483648, %v13076_v48 }
 0xaf2   :  { %v4230_v48 = vor.u32 1.1754944e-38, %v4229_v5  ;;  %v4372_v5 = vsub.f32 1.0, %v4371_v47 }
 0xaf4   :  { %v4231_v56 = vsel %vm13163_vm15, %v4230_v48, %v4226_v59 }
 0xaf7   :  { %v4141_v9 = vpop.f32.mrf.mxu0  ;;  %v4031_v40 = vpop.f32.mrf.mxu1 }
 0xaf8   :  { %v13108_v11 = vadd.f32 %v4141_v9, %v4028_v52  ;;  %v4357_v52 = vsub.f32 1.0, %v4356_v61  ;;  %v4244_v9 = vand.u32 2147483648, %v13083_v28  ;;  %v4366_v28 = vand.u32 2147483648, %v13089_v8 }
 0xaf9   :  { %v4373_v8 = vmul.f32 %v13147_v13, %v4372_v5 }
 0xafa   :  { %v4358_v22 = vmul.f32 %v13110_v16, %v4357_v52  ;;  %v4245_v41 = vor.u32 1.1754944e-38, %v4244_v9  ;;  %v4367_v37 = vor.u32 1.1754944e-38, %v4366_v28 }
 0xafc   :  { %v4359_v3 = vadd.f32 %v13110_v16, %v4358_v22 }
 0xaff   :  { %v4144_v17 = vpop.f32.mrf.mxu0  ;;  %v4034_v29 = vpop.f32.mrf.mxu1 }
 0xb00   :  { %v13131_v4 = vadd.f32 %v4144_v17, %v4031_v40  ;;  %v6348_v40 = vpop.eup %6347  ;;  %v4259_v17 = vand.u32 2147483648, %v13124_v39 }
 0xb01   :  { %v6350_v43 = vpop.eup %6349  ;;  %v13180_v61 = vadd.f32 1.0, %v6348_v40  ;;  %v4363_v40 = vsel %vm13221_vm11, %v13110_v16, %v4359_v3 }
 0xb02   :  { %v13186_v38 = vpop.eup %6351  ;;  %v13188_v46 = vadd.f32 1.0, %v6350_v43  ;;  %v4246_v43 = vsel %vm13182_vm8, %v4245_v41, %v4241_v31  ;;  %v13234_v49 = vor.u32 1.1754944e-38, %v4259_v17 }
 0xb03   :  { %v6354_v30 = vpop.eup %6353  ;;  %6359 = vrcp.f32 %v13180_v61  ;;  %v4249_v26 = vmul.f32 %v13186_v38, %v13124_v39  ;;  %vm4254_vm5 = vweird.f32 %v13186_v38  ;;  %v4274_v41 = vand.u32 2147483648, %v13180_v61 }
 0xb04   :  { %v13215_v14 = vadd.f32 1.0, %v6354_v30  ;;  %6361 = vrcp.f32 %v13188_v46  ;;  %v5756_v30 = vmul.f32 -1.442695, %v13042_v7  ;;  %vm4268_vm7 = vweird.f32 %v13180_v61  ;;  %vm13313_vm6 = vmor %vm4253_vm9, %vm4254_vm5 }
 0xb05   :  { %6363 = vpow2.f32 %v5748_v63  ;;  %v4250_v22 = vsub.f32 1.0, %v4249_v26  ;;  %v4379_v63 = vand.u32 2147483647, %v13106_v35  ;;  %vm4405_vm13 = vweird.f32 %v13188_v46 }
 0xb06   :  { %vm4283_vm9 = vweird.f32 %v13215_v14 }
 0xb07   :  { %v4147_v62 = vpop.f32.mrf.mxu0  ;;  %v4037_v20 = vpop.f32.mrf.mxu1  ;;  %vm4380_vm1 = vcmp.eq.f32.partialorder %v4379_v63, 8.507059e+37 }
 0xb08   :  { %v4148_v55 = vadd.f32 %v4147_v62, %v4034_v29  ;;  %v13203_v29 = vpop.eup %6355  ;;  %v4374_v62 = vadd.f32 %v13147_v13, %v4373_v8 }
 0xb09   :  { %v6358_v9 = vpop.eup %6357  ;;  %v4386_v50 = vmul.f32 %v13203_v29, %v13129_v15  ;;  %vm4391_vm15 = vweird.f32 %v13203_v29 }
 0xb0a   :  { %v4475_v44 = vmul.f32 %v4216_v0, %v4148_v55  ;;  %v13236_v47 = vadd.f32 1.0, %v6358_v9  ;;  %v4368_v0 = vsel %vm4365_vm3, %v4367_v37, %v4363_v40  ;;  %v13238_v16 = vpop.eup %6359  ;;  %v4272_v9 = vand.u32 2147483647, %v13180_v61  ;;  %vm13302_vm8 = vmor %vm4390_vm14, %vm4391_vm15 }
 0xb0b   :  { %v4387_v34 = vsub.f32 1.0, %v4386_v50  ;;  %v13243_v55 = vpop.eup %6361  ;;  %v4499_v5 = vsub.f32 1.0, %v4368_v0  ;;  %v4515_v7 = vmul.f32 %v4368_v0, %v12741_v51  ;;  %v4264_v53 = vmul.f32 %v13238_v16, %v13180_v61 }
 0xb0c   :  { %v4483_v2 = vadd.f32 %v4475_v44, %v13058_v19  ;;  %v4257_v19 = vand.u32 2147483647, %v13124_v39  ;;  %v6364_v17 = vpop.eup %6363  ;;  %v13283_v37 = vor.u32 1.1754944e-38, %v4274_v41  ;;  %v4394_v41 = vand.u32 2147483647, %v13129_v15 }
 0xb0d   :  { %v4388_v31 = vmul.f32 %v13203_v29, %v4387_v34  ;;  %vm13333_vm0 = vcmp.eq.f32.partialorder %v4272_v9, 8.507059e+37  ;;  %vm4406_vm11 = vweird.f32 %v13243_v55  ;;  %vm4269_vm3 = vweird.f32 %v13238_v16 }
 0xb0e   :  { %6365 = vtanh.f32 %v4483_v2  ;;  %vm13279_vm10 = vcmp.eq.f32.partialorder %v4257_v19, 8.507059e+37  ;;  %v4396_v19 = vand.u32 2147483648, %v13129_v15  ;;  %vm4395_vm4 = vcmp.eq.f32.partialorder %v4394_v41, 8.507059e+37  ;;  %vm13353_vm5 = vmor %vm4405_vm13, %vm4406_vm11 }
 0xb0f   :  { %6367 = vpow2.f32 %v5755_v42  ;;  %v4150_v27 = vpop.f32.mrf.mxu0  ;;  %v4040_v48 = vpop.f32.mrf.mxu1  ;;  %v13268_v42 = vadd.f32 1.0, %v6364_v17  ;;  %v4389_v0 = vadd.f32 %v13203_v29, %v4388_v31  ;;  %v4411_v9 = vand.u32 2147483648, %v13188_v46  ;;  %vm13362_vm2 = vmor %vm4268_vm7, %vm4269_vm3 }
 0xb10   :  { %v4151_v59 = vadd.f32 %v4150_v27, %v4037_v20  ;;  %6369 = vrcp.f32 %v13215_v14  ;;  %v4381_v20 = vand.u32 2147483648, %v13106_v35  ;;  %v4401_v35 = vmul.f32 %v13243_v55, %v13188_v46 }
 0xb11   :  { %6371 = vpow2.f32 %v5749_v6  ;;  %v4409_v6 = vand.u32 2147483647, %v13188_v46  ;;  %v4412_v61 = vor.u32 1.1754944e-38, %v4411_v9  ;;  %vm4420_vm14 = vweird.f32 %v13236_v47 }
 0xb12   :  { %v4476_v12 = vmul.f32 %v4231_v56, %v4151_v59  ;;  %6373 = vrcp.f32 %v13236_v47  ;;  %v4251_v56 = vmul.f32 %v13186_v38, %v4250_v22  ;;  %v4382_v2 = vor.u32 1.1754944e-38, %v4381_v20 }
 0xb13   :  { %v4402_v59 = vsub.f32 1.0, %v4401_v35  ;;  %vm4298_vm3 = vweird.f32 %v13268_v42 }
 0xb14   :  { %v6366_v52 = vpop.eup %6365  ;;  %v4484_v3 = vadd.f32 %v4476_v12, %v13060_v25  ;;  %v4378_v25 = vsel %vm13257_vm12, %v13147_v13, %v4374_v62  ;;  %v4252_v22 = vadd.f32 %v13186_v38, %v4251_v56  ;;  %v5757_v12 = vmul.f32 -1.442695, %v13052_v58 }
 0xb15   :  { %v6368_v44 = vpop.eup %6367  ;;  %v4507_v28 = vmul.f32 %v6366_v52, %v4499_v5  ;;  %v4383_v27 = vsel %vm4380_vm1, %v4382_v2, %v4378_v25  ;;  %v4403_v52 = vmul.f32 %v13243_v55, %v4402_v59  ;;  %vm4410_vm1 = vcmp.eq.f32.partialorder %v4409_v6, 8.507059e+37 }
 0xb16   :  { %6375 = vtanh.f32 %v4484_v3  ;;  %v13272_v26 = vpop.eup %6369  ;;  %v13277_v13 = vadd.f32 1.0, %v6368_v44  ;;  %v4500_v20 = vsub.f32 1.0, %v4383_v27  ;;  %v4516_v58 = vmul.f32 %v4383_v27, %v12736_v54 }
 0xb17   :  { %6377 = vpow2.f32 %v5756_v30  ;;  %v4153_v51 = vpop.f32.mrf.mxu0  ;;  %v4043_v45 = vpop.f32.mrf.mxu1  ;;  %v13275_v50 = vadd.f32 %v4515_v7, %v4507_v28  ;;  %v4393_v3 = vsel %vm13302_vm8, %v13203_v29, %v4389_v0  ;;  %v4256_v54 = vsel %vm13313_vm6, %v13186_v38, %v4252_v22 }
 0xb18   :  { %v6372_v8 = vpop.eup %6371  ;;  %v4154_v40 = vadd.f32 %v4153_v51, %v4040_v48  ;;  %6379 = vrcp.f32 %v13268_v42  ;;  %v4265_v48 = vsub.f32 1.0, %v4264_v53  ;;  %v4397_v7 = vor.u32 1.1754944e-38, %v4396_v19 }
 0xb19   :  { %v13288_v34 = vpop.eup %6373  ;;  %6381 = vrcp.f32 %v13277_v13  ;;  %v13325_v39 = vadd.f32 1.0, %v6372_v8  ;;  %v4261_v8 = vsel %vm13279_vm10, %v13234_v49, %v4256_v54  ;;  %vm4284_vm12 = vweird.f32 %v13272_v26 }
 0xb1a   :  { %v4477_v62 = vmul.f32 %v4246_v43, %v4154_v40  ;;  %v4279_v43 = vmul.f32 %v13272_v26, %v13215_v14  ;;  %v4416_v5 = vmul.f32 %v13288_v34, %v13236_v47  ;;  %v4266_v21 = vmul.f32 %v13238_v16, %v4265_v48  ;;  %vm13397_vm15 = vmor %vm4283_vm9, %vm4284_vm12 }
 0xb1b   :  { %v4398_v2 = vsel %vm4395_vm4, %v4397_v7, %v4393_v3  ;;  %v4404_v40 = vadd.f32 %v13243_v55, %v4403_v52  ;;  %vm4421_vm10 = vweird.f32 %v13288_v34  ;;  %v4287_v7 = vand.u32 2147483647, %v13215_v14 }
 0xb1c   :  { %v6376_v17 = vpop.eup %6375  ;;  %v4485_v30 = vadd.f32 %v4477_v62, %v13066_v23  ;;  %v4280_v38 = vsub.f32 1.0, %v4279_v43  ;;  %v4417_v51 = vsub.f32 1.0, %v4416_v5  ;;  %v4501_v49 = vsub.f32 1.0, %v4398_v2  ;;  %vm13411_vm7 = vmor %vm4420_vm14, %vm4421_vm10 }
 0xb1d   :  { %v6378_v15 = vpop.eup %6377  ;;  %v4508_v56 = vmul.f32 %v6376_v17, %v4500_v20  ;;  %v4517_v19 = vmul.f32 %v4398_v2, %v12731_v33  ;;  %v4408_v20 = vsel %vm13353_vm5, %v13243_v55, %v4404_v40  ;;  %v4424_v53 = vand.u32 2147483647, %v13236_v47 }
 0xb1e   :  { %6383 = vtanh.f32 %v4485_v30  ;;  %v13329_v25 = vpop.eup %6379  ;;  %v13331_v29 = vadd.f32 1.0, %v6378_v15  ;;  %v4281_v62 = vmul.f32 %v13272_v26, %v4280_v38  ;;  %v4413_v5 = vsel %vm4410_vm1, %v4412_v61, %v4408_v20 }
 0xb1f   :  { %6385 = vpow2.f32 %v5757_v12  ;;  %v4156_v44 = vpop.f32.mrf.mxu0  ;;  %v4046_v35 = vpop.f32.mrf.mxu1  ;;  %v13327_v31 = vadd.f32 %v4516_v58, %v4508_v56  ;;  %v4294_v30 = vmul.f32 %v13329_v25, %v13268_v42  ;;  %v4502_v38 = vsub.f32 1.0, %v4413_v5 }
 0xb20   :  { %v4157_v28 = vadd.f32 %v4156_v44, %v4043_v45  ;;  %v13342_v27 = vpop.eup %6381  ;;  %v4267_v45 = vadd.f32 %v13238_v16, %v4266_v21  ;;  %6387 = vrcp.f32 %v13325_v39  ;;  %v4282_v15 = vadd.f32 %v13272_v26, %v4281_v62 }
 0xb21   :  { %6389 = vrcp.f32 %v13331_v29  ;;  %v4431_v41 = vmul.f32 %v13342_v27, %v13277_v13  ;;  %v4295_v44 = vsub.f32 1.0, %v4294_v30  ;;  %vm4425_vm8 = vcmp.eq.f32.partialorder %v4424_v53, 8.507059e+37 }
 0xb22   :  { %v4478_v59 = vmul.f32 %v4261_v8, %v4157_v28  ;;  %v4271_v33 = vsel %vm13362_vm2, %v13238_v16, %v4267_v45  ;;  %v4286_v8 = vsel %vm13397_vm15, %v13272_v26, %v4282_v15  ;;  %vm4288_vm6 = vcmp.eq.f32.partialorder %v4287_v7, 8.507059e+37 }
 0xb23   :  { %v4432_v16 = vsub.f32 1.0, %v4431_v41  ;;  %v4276_v52 = vsel %vm13333_vm0, %v13283_v37, %v4271_v33  ;;  %v4289_v37 = vand.u32 2147483648, %v13215_v14  ;;  %v4518_v14 = vmul.f32 %v4413_v5, %v12726_v36 }
 0xb24   :  { %v6384_v22 = vpop.eup %6383  ;;  %v4486_v0 = vadd.f32 %v4478_v59, %v13072_v57  ;;  %v4418_v57 = vmul.f32 %v13288_v34, %v4417_v51  ;;  %v4296_v26 = vmul.f32 %v13329_v25, %v4295_v44  ;;  %vm4299_vm4 = vweird.f32 %v13329_v25 }
 0xb25   :  { %v6386_v12 = vpop.eup %6385  ;;  %v4509_v17 = vmul.f32 %v6384_v22, %v4501_v49  ;;  %v4433_v59 = vmul.f32 %v13342_v27, %v4432_v16  ;;  %v4290_v22 = vor.u32 1.1754944e-38, %v4289_v37  ;;  %vm4436_vm0 = vweird.f32 %v13342_v27  ;;  %vm13451_vm5 = vmor %vm4298_vm3, %vm4299_vm4 }
 0xb26   :  { %6391 = vtanh.f32 %v4486_v0  ;;  %v13379_v58 = vadd.f32 1.0, %v6386_v12  ;;  %v13382_v23 = vpop.eup %6387  ;;  %v4419_v56 = vadd.f32 %v13288_v34, %v4418_v57  ;;  %v4297_v46 = vadd.f32 %v13329_v25, %v4296_v26 }
 0xb27   :  { %v4159_v43 = vpop.f32.mrf.mxu0  ;;  %v13377_v63 = vadd.f32 %v4517_v19, %v4509_v17  ;;  %v4049_v3 = vpop.f32.mrf.mxu1  ;;  %v4309_v9 = vmul.f32 %v13382_v23, %v13325_v39  ;;  %v4434_v19 = vadd.f32 %v13342_v27, %v4433_v59  ;;  %v4441_v20 = vand.u32 2147483648, %v13277_v13 }
 0xb28   :  { %v4160_v55 = vadd.f32 %v4159_v43, %v4046_v35  ;;  %v13389_v54 = vpop.eup %6389  ;;  %v4426_v35 = vand.u32 2147483648, %v13236_v47  ;;  %6393 = vrcp.f32 %v13379_v58  ;;  %v4304_v33 = vand.u32 2147483648, %v13268_v42 }
 0xb29   :  { %v4446_v47 = vmul.f32 %v13389_v54, %v13331_v29  ;;  %v4310_v57 = vsub.f32 1.0, %v4309_v9  ;;  %vm4435_vm11 = vweird.f32 %v13277_v13  ;;  %v4439_v30 = vand.u32 2147483647, %v13277_v13  ;;  %v6875_v13 = vld [vmem:[%s14245_s2 + $0x8] sm:$0xff] }
 0xb2a   :  { %v4479_v21 = vmul.f32 %v4276_v52, %v4160_v55  ;;  %v4427_v6 = vor.u32 1.1754944e-38, %v4426_v35  ;;  %v4302_v15 = vand.u32 2147483647, %v13268_v42  ;;  %vm13442_vm13 = vmor %vm4435_vm11, %vm4436_vm0  ;;  %v4305_v44 = vor.u32 1.1754944e-38, %v4304_v33 }
 0xb2b   :  { %v4447_v48 = vsub.f32 1.0, %v4446_v47  ;;  %v4438_v42 = vsel %vm13442_vm13, %v13342_v27, %v4434_v19  ;;  %vm4440_vm2 = vcmp.eq.f32.partialorder %v4439_v30, 8.507059e+37  ;;  %vm4451_vm12 = vweird.f32 %v13389_v54 }
 0xb2c   :  { %v6392_v2 = vpop.eup %6391  ;;  %v4487_v51 = vadd.f32 %v4479_v21, %v13078_v24  ;;  %v4423_v24 = vsel %vm13411_vm7, %v13288_v34, %v4419_v56  ;;  %v4291_v34 = vsel %vm4288_vm6, %v4290_v22, %v4286_v8  ;;  %v4311_v56 = vmul.f32 %v13382_v23, %v4310_v57 }
 0xb2d   :  { %v4510_v45 = vmul.f32 %v6392_v2, %v4502_v38  ;;  %v4428_v62 = vsel %vm4425_vm8, %v4427_v6, %v4423_v24  ;;  %v4442_v21 = vor.u32 1.1754944e-38, %v4441_v20  ;;  %vm4303_vm9 = vcmp.eq.f32.partialorder %v4302_v15, 8.507059e+37 }
 0xb2e   :  { %6395 = vtanh.f32 %v4487_v51  ;;  %v13430_v12 = vpop.eup %6393  ;;  %v4503_v61 = vsub.f32 1.0, %v4428_v62  ;;  %v4519_v16 = vmul.f32 %v4428_v62, %v12721_v1  ;;  %v4301_v1 = vsel %vm13451_vm5, %v13329_v25, %v4297_v46 }
 0xb2f   :  { %v4162_v49 = vpop.f32.mrf.mxu0  ;;  %v13425_v36 = vadd.f32 %v4518_v14, %v4510_v45  ;;  %v4052_v17 = vpop.f32.mrf.mxu1  ;;  %v4461_v52 = vmul.f32 %v13430_v12, %v13379_v58  ;;  %v4443_v37 = vsel %vm4440_vm2, %v4442_v21, %v4438_v42  ;;  %v4306_v38 = vsel %vm4303_vm9, %v4305_v44, %v4301_v1  ;;  %v6877_v42 = vld [vmem:[%s14245_s2 + $0x10] sm:$0xff]  ;;  %v6879_v1 = vld [vmem:[%s14245_s2 + $0x18] sm:$0xff]  ;;  %v6881_v21 = vld [vmem:[%s14245_s2 + $0x20] sm:$0xff] }
 0xb30   :  { %v4163_v0 = vadd.f32 %v4162_v49, %v4049_v3  ;;  %v4312_v25 = vadd.f32 %v13382_v23, %v4311_v56  ;;  %vm4314_vm1 = vweird.f32 %v13382_v23  ;;  %v4456_v51 = vand.u32 2147483648, %v13331_v29  ;;  %v6880_v56 = vld [vmem:[%s14244_s1 + $0x18] sm:$0xff]  ;;  %v6883_v44 = vld [vmem:[%s14245_s2 + $0x28] sm:$0xff]  ;;  %v6898_v45 = vld [vmem:[%s14244_s1 + $0x60] sm:$0xff] }
 0xb31   :  { %v4462_v53 = vsub.f32 1.0, %v4461_v52  ;;  %v4319_v8 = vand.u32 2147483648, %v13325_v39  ;;  %vm4450_vm10 = vweird.f32 %v13331_v29  ;;  %v4454_v40 = vand.u32 2147483647, %v13331_v29 }
 0xb32   :  { %v4480_v41 = vmul.f32 %v4291_v34, %v4163_v0  ;;  %v4504_v14 = vsub.f32 1.0, %v4443_v37  ;;  %vm4313_vm15 = vweird.f32 %v13325_v39  ;;  %v4317_v24 = vand.u32 2147483647, %v13325_v39  ;;  %vm13476_vm14 = vmor %vm4450_vm10, %vm4451_vm12 }
 0xb33   :  { %v4463_v26 = vmul.f32 %v13430_v12, %v4462_v53  ;;  %vm4315_vm7 = vmor %vm4313_vm15, %vm4314_vm1  ;;  %v4520_v49 = vmul.f32 %v4443_v37, %v12716_v60  ;;  %v4457_v22 = vor.u32 1.1754944e-38, %v4456_v51  ;;  %v4320_v0 = vor.u32 1.1754944e-38, %v4319_v8  ;;  %v6885_v37 = vld [vmem:[%s14245_s2 + $0x30] sm:$0xff]  ;;  %v6891_v51 = vld [vmem:[%s14245_s2 + $0x48] sm:$0xff] }
 0xb34   :  { %v6396_v43 = vpop.eup %6395  ;;  %v4488_v55 = vadd.f32 %v4480_v41, %v13091_v10  ;;  %v4448_v10 = vmul.f32 %v13389_v54, %v4447_v48  ;;  %vm4455_vm8 = vcmp.eq.f32.partialorder %v4454_v40, 8.507059e+37  ;;  %vm4318_vm6 = vcmp.eq.f32.partialorder %v4317_v24, 8.507059e+37  ;;  %v6886_v53 = vld [vmem:[%s14244_s1 + $0x30] sm:$0xff]  ;;  %v6892_v8 = vld [vmem:[%s14244_s1 + $0x48] sm:$0xff]  ;;  %v6897_v24 = vld [vmem:[%s14245_s2 + $0x60] sm:$0xff] }
 0xb35   :  { %v4511_v3 = vmul.f32 %v6396_v43, %v4503_v61  ;;  %v4464_v41 = vadd.f32 %v13430_v12, %v4463_v26  ;;  %vm4466_vm4 = vweird.f32 %v13430_v12  ;;  %v4471_v60 = vand.u32 2147483648, %v13379_v58  ;;  %v6893_v40 = vld [vmem:[%s14245_s2 + $0x50] sm:$0xff]  ;;  %v6899_v26 = vld [vmem:[%s14245_s2 + $0x68] sm:$0xff] }
 0xb36   :  { %6397 = vtanh.f32 %v4488_v55  ;;  %v4449_v27 = vadd.f32 %v13389_v54, %v4448_v10  ;;  %vm4465_vm0 = vweird.f32 %v13379_v58  ;;  %vm15237_vm13 = vcmask 523264   ;;  %v6876_v10 = vld [vmem:[%s14244_s1 + $0x8] sm:$0xff] }
 0xb37   :  { %v4165_v7 = vpop.f32.mrf.mxu0  ;;  %v13463_v35 = vadd.f32 %v4519_v16, %v4511_v3  ;;  %v4055_v9 = vpop.f32.mrf.mxu1  ;;  %vm4467_vm11 = vmor %vm4465_vm0, %vm4466_vm4  ;;  %v4472_v61 = vor.u32 1.1754944e-38, %v4471_v60  ;;  %vm15239_vm2 = vcmask 64512   ;;  %v6878_v3 = vld [vmem:[%s14244_s1 + $0x10] sm:$0xff]  ;;  %v6908_v60 = vld [vmem:[%s14244_s1 + $0x88] sm:$0xff] }
 0xb38   :  { %v4166_v28 = vadd.f32 %v4165_v7, %v4052_v17  ;;  %v4453_v29 = vsel %vm13476_vm14, %v13389_v54, %v4449_v27  ;;  %v4468_v17 = vsel %vm4467_vm11, %v13430_v12, %v4464_v41  ;;  %vm15238_vm5 = vmmov %vm15237_vm13  ;;  %v6874_v12 = vld [vmem:[%s14244_s1] sm:$0xff]  ;;  %v6888_v27 = vld [vmem:[%s14244_s1 + $0x38] sm:$0xff] }
 0xb39   :  { %v4458_v34 = vsel %vm4455_vm8, %v4457_v22, %v4453_v29  ;;  %vm15240_vm9 = vmmov %vm15238_vm5  ;;  %v6882_v7 = vld [vmem:[%s14244_s1 + $0x20] sm:$0xff]  ;;  %v6901_v29 = vld [vmem:[%s14245_s2 + $0x70] sm:$0xff] }
 0xb3a   :  { %v4481_v2 = vmul.f32 %v4306_v38, %v4166_v28  ;;  %v4505_v46 = vsub.f32 1.0, %v4458_v34  ;;  %v4521_v30 = vmul.f32 %v4458_v34, %v12705_v32  ;;  %v6872_v32 = vld [vmem:[%s14246_s3] sm:$0x3]  ;;  %vm15241_vm12 = vmmov %vm15239_vm2  ;;  %v6884_v28 = vld [vmem:[%s14244_s1 + $0x28] sm:$0xff] }
 0xb3b   :  { %vm15242_vm1 = vmmov %vm15238_vm5  ;;  %v6887_v38 = vld [vmem:[%s14245_s2 + $0x38] sm:$0xff]  ;;  %v6905_v22 = vld [vmem:[%s14245_s2 + $0x80] sm:$0xff] }
 0xb3c   :  { %v6398_v47 = vpop.eup %6397  ;;  %v4489_v59 = vadd.f32 %v4481_v2, %v13108_v11  ;;  %v4316_v11 = vsel %vm4315_vm7, %v13382_v23, %v4312_v25  ;;  %v4469_v23 = vand.u32 2147483647, %v13379_v58  ;;  %vm15243_vm10 = vmmov %vm15239_vm2  ;;  %v6889_v2 = vld [vmem:[%s14245_s2 + $0x40] sm:$0xff]  ;;  %v6907_v34 = vld [vmem:[%s14245_s2 + $0x88] sm:$0xff] }
 0xb3d   :  { %v4512_v6 = vmul.f32 %v6398_v47, %v4504_v14  ;;  %v4321_v19 = vsel %vm4318_vm6, %v4320_v0, %v4316_v11  ;;  %vm15244_vm15 = vmmov %vm15242_vm1  ;;  %v6890_v25 = vld [vmem:[%s14244_s1 + $0x40] sm:$0xff]  ;;  %v6894_v14 = vld [vmem:[%s14244_s1 + $0x50] sm:$0xff] }
 0xb3e   :  { %6399 = vtanh.f32 %v4489_v59  ;;  %vm4470_vm3 = vcmp.eq.f32.partialorder %v4469_v23, 8.507059e+37  ;;  %vm15245_vm14 = vmmov %vm15239_vm2  ;;  %v6895_v47 = vld [vmem:[%s14245_s2 + $0x58] sm:$0xff]  ;;  %v6909_v23 = vld [vmem:[%s14245_s2 + $0x90] sm:$0xff] }
 0xb3f   :  { %v4168_v39 = vpop.f32.mrf.mxu0  ;;  %v13486_v62 = vadd.f32 %v4520_v49, %v4512_v6  ;;  %v4473_v55 = vsel %vm4470_vm3, %v4472_v61, %v4468_v17  ;;  %vm15246_vm7 = vmmov %vm15242_vm1  ;;  %v6896_v59 = vld [vmem:[%s14244_s1 + $0x58] sm:$0xff]  ;;  %v6902_v6 = vld [vmem:[%s14244_s1 + $0x70] sm:$0xff] }
 0xb40   :  { %v4169_v48 = vadd.f32 %v4168_v39, %v4055_v9  ;;  %v4506_v15 = vsub.f32 1.0, %v4473_v55  ;;  %v4522_v58 = vmul.f32 %v4473_v55, %v12684_v18  ;;  %v5759_v18 = vld [vmem:[%s14243_s0 + $0x38] sm:$0xff]  ;;  %vm15247_vm8 = vmmov %vm15239_vm2  ;;  %v6900_v9 = vld [vmem:[%s14244_s1 + $0x68] sm:$0xff]  ;;  %s5177_s0 = sshll.u32 %s14248_s5, 4  ;;  %s5178_s0 = int_to_ptr.hbm [resolvable:$true] %s5177_s0 }
 0xb41   :  { %vm15248_vm6 = vmmov %vm15242_vm1  ;;  %v6903_v49 = vld [vmem:[%s14245_s2 + $0x78] sm:$0xff]  ;;  %v6910_v17 = vld [vmem:[%s14244_s1 + $0x90] sm:$0xff] }
 0xb42   :  { %v4482_v54 = vmul.f32 %v4321_v19, %v4169_v48  ;;  %vm15249_vm4 = vmmov %vm15239_vm2  ;;  %v6904_v11 = vld [vmem:[%s14244_s1 + $0x78] sm:$0xff]  ;;  %v6906_v48 = vld [vmem:[%s14244_s1 + $0x80] sm:$0xff] }
 0xb43   :  { %vm15250_vm0 = vmmov %vm15242_vm1 }
 0xb44   :  { %v6400_v57 = vpop.eup %6399  ;;  %v4490_v20 = vadd.f32 %v4482_v54, %v13131_v4  ;;  %v6873_v4 = vld [vmem:[%s14245_s2] sm:$0xff]  ;;  %vm15251_vm11 = vmmov %vm15239_vm2 }
 0xb45   :  { %v4513_v33 = vmul.f32 %v6400_v57, %v4505_v46  ;;  %vm15252_vm3 = vmmov %vm15250_vm0 }
 0xb46   :  { %6401 = vtanh.f32 %v4490_v20 }
 0xb47   :  { %v13496_v43 = vadd.f32 %v4521_v30, %v4513_v33  ;;  %v6911_v33 = vld [vmem:[%s14245_s2 + $0x98] sm:$0xff] }
 0xb4c   :  { %v6402_v5 = vpop.eup %6401 }
 0xb4d   :  { %v4514_v16 = vmul.f32 %v6402_v5, %v4506_v15  ;;  %v6912_v15 = vld [vmem:[%s14244_s1 + $0x98] sm:$0xff]  ;;  %v6913_v5 = vld [vmem:[%s14245_s2 + $0xa0] sm:$0xff] }
 0xb4f   :  { %v13499_v52 = vadd.f32 %v4522_v58, %v4514_v16 }
 0xb51   :  { %4539 = vmatpush.msra.mxu3 %v13499_v52  ;;  %4563 = vmatpush.msrb.mxu2 %v13499_v52 }
 0xb53   :  { %4540 = vmatpush.msra.mxu3 %v13496_v43  ;;  %4564 = vmatpush.msrb.mxu2 %v13496_v43 }
 0xb55   :  { %4541 = vmatpush.msra.mxu3 %v13486_v62  ;;  %4565 = vmatpush.msrb.mxu2 %v13486_v62 }
 0xb57   :  { %4542 = vmatpush.msra.mxu3 %v13463_v35  ;;  %4566 = vmatpush.msrb.mxu2 %v13463_v35 }
 0xb59   :  { %4543 = vmatpush.msra.mxu3 %v13425_v36  ;;  %4567 = vmatpush.msrb.mxu2 %v13425_v36 }
 0xb5b   :  { %4544 = vmatpush.msra.mxu3 %v13377_v63  ;;  %4568 = vmatpush.msrb.mxu2 %v13377_v63 }
 0xb5d   :  { %4545 = vmatpush.msra.mxu3 %v13327_v31  ;;  %4569 = vmatpush.msrb.mxu2 %v13327_v31 }
 0xb5f   :  { %4546 = vmatpush.msra.mxu3 %v13275_v50  ;;  %4570 = vmatpush.msrb.mxu2 %v13275_v50 }
 0xb60   :  { %5758 = vmatmul.msk.f32.vlgmr.msra.gmra.mxu3 %vm15237_vm13, %v6872_v32  ;;  %5760 = vmatmul.msk.f32.vlgmr.msrb.gmra.mxu2 %vm15238_vm5, %v6873_v4  ;;  %vm15253_vm13 = vmmov %vm15239_vm2  ;;  %v6914_v32 = vld [vmem:[%s14244_s1 + $0xa0] sm:$0xff]  ;;  %v6915_v4 = vld [vmem:[%s14245_s2 + $0xa8] sm:$0xff] }
 0xb61   :  { %4683 = vmatpush.msrb.mxu3 %v5759_v18  ;;  %vm15254_vm5 = vmmov %vm15250_vm0 }
 0xb68   :  { %5792 = vmatmul.msk.f32.vlgmr.msrb.gmra.mxu3 %vm15239_vm2, %v6874_v12  ;;  %5761 = vmatmul.msk.f32.gmra.mxu2 %vm15240_vm9, %v6875_v13  ;;  %vm15255_vm9 = vmmov %vm15250_vm0 }
 0xb70   :  { %5793 = vmatmul.msk.f32.gmra.mxu3 %vm15241_vm12, %v6876_v10  ;;  %5762 = vmatmul.msk.f32.gmra.mxu2 %vm15242_vm1, %v6877_v42  ;;  %vm15256_vm12 = vmmov %vm15239_vm2  ;;  %v6916_v42 = vld [vmem:[%s14244_s1 + $0xa8] sm:$0xff] }
 0xb71   :  { %vm15257_vm1 = vmmov %vm15250_vm0 }
 0xb78   :  { %5794 = vmatmul.msk.f32.gmra.mxu3 %vm15243_vm10, %v6878_v3  ;;  %5763 = vmatmul.msk.f32.gmra.mxu2 %vm15244_vm15, %v6879_v1  ;;  %vm15258_vm10 = vmmov %vm15239_vm2  ;;  %v6917_v3 = vld [vmem:[%s14245_s2 + $0xb0] sm:$0xff] }
 0xb79   :  { %vm15259_vm15 = vmmov %vm15250_vm0 }
 0xb80   :  { %5795 = vmatmul.msk.f32.gmra.mxu3 %vm15245_vm14, %v6880_v56  ;;  %5764 = vmatmul.msk.f32.gmra.mxu2 %vm15246_vm7, %v6881_v21  ;;  %vm15260_vm14 = vmmov %vm15239_vm2 }
 0xb81   :  { %vm15261_vm7 = vmmov %vm15250_vm0 }
 0xb88   :  { %5796 = vmatmul.msk.f32.gmra.mxu3 %vm15247_vm8, %v6882_v7  ;;  %5765 = vmatmul.msk.f32.gmra.mxu2 %vm15248_vm6, %v6883_v44  ;;  %vm15262_vm8 = vmmov %vm15239_vm2  ;;  %v6918_v7 = vld [vmem:[%s14244_s1 + $0xb0] sm:$0xff]  ;;  %v6919_v44 = vld [vmem:[%s14245_s2 + $0xb8] sm:$0xff] }
 0xb89   :  { %vm15263_vm6 = vmmov %vm15250_vm0 }
 0xb90   :  { %5797 = vmatmul.msk.f32.gmra.mxu3 %vm15249_vm4, %v6884_v28  ;;  %5766 = vmatmul.msk.f32.gmra.mxu2 %vm15250_vm0, %v6885_v37  ;;  %vm15264_vm4 = vmmov %vm15239_vm2 }
 0xb98   :  { %5798 = vmatmul.msk.f32.gmra.mxu3 %vm15251_vm11, %v6886_v53  ;;  %5767 = vmatmul.msk.f32.gmra.mxu2 %vm15252_vm3, %v6887_v38  ;;  %vm15265_vm11 = vmmov %vm15239_vm2  ;;  %v6920_v38 = vld [vmem:[%s14244_s1 + $0xb8] sm:$0xff] }
 0xb99   :  { %vm15266_vm3 = vmmov %vm15250_vm0 }
 0xba0   :  { %5799 = vmatmul.msk.f32.gmra.mxu3 %vm15253_vm13, %v6888_v27  ;;  %5768 = vmatmul.msk.f32.gmra.mxu2 %vm15254_vm5, %v6889_v2  ;;  %vm15267_vm13 = vmmov %vm15239_vm2  ;;  %v6921_v27 = vld [vmem:[%s14245_s2 + $0xc0] sm:$0xff] }
 0xba1   :  { %vm15268_vm5 = vmmov %vm15250_vm0 }
 0xba8   :  { %5800 = vmatmul.msk.f32.gmra.mxu3 %vm15239_vm2, %v6890_v25  ;;  %5769 = vmatmul.msk.f32.gmra.mxu2 %vm15255_vm9, %v6891_v51  ;;  %vm15269_vm9 = vmmov %vm15250_vm0 }
 0xbb0   :  { %5801 = vmatmul.msk.f32.gmra.mxu3 %vm15256_vm12, %v6892_v8  ;;  %5770 = vmatmul.msk.f32.gmra.mxu2 %vm15257_vm1, %v6893_v40  ;;  %vm15270_vm12 = vmmov %vm15239_vm2  ;;  %v6922_v8 = vld [vmem:[%s14244_s1 + $0xc0] sm:$0xff]  ;;  %v6923_v40 = vld [vmem:[%s14245_s2 + $0xc8] sm:$0xff] }
 0xbb1   :  { %vm15271_vm1 = vmmov %vm15250_vm0 }
 0xbb8   :  { %5802 = vmatmul.msk.f32.gmra.mxu3 %vm15258_vm10, %v6894_v14  ;;  %5771 = vmatmul.msk.f32.gmra.mxu2 %vm15259_vm15, %v6895_v47  ;;  %vm15272_vm10 = vmmov %vm15239_vm2 }
 0xbb9   :  { %vm15273_vm15 = vmmov %vm15250_vm0 }
 0xbc0   :  { %5803 = vmatmul.msk.f32.gmra.mxu3 %vm15260_vm14, %v6896_v59  ;;  %5772 = vmatmul.msk.f32.gmra.mxu2 %vm15261_vm7, %v6897_v24  ;;  %vm15274_vm14 = vmmov %vm15239_vm2  ;;  %v6924_v24 = vld [vmem:[%s14244_s1 + $0xc8] sm:$0xff] }
 0xbc1   :  { %vm15275_vm7 = vmmov %vm15250_vm0 }
 0xbc8   :  { %5804 = vmatmul.msk.f32.gmra.mxu3 %vm15262_vm8, %v6898_v45  ;;  %5773 = vmatmul.msk.f32.gmra.mxu2 %vm15263_vm6, %v6899_v26  ;;  %vm15276_vm8 = vmmov %vm15239_vm2  ;;  %v6925_v45 = vld [vmem:[%s14245_s2 + $0xd0] sm:$0xff] }
 0xbc9   :  { %vm15277_vm6 = vmmov %vm15250_vm0 }
 0xbd0   :  { %5805 = vmatmul.msk.f32.gmra.mxu3 %vm15264_vm4, %v6900_v9  ;;  %5774 = vmatmul.msk.f32.gmra.mxu2 %vm15250_vm0, %v6901_v29  ;;  %vm15278_vm4 = vmmov %vm15239_vm2 }
 0xbd8   :  { %5806 = vmatmul.msk.f32.gmra.mxu3 %vm15265_vm11, %v6902_v6  ;;  %5775 = vmatmul.msk.f32.gmra.mxu2 %vm15266_vm3, %v6903_v49  ;;  %vm15279_vm11 = vmmov %vm15239_vm2  ;;  %v6926_v6 = vld [vmem:[%s14244_s1 + $0xd0] sm:$0xff]  ;;  %v6927_v49 = vld [vmem:[%s14245_s2 + $0xd8] sm:$0xff] }
 0xbd9   :  { %vm15280_vm3 = vmmov %vm15250_vm0 }
 0xbe0   :  { %5807 = vmatmul.msk.f32.gmra.mxu3 %vm15267_vm13, %v6904_v11  ;;  %5776 = vmatmul.msk.f32.gmra.mxu2 %vm15268_vm5, %v6905_v22  ;;  %vm15281_vm13 = vmmov %vm15239_vm2 }
 0xbe1   :  { %vm15282_vm5 = vmmov %vm15250_vm0 }
 0xbe3   :  { %v4548_v39 = vpop.f32.mrf.mxu3  ;;  %v4572_v0 = vpop.f32.mrf.mxu2 }
 0xbe4   :  { %4551 = vst [vmem:[#allocation2 + $0x6] sm:$0x1] %v4548_v39 }
 0xbe5   :  { %4552 = vst [vmem:[#allocation3] sm:$0x2] %v4548_v39 }
 0xbe8   :  { %5808 = vmatmul.msk.f32.gmra.mxu3 %vm15239_vm2, %v6906_v48  ;;  %5777 = vmatmul.msk.f32.gmra.mxu2 %vm15269_vm9, %v6907_v34  ;;  %vm15283_vm9 = vmmov %vm15250_vm0  ;;  %v6929_v48 = vld [vmem:[%s14245_s2 + $0xe0] sm:$0xff] }
 0xbeb   :  { %v4685_v19 = vpop.f32.mrf.mxu3  ;;  %v4575_v41 = vpop.f32.mrf.mxu2 }
 0xbec   :  { %v13664_v54 = vadd.f32 %v4685_v19, %v4572_v0  ;;  %v6928_v0 = vld [vmem:[%s14244_s1 + $0xd8] sm:$0xff] }
 0xbf0   :  { %5809 = vmatmul.msk.f32.gmra.mxu3 %vm15270_vm12, %v6908_v60  ;;  %5778 = vmatmul.msk.f32.gmra.mxu2 %vm15271_vm1, %v6909_v23  ;;  %vm15284_vm12 = vmmov %vm15239_vm2  ;;  %v6930_v60 = vld [vmem:[%s14244_s1 + $0xe0] sm:$0xff]  ;;  %v6931_v23 = vld [vmem:[%s14245_s2 + $0xe8] sm:$0xff] }
 0xbf1   :  { %vm15285_vm1 = vmmov %vm15250_vm0 }
 0xbf3   :  { %v4688_v46 = vpop.f32.mrf.mxu3  ;;  %v4578_v57 = vpop.f32.mrf.mxu2 }
 0xbf4   :  { %v13674_v20 = vadd.f32 %v4688_v46, %v4575_v41 }
 0xbf8   :  { %5810 = vmatmul.msk.f32.gmra.mxu3 %vm15272_vm10, %v6910_v17  ;;  %5779 = vmatmul.msk.f32.gmra.mxu2 %vm15273_vm15, %v6911_v33  ;;  %vm15286_vm10 = vmmov %vm15239_vm2  ;;  %v6932_v33 = vld [vmem:[%s14244_s1 + $0xe8] sm:$0xff] }
 0xbf9   :  { %vm15287_vm15 = vmmov %vm15250_vm0 }
 0xbfb   :  { %v4691_v30 = vpop.f32.mrf.mxu3  ;;  %v4581_v61 = vpop.f32.mrf.mxu2 }
 0xbfc   :  { %v13684_v55 = vadd.f32 %v4691_v30, %v4578_v57  ;;  %v6933_v30 = vld [vmem:[%s14245_s2 + $0xf0] sm:$0xff] }
 0xc00   :  { %5811 = vmatmul.msk.f32.gmra.mxu3 %vm15274_vm14, %v6912_v15  ;;  %5780 = vmatmul.msk.f32.gmra.mxu2 %vm15275_vm7, %v6913_v5  ;;  %vm15288_vm14 = vmmov %vm15239_vm2 }
 0xc01   :  { %vm15289_vm7 = vmmov %vm15250_vm0 }
 0xc03   :  { %v4694_v16 = vpop.f32.mrf.mxu3  ;;  %v4584_v58 = vpop.f32.mrf.mxu2 }
 0xc04   :  { %v13694_v18 = vadd.f32 %v4694_v16, %v4581_v61  ;;  %v6934_v16 = vld [vmem:[%s14244_s1 + $0xf0] sm:$0xff] }
 0xc08   :  { %5812 = vmatmul.msk.f32.gmra.mxu3 %vm15276_vm8, %v6914_v32  ;;  %5781 = vmatmul.msk.f32.gmra.mxu2 %vm15277_vm6, %v6915_v4  ;;  %vm15290_vm8 = vmmov %vm15239_vm2 }
 0xc09   :  { %vm15291_vm6 = vmmov %vm15250_vm0 }
 0xc0b   :  { %v4697_v12 = vpop.f32.mrf.mxu3  ;;  %v4587_v13 = vpop.f32.mrf.mxu2 }
 0xc0c   :  { %v13704_v10 = vadd.f32 %v4697_v12, %v4584_v58  ;;  %v6935_v58 = vld [vmem:[%s14245_s2 + $0xf8] sm:$0xff] }
 0xc10   :  { %5813 = vmatmul.msk.f32.gmra.mxu3 %vm15278_vm4, %v6916_v42  ;;  %5782 = vmatmul.msk.f32.gmra.mxu2 %vm15250_vm0, %v6917_v3  ;;  %vm15292_vm4 = vmmov %vm15239_vm2 }
 0xc13   :  { %v4700_v1 = vpop.f32.mrf.mxu3  ;;  %v4590_v56 = vpop.f32.mrf.mxu2 }
 0xc14   :  { %v13714_v21 = vadd.f32 %v4700_v1, %v4587_v13  ;;  %v6936_v13 = vld [vmem:[%s14244_s1 + $0xf8] sm:$0xff] }
 0xc18   :  { %5814 = vmatmul.msk.f32.gmra.mxu3 %vm15279_vm11, %v6918_v7  ;;  %5783 = vmatmul.msk.f32.gmra.mxu2 %vm15280_vm3, %v6919_v44  ;;  %vm15293_vm11 = vmmov %vm15239_vm2 }
 0xc19   :  { %vm15294_vm3 = vmmov %vm15250_vm0 }
 0xc1b   :  { %v4703_v28 = vpop.f32.mrf.mxu3  ;;  %v4593_v37 = vpop.f32.mrf.mxu2 }
 0xc1c   :  { %v13724_v53 = vadd.f32 %v4703_v28, %v4590_v56 }
 0xc20   :  { %5815 = vmatmul.msk.f32.gmra.mxu3 %vm15281_vm13, %v6920_v38  ;;  %5784 = vmatmul.msk.f32.gmra.mxu2 %vm15282_vm5, %v6921_v27  ;;  %vm15295_vm13 = vmmov %vm15239_vm2 }
 0xc23   :  { %v4706_v2 = vpop.f32.mrf.mxu3  ;;  %v4596_v25 = vpop.f32.mrf.mxu2 }
 0xc24   :  { %v13734_v51 = vadd.f32 %v4706_v2, %v4593_v37 }
 0xc28   :  { %5816 = vmatmul.msk.f32.gmra.mxu3 %vm15239_vm2, %v6922_v8  ;;  %5785 = vmatmul.msk.f32.gmra.mxu2 %vm15283_vm9, %v6923_v40  ;;  %v5824_v8 = vmul.f32 -1.442695, %v13664_v54  ;;  %v5825_v40 = vmul.f32 -1.442695, %v13674_v20 }
 0xc2a   :  { %6403 = vpow2.f32 %v5824_v8 }
 0xc2b   :  { %v4709_v14 = vpop.f32.mrf.mxu3  ;;  %v4599_v47 = vpop.f32.mrf.mxu2  ;;  %6405 = vpow2.f32 %v5825_v40 }
 0xc2c   :  { %v13744_v59 = vadd.f32 %v4709_v14, %v4596_v25 }
 0xc30   :  { %5817 = vmatmul.msk.f32.gmra.mxu3 %vm15284_vm12, %v6924_v24  ;;  %5786 = vmatmul.msk.f32.gmra.mxu2 %vm15285_vm1, %v6925_v45  ;;  %v5826_v24 = vmul.f32 -1.442695, %v13684_v55 }
 0xc32   :  { %6407 = vpow2.f32 %v5826_v24 }
 0xc33   :  { %v4712_v26 = vpop.f32.mrf.mxu3  ;;  %v4602_v9 = vpop.f32.mrf.mxu2 }
 0xc34   :  { %v13754_v29 = vadd.f32 %v4712_v26, %v4599_v47  ;;  %v6404_v26 = vpop.eup %6403 }
 0xc36   :  { %v5833_v55 = vmul.f32 -1.442695, %v13754_v29 }
 0xc38   :  { %5818 = vmatmul.msk.f32.gmra.mxu3 %vm15286_vm10, %v6926_v6  ;;  %5787 = vmatmul.msk.f32.gmra.mxu2 %vm15287_vm15, %v6927_v49  ;;  %v6406_v6 = vpop.eup %6405  ;;  %v13824_v49 = vadd.f32 1.0, %v6404_v26 }
 0xc3a   :  { %vm4818_vm5 = vweird.f32 %v13824_v49 }
 0xc3b   :  { %v4715_v11 = vpop.f32.mrf.mxu3  ;;  %v4605_v22 = vpop.f32.mrf.mxu2 }
 0xc3c   :  { %v13764_v39 = vadd.f32 %v4715_v11, %v4602_v9  ;;  %v5832_v9 = vmul.f32 -1.442695, %v13744_v59 }
 0xc3e   :  { %6409 = vpow2.f32 %v5832_v9  ;;  %v5834_v29 = vmul.f32 -1.442695, %v13764_v39 }
 0xc3f   :  { %6411 = vrcp.f32 %v13824_v49 }
 0xc40   :  { %5819 = vmatmul.msk.f32.gmra.mxu3 %vm15288_vm14, %v6928_v0  ;;  %5788 = vmatmul.msk.f32.gmra.mxu2 %vm15289_vm7, %v6929_v48  ;;  %v6408_v0 = vpop.eup %6407 }
 0xc41   :  { %v13833_v59 = vadd.f32 1.0, %v6408_v0 }
 0xc43   :  { %v4718_v34 = vpop.f32.mrf.mxu3  ;;  %v4608_v19 = vpop.f32.mrf.mxu2 }
 0xc44   :  { %v13774_v41 = vadd.f32 %v4718_v34, %v4605_v22  ;;  %v13826_v22 = vadd.f32 1.0, %v6406_v6  ;;  %v6410_v48 = vpop.eup %6409  ;;  %v4822_v6 = vand.u32 2147483647, %v13824_v49 }
 0xc46   :  { %6413 = vrcp.f32 %v13826_v22  ;;  %vm4833_vm1 = vweird.f32 %v13826_v22  ;;  %vm4823_vm10 = vcmp.eq.f32.partialorder %v4822_v6, 8.507059e+37 }
 0xc47   :  { %6415 = vpow2.f32 %v5833_v55 }
 0xc48   :  { %5820 = vmatmul.msk.f32.gmra.mxu3 %vm15290_vm8, %v6930_v60  ;;  %5789 = vmatmul.msk.f32.gmra.mxu2 %vm15291_vm6, %v6931_v23  ;;  %v13835_v60 = vpop.eup %6411  ;;  %v13837_v23 = vadd.f32 1.0, %v6410_v48  ;;  %6417 = vrcp.f32 %v13833_v59  ;;  %vm4848_vm8 = vweird.f32 %v13833_v59 }
 0xc49   :  { %vm4819_vm2 = vweird.f32 %v13835_v60 }
 0xc4a   :  { %6419 = vrcp.f32 %v13837_v23  ;;  %vm13888_vm12 = vmor %vm4818_vm5, %vm4819_vm2  ;;  %v4974_v48 = vand.u32 2147483647, %v13837_v23 }
 0xc4b   :  { %v4721_v46 = vpop.f32.mrf.mxu3  ;;  %v4611_v57 = vpop.f32.mrf.mxu2 }
 0xc4c   :  { %v13784_v17 = vadd.f32 %v4721_v46, %v4608_v19 }
 0xc50   :  { %5821 = vmatmul.msk.f32.gmra.mxu3 %vm15292_vm4, %v6932_v33  ;;  %5790 = vmatmul.msk.f32.gmra.mxu2 %vm15250_vm0, %v6933_v30  ;;  %v13843_v33 = vpop.eup %6413  ;;  %v4814_v30 = vmul.f32 %v13835_v60, %v13824_v49 }
 0xc51   :  { %vm4834_vm9 = vweird.f32 %v13843_v33 }
 0xc52   :  { %vm13903_vm15 = vmor %vm4833_vm1, %vm4834_vm9 }
 0xc53   :  { %v4724_v61 = vpop.f32.mrf.mxu3  ;;  %v4614_v15 = vpop.f32.mrf.mxu2 }
 0xc54   :  { %v13794_v5 = vadd.f32 %v4724_v61, %v4611_v57  ;;  %v5827_v57 = vmul.f32 -1.442695, %v13694_v18  ;;  %v6416_v61 = vpop.eup %6415  ;;  %v4815_v18 = vsub.f32 1.0, %v4814_v30  ;;  %v4852_v30 = vand.u32 2147483647, %v13833_v59 }
 0xc56   :  { %6421 = vpow2.f32 %v5827_v57  ;;  %v5836_v57 = vmul.f32 -1.442695, %v13784_v17  ;;  %vm13919_vm6 = vcmp.eq.f32.partialorder %v4852_v30, 8.507059e+37 }
 0xc57   :  { %6423 = vpow2.f32 %v5834_v29 }
 0xc58   :  { %5822 = vmatmul.msk.f32.gmra.mxu3 %vm15293_vm11, %v6934_v16  ;;  %5791 = vmatmul.msk.f32.gmra.mxu2 %vm15294_vm3, %v6935_v58  ;;  %v13851_v16 = vpop.eup %6417  ;;  %vm4970_vm11 = vweird.f32 %v13837_v23 }
 0xc59   :  { %vm4849_vm7 = vweird.f32 %v13851_v16 }
 0xc5a   :  { %vm13930_vm4 = vmor %vm4848_vm8, %vm4849_vm7 }
 0xc5b   :  { %v4727_v32 = vpop.f32.mrf.mxu3  ;;  %v4617_v4 = vpop.f32.mrf.mxu2 }
 0xc5c   :  { %v13804_v12 = vadd.f32 %v4727_v32, %v4614_v15  ;;  %v4829_v15 = vmul.f32 %v13843_v33, %v13826_v22 }
 0xc5e   :  { %v4830_v39 = vsub.f32 1.0, %v4829_v15  ;;  %v4854_v15 = vand.u32 2147483648, %v13833_v59 }
 0xc60   :  { %5823 = vmatmul.msk.f32.gmra.mxu3 %vm15295_vm13, %v6936_v13  ;;  %v4831_v8 = vmul.f32 %v13843_v33, %v4830_v39  ;;  %vm4975_vm13 = vcmp.eq.f32.partialorder %v4974_v48, 8.507059e+37 }
 0xc62   :  { %v4832_v0 = vadd.f32 %v13843_v33, %v4831_v8 }
 0xc63   :  { %v4730_v42 = vpop.f32.mrf.mxu3  ;;  %v4620_v3 = vpop.f32.mrf.mxu2 }
 0xc64   :  { %v13810_v1 = vadd.f32 %v4730_v42, %v4617_v4  ;;  %v13853_v4 = vadd.f32 1.0, %v6416_v61  ;;  %v13857_v42 = vpop.eup %6419 }
 0xc65   :  { %vm4971_vm0 = vweird.f32 %v13857_v42 }
 0xc66   :  { %6425 = vrcp.f32 %v13853_v4  ;;  %vm13953_vm3 = vmor %vm4970_vm11, %vm4971_vm0  ;;  %vm4985_vm9 = vweird.f32 %v13853_v4 }
 0xc6b   :  { %v4733_v56 = vpop.f32.mrf.mxu3  ;;  %v4623_v7 = vpop.f32.mrf.mxu2 }
 0xc6c   :  { %v13812_v44 = vadd.f32 %v4733_v56, %v4620_v3  ;;  %v5828_v3 = vmul.f32 -1.442695, %v13704_v10  ;;  %v4844_v56 = vmul.f32 %v13851_v16, %v13833_v59 }
 0xc6e   :  { %6427 = vpow2.f32 %v5828_v3  ;;  %v4845_v10 = vsub.f32 1.0, %v4844_v56 }
 0xc73   :  { %v4736_v28 = vpop.f32.mrf.mxu3  ;;  %v4626_v37 = vpop.f32.mrf.mxu2 }
 0xc74   :  { %v13814_v38 = vadd.f32 %v4736_v28, %v4623_v7  ;;  %v6422_v7 = vpop.eup %6421  ;;  %v5835_v28 = vmul.f32 -1.442695, %v13774_v41 }
 0xc75   :  { %v13868_v40 = vadd.f32 1.0, %v6422_v7 }
 0xc76   :  { %6429 = vpow2.f32 %v5835_v28 }
 0xc77   :  { %6431 = vrcp.f32 %v13868_v40 }
 0xc7b   :  { %v4739_v27 = vpop.f32.mrf.mxu3  ;;  %v4629_v2 = vpop.f32.mrf.mxu2 }
 0xc7c   :  { %v13816_v25 = vadd.f32 %v4739_v27, %v4626_v37  ;;  %v4816_v37 = vmul.f32 %v13835_v60, %v4815_v18  ;;  %v6424_v27 = vpop.eup %6423 }
 0xc7d   :  { %v13874_v26 = vadd.f32 1.0, %v6424_v27  ;;  %v13883_v55 = vpop.eup %6425 }
 0xc7e   :  { %v4817_v24 = vadd.f32 %v13835_v60, %v4816_v37  ;;  %vm4986_vm5 = vweird.f32 %v13883_v55 }
 0xc7f   :  { %vm13990_vm1 = vmor %vm4985_vm9, %vm4986_vm5  ;;  %vm5000_vm7 = vweird.f32 %v13874_v26 }
 0xc80   :  { %v4821_v29 = vsel %vm13888_vm12, %v13835_v60, %v4817_v24  ;;  %v4836_v60 = vsel %vm13903_vm15, %v13843_v33, %v4832_v0  ;;  %v4976_v0 = vand.u32 2147483648, %v13837_v23  ;;  %vm4863_vm12 = vweird.f32 %v13868_v40 }
 0xc83   :  { %v4742_v14 = vpop.f32.mrf.mxu3  ;;  %v4632_v47 = vpop.f32.mrf.mxu2 }
 0xc84   :  { %v13821_v45 = vadd.f32 %v4742_v14, %v4629_v2  ;;  %v4966_v2 = vmul.f32 %v13857_v42, %v13837_v23  ;;  %v5829_v14 = vmul.f32 -1.442695, %v13714_v21  ;;  %v4837_v21 = vand.u32 2147483647, %v13826_v22 }
 0xc86   :  { %6433 = vpow2.f32 %v5829_v14  ;;  %vm4838_vm14 = vcmp.eq.f32.partialorder %v4837_v21, 8.507059e+37  ;;  %v5837_v21 = vmul.f32 -1.442695, %v13794_v5 }
 0xc87   :  { %6435 = vrcp.f32 %v13874_v26 }
 0xc88   :  { %6437 = vpow2.f32 %v5836_v57 }
 0xc8b   :  { %v4745_v11 = vpop.f32.mrf.mxu3  ;;  %v4635_v54 = vpop.f32.mrf.mxu2 }
 0xc8c   :  { %v13828_v20 = vadd.f32 %v4745_v11, %v4632_v47  ;;  %v4824_v11 = vand.u32 2147483648, %v13824_v49  ;;  %v6428_v49 = vpop.eup %6427 }
 0xc8d   :  { %v6430_v17 = vpop.eup %6429  ;;  %v13916_v56 = vadd.f32 1.0, %v6428_v49  ;;  %v4867_v49 = vand.u32 2147483647, %v13868_v40 }
 0xc8e   :  { %v4825_v61 = vor.u32 1.1754944e-38, %v4824_v11  ;;  %v13923_v33 = vpop.eup %6431  ;;  %v13925_v27 = vadd.f32 1.0, %v6430_v17 }
 0xc8f   :  { %v6434_v14 = vpop.eup %6433  ;;  %6439 = vrcp.f32 %v13916_v56  ;;  %vm4864_vm2 = vweird.f32 %v13923_v33  ;;  %vm14012_vm15 = vcmp.eq.f32.partialorder %v4867_v49, 8.507059e+37  ;;  %v5006_v49 = vand.u32 2147483648, %v13874_v26 }
 0xc90   :  { %v4826_v18 = vsel %vm4823_vm10, %v4825_v61, %v4821_v29  ;;  %v13936_v11 = vpop.eup %6435  ;;  %6441 = vrcp.f32 %v13925_v27  ;;  %v4977_v61 = vor.u32 1.1754944e-38, %v4976_v0  ;;  %vm4878_vm8 = vweird.f32 %v13916_v56 }
 0xc91   :  { %v6438_v29 = vpop.eup %6437  ;;  %v4996_v5 = vmul.f32 %v13936_v11, %v13874_v26  ;;  %vm5015_vm5 = vweird.f32 %v13925_v27 }
 0xc93   :  { %v4748_v34 = vpop.f32.mrf.mxu3  ;;  %v4638_v19 = vpop.f32.mrf.mxu2 }
 0xc94   :  { %v13839_v46 = vadd.f32 %v4748_v34, %v4635_v54  ;;  %v4967_v54 = vsub.f32 1.0, %v4966_v2  ;;  %v4839_v34 = vand.u32 2147483648, %v13826_v22 }
 0xc96   :  { %v4840_v39 = vor.u32 1.1754944e-38, %v4839_v34  ;;  %v13947_v34 = vadd.f32 1.0, %v6434_v14  ;;  %v5838_v14 = vmul.f32 -1.442695, %v13804_v12 }
 0xc98   :  { %v4841_v8 = vsel %vm4838_vm14, %v4840_v39, %v4836_v60  ;;  %v13969_v60 = vadd.f32 1.0, %v6438_v29  ;;  %v13971_v39 = vpop.eup %6439  ;;  %v4882_v29 = vand.u32 2147483647, %v13916_v56  ;;  %vm5001_vm14 = vweird.f32 %v13936_v11 }
 0xc99   :  { %v4874_v48 = vmul.f32 %v13971_v39, %v13916_v56 }
 0xc9a   :  { %vm14066_vm11 = vcmp.eq.f32.partialorder %v4882_v29, 8.507059e+37  ;;  %v5021_v29 = vand.u32 2147483648, %v13925_v27 }
 0xc9b   :  { %v4751_v58 = vpop.f32.mrf.mxu3  ;;  %v4641_v32 = vpop.f32.mrf.mxu2 }
 0xc9c   :  { %v13855_v13 = vadd.f32 %v4751_v58, %v4638_v19  ;;  %v4846_v19 = vmul.f32 %v13851_v16, %v4845_v10  ;;  %v4981_v58 = vmul.f32 %v13883_v55, %v13853_v4  ;;  %v4855_v10 = vor.u32 1.1754944e-38, %v4854_v15 }
 0xc9e   :  { %v4847_v3 = vadd.f32 %v13851_v16, %v4846_v19  ;;  %v4982_v24 = vsub.f32 1.0, %v4981_v58 }
 0xca0   :  { %v4983_v23 = vmul.f32 %v13883_v55, %v4982_v24 }
 0xca3   :  { %v4754_v41 = vpop.f32.mrf.mxu3  ;;  %v4644_v47 = vpop.f32.mrf.mxu2 }
 0xca4   :  { %v13876_v9 = vadd.f32 %v4754_v41, %v4641_v32  ;;  %v4968_v32 = vmul.f32 %v13857_v42, %v4967_v54  ;;  %v5830_v41 = vmul.f32 -1.442695, %v13724_v53  ;;  %v4869_v53 = vand.u32 2147483648, %v13868_v40 }
 0xca6   :  { %v4969_v59 = vadd.f32 %v13857_v42, %v4968_v32  ;;  %6443 = vpow2.f32 %v5830_v41  ;;  %v13967_v58 = vor.u32 1.1754944e-38, %v4869_v53  ;;  %v4989_v41 = vand.u32 2147483647, %v13853_v4 }
 0xca8   :  { %v4973_v30 = vsel %vm13953_vm3, %v13857_v42, %v4969_v59  ;;  %vm4990_vm10 = vcmp.eq.f32.partialorder %v4989_v41, 8.507059e+37 }
 0xca9   :  { %v4978_v42 = vsel %vm4975_vm13, %v4977_v61, %v4973_v30  ;;  %vm4879_vm13 = vweird.f32 %v13971_v39 }
 0xcaa   :  { %v5109_v24 = vsub.f32 1.0, %v4978_v42  ;;  %v5125_v12 = vmul.f32 %v4978_v42, %v13275_v50  ;;  %vm14095_vm9 = vmor %vm4878_vm8, %vm4879_vm13 }
 0xcab   :  { %v4757_v7 = vpop.f32.mrf.mxu3  ;;  %v4647_v28 = vpop.f32.mrf.mxu2 }
 0xcac   :  { %v4758_v2 = vadd.f32 %v4757_v7, %v4644_v47  ;;  %v4851_v47 = vsel %vm13930_vm4, %v13851_v16, %v4847_v3  ;;  %v4859_v16 = vmul.f32 %v13923_v33, %v13868_v40  ;;  %v4984_v3 = vadd.f32 %v13883_v55, %v4983_v23  ;;  %v13976_v7 = vpop.eup %6441  ;;  %vm14046_vm4 = vmor %vm4863_vm12, %vm4864_vm2 }
 0xcad   :  { %v4856_v17 = vsel %vm13919_vm6, %v4855_v10, %v4851_v47  ;;  %v6444_v10 = vpop.eup %6443  ;;  %vm14035_vm6 = vmor %vm5000_vm7, %vm5001_vm14  ;;  %vm5016_vm3 = vweird.f32 %v13976_v7  ;;  %vm4893_vm12 = vweird.f32 %v13947_v34  ;;  %vm5030_vm7 = vweird.f32 %v13969_v60 }
 0xcae   :  { %v5085_v54 = vmul.f32 %v4826_v18, %v4758_v2  ;;  %v4860_v18 = vsub.f32 1.0, %v4859_v16  ;;  %v4884_v2 = vand.u32 2147483648, %v13916_v56  ;;  %vm14086_vm2 = vmor %vm5015_vm5, %vm5016_vm3  ;;  %v5022_v56 = vor.u32 1.1754944e-38, %v5021_v29 }
 0xcb0   :  { %v5093_v19 = vadd.f32 %v5085_v54, %v13812_v44  ;;  %v5831_v44 = vmul.f32 -1.442695, %v13734_v51  ;;  %v4997_v51 = vsub.f32 1.0, %v4996_v5  ;;  %v14016_v61 = vor.u32 1.1754944e-38, %v4884_v2 }
 0xcb1   :  { %v5004_v2 = vand.u32 2147483647, %v13874_v26 }
 0xcb2   :  { %6445 = vtanh.f32 %v5093_v19  ;;  %v4998_v53 = vmul.f32 %v13936_v11, %v4997_v51 }
 0xcb3   :  { %6447 = vpow2.f32 %v5837_v21  ;;  %v4760_v22 = vpop.f32.mrf.mxu3  ;;  %v4650_v15 = vpop.f32.mrf.mxu2  ;;  %v14001_v21 = vadd.f32 1.0, %v6444_v10  ;;  %vm5005_vm0 = vcmp.eq.f32.partialorder %v5004_v2, 8.507059e+37 }
 0xcb4   :  { %v4761_v32 = vadd.f32 %v4760_v22, %v4647_v28  ;;  %6449 = vrcp.f32 %v13947_v34  ;;  %v4991_v28 = vand.u32 2147483648, %v13853_v4  ;;  %v5011_v4 = vmul.f32 %v13976_v7, %v13925_v27 }
 0xcb5   :  { %6451 = vpow2.f32 %v5831_v44  ;;  %v4999_v42 = vadd.f32 %v13936_v11, %v4998_v53  ;;  %v5019_v44 = vand.u32 2147483647, %v13925_v27  ;;  %vm4908_vm13 = vweird.f32 %v14001_v21 }
 0xcb6   :  { %v5086_v37 = vmul.f32 %v4841_v8, %v4761_v32  ;;  %6453 = vrcp.f32 %v13969_v60  ;;  %v4861_v8 = vmul.f32 %v13923_v33, %v4860_v18  ;;  %v4992_v19 = vor.u32 1.1754944e-38, %v4991_v28 }
 0xcb7   :  { %v5012_v32 = vsub.f32 1.0, %v5011_v4 }
 0xcb8   :  { %v6446_v6 = vpop.eup %6445  ;;  %v5094_v59 = vadd.f32 %v5086_v37, %v13814_v38  ;;  %v4988_v38 = vsel %vm13990_vm1, %v13883_v55, %v4984_v3  ;;  %v4862_v18 = vadd.f32 %v13923_v33, %v4861_v8  ;;  %v5839_v37 = vmul.f32 -1.442695, %v13810_v1 }
 0xcb9   :  { %v6448_v47 = vpop.eup %6447  ;;  %v5117_v0 = vmul.f32 %v6446_v6, %v5109_v24  ;;  %v4993_v22 = vsel %vm4990_vm10, %v4992_v19, %v4988_v38  ;;  %v5013_v6 = vmul.f32 %v13976_v7, %v5012_v32  ;;  %vm5020_vm10 = vcmp.eq.f32.partialorder %v5019_v44, 8.507059e+37 }
 0xcba   :  { %6455 = vtanh.f32 %v5094_v59  ;;  %v14005_v16 = vpop.eup %6449  ;;  %v14010_v55 = vadd.f32 1.0, %v6448_v47  ;;  %v5110_v28 = vsub.f32 1.0, %v4993_v22  ;;  %v5126_v1 = vmul.f32 %v4993_v22, %v13327_v31 }
 0xcbb   :  { %6457 = vpow2.f32 %v5838_v14  ;;  %v4763_v50 = vpop.f32.mrf.mxu3  ;;  %v4653_v57 = vpop.f32.mrf.mxu2  ;;  %v14008_v5 = vadd.f32 %v5125_v12, %v5117_v0  ;;  %v5003_v59 = vsel %vm14035_vm6, %v13936_v11, %v4999_v42  ;;  %v4866_v31 = vsel %vm14046_vm4, %v13923_v33, %v4862_v18 }
 0xcbc   :  { %v6452_v23 = vpop.eup %6451  ;;  %v4764_v30 = vadd.f32 %v4763_v50, %v4650_v15  ;;  %6459 = vrcp.f32 %v14001_v21  ;;  %v4875_v15 = vsub.f32 1.0, %v4874_v48  ;;  %v5007_v12 = vor.u32 1.1754944e-38, %v5006_v49 }
 0xcbd   :  { %v14021_v51 = vpop.eup %6453  ;;  %6461 = vrcp.f32 %v14010_v55  ;;  %v14058_v40 = vadd.f32 1.0, %v6452_v23  ;;  %v4871_v23 = vsel %vm14012_vm15, %v13967_v58, %v4866_v31  ;;  %vm4894_vm1 = vweird.f32 %v14005_v16 }
 0xcbe   :  { %v5087_v3 = vmul.f32 %v4856_v17, %v4764_v30  ;;  %v4889_v17 = vmul.f32 %v14005_v16, %v13947_v34  ;;  %v5026_v24 = vmul.f32 %v14021_v51, %v13969_v60  ;;  %v4876_v54 = vmul.f32 %v13971_v39, %v4875_v15  ;;  %vm14130_vm14 = vmor %vm4893_vm12, %vm4894_vm1 }
 0xcbf   :  { %v5008_v19 = vsel %vm5005_vm0, %v5007_v12, %v5003_v59  ;;  %v5014_v30 = vadd.f32 %v13976_v7, %v5013_v6  ;;  %vm5031_vm15 = vweird.f32 %v14021_v51  ;;  %v4897_v12 = vand.u32 2147483647, %v13947_v34 }
 0xcc0   :  { %v6456_v10 = vpop.eup %6455  ;;  %v5095_v14 = vadd.f32 %v5087_v3, %v13816_v25  ;;  %v4890_v33 = vsub.f32 1.0, %v4889_v17  ;;  %v5027_v50 = vsub.f32 1.0, %v5026_v24  ;;  %v5111_v58 = vsub.f32 1.0, %v5008_v19  ;;  %vm14144_vm8 = vmor %vm5030_vm7, %vm5031_vm15 }
 0xcc1   :  { %v6458_v26 = vpop.eup %6457  ;;  %v5118_v8 = vmul.f32 %v6456_v10, %v5110_v28  ;;  %v5127_v49 = vmul.f32 %v5008_v19, %v13377_v63  ;;  %v5018_v28 = vsel %vm14086_vm2, %v13976_v7, %v5014_v30  ;;  %v5034_v48 = vand.u32 2147483647, %v13969_v60 }
 0xcc2   :  { %6463 = vtanh.f32 %v5095_v14  ;;  %v14062_v38 = vpop.eup %6459  ;;  %v14064_v11 = vadd.f32 1.0, %v6458_v26  ;;  %v4891_v3 = vmul.f32 %v14005_v16, %v4890_v33  ;;  %v5023_v24 = vsel %vm5020_vm10, %v5022_v56, %v5018_v28 }
 0xcc3   :  { %6465 = vpow2.f32 %v5839_v37  ;;  %v4766_v47 = vpop.f32.mrf.mxu3  ;;  %v4656_v4 = vpop.f32.mrf.mxu2  ;;  %v14060_v53 = vadd.f32 %v5126_v1, %v5118_v8  ;;  %v4904_v14 = vmul.f32 %v14062_v38, %v14001_v21  ;;  %v5112_v33 = vsub.f32 1.0, %v5023_v24 }
 0xcc4   :  { %v4767_v0 = vadd.f32 %v4766_v47, %v4653_v57  ;;  %v14075_v22 = vpop.eup %6461  ;;  %v4877_v57 = vadd.f32 %v13971_v39, %v4876_v54  ;;  %6467 = vrcp.f32 %v14058_v40  ;;  %v4892_v26 = vadd.f32 %v14005_v16, %v4891_v3 }
 0xcc5   :  { %6469 = vrcp.f32 %v14064_v11  ;;  %v5041_v2 = vmul.f32 %v14075_v22, %v14010_v55  ;;  %v4905_v47 = vsub.f32 1.0, %v4904_v14  ;;  %vm5035_vm6 = vcmp.eq.f32.partialorder %v5034_v48, 8.507059e+37 }
 0xcc6   :  { %v5088_v32 = vmul.f32 %v4871_v23, %v4767_v0  ;;  %v4881_v63 = vsel %vm14095_vm9, %v13971_v39, %v4877_v57  ;;  %v4896_v23 = vsel %vm14130_vm14, %v14005_v16, %v4892_v26  ;;  %vm4898_vm4 = vcmp.eq.f32.partialorder %v4897_v12, 8.507059e+37 }
 0xcc7   :  { %v5042_v39 = vsub.f32 1.0, %v5041_v2  ;;  %v4886_v6 = vsel %vm14066_vm11, %v14016_v61, %v4881_v63  ;;  %v4899_v61 = vand.u32 2147483648, %v13947_v34  ;;  %v5128_v34 = vmul.f32 %v5023_v24, %v13425_v36 }
 0xcc8   :  { %v6464_v18 = vpop.eup %6463  ;;  %v5096_v42 = vadd.f32 %v5088_v32, %v13821_v45  ;;  %v5028_v45 = vmul.f32 %v14021_v51, %v5027_v50  ;;  %v4906_v16 = vmul.f32 %v14062_v38, %v4905_v47  ;;  %vm4909_vm0 = vweird.f32 %v14062_v38 }
 0xcc9   :  { %v6466_v37 = vpop.eup %6465  ;;  %v5119_v10 = vmul.f32 %v6464_v18, %v5111_v58  ;;  %v5043_v32 = vmul.f32 %v14075_v22, %v5042_v39  ;;  %v4900_v18 = vor.u32 1.1754944e-38, %v4899_v61  ;;  %vm5046_vm11 = vweird.f32 %v14075_v22  ;;  %vm14184_vm2 = vmor %vm4908_vm13, %vm4909_vm0 }
 0xcca   :  { %6471 = vtanh.f32 %v5096_v42  ;;  %v14112_v1 = vadd.f32 1.0, %v6466_v37  ;;  %v14115_v25 = vpop.eup %6467  ;;  %v5029_v8 = vadd.f32 %v14021_v51, %v5028_v45  ;;  %v4907_v27 = vadd.f32 %v14062_v38, %v4906_v16 }
 0xccb   :  { %v4769_v17 = vpop.f32.mrf.mxu3  ;;  %v14110_v41 = vadd.f32 %v5127_v49, %v5119_v10  ;;  %v4659_v59 = vpop.f32.mrf.mxu2  ;;  %v4919_v29 = vmul.f32 %v14115_v25, %v14058_v40  ;;  %v5044_v49 = vadd.f32 %v14075_v22, %v5043_v32  ;;  %v5051_v28 = vand.u32 2147483648, %v14010_v55 }
 0xccc   :  { %v4770_v7 = vadd.f32 %v4769_v17, %v4656_v4  ;;  %v14122_v31 = vpop.eup %6469  ;;  %v5036_v4 = vand.u32 2147483648, %v13969_v60  ;;  %6473 = vrcp.f32 %v14112_v1  ;;  %v4914_v63 = vand.u32 2147483648, %v14001_v21 }
 0xccd   :  { %v5056_v60 = vmul.f32 %v14122_v31, %v14064_v11  ;;  %v4920_v45 = vsub.f32 1.0, %v4919_v29  ;;  %vm5045_vm3 = vweird.f32 %v14010_v55  ;;  %v5049_v14 = vand.u32 2147483647, %v14010_v55 }
 0xcce   :  { %v5089_v54 = vmul.f32 %v4886_v6, %v4770_v7  ;;  %v5037_v44 = vor.u32 1.1754944e-38, %v5036_v4  ;;  %v4912_v26 = vand.u32 2147483647, %v14001_v21  ;;  %vm14175_vm5 = vmor %vm5045_vm3, %vm5046_vm11  ;;  %v4915_v47 = vor.u32 1.1754944e-38, %v4914_v63 }
 0xccf   :  { %v5057_v15 = vsub.f32 1.0, %v5056_v60  ;;  %v5048_v21 = vsel %vm14175_vm5, %v14075_v22, %v5044_v49  ;;  %vm5050_vm9 = vcmp.eq.f32.partialorder %v5049_v14, 8.507059e+37  ;;  %vm5061_vm1 = vweird.f32 %v14122_v31 }
 0xcd0   :  { %v6472_v19 = vpop.eup %6471  ;;  %v5097_v50 = vadd.f32 %v5089_v54, %v13828_v20  ;;  %v5033_v20 = vsel %vm14144_vm8, %v14021_v51, %v5029_v8  ;;  %v4901_v51 = vsel %vm4898_vm4, %v4900_v18, %v4896_v23  ;;  %v4921_v8 = vmul.f32 %v14115_v25, %v4920_v45 }
 0xcd1   :  { %v5120_v57 = vmul.f32 %v6472_v19, %v5112_v33  ;;  %v5038_v3 = vsel %vm5035_vm6, %v5037_v44, %v5033_v20  ;;  %v5052_v54 = vor.u32 1.1754944e-38, %v5051_v28  ;;  %vm4913_vm12 = vcmp.eq.f32.partialorder %v4912_v26, 8.507059e+37 }
 0xcd2   :  { %6475 = vtanh.f32 %v5097_v50  ;;  %v14163_v37 = vpop.eup %6473  ;;  %v5113_v56 = vsub.f32 1.0, %v5038_v3  ;;  %v5129_v39 = vmul.f32 %v5038_v3, %v13463_v35  ;;  %v4911_v35 = vsel %vm14184_vm2, %v14062_v38, %v4907_v27 }
 0xcd3   :  { %v4772_v58 = vpop.f32.mrf.mxu3  ;;  %v14158_v36 = vadd.f32 %v5128_v34, %v5120_v57  ;;  %v4662_v10 = vpop.f32.mrf.mxu2  ;;  %v5071_v6 = vmul.f32 %v14163_v37, %v14112_v1  ;;  %v5053_v61 = vsel %vm5050_vm9, %v5052_v54, %v5048_v21  ;;  %v4916_v33 = vsel %vm4913_vm12, %v4915_v47, %v4911_v35 }
 0xcd4   :  { %v4773_v42 = vadd.f32 %v4772_v58, %v4659_v59  ;;  %v4922_v38 = vadd.f32 %v14115_v25, %v4921_v8  ;;  %vm4924_vm10 = vweird.f32 %v14115_v25  ;;  %v5066_v50 = vand.u32 2147483648, %v14064_v11 }
 0xcd5   :  { %v5072_v48 = vsub.f32 1.0, %v5071_v6  ;;  %v4929_v23 = vand.u32 2147483648, %v14058_v40  ;;  %vm5060_vm15 = vweird.f32 %v14064_v11  ;;  %v5064_v30 = vand.u32 2147483647, %v14064_v11 }
 0xcd6   :  { %v5090_v2 = vmul.f32 %v4901_v51, %v4773_v42  ;;  %v5114_v34 = vsub.f32 1.0, %v5053_v61  ;;  %vm4923_vm14 = vweird.f32 %v14058_v40  ;;  %v4927_v20 = vand.u32 2147483647, %v14058_v40  ;;  %vm14209_vm7 = vmor %vm5060_vm15, %vm5061_vm1 }
 0xcd7   :  { %v5073_v16 = vmul.f32 %v14163_v37, %v5072_v48  ;;  %vm4925_vm8 = vmor %vm4923_vm14, %vm4924_vm10  ;;  %v5130_v58 = vmul.f32 %v5053_v61, %v13486_v62  ;;  %v5067_v18 = vor.u32 1.1754944e-38, %v5066_v50  ;;  %v4930_v42 = vor.u32 1.1754944e-38, %v4929_v23 }
 0xcd8   :  { %v6476_v17 = vpop.eup %6475  ;;  %v5098_v7 = vadd.f32 %v5090_v2, %v13839_v46  ;;  %v5058_v46 = vmul.f32 %v14122_v31, %v5057_v15  ;;  %vm5065_vm6 = vcmp.eq.f32.partialorder %v5064_v30, 8.507059e+37  ;;  %vm4928_vm4 = vcmp.eq.f32.partialorder %v4927_v20, 8.507059e+37 }
 0xcd9   :  { %v5121_v59 = vmul.f32 %v6476_v17, %v5113_v56  ;;  %v5074_v2 = vadd.f32 %v14163_v37, %v5073_v16  ;;  %vm5076_vm0 = vweird.f32 %v14163_v37  ;;  %v5081_v27 = vand.u32 2147483648, %v14112_v1 }
 0xcda   :  { %6477 = vtanh.f32 %v5098_v7  ;;  %v5059_v22 = vadd.f32 %v14122_v31, %v5058_v46  ;;  %vm5075_vm11 = vweird.f32 %v14112_v1  ;;  %v5079_v62 = vand.u32 2147483647, %v14112_v1 }
 0xcdb   :  { %v4775_v12 = vpop.f32.mrf.mxu3  ;;  %v14196_v4 = vadd.f32 %v5129_v39, %v5121_v59  ;;  %v4665_v29 = vpop.f32.mrf.mxu2  ;;  %vm5077_vm3 = vmor %vm5075_vm11, %vm5076_vm0  ;;  %v5082_v56 = vor.u32 1.1754944e-38, %v5081_v27  ;;  %vm15330_vm5 = vcmask 523264  }
 0xcdc   :  { %v4776_v0 = vadd.f32 %v4775_v12, %v4662_v10  ;;  %v5063_v11 = vsel %vm14209_vm7, %v14122_v31, %v5059_v22  ;;  %v5078_v10 = vsel %vm5077_vm3, %v14163_v37, %v5074_v2  ;;  %vm5080_vm13 = vcmp.eq.f32.partialorder %v5079_v62, 8.507059e+37 }
 0xcdd   :  { %v5068_v51 = vsel %vm5065_vm6, %v5067_v18, %v5063_v11  ;;  %v5083_v7 = vsel %vm5080_vm13, %v5082_v56, %v5078_v10 }
 0xcde   :  { %v5091_v19 = vmul.f32 %v4916_v33, %v4776_v0  ;;  %v5131_v14 = vmul.f32 %v5068_v51, %v13496_v43  ;;  %v5116_v26 = vsub.f32 1.0, %v5083_v7  ;;  %v5132_v1 = vmul.f32 %v5083_v7, %v13499_v52  ;;  %v6937_v43 = vld [vmem:[%s14246_s3] sm:$0x3] }
 0xce0   :  { %v6478_v60 = vpop.eup %6477  ;;  %v5099_v32 = vadd.f32 %v5091_v19, %v13855_v13  ;;  %v4926_v13 = vsel %vm4925_vm8, %v14115_v25, %v4922_v38  ;;  %v5115_v25 = vsub.f32 1.0, %v5068_v51 }
 0xce1   :  { %v5122_v44 = vmul.f32 %v6478_v60, %v5114_v34  ;;  %v4931_v49 = vsel %vm4928_vm4, %v4930_v42, %v4926_v13 }
 0xce2   :  { %6479 = vtanh.f32 %v5099_v32 }
 0xce3   :  { %v4778_v40 = vpop.f32.mrf.mxu3  ;;  %v5138_v3 = vadd.f32 %v5130_v58, %v5122_v44 }
 0xce4   :  { %v4779_v15 = vadd.f32 %v4778_v40, %v4665_v29 }
 0xce6   :  { %v5092_v31 = vmul.f32 %v4931_v49, %v4779_v15 }
 0xce8   :  { %v6480_v45 = vpop.eup %6479  ;;  %v5100_v28 = vadd.f32 %v5092_v31, %v13876_v9 }
 0xce9   :  { %v5123_v63 = vmul.f32 %v6480_v45, %v5115_v25 }
 0xcea   :  { %6481 = vtanh.f32 %v5100_v28 }
 0xceb   :  { %v5139_v17 = vadd.f32 %v5131_v14, %v5123_v63 }
 0xcf0   :  { %v6482_v24 = vpop.eup %6481 }
 0xcf1   :  { %v5124_v39 = vmul.f32 %v6482_v24, %v5116_v26 }
 0xcf3   :  { %v5140_v6 = vadd.f32 %v5132_v1, %v5124_v39 }
 0xcf5   :  { %5149 = vmatpush.msrb.mxu1 %v5140_v6 }
 0xcf7   :  { %5150 = vmatpush.msrb.mxu1 %v5139_v17 }
 0xcf9   :  { %5151 = vmatpush.msrb.mxu1 %v5138_v3 }
 0xcfb   :  { %5152 = vmatpush.msrb.mxu1 %v14196_v4 }
 0xcfd   :  { %5153 = vmatpush.msrb.mxu1 %v14158_v36  ;;  %v5167_v36 = vstv %s14247_s4 }
 0xcff   :  { %5154 = vmatpush.msrb.mxu1 %v14110_v41 }
 0xd01   :  { %5155 = vmatpush.msrb.mxu1 %v14060_v53 }
 0xd03   :  { %5156 = vmatpush.msrb.mxu1 %v14008_v5 }
 0xd04   :  { %5840 = vmatmul.msk.f32.vlgmr.msrb.gmra.mxu1 %vm15330_vm5, %v6937_v43 }
 0xd81   :  { %v5158_v52 = vpop.f32.mrf.mxu1 }
 0xd82   :  { %5161 = vst [vmem:[#allocation2 + $0x7] sm:$0x1] %v5158_v52 }
 0xd83   :  { %5162 = vst [vmem:[#allocation3 - $0x1] sm:$0x2] %v5158_v52 }
 0xd89   :  { %v5163_v9 = vld [vmem:[#allocation2] sm:$0xff] }
 0xd8a   :  { %v5164_v37 = vld [vmem:[#allocation3] sm:$0xff] }
 0xd8b   :  { %v5165_v5 = vadd.f32 %v5164_v37, %v5163_v9 }
 0xd8d   :  { %v5168_v53 = vadd.f32 %v5167_v36, %v5165_v5 }
 0xd8f   :  { %5169 = vst [vmem:[#allocation5] sm:$0xff] %v5168_v53 }
 0xd90   :  { %5180 = dma.vmem_to_hbm [thread:$0]  %s5176_s20, 128, %s5178_s0, [#allocation6]  }
 0xd91   :  { %6962 = dma.done.wait [#allocation6], 128  }
 0xd92   :  { %6963 = vsyncadd [#allocation6], 4294967168 }
 0xd93   :  { %5185 = vsyncpa [#allocation6], 1 }

</bundles_post_ra>
